<compile_context>
chip_gen: v7x
topology: tpu7x:2x2x1
jax: 0.10.0
libtpu: 0.0.40
codegen_flags: <defaults>
</compile_context>

<pallas_src>
import functools
import math

import jax
import jax.numpy as jnp
from jax.experimental import pallas as pl
from jax.experimental.pallas import tpu as pltpu


# ------------------------------------------------------------------ utilities

def _round_up(x, m):
    return (x + m - 1) // m * m


def _pick_tile(total, candidates):
    """Largest candidate that evenly divides `total` (total is a multiple of
    the smallest candidate)."""
    for c in candidates:
        if total % c == 0:
            return c
    return candidates[-1]


# ------------------------------------------------------------------ kernels

def _gemm_kernel(x_ref, w_ref, b_ref, o_ref, acc_ref, *, swish):
    """out = x @ w + b (+ swish), tiled over (M, N, K)."""
    k = pl.program_id(2)

    @pl.when(k == 0)
    def _init():
        acc_ref[...] = jnp.zeros_like(acc_ref)

    acc_ref[...] += jnp.dot(x_ref[...], w_ref[...],
                            preferred_element_type=jnp.float32)

    @pl.when(k == pl.num_programs(2) - 1)
    def _fin():
        r = acc_ref[...] + b_ref[...]
        if swish:
            r = r * jax.nn.sigmoid(r)          # f32 epilogue (v5e-safe)
        o_ref[...] = r.astype(o_ref.dtype)


def _gemm_res_kernel(x_ref, w_ref, b_ref, r_ref, o_ref, acc_ref, *, swish):
    """out = x @ w + b + residual (+ swish) — identity-shortcut blocks."""
    k = pl.program_id(2)

    @pl.when(k == 0)
    def _init():
        acc_ref[...] = jnp.zeros_like(acc_ref)

    acc_ref[...] += jnp.dot(x_ref[...], w_ref[...],
                            preferred_element_type=jnp.float32)

    @pl.when(k == pl.num_programs(2) - 1)
    def _fin():
        r = acc_ref[...] + b_ref[...] + r_ref[...].astype(jnp.float32)
        if swish:
            r = r * jax.nn.sigmoid(r)
        o_ref[...] = r.astype(o_ref.dtype)


def _gemm_sc_kernel(x_ref, w_ref, b_ref, sx_ref, sw_ref, o_ref, acc_ref, *,
                    swish):
    """out = x @ w + b + (sx @ sw) (+ swish): conv2 with the block's 1x1
    strided shortcut conv fused into the same call (b already includes the
    shortcut bias)."""
    k = pl.program_id(2)

    @pl.when(k == 0)
    def _init():
        acc_ref[...] = jnp.dot(sx_ref[...], sw_ref[...],
                               preferred_element_type=jnp.float32)

    acc_ref[...] += jnp.dot(x_ref[...], w_ref[...],
                            preferred_element_type=jnp.float32)

    @pl.when(k == pl.num_programs(2) - 1)
    def _fin():
        r = acc_ref[...] + b_ref[...]
        if swish:
            r = r * jax.nn.sigmoid(r)
        o_ref[...] = r.astype(o_ref.dtype)


def _maxpool_kernel(*refs):
    """Elementwise max over the KH*KW shifted window views (passed as
    separate inputs; no stacked intermediate)."""
    o_ref = refs[-1]
    m = refs[0][...]
    for r in refs[1:-1]:
        m = jnp.maximum(m, r[...])
    o_ref[...] = m


def _head_kernel(x_ref, w_ref, b_ref, o_ref):
    """Global average pool over H*W followed by the FC layer, fused."""
    inv = 1.0 / x_ref.shape[1]
    pooled = jnp.sum(x_ref[...].astype(jnp.float32), axis=1) * inv
    o_ref[...] = jnp.dot(pooled.astype(jnp.bfloat16), w_ref[...],
                         preferred_element_type=jnp.float32) + b_ref[...]


# ------------------------------------------------------------------ GEMM wrap

def _fused_gemm(x, w, b, *, residual=None, sc_x=None, sc_w=None, swish=False,
                out_dtype=jnp.bfloat16):
    """Tiled, pipelined GEMM with fused epilogue.

    x: (M, K) bf16.  w: (K, N) bf16 (K, N multiples of 128, pre-padded).
    b: (1, N) f32.   residual: (M, N) bf16.   sc_x: (M, Ks) bf16, sc_w: (Ks, N).
    """
    assert residual is None or sc_x is None
    M, K = x.shape
    Kw, N = w.shape
    assert K == Kw and K % 128 == 0 and N % 128 == 0

    # Tile selection: lane-aligned N tiles (prefer 256 for v6e/v7x MXU),
    # K tiles chosen to divide K exactly (no per-call K padding).
    tm = 256 if M > 256 else _round_up(max(M, 8), 8)
    Mp = _round_up(M, tm)
    tn = _pick_tile(N, (256, 128))
    tk = _pick_tile(K, (512, 384, 256, 128))
    nk = K // tk

    xp = x if Mp == M else jnp.pad(x, ((0, Mp - M), (0, 0)))

    in_specs = [
        pl.BlockSpec((tm, tk), lambda i, j, k: (i, k)),
        pl.BlockSpec((tk, tn), lambda i, j, k: (k, j)),
        pl.BlockSpec((1, tn), lambda i, j, k: (0, j)),
    ]
    inputs = [xp, w, b]
    flops = 2 * Mp * N * K
    tile_bytes = 2 * (tm * tk * 2 + tk * tn * 2 + tm * tn * 2 + tn * 4)
    tile_bytes += tm * tn * 4                       # f32 accumulator scratch

    if residual is not None:
        rp = residual if Mp == M else jnp.pad(residual, ((0, Mp - M), (0, 0)))
        in_specs.append(pl.BlockSpec((tm, tn), lambda i, j, k: (i, j)))
        inputs.append(rp)
        tile_bytes += 2 * tm * tn * 2
        kernel = functools.partial(_gemm_res_kernel, swish=swish)
    elif sc_x is not None:
        Ks = sc_w.shape[0]
        assert sc_w.shape[1] == N and Ks % 128 == 0
        sxp = sc_x if Mp == M else jnp.pad(sc_x, ((0, Mp - M), (0, 0)))
        in_specs += [pl.BlockSpec((tm, Ks), lambda i, j, k: (i, 0)),
                     pl.BlockSpec((Ks, tn), lambda i, j, k: (0, j))]
        inputs += [sxp, sc_w]
        flops += 2 * Mp * N * Ks
        tile_bytes += 2 * (tm * Ks * 2 + Ks * tn * 2)
        kernel = functools.partial(_gemm_sc_kernel, swish=swish)
    else:
        kernel = functools.partial(_gemm_kernel, swish=swish)

    # VMEM budget derived from the actual tile footprint (double-buffered),
    # kept well under the 64 MiB v7x physical limit.
    vmem_limit = int(min(max(2 * tile_bytes, 16 * 1024 * 1024),
                         48 * 1024 * 1024))

    cost = pl.CostEstimate(
        flops=flops,
        transcendentals=Mp * N if swish else 0,
        bytes_accessed=sum(a.size * a.dtype.itemsize for a in inputs)
        + Mp * N * jnp.dtype(out_dtype).itemsize,
    )

    out = pl.pallas_call(
        kernel,
        out_shape=jax.ShapeDtypeStruct((Mp, N), out_dtype),
        grid_spec=pltpu.PrefetchScalarGridSpec(
            num_scalar_prefetch=0,
            grid=(Mp // tm, N // tn, nk),
            in_specs=in_specs,
            out_specs=pl.BlockSpec((tm, tn), lambda i, j, k: (i, j)),
            scratch_shapes=[pltpu.VMEM((tm, tn), jnp.float32)]),
        compiler_params=pltpu.CompilerParams(
            dimension_semantics=("parallel", "parallel", "arbitrary"),
            vmem_limit_bytes=vmem_limit),
        cost_estimate=cost,
    )(*inputs)
    return out[:M] if Mp != M else out


# ------------------------------------------------------------------ conv / pool / head

def _im2col(x, kh, kw, stride, pad):
    """x: NHWC -> ((N*OH*OW), kh*kw*C) patch matrix (XLA slicing glue)."""
    N, H, W, C = x.shape
    if pad:
        x = jnp.pad(x, ((0, 0), (pad, pad), (pad, pad), (0, 0)))
    OH = (H + 2 * pad - kh) // stride + 1
    OW = (W + 2 * pad - kw) // stride + 1
    views = []
    for i in range(kh):
        for j in range(kw):
            views.append(x[:, i:i + (OH - 1) * stride + 1:stride,
                           j:j + (OW - 1) * stride + 1:stride, :])
    patches = views[0] if len(views) == 1 else jnp.concatenate(views, axis=-1)
    return patches.reshape(N * OH * OW, kh * kw * C), OH, OW


def conv2d_pallas(x, conv, *, kh, kw, stride, pad, residual=None,
                  sc_x=None, sc_w=None, swish=False):
    """x: NHWC bf16 (channel-padded).  conv: {'w': (K, Np) bf16, 'b': (1, Np)}."""
    N = x.shape[0]
    cols, OH, OW = _im2col(x, kh, kw, stride, pad)
    Kw, Np = conv['w'].shape
    if cols.shape[1] != Kw:            # stem only: 7*7*4=196 -> 256 (zero taps)
        cols = jnp.pad(cols, ((0, 0), (0, Kw - cols.shape[1])))
    out = _fused_gemm(cols, conv['w'], conv['b'], residual=residual,
                      sc_x=sc_x, sc_w=sc_w, swish=swish)
    return out.reshape(N, OH, OW, Np)


def maxpool_pallas(x, k, stride, pad):
    """NHWC max pool (spatial -inf padding, matching PyTorch MaxPool2d)."""
    N, H, W, C = x.shape
    xp = jnp.pad(x, ((0, 0), (pad, pad), (pad, pad), (0, 0)),
                 constant_values=-jnp.inf)
    OH = (H + 2 * pad - k) // stride + 1
    OW = (W + 2 * pad - k) // stride + 1
    M = N * OH * OW
    views = []
    for i in range(k):
        for j in range(k):
            v = xp[:, i:i + (OH - 1) * stride + 1:stride,
                   j:j + (OW - 1) * stride + 1:stride, :]
            views.append(v.reshape(M, C))

    tm = 512 if M > 512 else _round_up(max(M, 8), 8)
    Mp = _round_up(M, tm)
    if Mp != M:
        views = [jnp.pad(v, ((0, Mp - M), (0, 0))) for v in views]

    spec = pl.BlockSpec((tm, C), lambda i: (i, 0))
    out = pl.pallas_call(
        _maxpool_kernel,
        out_shape=jax.ShapeDtypeStruct((Mp, C), x.dtype),
        grid_spec=pltpu.PrefetchScalarGridSpec(
            num_scalar_prefetch=0,
            grid=(Mp // tm,),
            in_specs=[spec] * len(views),
            out_specs=spec),
        compiler_params=pltpu.CompilerParams(
            dimension_semantics=("parallel",)),
    )(*views)
    return out[:M].reshape(N, OH, OW, C)


def head_pallas(feats, fc_w, fc_b):
    """feats: (N, H*W, 512) bf16 -> adaptive avg pool + Linear, fused."""
    N = feats.shape[0]
    Np = fc_w.shape[1]
    Nr = _round_up(max(N, 8), 8)
    fp = feats if Nr == N else jnp.pad(feats, ((0, Nr - N), (0, 0), (0, 0)))
    vspec = pl.BlockSpec(memory_space=pltpu.MemorySpace.VMEM)
    out = pl.pallas_call(
        _head_kernel,
        out_shape=jax.ShapeDtypeStruct((Nr, Np), jnp.float32),
        in_specs=[vspec] * 3,
        out_specs=vspec,
    )(fp, fc_w, fc_b)
    return out[:N]


# ------------------------------------------------------------------ parameters

def _init_conv(key, cout, cin, kh, kw):
    kw_, kb_ = jax.random.split(key)
    bound = 1.0 / math.sqrt(cin * kh * kw)
    w = jax.random.uniform(kw_, (cout, cin, kh, kw), jnp.float32, -bound, bound)
    b = jax.random.uniform(kb_, (cout,), jnp.float32, -bound, bound)
    return w, b


def make_params(key, in_channels=4, num_classes=10):
    """Raw PyTorch-style parameters (OIHW f32 conv weights)."""
    keys = iter(jax.random.split(key, 64))
    params = {'conv1': _init_conv(next(keys), 64, in_channels, 7, 7)}
    in_c = 64
    for li, (out_c, stride) in enumerate([(64, 1), (128, 2), (256, 2), (512, 2)], 1):
        blocks = []
        for b in range(2):
            s = stride if b == 0 else 1
            blk = {'conv1': _init_conv(next(keys), out_c, in_c, 3, 3),
                   'conv2': _init_conv(next(keys), out_c, out_c, 3, 3)}
            if s != 1 or in_c != out_c:
                blk['shortcut'] = _init_conv(next(keys), out_c, in_c, 1, 1)
            blocks.append(blk)
            in_c = out_c
        params[f'layer{li}'] = blocks
    kfw, kfb = jax.random.split(next(keys))
    bound = 1.0 / math.sqrt(512)
    params['fc_w'] = jax.random.uniform(kfw, (512, num_classes), jnp.float32,
                                        -bound, bound)
    params['fc_b'] = jax.random.uniform(kfb, (num_classes,), jnp.float32,
                                        -bound, bound)
    return params


def _prep_conv(w, b, cin_pad, extra_bias=None):
    """OIHW f32 conv params -> GEMM-ready bf16 (K, Np) weight + (1, Np) f32
    bias, padded once (K to a multiple of 128, Np = Cout rounded to 128)."""
    Cout, Cin, KH, KW = w.shape
    cout_pad = _round_up(Cout, 128)
    w_hwio = jnp.transpose(w, (2, 3, 1, 0))                    # (KH,KW,Cin,Cout)
    w_hwio = jnp.pad(w_hwio, ((0, 0), (0, 0),
                              (0, cin_pad - Cin), (0, cout_pad - Cout)))
    w2 = w_hwio.reshape(KH * KW * cin_pad, cout_pad)
    Kp = _round_up(w2.shape[0], 128)
    if Kp != w2.shape[0]:
        w2 = jnp.pad(w2, ((0, Kp - w2.shape[0]), (0, 0)))
    if extra_bias is not None:
        b = b + extra_bias
    b2 = jnp.pad(b, (0, cout_pad - Cout)).reshape(1, cout_pad).astype(jnp.float32)
    return {'w': w2.astype(jnp.bfloat16), 'b': b2}


def prepare_params(raw, in_channels, num_classes):
    """One-time conversion of raw params to the padded bf16 GEMM layout."""
    prep = {}
    w, b = raw['conv1']
    prep['conv1'] = _prep_conv(w, b, cin_pad=in_channels)
    for li in range(1, 5):
        blocks = []
        for blk in raw[f'layer{li}']:
            w1, b1 = blk['conv1']
            w2, b2 = blk['conv2']
            cin_pad = _round_up(w1.shape[1], 128)
            cmid_pad = _round_up(w2.shape[1], 128)
            p = {'conv1': _prep_conv(w1, b1, cin_pad=cin_pad)}
            if 'shortcut' in blk:
                sw, sb = blk['shortcut']
                # shortcut bias is folded into conv2's bias (fused epilogue).
                p['conv2'] = _prep_conv(w2, b2, cin_pad=cmid_pad, extra_bias=sb)
                p['shortcut'] = {'w': _prep_conv(sw, jnp.zeros_like(sb),
                                                 cin_pad=cin_pad)['w']}
            else:
                p['conv2'] = _prep_conv(w2, b2, cin_pad=cmid_pad)
            blocks.append(p)
        prep[f'layer{li}'] = blocks
    ncp = _round_up(num_classes, 128)
    prep['fc_w'] = jnp.pad(raw['fc_w'], ((0, 0), (0, ncp - num_classes))
                           ).astype(jnp.bfloat16)
    prep['fc_b'] = jnp.pad(raw['fc_b'], (0, ncp - num_classes)
                           ).reshape(1, ncp).astype(jnp.float32)
    return prep


# ------------------------------------------------------------------ model

def basic_block(x, blk, stride):
    out = conv2d_pallas(x, blk['conv1'], kh=3, kw=3, stride=stride, pad=1,
                        swish=True)
    if 'shortcut' in blk:
        # Fuse the 1x1 strided shortcut conv into conv2's pallas_call.
        sc_x = x[:, ::stride, ::stride, :] if stride > 1 else x
        sc_x = sc_x.reshape(-1, sc_x.shape[-1])
        out = conv2d_pallas(out, blk['conv2'], kh=3, kw=3, stride=1, pad=1,
                            swish=True, sc_x=sc_x, sc_w=blk['shortcut']['w'])
    else:
        out = conv2d_pallas(out, blk['conv2'], kh=3, kw=3, stride=1, pad=1,
                            swish=True, residual=x.reshape(-1, x.shape[-1]))
    return out


def resnet18_forward(params, x_nchw):
    # NCHW (PyTorch convention) -> NHWC bf16 activations.
    x = jnp.transpose(x_nchw, (0, 2, 3, 1)).astype(jnp.bfloat16)
    x = conv2d_pallas(x, params['conv1'], kh=7, kw=7, stride=2, pad=3,
                      swish=True)                      # conv1 + Swish
    x = maxpool_pallas(x, 3, 2, 1)                     # MaxPool2d(3, 2, 1)
    for li in range(1, 5):
        for bi, blk in enumerate(params[f'layer{li}']):
            stride = 1 if (li == 1 or bi > 0) else 2
            x = basic_block(x, blk, stride)
    N = x.shape[0]
    feats = x.reshape(N, -1, x.shape[-1])              # (N, H*W, 512)
    return head_pallas(feats, params['fc_w'], params['fc_b'])


# ------------------------------------------------------------------ main

if __name__ == "__main__":
    key = jax.random.PRNGKey(0)
    kp, kx = jax.random.split(key)
    batch, in_channels, spatial, num_classes = 2, 4, 16, 10

    raw_params = make_params(kp, in_channels=in_channels,
                             num_classes=num_classes)
    params = prepare_params(raw_params, in_channels=in_channels,
                            num_classes=num_classes)
    x = jax.random.normal(kx, (batch, in_channels, spatial, spatial),
                          jnp.float32)

    fwd = jax.jit(resnet18_forward)
    logits_padded = fwd(params, x)
    logits_padded = jax.block_until_ready(logits_padded)
    logits = logits_padded[:, :num_classes]

    assert logits.shape == (batch, num_classes), logits.shape
    assert jnp.all(jnp.isfinite(logits))
    print("KERNEL_OK")
</pallas_src>

<mosaic_0001>
module attributes {stable_mosaic.version = 11 : i64} {
  func.func @_gemm_kernel(%arg0: i32, %arg1: i32, %arg2: i32, %arg3: memref<128x256xbf16, #tpu.memory_space<vmem>>, %arg4: memref<256x128xbf16, #tpu.memory_space<vmem>>, %arg5: memref<1x128xf32, #tpu.memory_space<vmem>>, %arg6: memref<128x128xbf16, #tpu.memory_space<vmem>>, %arg7: memref<128x128xf32, #tpu.memory_space<vmem>>) attributes {dimension_semantics = [#tpu.dimension_semantics<parallel>, #tpu.dimension_semantics<parallel>, #tpu.dimension_semantics<arbitrary>], iteration_bounds = array<i64: 1, 1, 1>, scalar_prefetch = 0 : i64, scratch_operands = 1 : i64, tpu.core_type = #tpu.core_type<tc>, window_params = [{transform_indices = @transform_0, window_bounds = array<i64: 128, 256>}, {transform_indices = @transform_1, window_bounds = array<i64: 256, 128>}, {transform_indices = @transform_2, window_bounds = array<i64: 1, 128>}, {transform_indices = @transform_3, window_bounds = array<i64: 128, 128>}]} {
    %c0_i32 = arith.constant 0 : i32
    %0 = arith.cmpi eq, %arg2, %c0_i32 : i32
    %1 = arith.extui %0 : i1 to i32
    %c0_i32_0 = arith.constant 0 : i32
    %2 = arith.cmpi ne, %1, %c0_i32_0 : i32
    scf.if %2 {
      %cst_10 = arith.constant 0.000000e+00 : f32
      %12 = vector.broadcast %cst_10 : f32 to vector<128x128xf32>
      %c0_11 = arith.constant 0 : index
      %c0_12 = arith.constant 0 : index
      %13 = vector.load %arg7[%c0_11, %c0_12] : memref<128x128xf32, #tpu.memory_space<vmem>>, vector<128x128xf32>
      tpu.vector_store %arg7[%c0_11, %c0_12], %12 {strides = array<i32>} : memref<128x128xf32, #tpu.memory_space<vmem>>, vector<128x128xf32>,
    } else {
    }
    %c0 = arith.constant 0 : index
    %c0_1 = arith.constant 0 : index
    %3 = vector.load %arg7[%c0, %c0_1] : memref<128x128xf32, #tpu.memory_space<vmem>>, vector<128x128xf32>
    %c0_2 = arith.constant 0 : index
    %c0_3 = arith.constant 0 : index
    %4 = vector.load %arg3[%c0_2, %c0_3] : memref<128x256xbf16, #tpu.memory_space<vmem>>, vector<128x256xbf16>
    %c0_4 = arith.constant 0 : index
    %c0_5 = arith.constant 0 : index
    %5 = vector.load %arg4[%c0_4, %c0_5] : memref<256x128xbf16, #tpu.memory_space<vmem>>, vector<256x128xbf16>
    %cst = arith.constant dense<0.000000e+00> : vector<128x128xf32>
    %6 = tpu.matmul %4, %5, %cst {dimension_numbers = #tpu.dot_dimension_numbers<[1], [0], [0], [1], [0, 0, 1, 1], [], []>} : vector<128x256xbf16>, vector<256x128xbf16>, vector<128x128xf32> -> vector<128x128xf32>
    %7 = arith.addf %3, %6 : vector<128x128xf32>
    %c0_6 = arith.constant 0 : index
    %c0_7 = arith.constant 0 : index
    %8 = vector.load %arg7[%c0_6, %c0_7] : memref<128x128xf32, #tpu.memory_space<vmem>>, vector<128x128xf32>
    tpu.vector_store %arg7[%c0_6, %c0_7], %7 {strides = array<i32>} : memref<128x128xf32, #tpu.memory_space<vmem>>, vector<128x128xf32>,
    %c0_i32_8 = arith.constant 0 : i32
    %9 = arith.cmpi eq, %arg2, %c0_i32_8 : i32
    %10 = arith.extui %9 : i1 to i32
    %c0_i32_9 = arith.constant 0 : i32
    %11 = arith.cmpi ne, %10, %c0_i32_9 : i32
    scf.if %11 {
      %c0_10 = arith.constant 0 : index
      %c0_11 = arith.constant 0 : index
      %12 = vector.load %arg7[%c0_10, %c0_11] : memref<128x128xf32, #tpu.memory_space<vmem>>, vector<128x128xf32>
      %c0_12 = arith.constant 0 : index
      %c0_13 = arith.constant 0 : index
      %13 = vector.load %arg5[%c0_12, %c0_13] : memref<1x128xf32, #tpu.memory_space<vmem>>, vector<1x128xf32>
      %14 = vector.broadcast %13 : vector<1x128xf32> to vector<128x128xf32>
      %15 = arith.addf %12, %14 : vector<128x128xf32>
      %16 = arith.negf %15 : vector<128x128xf32>
      %17 = math.exp %16 : vector<128x128xf32>
      %cst_14 = arith.constant 1.000000e+00 : f32
      %18 = vector.broadcast %cst_14 : f32 to vector<128x128xf32>
      %19 = arith.addf %18, %17 : vector<128x128xf32>
      %20 = arith.divf %18, %19 : vector<128x128xf32>
      %21 = arith.mulf %15, %20 : vector<128x128xf32>
      %22 = arith.truncf %21 : vector<128x128xf32> to vector<128x128xbf16>
      %c0_15 = arith.constant 0 : index
      %c0_16 = arith.constant 0 : index
      %23 = vector.load %arg6[%c0_15, %c0_16] : memref<128x128xbf16, #tpu.memory_space<vmem>>, vector<128x128xbf16>
      tpu.vector_store %arg6[%c0_15, %c0_16], %22 {strides = array<i32>} : memref<128x128xbf16, #tpu.memory_space<vmem>>, vector<128x128xbf16>,
    } else {
    }
    return
  }
  func.func @transform_0(%arg0: i32, %arg1: i32, %arg2: i32) -> (i32, i32) {
    %c0_i32 = arith.constant 0 : i32
    return %arg0, %arg2 : i32, i32
  }
  func.func @transform_1(%arg0: i32, %arg1: i32, %arg2: i32) -> (i32, i32) {
    %c0_i32 = arith.constant 0 : i32
    return %arg2, %arg1 : i32, i32
  }
  func.func @transform_2(%arg0: i32, %arg1: i32, %arg2: i32) -> (i32, i32) {
    %c0_i32 = arith.constant 0 : i32
    %c0_i32_0 = arith.constant 0 : i32
    return %c0_i32, %arg1 : i32, i32
  }
  func.func @transform_3(%arg0: i32, %arg1: i32, %arg2: i32) -> (i32, i32) {
    %c0_i32 = arith.constant 0 : i32
    return %arg0, %arg1 : i32, i32
  }
}

module attributes {stable_mosaic.version = 11 : i64} {
  func.func @_maxpool_kernel(%arg0: i32, %arg1: memref<32x128xbf16, #tpu.memory_space<vmem>>, %arg2: memref<32x128xbf16, #tpu.memory_space<vmem>>, %arg3: memref<32x128xbf16, #tpu.memory_space<vmem>>, %arg4: memref<32x128xbf16, #tpu.memory_space<vmem>>, %arg5: memref<32x128xbf16, #tpu.memory_space<vmem>>, %arg6: memref<32x128xbf16, #tpu.memory_space<vmem>>, %arg7: memref<32x128xbf16, #tpu.memory_space<vmem>>, %arg8: memref<32x128xbf16, #tpu.memory_space<vmem>>, %arg9: memref<32x128xbf16, #tpu.memory_space<vmem>>, %arg10: memref<32x128xbf16, #tpu.memory_space<vmem>>) attributes {dimension_semantics = [#tpu.dimension_semantics<parallel>], iteration_bounds = array<i64: 1>, scalar_prefetch = 0 : i64, scratch_operands = 0 : i64, tpu.core_type = #tpu.core_type<tc>, window_params = [{transform_indices = @transform_0, window_bounds = array<i64: 32, 128>}, {transform_indices = @transform_1, window_bounds = array<i64: 32, 128>}, {transform_indices = @transform_2, window_bounds = array<i64: 32, 128>}, {transform_indices = @transform_3, window_bounds = array<i64: 32, 128>}, {transform_indices = @transform_4, window_bounds = array<i64: 32, 128>}, {transform_indices = @transform_5, window_bounds = array<i64: 32, 128>}, {transform_indices = @transform_6, window_bounds = array<i64: 32, 128>}, {transform_indices = @transform_7, window_bounds = array<i64: 32, 128>}, {transform_indices = @transform_8, window_bounds = array<i64: 32, 128>}, {transform_indices = @transform_9, window_bounds = array<i64: 32, 128>}]} {
    %c0 = arith.constant 0 : index
    %c0_0 = arith.constant 0 : index
    %0 = vector.load %arg1[%c0, %c0_0] : memref<32x128xbf16, #tpu.memory_space<vmem>>, vector<32x128xbf16>
    %c0_1 = arith.constant 0 : index
    %c0_2 = arith.constant 0 : index
    %1 = vector.load %arg2[%c0_1, %c0_2] : memref<32x128xbf16, #tpu.memory_space<vmem>>, vector<32x128xbf16>
    %2 = arith.maximumf %0, %1 : vector<32x128xbf16>
    %c0_3 = arith.constant 0 : index
    %c0_4 = arith.constant 0 : index
    %3 = vector.load %arg3[%c0_3, %c0_4] : memref<32x128xbf16, #tpu.memory_space<vmem>>, vector<32x128xbf16>
    %4 = arith.maximumf %2, %3 : vector<32x128xbf16>
    %c0_5 = arith.constant 0 : index
    %c0_6 = arith.constant 0 : index
    %5 = vector.load %arg4[%c0_5, %c0_6] : memref<32x128xbf16, #tpu.memory_space<vmem>>, vector<32x128xbf16>
    %6 = arith.maximumf %4, %5 : vector<32x128xbf16>
    %c0_7 = arith.constant 0 : index
    %c0_8 = arith.constant 0 : index
    %7 = vector.load %arg5[%c0_7, %c0_8] : memref<32x128xbf16, #tpu.memory_space<vmem>>, vector<32x128xbf16>
    %8 = arith.maximumf %6, %7 : vector<32x128xbf16>
    %c0_9 = arith.constant 0 : index
    %c0_10 = arith.constant 0 : index
    %9 = vector.load %arg6[%c0_9, %c0_10] : memref<32x128xbf16, #tpu.memory_space<vmem>>, vector<32x128xbf16>
    %10 = arith.maximumf %8, %9 : vector<32x128xbf16>
    %c0_11 = arith.constant 0 : index
    %c0_12 = arith.constant 0 : index
    %11 = vector.load %arg7[%c0_11, %c0_12] : memref<32x128xbf16, #tpu.memory_space<vmem>>, vector<32x128xbf16>
    %12 = arith.maximumf %10, %11 : vector<32x128xbf16>
    %c0_13 = arith.constant 0 : index
    %c0_14 = arith.constant 0 : index
    %13 = vector.load %arg8[%c0_13, %c0_14] : memref<32x128xbf16, #tpu.memory_space<vmem>>, vector<32x128xbf16>
    %14 = arith.maximumf %12, %13 : vector<32x128xbf16>
    %c0_15 = arith.constant 0 : index
    %c0_16 = arith.constant 0 : index
    %15 = vector.load %arg9[%c0_15, %c0_16] : memref<32x128xbf16, #tpu.memory_space<vmem>>, vector<32x128xbf16>
    %16 = arith.maximumf %14, %15 : vector<32x128xbf16>
    %c0_17 = arith.constant 0 : index
    %c0_18 = arith.constant 0 : index
    %17 = vector.load %arg10[%c0_17, %c0_18] : memref<32x128xbf16, #tpu.memory_space<vmem>>, vector<32x128xbf16>
    tpu.vector_store %arg10[%c0_17, %c0_18], %16 {strides = array<i32>} : memref<32x128xbf16, #tpu.memory_space<vmem>>, vector<32x128xbf16>,
    return
  }
  func.func @transform_0(%arg0: i32) -> (i32, i32) {
    %c0_i32 = arith.constant 0 : i32
    %c0_i32_0 = arith.constant 0 : i32
    return %arg0, %c0_i32 : i32, i32
  }
  func.func @transform_1(%arg0: i32) -> (i32, i32) {
    %c0_i32 = arith.constant 0 : i32
    %c0_i32_0 = arith.constant 0 : i32
    return %arg0, %c0_i32 : i32, i32
  }
  func.func @transform_2(%arg0: i32) -> (i32, i32) {
    %c0_i32 = arith.constant 0 : i32
    %c0_i32_0 = arith.constant 0 : i32
    return %arg0, %c0_i32 : i32, i32
  }
  func.func @transform_3(%arg0: i32) -> (i32, i32) {
    %c0_i32 = arith.constant 0 : i32
    %c0_i32_0 = arith.constant 0 : i32
    return %arg0, %c0_i32 : i32, i32
  }
  func.func @transform_4(%arg0: i32) -> (i32, i32) {
    %c0_i32 = arith.constant 0 : i32
    %c0_i32_0 = arith.constant 0 : i32
    return %arg0, %c0_i32 : i32, i32
  }
  func.func @transform_5(%arg0: i32) -> (i32, i32) {
    %c0_i32 = arith.constant 0 : i32
    %c0_i32_0 = arith.constant 0 : i32
    return %arg0, %c0_i32 : i32, i32
  }
  func.func @transform_6(%arg0: i32) -> (i32, i32) {
    %c0_i32 = arith.constant 0 : i32
    %c0_i32_0 = arith.constant 0 : i32
    return %arg0, %c0_i32 : i32, i32
  }
  func.func @transform_7(%arg0: i32) -> (i32, i32) {
    %c0_i32 = arith.constant 0 : i32
    %c0_i32_0 = arith.constant 0 : i32
    return %arg0, %c0_i32 : i32, i32
  }
  func.func @transform_8(%arg0: i32) -> (i32, i32) {
    %c0_i32 = arith.constant 0 : i32
    %c0_i32_0 = arith.constant 0 : i32
    return %arg0, %c0_i32 : i32, i32
  }
  func.func @transform_9(%arg0: i32) -> (i32, i32) {
    %c0_i32 = arith.constant 0 : i32
    %c0_i32_0 = arith.constant 0 : i32
    return %arg0, %c0_i32 : i32, i32
  }
}

module attributes {stable_mosaic.version = 11 : i64} {
  func.func @_gemm_kernel(%arg0: i32, %arg1: i32, %arg2: i32, %arg3: memref<32x384xbf16, #tpu.memory_space<vmem>>, %arg4: memref<384x128xbf16, #tpu.memory_space<vmem>>, %arg5: memref<1x128xf32, #tpu.memory_space<vmem>>, %arg6: memref<32x128xbf16, #tpu.memory_space<vmem>>, %arg7: memref<32x128xf32, #tpu.memory_space<vmem>>) attributes {dimension_semantics = [#tpu.dimension_semantics<parallel>, #tpu.dimension_semantics<parallel>, #tpu.dimension_semantics<arbitrary>], iteration_bounds = array<i64: 1, 1, 3>, scalar_prefetch = 0 : i64, scratch_operands = 1 : i64, tpu.core_type = #tpu.core_type<tc>, window_params = [{transform_indices = @transform_0, window_bounds = array<i64: 32, 384>}, {transform_indices = @transform_1, window_bounds = array<i64: 384, 128>}, {transform_indices = @transform_2, window_bounds = array<i64: 1, 128>}, {transform_indices = @transform_3, window_bounds = array<i64: 32, 128>}]} {
    %c0_i32 = arith.constant 0 : i32
    %0 = arith.cmpi eq, %arg2, %c0_i32 : i32
    %1 = arith.extui %0 : i1 to i32
    %c0_i32_0 = arith.constant 0 : i32
    %2 = arith.cmpi ne, %1, %c0_i32_0 : i32
    scf.if %2 {
      %cst_9 = arith.constant 0.000000e+00 : f32
      %12 = vector.broadcast %cst_9 : f32 to vector<32x128xf32>
      %c0_10 = arith.constant 0 : index
      %c0_11 = arith.constant 0 : index
      %13 = vector.load %arg7[%c0_10, %c0_11] : memref<32x128xf32, #tpu.memory_space<vmem>>, vector<32x128xf32>
      tpu.vector_store %arg7[%c0_10, %c0_11], %12 {strides = array<i32>} : memref<32x128xf32, #tpu.memory_space<vmem>>, vector<32x128xf32>,
    } else {
    }
    %c0 = arith.constant 0 : index
    %c0_1 = arith.constant 0 : index
    %3 = vector.load %arg7[%c0, %c0_1] : memref<32x128xf32, #tpu.memory_space<vmem>>, vector<32x128xf32>
    %c0_2 = arith.constant 0 : index
    %c0_3 = arith.constant 0 : index
    %4 = vector.load %arg3[%c0_2, %c0_3] : memref<32x384xbf16, #tpu.memory_space<vmem>>, vector<32x384xbf16>
    %c0_4 = arith.constant 0 : index
    %c0_5 = arith.constant 0 : index
    %5 = vector.load %arg4[%c0_4, %c0_5] : memref<384x128xbf16, #tpu.memory_space<vmem>>, vector<384x128xbf16>
    %cst = arith.constant dense<0.000000e+00> : vector<32x128xf32>
    %6 = tpu.matmul %4, %5, %cst {dimension_numbers = #tpu.dot_dimension_numbers<[1], [0], [0], [1], [0, 0, 1, 1], [], []>} : vector<32x384xbf16>, vector<384x128xbf16>, vector<32x128xf32> -> vector<32x128xf32>
    %7 = arith.addf %3, %6 : vector<32x128xf32>
    %c0_6 = arith.constant 0 : index
    %c0_7 = arith.constant 0 : index
    %8 = vector.load %arg7[%c0_6, %c0_7] : memref<32x128xf32, #tpu.memory_space<vmem>>, vector<32x128xf32>
    tpu.vector_store %arg7[%c0_6, %c0_7], %7 {strides = array<i32>} : memref<32x128xf32, #tpu.memory_space<vmem>>, vector<32x128xf32>,
    %c2_i32 = arith.constant 2 : i32
    %9 = arith.cmpi eq, %arg2, %c2_i32 : i32
    %10 = arith.extui %9 : i1 to i32
    %c0_i32_8 = arith.constant 0 : i32
    %11 = arith.cmpi ne, %10, %c0_i32_8 : i32
    scf.if %11 {
      %c0_9 = arith.constant 0 : index
      %c0_10 = arith.constant 0 : index
      %12 = vector.load %arg7[%c0_9, %c0_10] : memref<32x128xf32, #tpu.memory_space<vmem>>, vector<32x128xf32>
      %c0_11 = arith.constant 0 : index
      %c0_12 = arith.constant 0 : index
      %13 = vector.load %arg5[%c0_11, %c0_12] : memref<1x128xf32, #tpu.memory_space<vmem>>, vector<1x128xf32>
      %14 = vector.broadcast %13 : vector<1x128xf32> to vector<32x128xf32>
      %15 = arith.addf %12, %14 : vector<32x128xf32>
      %16 = arith.negf %15 : vector<32x128xf32>
      %17 = math.exp %16 : vector<32x128xf32>
      %cst_13 = arith.constant 1.000000e+00 : f32
      %18 = vector.broadcast %cst_13 : f32 to vector<32x128xf32>
      %19 = arith.addf %18, %17 : vector<32x128xf32>
      %20 = arith.divf %18, %19 : vector<32x128xf32>
      %21 = arith.mulf %15, %20 : vector<32x128xf32>
      %22 = arith.truncf %21 : vector<32x128xf32> to vector<32x128xbf16>
      %c0_14 = arith.constant 0 : index
      %c0_15 = arith.constant 0 : index
      %23 = vector.load %arg6[%c0_14, %c0_15] : memref<32x128xbf16, #tpu.memory_space<vmem>>, vector<32x128xbf16>
      tpu.vector_store %arg6[%c0_14, %c0_15], %22 {strides = array<i32>} : memref<32x128xbf16, #tpu.memory_space<vmem>>, vector<32x128xbf16>,
    } else {
    }
    return
  }
  func.func @transform_0(%arg0: i32, %arg1: i32, %arg2: i32) -> (i32, i32) {
    %c0_i32 = arith.constant 0 : i32
    return %arg0, %arg2 : i32, i32
  }
  func.func @transform_1(%arg0: i32, %arg1: i32, %arg2: i32) -> (i32, i32) {
    %c0_i32 = arith.constant 0 : i32
    return %arg2, %arg1 : i32, i32
  }
  func.func @transform_2(%arg0: i32, %arg1: i32, %arg2: i32) -> (i32, i32) {
    %c0_i32 = arith.constant 0 : i32
    %c0_i32_0 = arith.constant 0 : i32
    return %c0_i32, %arg1 : i32, i32
  }
  func.func @transform_3(%arg0: i32, %arg1: i32, %arg2: i32) -> (i32, i32) {
    %c0_i32 = arith.constant 0 : i32
    return %arg0, %arg1 : i32, i32
  }
}

module attributes {stable_mosaic.version = 11 : i64} {
  func.func @_gemm_res_kernel(%arg0: i32, %arg1: i32, %arg2: i32, %arg3: memref<32x384xbf16, #tpu.memory_space<vmem>>, %arg4: memref<384x128xbf16, #tpu.memory_space<vmem>>, %arg5: memref<1x128xf32, #tpu.memory_space<vmem>>, %arg6: memref<32x128xbf16, #tpu.memory_space<vmem>>, %arg7: memref<32x128xbf16, #tpu.memory_space<vmem>>, %arg8: memref<32x128xf32, #tpu.memory_space<vmem>>) attributes {dimension_semantics = [#tpu.dimension_semantics<parallel>, #tpu.dimension_semantics<parallel>, #tpu.dimension_semantics<arbitrary>], iteration_bounds = array<i64: 1, 1, 3>, scalar_prefetch = 0 : i64, scratch_operands = 1 : i64, tpu.core_type = #tpu.core_type<tc>, window_params = [{transform_indices = @transform_0, window_bounds = array<i64: 32, 384>}, {transform_indices = @transform_1, window_bounds = array<i64: 384, 128>}, {transform_indices = @transform_2, window_bounds = array<i64: 1, 128>}, {transform_indices = @transform_3, window_bounds = array<i64: 32, 128>}, {transform_indices = @transform_4, window_bounds = array<i64: 32, 128>}]} {
    %c0_i32 = arith.constant 0 : i32
    %0 = arith.cmpi eq, %arg2, %c0_i32 : i32
    %1 = arith.extui %0 : i1 to i32
    %c0_i32_0 = arith.constant 0 : i32
    %2 = arith.cmpi ne, %1, %c0_i32_0 : i32
    scf.if %2 {
      %cst_9 = arith.constant 0.000000e+00 : f32
      %12 = vector.broadcast %cst_9 : f32 to vector<32x128xf32>
      %c0_10 = arith.constant 0 : index
      %c0_11 = arith.constant 0 : index
      %13 = vector.load %arg8[%c0_10, %c0_11] : memref<32x128xf32, #tpu.memory_space<vmem>>, vector<32x128xf32>
      tpu.vector_store %arg8[%c0_10, %c0_11], %12 {strides = array<i32>} : memref<32x128xf32, #tpu.memory_space<vmem>>, vector<32x128xf32>,
    } else {
    }
    %c0 = arith.constant 0 : index
    %c0_1 = arith.constant 0 : index
    %3 = vector.load %arg8[%c0, %c0_1] : memref<32x128xf32, #tpu.memory_space<vmem>>, vector<32x128xf32>
    %c0_2 = arith.constant 0 : index
    %c0_3 = arith.constant 0 : index
    %4 = vector.load %arg3[%c0_2, %c0_3] : memref<32x384xbf16, #tpu.memory_space<vmem>>, vector<32x384xbf16>
    %c0_4 = arith.constant 0 : index
    %c0_5 = arith.constant 0 : index
    %5 = vector.load %arg4[%c0_4, %c0_5] : memref<384x128xbf16, #tpu.memory_space<vmem>>, vector<384x128xbf16>
    %cst = arith.constant dense<0.000000e+00> : vector<32x128xf32>
    %6 = tpu.matmul %4, %5, %cst {dimension_numbers = #tpu.dot_dimension_numbers<[1], [0], [0], [1], [0, 0, 1, 1], [], []>} : vector<32x384xbf16>, vector<384x128xbf16>, vector<32x128xf32> -> vector<32x128xf32>
    %7 = arith.addf %3, %6 : vector<32x128xf32>
    %c0_6 = arith.constant 0 : index
    %c0_7 = arith.constant 0 : index
    %8 = vector.load %arg8[%c0_6, %c0_7] : memref<32x128xf32, #tpu.memory_space<vmem>>, vector<32x128xf32>
    tpu.vector_store %arg8[%c0_6, %c0_7], %7 {strides = array<i32>} : memref<32x128xf32, #tpu.memory_space<vmem>>, vector<32x128xf32>,
    %c2_i32 = arith.constant 2 : i32
    %9 = arith.cmpi eq, %arg2, %c2_i32 : i32
    %10 = arith.extui %9 : i1 to i32
    %c0_i32_8 = arith.constant 0 : i32
    %11 = arith.cmpi ne, %10, %c0_i32_8 : i32
    scf.if %11 {
      %c0_9 = arith.constant 0 : index
      %c0_10 = arith.constant 0 : index
      %12 = vector.load %arg8[%c0_9, %c0_10] : memref<32x128xf32, #tpu.memory_space<vmem>>, vector<32x128xf32>
      %c0_11 = arith.constant 0 : index
      %c0_12 = arith.constant 0 : index
      %13 = vector.load %arg5[%c0_11, %c0_12] : memref<1x128xf32, #tpu.memory_space<vmem>>, vector<1x128xf32>
      %14 = vector.broadcast %13 : vector<1x128xf32> to vector<32x128xf32>
      %15 = arith.addf %12, %14 : vector<32x128xf32>
      %c0_13 = arith.constant 0 : index
      %c0_14 = arith.constant 0 : index
      %16 = vector.load %arg6[%c0_13, %c0_14] : memref<32x128xbf16, #tpu.memory_space<vmem>>, vector<32x128xbf16>
      %17 = arith.extf %16 : vector<32x128xbf16> to vector<32x128xf32>
      %18 = arith.addf %15, %17 : vector<32x128xf32>
      %19 = arith.negf %18 : vector<32x128xf32>
      %20 = math.exp %19 : vector<32x128xf32>
      %cst_15 = arith.constant 1.000000e+00 : f32
      %21 = vector.broadcast %cst_15 : f32 to vector<32x128xf32>
      %22 = arith.addf %21, %20 : vector<32x128xf32>
      %23 = arith.divf %21, %22 : vector<32x128xf32>
      %24 = arith.mulf %18, %23 : vector<32x128xf32>
      %25 = arith.truncf %24 : vector<32x128xf32> to vector<32x128xbf16>
      %c0_16 = arith.constant 0 : index
      %c0_17 = arith.constant 0 : index
      %26 = vector.load %arg7[%c0_16, %c0_17] : memref<32x128xbf16, #tpu.memory_space<vmem>>, vector<32x128xbf16>
      tpu.vector_store %arg7[%c0_16, %c0_17], %25 {strides = array<i32>} : memref<32x128xbf16, #tpu.memory_space<vmem>>, vector<32x128xbf16>,
    } else {
    }
    return
  }
  func.func @transform_0(%arg0: i32, %arg1: i32, %arg2: i32) -> (i32, i32) {
    %c0_i32 = arith.constant 0 : i32
    return %arg0, %arg2 : i32, i32
  }
  func.func @transform_1(%arg0: i32, %arg1: i32, %arg2: i32) -> (i32, i32) {
    %c0_i32 = arith.constant 0 : i32
    return %arg2, %arg1 : i32, i32
  }
  func.func @transform_2(%arg0: i32, %arg1: i32, %arg2: i32) -> (i32, i32) {
    %c0_i32 = arith.constant 0 : i32
    %c0_i32_0 = arith.constant 0 : i32
    return %c0_i32, %arg1 : i32, i32
  }
  func.func @transform_3(%arg0: i32, %arg1: i32, %arg2: i32) -> (i32, i32) {
    %c0_i32 = arith.constant 0 : i32
    return %arg0, %arg1 : i32, i32
  }
  func.func @transform_4(%arg0: i32, %arg1: i32, %arg2: i32) -> (i32, i32) {
    %c0_i32 = arith.constant 0 : i32
    return %arg0, %arg1 : i32, i32
  }
}

module attributes {stable_mosaic.version = 11 : i64} {
  func.func @_gemm_kernel(%arg0: i32, %arg1: i32, %arg2: i32, %arg3: memref<8x384xbf16, #tpu.memory_space<vmem>>, %arg4: memref<384x128xbf16, #tpu.memory_space<vmem>>, %arg5: memref<1x128xf32, #tpu.memory_space<vmem>>, %arg6: memref<8x128xbf16, #tpu.memory_space<vmem>>, %arg7: memref<8x128xf32, #tpu.memory_space<vmem>>) attributes {dimension_semantics = [#tpu.dimension_semantics<parallel>, #tpu.dimension_semantics<parallel>, #tpu.dimension_semantics<arbitrary>], iteration_bounds = array<i64: 1, 1, 3>, scalar_prefetch = 0 : i64, scratch_operands = 1 : i64, tpu.core_type = #tpu.core_type<tc>, window_params = [{transform_indices = @transform_0, window_bounds = array<i64: 8, 384>}, {transform_indices = @transform_1, window_bounds = array<i64: 384, 128>}, {transform_indices = @transform_2, window_bounds = array<i64: 1, 128>}, {transform_indices = @transform_3, window_bounds = array<i64: 8, 128>}]} {
    %c0_i32 = arith.constant 0 : i32
    %0 = arith.cmpi eq, %arg2, %c0_i32 : i32
    %1 = arith.extui %0 : i1 to i32
    %c0_i32_0 = arith.constant 0 : i32
    %2 = arith.cmpi ne, %1, %c0_i32_0 : i32
    scf.if %2 {
      %cst_9 = arith.constant 0.000000e+00 : f32
      %12 = vector.broadcast %cst_9 : f32 to vector<8x128xf32>
      %c0_10 = arith.constant 0 : index
      %c0_11 = arith.constant 0 : index
      %13 = vector.load %arg7[%c0_10, %c0_11] : memref<8x128xf32, #tpu.memory_space<vmem>>, vector<8x128xf32>
      tpu.vector_store %arg7[%c0_10, %c0_11], %12 {strides = array<i32>} : memref<8x128xf32, #tpu.memory_space<vmem>>, vector<8x128xf32>,
    } else {
    }
    %c0 = arith.constant 0 : index
    %c0_1 = arith.constant 0 : index
    %3 = vector.load %arg7[%c0, %c0_1] : memref<8x128xf32, #tpu.memory_space<vmem>>, vector<8x128xf32>
    %c0_2 = arith.constant 0 : index
    %c0_3 = arith.constant 0 : index
    %4 = vector.load %arg3[%c0_2, %c0_3] : memref<8x384xbf16, #tpu.memory_space<vmem>>, vector<8x384xbf16>
    %c0_4 = arith.constant 0 : index
    %c0_5 = arith.constant 0 : index
    %5 = vector.load %arg4[%c0_4, %c0_5] : memref<384x128xbf16, #tpu.memory_space<vmem>>, vector<384x128xbf16>
    %cst = arith.constant dense<0.000000e+00> : vector<8x128xf32>
    %6 = tpu.matmul %4, %5, %cst {dimension_numbers = #tpu.dot_dimension_numbers<[1], [0], [0], [1], [0, 0, 1, 1], [], []>} : vector<8x384xbf16>, vector<384x128xbf16>, vector<8x128xf32> -> vector<8x128xf32>
    %7 = arith.addf %3, %6 : vector<8x128xf32>
    %c0_6 = arith.constant 0 : index
    %c0_7 = arith.constant 0 : index
    %8 = vector.load %arg7[%c0_6, %c0_7] : memref<8x128xf32, #tpu.memory_space<vmem>>, vector<8x128xf32>
    tpu.vector_store %arg7[%c0_6, %c0_7], %7 {strides = array<i32>} : memref<8x128xf32, #tpu.memory_space<vmem>>, vector<8x128xf32>,
    %c2_i32 = arith.constant 2 : i32
    %9 = arith.cmpi eq, %arg2, %c2_i32 : i32
    %10 = arith.extui %9 : i1 to i32
    %c0_i32_8 = arith.constant 0 : i32
    %11 = arith.cmpi ne, %10, %c0_i32_8 : i32
    scf.if %11 {
      %c0_9 = arith.constant 0 : index
      %c0_10 = arith.constant 0 : index
      %12 = vector.load %arg7[%c0_9, %c0_10] : memref<8x128xf32, #tpu.memory_space<vmem>>, vector<8x128xf32>
      %c0_11 = arith.constant 0 : index
      %c0_12 = arith.constant 0 : index
      %13 = vector.load %arg5[%c0_11, %c0_12] : memref<1x128xf32, #tpu.memory_space<vmem>>, vector<1x128xf32>
      %14 = vector.broadcast %13 : vector<1x128xf32> to vector<8x128xf32>
      %15 = arith.addf %12, %14 : vector<8x128xf32>
      %16 = arith.negf %15 : vector<8x128xf32>
      %17 = math.exp %16 : vector<8x128xf32>
      %cst_13 = arith.constant 1.000000e+00 : f32
      %18 = vector.broadcast %cst_13 : f32 to vector<8x128xf32>
      %19 = arith.addf %18, %17 : vector<8x128xf32>
      %20 = arith.divf %18, %19 : vector<8x128xf32>
      %21 = arith.mulf %15, %20 : vector<8x128xf32>
      %22 = arith.truncf %21 : vector<8x128xf32> to vector<8x128xbf16>
      %c0_14 = arith.constant 0 : index
      %c0_15 = arith.constant 0 : index
      %23 = vector.load %arg6[%c0_14, %c0_15] : memref<8x128xbf16, #tpu.memory_space<vmem>>, vector<8x128xbf16>
      tpu.vector_store %arg6[%c0_14, %c0_15], %22 {strides = array<i32>} : memref<8x128xbf16, #tpu.memory_space<vmem>>, vector<8x128xbf16>,
    } else {
    }
    return
  }
  func.func @transform_0(%arg0: i32, %arg1: i32, %arg2: i32) -> (i32, i32) {
    %c0_i32 = arith.constant 0 : i32
    return %arg0, %arg2 : i32, i32
  }
  func.func @transform_1(%arg0: i32, %arg1: i32, %arg2: i32) -> (i32, i32) {
    %c0_i32 = arith.constant 0 : i32
    return %arg2, %arg1 : i32, i32
  }
  func.func @transform_2(%arg0: i32, %arg1: i32, %arg2: i32) -> (i32, i32) {
    %c0_i32 = arith.constant 0 : i32
    %c0_i32_0 = arith.constant 0 : i32
    return %c0_i32, %arg1 : i32, i32
  }
  func.func @transform_3(%arg0: i32, %arg1: i32, %arg2: i32) -> (i32, i32) {
    %c0_i32 = arith.constant 0 : i32
    return %arg0, %arg1 : i32, i32
  }
}

module attributes {stable_mosaic.version = 11 : i64} {
  func.func @_gemm_sc_kernel(%arg0: i32, %arg1: i32, %arg2: i32, %arg3: memref<8x384xbf16, #tpu.memory_space<vmem>>, %arg4: memref<384x128xbf16, #tpu.memory_space<vmem>>, %arg5: memref<1x128xf32, #tpu.memory_space<vmem>>, %arg6: memref<8x128xbf16, #tpu.memory_space<vmem>>, %arg7: memref<128x128xbf16, #tpu.memory_space<vmem>>, %arg8: memref<8x128xbf16, #tpu.memory_space<vmem>>, %arg9: memref<8x128xf32, #tpu.memory_space<vmem>>) attributes {dimension_semantics = [#tpu.dimension_semantics<parallel>, #tpu.dimension_semantics<parallel>, #tpu.dimension_semantics<arbitrary>], iteration_bounds = array<i64: 1, 1, 3>, scalar_prefetch = 0 : i64, scratch_operands = 1 : i64, tpu.core_type = #tpu.core_type<tc>, window_params = [{transform_indices = @transform_0, window_bounds = array<i64: 8, 384>}, {transform_indices = @transform_1, window_bounds = array<i64: 384, 128>}, {transform_indices = @transform_2, window_bounds = array<i64: 1, 128>}, {transform_indices = @transform_3, window_bounds = array<i64: 8, 128>}, {transform_indices = @transform_4, window_bounds = array<i64: 128, 128>}, {transform_indices = @transform_5, window_bounds = array<i64: 8, 128>}]} {
    %c0_i32 = arith.constant 0 : i32
    %0 = arith.cmpi eq, %arg2, %c0_i32 : i32
    %1 = arith.extui %0 : i1 to i32
    %c0_i32_0 = arith.constant 0 : i32
    %2 = arith.cmpi ne, %1, %c0_i32_0 : i32
    scf.if %2 {
      %c0_9 = arith.constant 0 : index
      %c0_10 = arith.constant 0 : index
      %12 = vector.load %arg6[%c0_9, %c0_10] : memref<8x128xbf16, #tpu.memory_space<vmem>>, vector<8x128xbf16>
      %c0_11 = arith.constant 0 : index
      %c0_12 = arith.constant 0 : index
      %13 = vector.load %arg7[%c0_11, %c0_12] : memref<128x128xbf16, #tpu.memory_space<vmem>>, vector<128x128xbf16>
      %cst_13 = arith.constant dense<0.000000e+00> : vector<8x128xf32>
      %14 = tpu.matmul %12, %13, %cst_13 {dimension_numbers = #tpu.dot_dimension_numbers<[1], [0], [0], [1], [0, 0, 1, 1], [], []>} : vector<8x128xbf16>, vector<128x128xbf16>, vector<8x128xf32> -> vector<8x128xf32>
      %c0_14 = arith.constant 0 : index
      %c0_15 = arith.constant 0 : index
      %15 = vector.load %arg9[%c0_14, %c0_15] : memref<8x128xf32, #tpu.memory_space<vmem>>, vector<8x128xf32>
      tpu.vector_store %arg9[%c0_14, %c0_15], %14 {strides = array<i32>} : memref<8x128xf32, #tpu.memory_space<vmem>>, vector<8x128xf32>,
    } else {
    }
    %c0 = arith.constant 0 : index
    %c0_1 = arith.constant 0 : index
    %3 = vector.load %arg9[%c0, %c0_1] : memref<8x128xf32, #tpu.memory_space<vmem>>, vector<8x128xf32>
    %c0_2 = arith.constant 0 : index
    %c0_3 = arith.constant 0 : index
    %4 = vector.load %arg3[%c0_2, %c0_3] : memref<8x384xbf16, #tpu.memory_space<vmem>>, vector<8x384xbf16>
    %c0_4 = arith.constant 0 : index
    %c0_5 = arith.constant 0 : index
    %5 = vector.load %arg4[%c0_4, %c0_5] : memref<384x128xbf16, #tpu.memory_space<vmem>>, vector<384x128xbf16>
    %cst = arith.constant dense<0.000000e+00> : vector<8x128xf32>
    %6 = tpu.matmul %4, %5, %cst {dimension_numbers = #tpu.dot_dimension_numbers<[1], [0], [0], [1], [0, 0, 1, 1], [], []>} : vector<8x384xbf16>, vector<384x128xbf16>, vector<8x128xf32> -> vector<8x128xf32>
    %7 = arith.addf %3, %6 : vector<8x128xf32>
    %c0_6 = arith.constant 0 : index
    %c0_7 = arith.constant 0 : index
    %8 = vector.load %arg9[%c0_6, %c0_7] : memref<8x128xf32, #tpu.memory_space<vmem>>, vector<8x128xf32>
    tpu.vector_store %arg9[%c0_6, %c0_7], %7 {strides = array<i32>} : memref<8x128xf32, #tpu.memory_space<vmem>>, vector<8x128xf32>,
    %c2_i32 = arith.constant 2 : i32
    %9 = arith.cmpi eq, %arg2, %c2_i32 : i32
    %10 = arith.extui %9 : i1 to i32
    %c0_i32_8 = arith.constant 0 : i32
    %11 = arith.cmpi ne, %10, %c0_i32_8 : i32
    scf.if %11 {
      %c0_9 = arith.constant 0 : index
      %c0_10 = arith.constant 0 : index
      %12 = vector.load %arg9[%c0_9, %c0_10] : memref<8x128xf32, #tpu.memory_space<vmem>>, vector<8x128xf32>
      %c0_11 = arith.constant 0 : index
      %c0_12 = arith.constant 0 : index
      %13 = vector.load %arg5[%c0_11, %c0_12] : memref<1x128xf32, #tpu.memory_space<vmem>>, vector<1x128xf32>
      %14 = vector.broadcast %13 : vector<1x128xf32> to vector<8x128xf32>
      %15 = arith.addf %12, %14 : vector<8x128xf32>
      %16 = arith.negf %15 : vector<8x128xf32>
      %17 = math.exp %16 : vector<8x128xf32>
      %cst_13 = arith.constant 1.000000e+00 : f32
      %18 = vector.broadcast %cst_13 : f32 to vector<8x128xf32>
      %19 = arith.addf %18, %17 : vector<8x128xf32>
      %20 = arith.divf %18, %19 : vector<8x128xf32>
      %21 = arith.mulf %15, %20 : vector<8x128xf32>
      %22 = arith.truncf %21 : vector<8x128xf32> to vector<8x128xbf16>
      %c0_14 = arith.constant 0 : index
      %c0_15 = arith.constant 0 : index
      %23 = vector.load %arg8[%c0_14, %c0_15] : memref<8x128xbf16, #tpu.memory_space<vmem>>, vector<8x128xbf16>
      tpu.vector_store %arg8[%c0_14, %c0_15], %22 {strides = array<i32>} : memref<8x128xbf16, #tpu.memory_space<vmem>>, vector<8x128xbf16>,
    } else {
    }
    return
  }
  func.func @transform_0(%arg0: i32, %arg1: i32, %arg2: i32) -> (i32, i32) {
    %c0_i32 = arith.constant 0 : i32
    return %arg0, %arg2 : i32, i32
  }
  func.func @transform_1(%arg0: i32, %arg1: i32, %arg2: i32) -> (i32, i32) {
    %c0_i32 = arith.constant 0 : i32
    return %arg2, %arg1 : i32, i32
  }
  func.func @transform_2(%arg0: i32, %arg1: i32, %arg2: i32) -> (i32, i32) {
    %c0_i32 = arith.constant 0 : i32
    %c0_i32_0 = arith.constant 0 : i32
    return %c0_i32, %arg1 : i32, i32
  }
  func.func @transform_3(%arg0: i32, %arg1: i32, %arg2: i32) -> (i32, i32) {
    %c0_i32 = arith.constant 0 : i32
    %c0_i32_0 = arith.constant 0 : i32
    return %arg0, %c0_i32 : i32, i32
  }
  func.func @transform_4(%arg0: i32, %arg1: i32, %arg2: i32) -> (i32, i32) {
    %c0_i32 = arith.constant 0 : i32
    %c0_i32_0 = arith.constant 0 : i32
    return %c0_i32, %arg1 : i32, i32
  }
  func.func @transform_5(%arg0: i32, %arg1: i32, %arg2: i32) -> (i32, i32) {
    %c0_i32 = arith.constant 0 : i32
    return %arg0, %arg1 : i32, i32
  }
}

module attributes {stable_mosaic.version = 11 : i64} {
  func.func @_gemm_res_kernel(%arg0: i32, %arg1: i32, %arg2: i32, %arg3: memref<8x384xbf16, #tpu.memory_space<vmem>>, %arg4: memref<384x128xbf16, #tpu.memory_space<vmem>>, %arg5: memref<1x128xf32, #tpu.memory_space<vmem>>, %arg6: memref<8x128xbf16, #tpu.memory_space<vmem>>, %arg7: memref<8x128xbf16, #tpu.memory_space<vmem>>, %arg8: memref<8x128xf32, #tpu.memory_space<vmem>>) attributes {dimension_semantics = [#tpu.dimension_semantics<parallel>, #tpu.dimension_semantics<parallel>, #tpu.dimension_semantics<arbitrary>], iteration_bounds = array<i64: 1, 1, 3>, scalar_prefetch = 0 : i64, scratch_operands = 1 : i64, tpu.core_type = #tpu.core_type<tc>, window_params = [{transform_indices = @transform_0, window_bounds = array<i64: 8, 384>}, {transform_indices = @transform_1, window_bounds = array<i64: 384, 128>}, {transform_indices = @transform_2, window_bounds = array<i64: 1, 128>}, {transform_indices = @transform_3, window_bounds = array<i64: 8, 128>}, {transform_indices = @transform_4, window_bounds = array<i64: 8, 128>}]} {
    %c0_i32 = arith.constant 0 : i32
    %0 = arith.cmpi eq, %arg2, %c0_i32 : i32
    %1 = arith.extui %0 : i1 to i32
    %c0_i32_0 = arith.constant 0 : i32
    %2 = arith.cmpi ne, %1, %c0_i32_0 : i32
    scf.if %2 {
      %cst_9 = arith.constant 0.000000e+00 : f32
      %12 = vector.broadcast %cst_9 : f32 to vector<8x128xf32>
      %c0_10 = arith.constant 0 : index
      %c0_11 = arith.constant 0 : index
      %13 = vector.load %arg8[%c0_10, %c0_11] : memref<8x128xf32, #tpu.memory_space<vmem>>, vector<8x128xf32>
      tpu.vector_store %arg8[%c0_10, %c0_11], %12 {strides = array<i32>} : memref<8x128xf32, #tpu.memory_space<vmem>>, vector<8x128xf32>,
    } else {
    }
    %c0 = arith.constant 0 : index
    %c0_1 = arith.constant 0 : index
    %3 = vector.load %arg8[%c0, %c0_1] : memref<8x128xf32, #tpu.memory_space<vmem>>, vector<8x128xf32>
    %c0_2 = arith.constant 0 : index
    %c0_3 = arith.constant 0 : index
    %4 = vector.load %arg3[%c0_2, %c0_3] : memref<8x384xbf16, #tpu.memory_space<vmem>>, vector<8x384xbf16>
    %c0_4 = arith.constant 0 : index
    %c0_5 = arith.constant 0 : index
    %5 = vector.load %arg4[%c0_4, %c0_5] : memref<384x128xbf16, #tpu.memory_space<vmem>>, vector<384x128xbf16>
    %cst = arith.constant dense<0.000000e+00> : vector<8x128xf32>
    %6 = tpu.matmul %4, %5, %cst {dimension_numbers = #tpu.dot_dimension_numbers<[1], [0], [0], [1], [0, 0, 1, 1], [], []>} : vector<8x384xbf16>, vector<384x128xbf16>, vector<8x128xf32> -> vector<8x128xf32>
    %7 = arith.addf %3, %6 : vector<8x128xf32>
    %c0_6 = arith.constant 0 : index
    %c0_7 = arith.constant 0 : index
    %8 = vector.load %arg8[%c0_6, %c0_7] : memref<8x128xf32, #tpu.memory_space<vmem>>, vector<8x128xf32>
    tpu.vector_store %arg8[%c0_6, %c0_7], %7 {strides = array<i32>} : memref<8x128xf32, #tpu.memory_space<vmem>>, vector<8x128xf32>,
    %c2_i32 = arith.constant 2 : i32
    %9 = arith.cmpi eq, %arg2, %c2_i32 : i32
    %10 = arith.extui %9 : i1 to i32
    %c0_i32_8 = arith.constant 0 : i32
    %11 = arith.cmpi ne, %10, %c0_i32_8 : i32
    scf.if %11 {
      %c0_9 = arith.constant 0 : index
      %c0_10 = arith.constant 0 : index
      %12 = vector.load %arg8[%c0_9, %c0_10] : memref<8x128xf32, #tpu.memory_space<vmem>>, vector<8x128xf32>
      %c0_11 = arith.constant 0 : index
      %c0_12 = arith.constant 0 : index
      %13 = vector.load %arg5[%c0_11, %c0_12] : memref<1x128xf32, #tpu.memory_space<vmem>>, vector<1x128xf32>
      %14 = vector.broadcast %13 : vector<1x128xf32> to vector<8x128xf32>
      %15 = arith.addf %12, %14 : vector<8x128xf32>
      %c0_13 = arith.constant 0 : index
      %c0_14 = arith.constant 0 : index
      %16 = vector.load %arg6[%c0_13, %c0_14] : memref<8x128xbf16, #tpu.memory_space<vmem>>, vector<8x128xbf16>
      %17 = arith.extf %16 : vector<8x128xbf16> to vector<8x128xf32>
      %18 = arith.addf %15, %17 : vector<8x128xf32>
      %19 = arith.negf %18 : vector<8x128xf32>
      %20 = math.exp %19 : vector<8x128xf32>
      %cst_15 = arith.constant 1.000000e+00 : f32
      %21 = vector.broadcast %cst_15 : f32 to vector<8x128xf32>
      %22 = arith.addf %21, %20 : vector<8x128xf32>
      %23 = arith.divf %21, %22 : vector<8x128xf32>
      %24 = arith.mulf %18, %23 : vector<8x128xf32>
      %25 = arith.truncf %24 : vector<8x128xf32> to vector<8x128xbf16>
      %c0_16 = arith.constant 0 : index
      %c0_17 = arith.constant 0 : index
      %26 = vector.load %arg7[%c0_16, %c0_17] : memref<8x128xbf16, #tpu.memory_space<vmem>>, vector<8x128xbf16>
      tpu.vector_store %arg7[%c0_16, %c0_17], %25 {strides = array<i32>} : memref<8x128xbf16, #tpu.memory_space<vmem>>, vector<8x128xbf16>,
    } else {
    }
    return
  }
  func.func @transform_0(%arg0: i32, %arg1: i32, %arg2: i32) -> (i32, i32) {
    %c0_i32 = arith.constant 0 : i32
    return %arg0, %arg2 : i32, i32
  }
  func.func @transform_1(%arg0: i32, %arg1: i32, %arg2: i32) -> (i32, i32) {
    %c0_i32 = arith.constant 0 : i32
    return %arg2, %arg1 : i32, i32
  }
  func.func @transform_2(%arg0: i32, %arg1: i32, %arg2: i32) -> (i32, i32) {
    %c0_i32 = arith.constant 0 : i32
    %c0_i32_0 = arith.constant 0 : i32
    return %c0_i32, %arg1 : i32, i32
  }
  func.func @transform_3(%arg0: i32, %arg1: i32, %arg2: i32) -> (i32, i32) {
    %c0_i32 = arith.constant 0 : i32
    return %arg0, %arg1 : i32, i32
  }
  func.func @transform_4(%arg0: i32, %arg1: i32, %arg2: i32) -> (i32, i32) {
    %c0_i32 = arith.constant 0 : i32
    return %arg0, %arg1 : i32, i32
  }
}

module attributes {stable_mosaic.version = 11 : i64} {
  func.func @_gemm_kernel(%arg0: i32, %arg1: i32, %arg2: i32, %arg3: memref<8x384xbf16, #tpu.memory_space<vmem>>, %arg4: memref<384x256xbf16, #tpu.memory_space<vmem>>, %arg5: memref<1x256xf32, #tpu.memory_space<vmem>>, %arg6: memref<8x256xbf16, #tpu.memory_space<vmem>>, %arg7: memref<8x256xf32, #tpu.memory_space<vmem>>) attributes {dimension_semantics = [#tpu.dimension_semantics<parallel>, #tpu.dimension_semantics<parallel>, #tpu.dimension_semantics<arbitrary>], iteration_bounds = array<i64: 1, 1, 3>, scalar_prefetch = 0 : i64, scratch_operands = 1 : i64, tpu.core_type = #tpu.core_type<tc>, window_params = [{transform_indices = @transform_0, window_bounds = array<i64: 8, 384>}, {transform_indices = @transform_1, window_bounds = array<i64: 384, 256>}, {transform_indices = @transform_2, window_bounds = array<i64: 1, 256>}, {transform_indices = @transform_3, window_bounds = array<i64: 8, 256>}]} {
    %c0_i32 = arith.constant 0 : i32
    %0 = arith.cmpi eq, %arg2, %c0_i32 : i32
    %1 = arith.extui %0 : i1 to i32
    %c0_i32_0 = arith.constant 0 : i32
    %2 = arith.cmpi ne, %1, %c0_i32_0 : i32
    scf.if %2 {
      %cst_9 = arith.constant 0.000000e+00 : f32
      %12 = vector.broadcast %cst_9 : f32 to vector<8x256xf32>
      %c0_10 = arith.constant 0 : index
      %c0_11 = arith.constant 0 : index
      %13 = vector.load %arg7[%c0_10, %c0_11] : memref<8x256xf32, #tpu.memory_space<vmem>>, vector<8x256xf32>
      tpu.vector_store %arg7[%c0_10, %c0_11], %12 {strides = array<i32>} : memref<8x256xf32, #tpu.memory_space<vmem>>, vector<8x256xf32>,
    } else {
    }
    %c0 = arith.constant 0 : index
    %c0_1 = arith.constant 0 : index
    %3 = vector.load %arg7[%c0, %c0_1] : memref<8x256xf32, #tpu.memory_space<vmem>>, vector<8x256xf32>
    %c0_2 = arith.constant 0 : index
    %c0_3 = arith.constant 0 : index
    %4 = vector.load %arg3[%c0_2, %c0_3] : memref<8x384xbf16, #tpu.memory_space<vmem>>, vector<8x384xbf16>
    %c0_4 = arith.constant 0 : index
    %c0_5 = arith.constant 0 : index
    %5 = vector.load %arg4[%c0_4, %c0_5] : memref<384x256xbf16, #tpu.memory_space<vmem>>, vector<384x256xbf16>
    %cst = arith.constant dense<0.000000e+00> : vector<8x256xf32>
    %6 = tpu.matmul %4, %5, %cst {dimension_numbers = #tpu.dot_dimension_numbers<[1], [0], [0], [1], [0, 0, 1, 1], [], []>} : vector<8x384xbf16>, vector<384x256xbf16>, vector<8x256xf32> -> vector<8x256xf32>
    %7 = arith.addf %3, %6 : vector<8x256xf32>
    %c0_6 = arith.constant 0 : index
    %c0_7 = arith.constant 0 : index
    %8 = vector.load %arg7[%c0_6, %c0_7] : memref<8x256xf32, #tpu.memory_space<vmem>>, vector<8x256xf32>
    tpu.vector_store %arg7[%c0_6, %c0_7], %7 {strides = array<i32>} : memref<8x256xf32, #tpu.memory_space<vmem>>, vector<8x256xf32>,
    %c2_i32 = arith.constant 2 : i32
    %9 = arith.cmpi eq, %arg2, %c2_i32 : i32
    %10 = arith.extui %9 : i1 to i32
    %c0_i32_8 = arith.constant 0 : i32
    %11 = arith.cmpi ne, %10, %c0_i32_8 : i32
    scf.if %11 {
      %c0_9 = arith.constant 0 : index
      %c0_10 = arith.constant 0 : index
      %12 = vector.load %arg7[%c0_9, %c0_10] : memref<8x256xf32, #tpu.memory_space<vmem>>, vector<8x256xf32>
      %c0_11 = arith.constant 0 : index
      %c0_12 = arith.constant 0 : index
      %13 = vector.load %arg5[%c0_11, %c0_12] : memref<1x256xf32, #tpu.memory_space<vmem>>, vector<1x256xf32>
      %14 = vector.broadcast %13 : vector<1x256xf32> to vector<8x256xf32>
      %15 = arith.addf %12, %14 : vector<8x256xf32>
      %16 = arith.negf %15 : vector<8x256xf32>
      %17 = math.exp %16 : vector<8x256xf32>
      %cst_13 = arith.constant 1.000000e+00 : f32
      %18 = vector.broadcast %cst_13 : f32 to vector<8x256xf32>
      %19 = arith.addf %18, %17 : vector<8x256xf32>
      %20 = arith.divf %18, %19 : vector<8x256xf32>
      %21 = arith.mulf %15, %20 : vector<8x256xf32>
      %22 = arith.truncf %21 : vector<8x256xf32> to vector<8x256xbf16>
      %c0_14 = arith.constant 0 : index
      %c0_15 = arith.constant 0 : index
      %23 = vector.load %arg6[%c0_14, %c0_15] : memref<8x256xbf16, #tpu.memory_space<vmem>>, vector<8x256xbf16>
      tpu.vector_store %arg6[%c0_14, %c0_15], %22 {strides = array<i32>} : memref<8x256xbf16, #tpu.memory_space<vmem>>, vector<8x256xbf16>,
    } else {
    }
    return
  }
  func.func @transform_0(%arg0: i32, %arg1: i32, %arg2: i32) -> (i32, i32) {
    %c0_i32 = arith.constant 0 : i32
    return %arg0, %arg2 : i32, i32
  }
  func.func @transform_1(%arg0: i32, %arg1: i32, %arg2: i32) -> (i32, i32) {
    %c0_i32 = arith.constant 0 : i32
    return %arg2, %arg1 : i32, i32
  }
  func.func @transform_2(%arg0: i32, %arg1: i32, %arg2: i32) -> (i32, i32) {
    %c0_i32 = arith.constant 0 : i32
    %c0_i32_0 = arith.constant 0 : i32
    return %c0_i32, %arg1 : i32, i32
  }
  func.func @transform_3(%arg0: i32, %arg1: i32, %arg2: i32) -> (i32, i32) {
    %c0_i32 = arith.constant 0 : i32
    return %arg0, %arg1 : i32, i32
  }
}

module attributes {stable_mosaic.version = 11 : i64} {
  func.func @_gemm_res_kernel(%arg0: i32, %arg1: i32, %arg2: i32, %arg3: memref<8x384xbf16, #tpu.memory_space<vmem>>, %arg4: memref<384x256xbf16, #tpu.memory_space<vmem>>, %arg5: memref<1x256xf32, #tpu.memory_space<vmem>>, %arg6: memref<8x256xbf16, #tpu.memory_space<vmem>>, %arg7: memref<8x256xbf16, #tpu.memory_space<vmem>>, %arg8: memref<8x256xf32, #tpu.memory_space<vmem>>) attributes {dimension_semantics = [#tpu.dimension_semantics<parallel>, #tpu.dimension_semantics<parallel>, #tpu.dimension_semantics<arbitrary>], iteration_bounds = array<i64: 1, 1, 6>, scalar_prefetch = 0 : i64, scratch_operands = 1 : i64, tpu.core_type = #tpu.core_type<tc>, window_params = [{transform_indices = @transform_0, window_bounds = array<i64: 8, 384>}, {transform_indices = @transform_1, window_bounds = array<i64: 384, 256>}, {transform_indices = @transform_2, window_bounds = array<i64: 1, 256>}, {transform_indices = @transform_3, window_bounds = array<i64: 8, 256>}, {transform_indices = @transform_4, window_bounds = array<i64: 8, 256>}]} {
    %c0_i32 = arith.constant 0 : i32
    %0 = arith.cmpi eq, %arg2, %c0_i32 : i32
    %1 = arith.extui %0 : i1 to i32
    %c0_i32_0 = arith.constant 0 : i32
    %2 = arith.cmpi ne, %1, %c0_i32_0 : i32
    scf.if %2 {
      %cst_9 = arith.constant 0.000000e+00 : f32
      %12 = vector.broadcast %cst_9 : f32 to vector<8x256xf32>
      %c0_10 = arith.constant 0 : index
      %c0_11 = arith.constant 0 : index
      %13 = vector.load %arg8[%c0_10, %c0_11] : memref<8x256xf32, #tpu.memory_space<vmem>>, vector<8x256xf32>
      tpu.vector_store %arg8[%c0_10, %c0_11], %12 {strides = array<i32>} : memref<8x256xf32, #tpu.memory_space<vmem>>, vector<8x256xf32>,
    } else {
    }
    %c0 = arith.constant 0 : index
    %c0_1 = arith.constant 0 : index
    %3 = vector.load %arg8[%c0, %c0_1] : memref<8x256xf32, #tpu.memory_space<vmem>>, vector<8x256xf32>
    %c0_2 = arith.constant 0 : index
    %c0_3 = arith.constant 0 : index
    %4 = vector.load %arg3[%c0_2, %c0_3] : memref<8x384xbf16, #tpu.memory_space<vmem>>, vector<8x384xbf16>
    %c0_4 = arith.constant 0 : index
    %c0_5 = arith.constant 0 : index
    %5 = vector.load %arg4[%c0_4, %c0_5] : memref<384x256xbf16, #tpu.memory_space<vmem>>, vector<384x256xbf16>
    %cst = arith.constant dense<0.000000e+00> : vector<8x256xf32>
    %6 = tpu.matmul %4, %5, %cst {dimension_numbers = #tpu.dot_dimension_numbers<[1], [0], [0], [1], [0, 0, 1, 1], [], []>} : vector<8x384xbf16>, vector<384x256xbf16>, vector<8x256xf32> -> vector<8x256xf32>
    %7 = arith.addf %3, %6 : vector<8x256xf32>
    %c0_6 = arith.constant 0 : index
    %c0_7 = arith.constant 0 : index
    %8 = vector.load %arg8[%c0_6, %c0_7] : memref<8x256xf32, #tpu.memory_space<vmem>>, vector<8x256xf32>
    tpu.vector_store %arg8[%c0_6, %c0_7], %7 {strides = array<i32>} : memref<8x256xf32, #tpu.memory_space<vmem>>, vector<8x256xf32>,
    %c5_i32 = arith.constant 5 : i32
    %9 = arith.cmpi eq, %arg2, %c5_i32 : i32
    %10 = arith.extui %9 : i1 to i32
    %c0_i32_8 = arith.constant 0 : i32
    %11 = arith.cmpi ne, %10, %c0_i32_8 : i32
    scf.if %11 {
      %c0_9 = arith.constant 0 : index
      %c0_10 = arith.constant 0 : index
      %12 = vector.load %arg8[%c0_9, %c0_10] : memref<8x256xf32, #tpu.memory_space<vmem>>, vector<8x256xf32>
      %c0_11 = arith.constant 0 : index
      %c0_12 = arith.constant 0 : index
      %13 = vector.load %arg5[%c0_11, %c0_12] : memref<1x256xf32, #tpu.memory_space<vmem>>, vector<1x256xf32>
      %14 = vector.broadcast %13 : vector<1x256xf32> to vector<8x256xf32>
      %15 = arith.addf %12, %14 : vector<8x256xf32>
      %c0_13 = arith.constant 0 : index
      %c0_14 = arith.constant 0 : index
      %16 = vector.load %arg6[%c0_13, %c0_14] : memref<8x256xbf16, #tpu.memory_space<vmem>>, vector<8x256xbf16>
      %17 = arith.extf %16 : vector<8x256xbf16> to vector<8x256xf32>
      %18 = arith.addf %15, %17 : vector<8x256xf32>
      %19 = arith.negf %18 : vector<8x256xf32>
      %20 = math.exp %19 : vector<8x256xf32>
      %cst_15 = arith.constant 1.000000e+00 : f32
      %21 = vector.broadcast %cst_15 : f32 to vector<8x256xf32>
      %22 = arith.addf %21, %20 : vector<8x256xf32>
      %23 = arith.divf %21, %22 : vector<8x256xf32>
      %24 = arith.mulf %18, %23 : vector<8x256xf32>
      %25 = arith.truncf %24 : vector<8x256xf32> to vector<8x256xbf16>
      %c0_16 = arith.constant 0 : index
      %c0_17 = arith.constant 0 : index
      %26 = vector.load %arg7[%c0_16, %c0_17] : memref<8x256xbf16, #tpu.memory_space<vmem>>, vector<8x256xbf16>
      tpu.vector_store %arg7[%c0_16, %c0_17], %25 {strides = array<i32>} : memref<8x256xbf16, #tpu.memory_space<vmem>>, vector<8x256xbf16>,
    } else {
    }
    return
  }
  func.func @transform_0(%arg0: i32, %arg1: i32, %arg2: i32) -> (i32, i32) {
    %c0_i32 = arith.constant 0 : i32
    return %arg0, %arg2 : i32, i32
  }
  func.func @transform_1(%arg0: i32, %arg1: i32, %arg2: i32) -> (i32, i32) {
    %c0_i32 = arith.constant 0 : i32
    return %arg2, %arg1 : i32, i32
  }
  func.func @transform_2(%arg0: i32, %arg1: i32, %arg2: i32) -> (i32, i32) {
    %c0_i32 = arith.constant 0 : i32
    %c0_i32_0 = arith.constant 0 : i32
    return %c0_i32, %arg1 : i32, i32
  }
  func.func @transform_3(%arg0: i32, %arg1: i32, %arg2: i32) -> (i32, i32) {
    %c0_i32 = arith.constant 0 : i32
    return %arg0, %arg1 : i32, i32
  }
  func.func @transform_4(%arg0: i32, %arg1: i32, %arg2: i32) -> (i32, i32) {
    %c0_i32 = arith.constant 0 : i32
    return %arg0, %arg1 : i32, i32
  }
}

module attributes {stable_mosaic.version = 11 : i64} {
  func.func @_gemm_kernel(%arg0: i32, %arg1: i32, %arg2: i32, %arg3: memref<8x384xbf16, #tpu.memory_space<vmem>>, %arg4: memref<384x256xbf16, #tpu.memory_space<vmem>>, %arg5: memref<1x256xf32, #tpu.memory_space<vmem>>, %arg6: memref<8x256xbf16, #tpu.memory_space<vmem>>, %arg7: memref<8x256xf32, #tpu.memory_space<vmem>>) attributes {dimension_semantics = [#tpu.dimension_semantics<parallel>, #tpu.dimension_semantics<parallel>, #tpu.dimension_semantics<arbitrary>], iteration_bounds = array<i64: 1, 1, 6>, scalar_prefetch = 0 : i64, scratch_operands = 1 : i64, tpu.core_type = #tpu.core_type<tc>, window_params = [{transform_indices = @transform_0, window_bounds = array<i64: 8, 384>}, {transform_indices = @transform_1, window_bounds = array<i64: 384, 256>}, {transform_indices = @transform_2, window_bounds = array<i64: 1, 256>}, {transform_indices = @transform_3, window_bounds = array<i64: 8, 256>}]} {
    %c0_i32 = arith.constant 0 : i32
    %0 = arith.cmpi eq, %arg2, %c0_i32 : i32
    %1 = arith.extui %0 : i1 to i32
    %c0_i32_0 = arith.constant 0 : i32
    %2 = arith.cmpi ne, %1, %c0_i32_0 : i32
    scf.if %2 {
      %cst_9 = arith.constant 0.000000e+00 : f32
      %12 = vector.broadcast %cst_9 : f32 to vector<8x256xf32>
      %c0_10 = arith.constant 0 : index
      %c0_11 = arith.constant 0 : index
      %13 = vector.load %arg7[%c0_10, %c0_11] : memref<8x256xf32, #tpu.memory_space<vmem>>, vector<8x256xf32>
      tpu.vector_store %arg7[%c0_10, %c0_11], %12 {strides = array<i32>} : memref<8x256xf32, #tpu.memory_space<vmem>>, vector<8x256xf32>,
    } else {
    }
    %c0 = arith.constant 0 : index
    %c0_1 = arith.constant 0 : index
    %3 = vector.load %arg7[%c0, %c0_1] : memref<8x256xf32, #tpu.memory_space<vmem>>, vector<8x256xf32>
    %c0_2 = arith.constant 0 : index
    %c0_3 = arith.constant 0 : index
    %4 = vector.load %arg3[%c0_2, %c0_3] : memref<8x384xbf16, #tpu.memory_space<vmem>>, vector<8x384xbf16>
    %c0_4 = arith.constant 0 : index
    %c0_5 = arith.constant 0 : index
    %5 = vector.load %arg4[%c0_4, %c0_5] : memref<384x256xbf16, #tpu.memory_space<vmem>>, vector<384x256xbf16>
    %cst = arith.constant dense<0.000000e+00> : vector<8x256xf32>
    %6 = tpu.matmul %4, %5, %cst {dimension_numbers = #tpu.dot_dimension_numbers<[1], [0], [0], [1], [0, 0, 1, 1], [], []>} : vector<8x384xbf16>, vector<384x256xbf16>, vector<8x256xf32> -> vector<8x256xf32>
    %7 = arith.addf %3, %6 : vector<8x256xf32>
    %c0_6 = arith.constant 0 : index
    %c0_7 = arith.constant 0 : index
    %8 = vector.load %arg7[%c0_6, %c0_7] : memref<8x256xf32, #tpu.memory_space<vmem>>, vector<8x256xf32>
    tpu.vector_store %arg7[%c0_6, %c0_7], %7 {strides = array<i32>} : memref<8x256xf32, #tpu.memory_space<vmem>>, vector<8x256xf32>,
    %c5_i32 = arith.constant 5 : i32
    %9 = arith.cmpi eq, %arg2, %c5_i32 : i32
    %10 = arith.extui %9 : i1 to i32
    %c0_i32_8 = arith.constant 0 : i32
    %11 = arith.cmpi ne, %10, %c0_i32_8 : i32
    scf.if %11 {
      %c0_9 = arith.constant 0 : index
      %c0_10 = arith.constant 0 : index
      %12 = vector.load %arg7[%c0_9, %c0_10] : memref<8x256xf32, #tpu.memory_space<vmem>>, vector<8x256xf32>
      %c0_11 = arith.constant 0 : index
      %c0_12 = arith.constant 0 : index
      %13 = vector.load %arg5[%c0_11, %c0_12] : memref<1x256xf32, #tpu.memory_space<vmem>>, vector<1x256xf32>
      %14 = vector.broadcast %13 : vector<1x256xf32> to vector<8x256xf32>
      %15 = arith.addf %12, %14 : vector<8x256xf32>
      %16 = arith.negf %15 : vector<8x256xf32>
      %17 = math.exp %16 : vector<8x256xf32>
      %cst_13 = arith.constant 1.000000e+00 : f32
      %18 = vector.broadcast %cst_13 : f32 to vector<8x256xf32>
      %19 = arith.addf %18, %17 : vector<8x256xf32>
      %20 = arith.divf %18, %19 : vector<8x256xf32>
      %21 = arith.mulf %15, %20 : vector<8x256xf32>
      %22 = arith.truncf %21 : vector<8x256xf32> to vector<8x256xbf16>
      %c0_14 = arith.constant 0 : index
      %c0_15 = arith.constant 0 : index
      %23 = vector.load %arg6[%c0_14, %c0_15] : memref<8x256xbf16, #tpu.memory_space<vmem>>, vector<8x256xbf16>
      tpu.vector_store %arg6[%c0_14, %c0_15], %22 {strides = array<i32>} : memref<8x256xbf16, #tpu.memory_space<vmem>>, vector<8x256xbf16>,
    } else {
    }
    return
  }
  func.func @transform_0(%arg0: i32, %arg1: i32, %arg2: i32) -> (i32, i32) {
    %c0_i32 = arith.constant 0 : i32
    return %arg0, %arg2 : i32, i32
  }
  func.func @transform_1(%arg0: i32, %arg1: i32, %arg2: i32) -> (i32, i32) {
    %c0_i32 = arith.constant 0 : i32
    return %arg2, %arg1 : i32, i32
  }
  func.func @transform_2(%arg0: i32, %arg1: i32, %arg2: i32) -> (i32, i32) {
    %c0_i32 = arith.constant 0 : i32
    %c0_i32_0 = arith.constant 0 : i32
    return %c0_i32, %arg1 : i32, i32
  }
  func.func @transform_3(%arg0: i32, %arg1: i32, %arg2: i32) -> (i32, i32) {
    %c0_i32 = arith.constant 0 : i32
    return %arg0, %arg1 : i32, i32
  }
}

module attributes {stable_mosaic.version = 11 : i64} {
  func.func @_gemm_sc_kernel(%arg0: i32, %arg1: i32, %arg2: i32, %arg3: memref<8x384xbf16, #tpu.memory_space<vmem>>, %arg4: memref<384x256xbf16, #tpu.memory_space<vmem>>, %arg5: memref<1x256xf32, #tpu.memory_space<vmem>>, %arg6: memref<8x128xbf16, #tpu.memory_space<vmem>>, %arg7: memref<128x256xbf16, #tpu.memory_space<vmem>>, %arg8: memref<8x256xbf16, #tpu.memory_space<vmem>>, %arg9: memref<8x256xf32, #tpu.memory_space<vmem>>) attributes {dimension_semantics = [#tpu.dimension_semantics<parallel>, #tpu.dimension_semantics<parallel>, #tpu.dimension_semantics<arbitrary>], iteration_bounds = array<i64: 1, 1, 6>, scalar_prefetch = 0 : i64, scratch_operands = 1 : i64, tpu.core_type = #tpu.core_type<tc>, window_params = [{transform_indices = @transform_0, window_bounds = array<i64: 8, 384>}, {transform_indices = @transform_1, window_bounds = array<i64: 384, 256>}, {transform_indices = @transform_2, window_bounds = array<i64: 1, 256>}, {transform_indices = @transform_3, window_bounds = array<i64: 8, 128>}, {transform_indices = @transform_4, window_bounds = array<i64: 128, 256>}, {transform_indices = @transform_5, window_bounds = array<i64: 8, 256>}]} {
    %c0_i32 = arith.constant 0 : i32
    %0 = arith.cmpi eq, %arg2, %c0_i32 : i32
    %1 = arith.extui %0 : i1 to i32
    %c0_i32_0 = arith.constant 0 : i32
    %2 = arith.cmpi ne, %1, %c0_i32_0 : i32
    scf.if %2 {
      %c0_9 = arith.constant 0 : index
      %c0_10 = arith.constant 0 : index
      %12 = vector.load %arg6[%c0_9, %c0_10] : memref<8x128xbf16, #tpu.memory_space<vmem>>, vector<8x128xbf16>
      %c0_11 = arith.constant 0 : index
      %c0_12 = arith.constant 0 : index
      %13 = vector.load %arg7[%c0_11, %c0_12] : memref<128x256xbf16, #tpu.memory_space<vmem>>, vector<128x256xbf16>
      %cst_13 = arith.constant dense<0.000000e+00> : vector<8x256xf32>
      %14 = tpu.matmul %12, %13, %cst_13 {dimension_numbers = #tpu.dot_dimension_numbers<[1], [0], [0], [1], [0, 0, 1, 1], [], []>} : vector<8x128xbf16>, vector<128x256xbf16>, vector<8x256xf32> -> vector<8x256xf32>
      %c0_14 = arith.constant 0 : index
      %c0_15 = arith.constant 0 : index
      %15 = vector.load %arg9[%c0_14, %c0_15] : memref<8x256xf32, #tpu.memory_space<vmem>>, vector<8x256xf32>
      tpu.vector_store %arg9[%c0_14, %c0_15], %14 {strides = array<i32>} : memref<8x256xf32, #tpu.memory_space<vmem>>, vector<8x256xf32>,
    } else {
    }
    %c0 = arith.constant 0 : index
    %c0_1 = arith.constant 0 : index
    %3 = vector.load %arg9[%c0, %c0_1] : memref<8x256xf32, #tpu.memory_space<vmem>>, vector<8x256xf32>
    %c0_2 = arith.constant 0 : index
    %c0_3 = arith.constant 0 : index
    %4 = vector.load %arg3[%c0_2, %c0_3] : memref<8x384xbf16, #tpu.memory_space<vmem>>, vector<8x384xbf16>
    %c0_4 = arith.constant 0 : index
    %c0_5 = arith.constant 0 : index
    %5 = vector.load %arg4[%c0_4, %c0_5] : memref<384x256xbf16, #tpu.memory_space<vmem>>, vector<384x256xbf16>
    %cst = arith.constant dense<0.000000e+00> : vector<8x256xf32>
    %6 = tpu.matmul %4, %5, %cst {dimension_numbers = #tpu.dot_dimension_numbers<[1], [0], [0], [1], [0, 0, 1, 1], [], []>} : vector<8x384xbf16>, vector<384x256xbf16>, vector<8x256xf32> -> vector<8x256xf32>
    %7 = arith.addf %3, %6 : vector<8x256xf32>
    %c0_6 = arith.constant 0 : index
    %c0_7 = arith.constant 0 : index
    %8 = vector.load %arg9[%c0_6, %c0_7] : memref<8x256xf32, #tpu.memory_space<vmem>>, vector<8x256xf32>
    tpu.vector_store %arg9[%c0_6, %c0_7], %7 {strides = array<i32>} : memref<8x256xf32, #tpu.memory_space<vmem>>, vector<8x256xf32>,
    %c5_i32 = arith.constant 5 : i32
    %9 = arith.cmpi eq, %arg2, %c5_i32 : i32
    %10 = arith.extui %9 : i1 to i32
    %c0_i32_8 = arith.constant 0 : i32
    %11 = arith.cmpi ne, %10, %c0_i32_8 : i32
    scf.if %11 {
      %c0_9 = arith.constant 0 : index
      %c0_10 = arith.constant 0 : index
      %12 = vector.load %arg9[%c0_9, %c0_10] : memref<8x256xf32, #tpu.memory_space<vmem>>, vector<8x256xf32>
      %c0_11 = arith.constant 0 : index
      %c0_12 = arith.constant 0 : index
      %13 = vector.load %arg5[%c0_11, %c0_12] : memref<1x256xf32, #tpu.memory_space<vmem>>, vector<1x256xf32>
      %14 = vector.broadcast %13 : vector<1x256xf32> to vector<8x256xf32>
      %15 = arith.addf %12, %14 : vector<8x256xf32>
      %16 = arith.negf %15 : vector<8x256xf32>
      %17 = math.exp %16 : vector<8x256xf32>
      %cst_13 = arith.constant 1.000000e+00 : f32
      %18 = vector.broadcast %cst_13 : f32 to vector<8x256xf32>
      %19 = arith.addf %18, %17 : vector<8x256xf32>
      %20 = arith.divf %18, %19 : vector<8x256xf32>
      %21 = arith.mulf %15, %20 : vector<8x256xf32>
      %22 = arith.truncf %21 : vector<8x256xf32> to vector<8x256xbf16>
      %c0_14 = arith.constant 0 : index
      %c0_15 = arith.constant 0 : index
      %23 = vector.load %arg8[%c0_14, %c0_15] : memref<8x256xbf16, #tpu.memory_space<vmem>>, vector<8x256xbf16>
      tpu.vector_store %arg8[%c0_14, %c0_15], %22 {strides = array<i32>} : memref<8x256xbf16, #tpu.memory_space<vmem>>, vector<8x256xbf16>,
    } else {
    }
    return
  }
  func.func @transform_0(%arg0: i32, %arg1: i32, %arg2: i32) -> (i32, i32) {
    %c0_i32 = arith.constant 0 : i32
    return %arg0, %arg2 : i32, i32
  }
  func.func @transform_1(%arg0: i32, %arg1: i32, %arg2: i32) -> (i32, i32) {
    %c0_i32 = arith.constant 0 : i32
    return %arg2, %arg1 : i32, i32
  }
  func.func @transform_2(%arg0: i32, %arg1: i32, %arg2: i32) -> (i32, i32) {
    %c0_i32 = arith.constant 0 : i32
    %c0_i32_0 = arith.constant 0 : i32
    return %c0_i32, %arg1 : i32, i32
  }
  func.func @transform_3(%arg0: i32, %arg1: i32, %arg2: i32) -> (i32, i32) {
    %c0_i32 = arith.constant 0 : i32
    %c0_i32_0 = arith.constant 0 : i32
    return %arg0, %c0_i32 : i32, i32
  }
  func.func @transform_4(%arg0: i32, %arg1: i32, %arg2: i32) -> (i32, i32) {
    %c0_i32 = arith.constant 0 : i32
    %c0_i32_0 = arith.constant 0 : i32
    return %c0_i32, %arg1 : i32, i32
  }
  func.func @transform_5(%arg0: i32, %arg1: i32, %arg2: i32) -> (i32, i32) {
    %c0_i32 = arith.constant 0 : i32
    return %arg0, %arg1 : i32, i32
  }
}

module attributes {stable_mosaic.version = 11 : i64} {
  func.func @_gemm_kernel(%arg0: i32, %arg1: i32, %arg2: i32, %arg3: memref<8x384xbf16, #tpu.memory_space<vmem>>, %arg4: memref<384x256xbf16, #tpu.memory_space<vmem>>, %arg5: memref<1x256xf32, #tpu.memory_space<vmem>>, %arg6: memref<8x256xbf16, #tpu.memory_space<vmem>>, %arg7: memref<8x256xf32, #tpu.memory_space<vmem>>) attributes {dimension_semantics = [#tpu.dimension_semantics<parallel>, #tpu.dimension_semantics<parallel>, #tpu.dimension_semantics<arbitrary>], iteration_bounds = array<i64: 1, 2, 6>, scalar_prefetch = 0 : i64, scratch_operands = 1 : i64, tpu.core_type = #tpu.core_type<tc>, window_params = [{transform_indices = @transform_0, window_bounds = array<i64: 8, 384>}, {transform_indices = @transform_1, window_bounds = array<i64: 384, 256>}, {transform_indices = @transform_2, window_bounds = array<i64: 1, 256>}, {transform_indices = @transform_3, window_bounds = array<i64: 8, 256>}]} {
    %c0_i32 = arith.constant 0 : i32
    %0 = arith.cmpi eq, %arg2, %c0_i32 : i32
    %1 = arith.extui %0 : i1 to i32
    %c0_i32_0 = arith.constant 0 : i32
    %2 = arith.cmpi ne, %1, %c0_i32_0 : i32
    scf.if %2 {
      %cst_9 = arith.constant 0.000000e+00 : f32
      %12 = vector.broadcast %cst_9 : f32 to vector<8x256xf32>
      %c0_10 = arith.constant 0 : index
      %c0_11 = arith.constant 0 : index
      %13 = vector.load %arg7[%c0_10, %c0_11] : memref<8x256xf32, #tpu.memory_space<vmem>>, vector<8x256xf32>
      tpu.vector_store %arg7[%c0_10, %c0_11], %12 {strides = array<i32>} : memref<8x256xf32, #tpu.memory_space<vmem>>, vector<8x256xf32>,
    } else {
    }
    %c0 = arith.constant 0 : index
    %c0_1 = arith.constant 0 : index
    %3 = vector.load %arg7[%c0, %c0_1] : memref<8x256xf32, #tpu.memory_space<vmem>>, vector<8x256xf32>
    %c0_2 = arith.constant 0 : index
    %c0_3 = arith.constant 0 : index
    %4 = vector.load %arg3[%c0_2, %c0_3] : memref<8x384xbf16, #tpu.memory_space<vmem>>, vector<8x384xbf16>
    %c0_4 = arith.constant 0 : index
    %c0_5 = arith.constant 0 : index
    %5 = vector.load %arg4[%c0_4, %c0_5] : memref<384x256xbf16, #tpu.memory_space<vmem>>, vector<384x256xbf16>
    %cst = arith.constant dense<0.000000e+00> : vector<8x256xf32>
    %6 = tpu.matmul %4, %5, %cst {dimension_numbers = #tpu.dot_dimension_numbers<[1], [0], [0], [1], [0, 0, 1, 1], [], []>} : vector<8x384xbf16>, vector<384x256xbf16>, vector<8x256xf32> -> vector<8x256xf32>
    %7 = arith.addf %3, %6 : vector<8x256xf32>
    %c0_6 = arith.constant 0 : index
    %c0_7 = arith.constant 0 : index
    %8 = vector.load %arg7[%c0_6, %c0_7] : memref<8x256xf32, #tpu.memory_space<vmem>>, vector<8x256xf32>
    tpu.vector_store %arg7[%c0_6, %c0_7], %7 {strides = array<i32>} : memref<8x256xf32, #tpu.memory_space<vmem>>, vector<8x256xf32>,
    %c5_i32 = arith.constant 5 : i32
    %9 = arith.cmpi eq, %arg2, %c5_i32 : i32
    %10 = arith.extui %9 : i1 to i32
    %c0_i32_8 = arith.constant 0 : i32
    %11 = arith.cmpi ne, %10, %c0_i32_8 : i32
    scf.if %11 {
      %c0_9 = arith.constant 0 : index
      %c0_10 = arith.constant 0 : index
      %12 = vector.load %arg7[%c0_9, %c0_10] : memref<8x256xf32, #tpu.memory_space<vmem>>, vector<8x256xf32>
      %c0_11 = arith.constant 0 : index
      %c0_12 = arith.constant 0 : index
      %13 = vector.load %arg5[%c0_11, %c0_12] : memref<1x256xf32, #tpu.memory_space<vmem>>, vector<1x256xf32>
      %14 = vector.broadcast %13 : vector<1x256xf32> to vector<8x256xf32>
      %15 = arith.addf %12, %14 : vector<8x256xf32>
      %16 = arith.negf %15 : vector<8x256xf32>
      %17 = math.exp %16 : vector<8x256xf32>
      %cst_13 = arith.constant 1.000000e+00 : f32
      %18 = vector.broadcast %cst_13 : f32 to vector<8x256xf32>
      %19 = arith.addf %18, %17 : vector<8x256xf32>
      %20 = arith.divf %18, %19 : vector<8x256xf32>
      %21 = arith.mulf %15, %20 : vector<8x256xf32>
      %22 = arith.truncf %21 : vector<8x256xf32> to vector<8x256xbf16>
      %c0_14 = arith.constant 0 : index
      %c0_15 = arith.constant 0 : index
      %23 = vector.load %arg6[%c0_14, %c0_15] : memref<8x256xbf16, #tpu.memory_space<vmem>>, vector<8x256xbf16>
      tpu.vector_store %arg6[%c0_14, %c0_15], %22 {strides = array<i32>} : memref<8x256xbf16, #tpu.memory_space<vmem>>, vector<8x256xbf16>,
    } else {
    }
    return
  }
  func.func @transform_0(%arg0: i32, %arg1: i32, %arg2: i32) -> (i32, i32) {
    %c0_i32 = arith.constant 0 : i32
    return %arg0, %arg2 : i32, i32
  }
  func.func @transform_1(%arg0: i32, %arg1: i32, %arg2: i32) -> (i32, i32) {
    %c0_i32 = arith.constant 0 : i32
    return %arg2, %arg1 : i32, i32
  }
  func.func @transform_2(%arg0: i32, %arg1: i32, %arg2: i32) -> (i32, i32) {
    %c0_i32 = arith.constant 0 : i32
    %c0_i32_0 = arith.constant 0 : i32
    return %c0_i32, %arg1 : i32, i32
  }
  func.func @transform_3(%arg0: i32, %arg1: i32, %arg2: i32) -> (i32, i32) {
    %c0_i32 = arith.constant 0 : i32
    return %arg0, %arg1 : i32, i32
  }
}

module attributes {stable_mosaic.version = 11 : i64} {
  func.func @_gemm_sc_kernel(%arg0: i32, %arg1: i32, %arg2: i32, %arg3: memref<8x512xbf16, #tpu.memory_space<vmem>>, %arg4: memref<512x256xbf16, #tpu.memory_space<vmem>>, %arg5: memref<1x256xf32, #tpu.memory_space<vmem>>, %arg6: memref<8x256xbf16, #tpu.memory_space<vmem>>, %arg7: memref<256x256xbf16, #tpu.memory_space<vmem>>, %arg8: memref<8x256xbf16, #tpu.memory_space<vmem>>, %arg9: memref<8x256xf32, #tpu.memory_space<vmem>>) attributes {dimension_semantics = [#tpu.dimension_semantics<parallel>, #tpu.dimension_semantics<parallel>, #tpu.dimension_semantics<arbitrary>], iteration_bounds = array<i64: 1, 2, 9>, scalar_prefetch = 0 : i64, scratch_operands = 1 : i64, tpu.core_type = #tpu.core_type<tc>, window_params = [{transform_indices = @transform_0, window_bounds = array<i64: 8, 512>}, {transform_indices = @transform_1, window_bounds = array<i64: 512, 256>}, {transform_indices = @transform_2, window_bounds = array<i64: 1, 256>}, {transform_indices = @transform_3, window_bounds = array<i64: 8, 256>}, {transform_indices = @transform_4, window_bounds = array<i64: 256, 256>}, {transform_indices = @transform_5, window_bounds = array<i64: 8, 256>}]} {
    %c0_i32 = arith.constant 0 : i32
    %0 = arith.cmpi eq, %arg2, %c0_i32 : i32
    %1 = arith.extui %0 : i1 to i32
    %c0_i32_0 = arith.constant 0 : i32
    %2 = arith.cmpi ne, %1, %c0_i32_0 : i32
    scf.if %2 {
      %c0_9 = arith.constant 0 : index
      %c0_10 = arith.constant 0 : index
      %12 = vector.load %arg6[%c0_9, %c0_10] : memref<8x256xbf16, #tpu.memory_space<vmem>>, vector<8x256xbf16>
      %c0_11 = arith.constant 0 : index
      %c0_12 = arith.constant 0 : index
      %13 = vector.load %arg7[%c0_11, %c0_12] : memref<256x256xbf16, #tpu.memory_space<vmem>>, vector<256x256xbf16>
      %cst_13 = arith.constant dense<0.000000e+00> : vector<8x256xf32>
      %14 = tpu.matmul %12, %13, %cst_13 {dimension_numbers = #tpu.dot_dimension_numbers<[1], [0], [0], [1], [0, 0, 1, 1], [], []>} : vector<8x256xbf16>, vector<256x256xbf16>, vector<8x256xf32> -> vector<8x256xf32>
      %c0_14 = arith.constant 0 : index
      %c0_15 = arith.constant 0 : index
      %15 = vector.load %arg9[%c0_14, %c0_15] : memref<8x256xf32, #tpu.memory_space<vmem>>, vector<8x256xf32>
      tpu.vector_store %arg9[%c0_14, %c0_15], %14 {strides = array<i32>} : memref<8x256xf32, #tpu.memory_space<vmem>>, vector<8x256xf32>,
    } else {
    }
    %c0 = arith.constant 0 : index
    %c0_1 = arith.constant 0 : index
    %3 = vector.load %arg9[%c0, %c0_1] : memref<8x256xf32, #tpu.memory_space<vmem>>, vector<8x256xf32>
    %c0_2 = arith.constant 0 : index
    %c0_3 = arith.constant 0 : index
    %4 = vector.load %arg3[%c0_2, %c0_3] : memref<8x512xbf16, #tpu.memory_space<vmem>>, vector<8x512xbf16>
    %c0_4 = arith.constant 0 : index
    %c0_5 = arith.constant 0 : index
    %5 = vector.load %arg4[%c0_4, %c0_5] : memref<512x256xbf16, #tpu.memory_space<vmem>>, vector<512x256xbf16>
    %cst = arith.constant dense<0.000000e+00> : vector<8x256xf32>
    %6 = tpu.matmul %4, %5, %cst {dimension_numbers = #tpu.dot_dimension_numbers<[1], [0], [0], [1], [0, 0, 1, 1], [], []>} : vector<8x512xbf16>, vector<512x256xbf16>, vector<8x256xf32> -> vector<8x256xf32>
    %7 = arith.addf %3, %6 : vector<8x256xf32>
    %c0_6 = arith.constant 0 : index
    %c0_7 = arith.constant 0 : index
    %8 = vector.load %arg9[%c0_6, %c0_7] : memref<8x256xf32, #tpu.memory_space<vmem>>, vector<8x256xf32>
    tpu.vector_store %arg9[%c0_6, %c0_7], %7 {strides = array<i32>} : memref<8x256xf32, #tpu.memory_space<vmem>>, vector<8x256xf32>,
    %c8_i32 = arith.constant 8 : i32
    %9 = arith.cmpi eq, %arg2, %c8_i32 : i32
    %10 = arith.extui %9 : i1 to i32
    %c0_i32_8 = arith.constant 0 : i32
    %11 = arith.cmpi ne, %10, %c0_i32_8 : i32
    scf.if %11 {
      %c0_9 = arith.constant 0 : index
      %c0_10 = arith.constant 0 : index
      %12 = vector.load %arg9[%c0_9, %c0_10] : memref<8x256xf32, #tpu.memory_space<vmem>>, vector<8x256xf32>
      %c0_11 = arith.constant 0 : index
      %c0_12 = arith.constant 0 : index
      %13 = vector.load %arg5[%c0_11, %c0_12] : memref<1x256xf32, #tpu.memory_space<vmem>>, vector<1x256xf32>
      %14 = vector.broadcast %13 : vector<1x256xf32> to vector<8x256xf32>
      %15 = arith.addf %12, %14 : vector<8x256xf32>
      %16 = arith.negf %15 : vector<8x256xf32>
      %17 = math.exp %16 : vector<8x256xf32>
      %cst_13 = arith.constant 1.000000e+00 : f32
      %18 = vector.broadcast %cst_13 : f32 to vector<8x256xf32>
      %19 = arith.addf %18, %17 : vector<8x256xf32>
      %20 = arith.divf %18, %19 : vector<8x256xf32>
      %21 = arith.mulf %15, %20 : vector<8x256xf32>
      %22 = arith.truncf %21 : vector<8x256xf32> to vector<8x256xbf16>
      %c0_14 = arith.constant 0 : index
      %c0_15 = arith.constant 0 : index
      %23 = vector.load %arg8[%c0_14, %c0_15] : memref<8x256xbf16, #tpu.memory_space<vmem>>, vector<8x256xbf16>
      tpu.vector_store %arg8[%c0_14, %c0_15], %22 {strides = array<i32>} : memref<8x256xbf16, #tpu.memory_space<vmem>>, vector<8x256xbf16>,
    } else {
    }
    return
  }
  func.func @transform_0(%arg0: i32, %arg1: i32, %arg2: i32) -> (i32, i32) {
    %c0_i32 = arith.constant 0 : i32
    return %arg0, %arg2 : i32, i32
  }
  func.func @transform_1(%arg0: i32, %arg1: i32, %arg2: i32) -> (i32, i32) {
    %c0_i32 = arith.constant 0 : i32
    return %arg2, %arg1 : i32, i32
  }
  func.func @transform_2(%arg0: i32, %arg1: i32, %arg2: i32) -> (i32, i32) {
    %c0_i32 = arith.constant 0 : i32
    %c0_i32_0 = arith.constant 0 : i32
    return %c0_i32, %arg1 : i32, i32
  }
  func.func @transform_3(%arg0: i32, %arg1: i32, %arg2: i32) -> (i32, i32) {
    %c0_i32 = arith.constant 0 : i32
    %c0_i32_0 = arith.constant 0 : i32
    return %arg0, %c0_i32 : i32, i32
  }
  func.func @transform_4(%arg0: i32, %arg1: i32, %arg2: i32) -> (i32, i32) {
    %c0_i32 = arith.constant 0 : i32
    %c0_i32_0 = arith.constant 0 : i32
    return %c0_i32, %arg1 : i32, i32
  }
  func.func @transform_5(%arg0: i32, %arg1: i32, %arg2: i32) -> (i32, i32) {
    %c0_i32 = arith.constant 0 : i32
    return %arg0, %arg1 : i32, i32
  }
}

module attributes {stable_mosaic.version = 11 : i64} {
  func.func @_gemm_kernel(%arg0: i32, %arg1: i32, %arg2: i32, %arg3: memref<8x512xbf16, #tpu.memory_space<vmem>>, %arg4: memref<512x256xbf16, #tpu.memory_space<vmem>>, %arg5: memref<1x256xf32, #tpu.memory_space<vmem>>, %arg6: memref<8x256xbf16, #tpu.memory_space<vmem>>, %arg7: memref<8x256xf32, #tpu.memory_space<vmem>>) attributes {dimension_semantics = [#tpu.dimension_semantics<parallel>, #tpu.dimension_semantics<parallel>, #tpu.dimension_semantics<arbitrary>], iteration_bounds = array<i64: 1, 2, 9>, scalar_prefetch = 0 : i64, scratch_operands = 1 : i64, tpu.core_type = #tpu.core_type<tc>, window_params = [{transform_indices = @transform_0, window_bounds = array<i64: 8, 512>}, {transform_indices = @transform_1, window_bounds = array<i64: 512, 256>}, {transform_indices = @transform_2, window_bounds = array<i64: 1, 256>}, {transform_indices = @transform_3, window_bounds = array<i64: 8, 256>}]} {
    %c0_i32 = arith.constant 0 : i32
    %0 = arith.cmpi eq, %arg2, %c0_i32 : i32
    %1 = arith.extui %0 : i1 to i32
    %c0_i32_0 = arith.constant 0 : i32
    %2 = arith.cmpi ne, %1, %c0_i32_0 : i32
    scf.if %2 {
      %cst_9 = arith.constant 0.000000e+00 : f32
      %12 = vector.broadcast %cst_9 : f32 to vector<8x256xf32>
      %c0_10 = arith.constant 0 : index
      %c0_11 = arith.constant 0 : index
      %13 = vector.load %arg7[%c0_10, %c0_11] : memref<8x256xf32, #tpu.memory_space<vmem>>, vector<8x256xf32>
      tpu.vector_store %arg7[%c0_10, %c0_11], %12 {strides = array<i32>} : memref<8x256xf32, #tpu.memory_space<vmem>>, vector<8x256xf32>,
    } else {
    }
    %c0 = arith.constant 0 : index
    %c0_1 = arith.constant 0 : index
    %3 = vector.load %arg7[%c0, %c0_1] : memref<8x256xf32, #tpu.memory_space<vmem>>, vector<8x256xf32>
    %c0_2 = arith.constant 0 : index
    %c0_3 = arith.constant 0 : index
    %4 = vector.load %arg3[%c0_2, %c0_3] : memref<8x512xbf16, #tpu.memory_space<vmem>>, vector<8x512xbf16>
    %c0_4 = arith.constant 0 : index
    %c0_5 = arith.constant 0 : index
    %5 = vector.load %arg4[%c0_4, %c0_5] : memref<512x256xbf16, #tpu.memory_space<vmem>>, vector<512x256xbf16>
    %cst = arith.constant dense<0.000000e+00> : vector<8x256xf32>
    %6 = tpu.matmul %4, %5, %cst {dimension_numbers = #tpu.dot_dimension_numbers<[1], [0], [0], [1], [0, 0, 1, 1], [], []>} : vector<8x512xbf16>, vector<512x256xbf16>, vector<8x256xf32> -> vector<8x256xf32>
    %7 = arith.addf %3, %6 : vector<8x256xf32>
    %c0_6 = arith.constant 0 : index
    %c0_7 = arith.constant 0 : index
    %8 = vector.load %arg7[%c0_6, %c0_7] : memref<8x256xf32, #tpu.memory_space<vmem>>, vector<8x256xf32>
    tpu.vector_store %arg7[%c0_6, %c0_7], %7 {strides = array<i32>} : memref<8x256xf32, #tpu.memory_space<vmem>>, vector<8x256xf32>,
    %c8_i32 = arith.constant 8 : i32
    %9 = arith.cmpi eq, %arg2, %c8_i32 : i32
    %10 = arith.extui %9 : i1 to i32
    %c0_i32_8 = arith.constant 0 : i32
    %11 = arith.cmpi ne, %10, %c0_i32_8 : i32
    scf.if %11 {
      %c0_9 = arith.constant 0 : index
      %c0_10 = arith.constant 0 : index
      %12 = vector.load %arg7[%c0_9, %c0_10] : memref<8x256xf32, #tpu.memory_space<vmem>>, vector<8x256xf32>
      %c0_11 = arith.constant 0 : index
      %c0_12 = arith.constant 0 : index
      %13 = vector.load %arg5[%c0_11, %c0_12] : memref<1x256xf32, #tpu.memory_space<vmem>>, vector<1x256xf32>
      %14 = vector.broadcast %13 : vector<1x256xf32> to vector<8x256xf32>
      %15 = arith.addf %12, %14 : vector<8x256xf32>
      %16 = arith.negf %15 : vector<8x256xf32>
      %17 = math.exp %16 : vector<8x256xf32>
      %cst_13 = arith.constant 1.000000e+00 : f32
      %18 = vector.broadcast %cst_13 : f32 to vector<8x256xf32>
      %19 = arith.addf %18, %17 : vector<8x256xf32>
      %20 = arith.divf %18, %19 : vector<8x256xf32>
      %21 = arith.mulf %15, %20 : vector<8x256xf32>
      %22 = arith.truncf %21 : vector<8x256xf32> to vector<8x256xbf16>
      %c0_14 = arith.constant 0 : index
      %c0_15 = arith.constant 0 : index
      %23 = vector.load %arg6[%c0_14, %c0_15] : memref<8x256xbf16, #tpu.memory_space<vmem>>, vector<8x256xbf16>
      tpu.vector_store %arg6[%c0_14, %c0_15], %22 {strides = array<i32>} : memref<8x256xbf16, #tpu.memory_space<vmem>>, vector<8x256xbf16>,
    } else {
    }
    return
  }
  func.func @transform_0(%arg0: i32, %arg1: i32, %arg2: i32) -> (i32, i32) {
    %c0_i32 = arith.constant 0 : i32
    return %arg0, %arg2 : i32, i32
  }
  func.func @transform_1(%arg0: i32, %arg1: i32, %arg2: i32) -> (i32, i32) {
    %c0_i32 = arith.constant 0 : i32
    return %arg2, %arg1 : i32, i32
  }
  func.func @transform_2(%arg0: i32, %arg1: i32, %arg2: i32) -> (i32, i32) {
    %c0_i32 = arith.constant 0 : i32
    %c0_i32_0 = arith.constant 0 : i32
    return %c0_i32, %arg1 : i32, i32
  }
  func.func @transform_3(%arg0: i32, %arg1: i32, %arg2: i32) -> (i32, i32) {
    %c0_i32 = arith.constant 0 : i32
    return %arg0, %arg1 : i32, i32
  }
}

module attributes {stable_mosaic.version = 11 : i64} {
  func.func @_gemm_res_kernel(%arg0: i32, %arg1: i32, %arg2: i32, %arg3: memref<8x512xbf16, #tpu.memory_space<vmem>>, %arg4: memref<512x256xbf16, #tpu.memory_space<vmem>>, %arg5: memref<1x256xf32, #tpu.memory_space<vmem>>, %arg6: memref<8x256xbf16, #tpu.memory_space<vmem>>, %arg7: memref<8x256xbf16, #tpu.memory_space<vmem>>, %arg8: memref<8x256xf32, #tpu.memory_space<vmem>>) attributes {dimension_semantics = [#tpu.dimension_semantics<parallel>, #tpu.dimension_semantics<parallel>, #tpu.dimension_semantics<arbitrary>], iteration_bounds = array<i64: 1, 2, 9>, scalar_prefetch = 0 : i64, scratch_operands = 1 : i64, tpu.core_type = #tpu.core_type<tc>, window_params = [{transform_indices = @transform_0, window_bounds = array<i64: 8, 512>}, {transform_indices = @transform_1, window_bounds = array<i64: 512, 256>}, {transform_indices = @transform_2, window_bounds = array<i64: 1, 256>}, {transform_indices = @transform_3, window_bounds = array<i64: 8, 256>}, {transform_indices = @transform_4, window_bounds = array<i64: 8, 256>}]} {
    %c0_i32 = arith.constant 0 : i32
    %0 = arith.cmpi eq, %arg2, %c0_i32 : i32
    %1 = arith.extui %0 : i1 to i32
    %c0_i32_0 = arith.constant 0 : i32
    %2 = arith.cmpi ne, %1, %c0_i32_0 : i32
    scf.if %2 {
      %cst_9 = arith.constant 0.000000e+00 : f32
      %12 = vector.broadcast %cst_9 : f32 to vector<8x256xf32>
      %c0_10 = arith.constant 0 : index
      %c0_11 = arith.constant 0 : index
      %13 = vector.load %arg8[%c0_10, %c0_11] : memref<8x256xf32, #tpu.memory_space<vmem>>, vector<8x256xf32>
      tpu.vector_store %arg8[%c0_10, %c0_11], %12 {strides = array<i32>} : memref<8x256xf32, #tpu.memory_space<vmem>>, vector<8x256xf32>,
    } else {
    }
    %c0 = arith.constant 0 : index
    %c0_1 = arith.constant 0 : index
    %3 = vector.load %arg8[%c0, %c0_1] : memref<8x256xf32, #tpu.memory_space<vmem>>, vector<8x256xf32>
    %c0_2 = arith.constant 0 : index
    %c0_3 = arith.constant 0 : index
    %4 = vector.load %arg3[%c0_2, %c0_3] : memref<8x512xbf16, #tpu.memory_space<vmem>>, vector<8x512xbf16>
    %c0_4 = arith.constant 0 : index
    %c0_5 = arith.constant 0 : index
    %5 = vector.load %arg4[%c0_4, %c0_5] : memref<512x256xbf16, #tpu.memory_space<vmem>>, vector<512x256xbf16>
    %cst = arith.constant dense<0.000000e+00> : vector<8x256xf32>
    %6 = tpu.matmul %4, %5, %cst {dimension_numbers = #tpu.dot_dimension_numbers<[1], [0], [0], [1], [0, 0, 1, 1], [], []>} : vector<8x512xbf16>, vector<512x256xbf16>, vector<8x256xf32> -> vector<8x256xf32>
    %7 = arith.addf %3, %6 : vector<8x256xf32>
    %c0_6 = arith.constant 0 : index
    %c0_7 = arith.constant 0 : index
    %8 = vector.load %arg8[%c0_6, %c0_7] : memref<8x256xf32, #tpu.memory_space<vmem>>, vector<8x256xf32>
    tpu.vector_store %arg8[%c0_6, %c0_7], %7 {strides = array<i32>} : memref<8x256xf32, #tpu.memory_space<vmem>>, vector<8x256xf32>,
    %c8_i32 = arith.constant 8 : i32
    %9 = arith.cmpi eq, %arg2, %c8_i32 : i32
    %10 = arith.extui %9 : i1 to i32
    %c0_i32_8 = arith.constant 0 : i32
    %11 = arith.cmpi ne, %10, %c0_i32_8 : i32
    scf.if %11 {
      %c0_9 = arith.constant 0 : index
      %c0_10 = arith.constant 0 : index
      %12 = vector.load %arg8[%c0_9, %c0_10] : memref<8x256xf32, #tpu.memory_space<vmem>>, vector<8x256xf32>
      %c0_11 = arith.constant 0 : index
      %c0_12 = arith.constant 0 : index
      %13 = vector.load %arg5[%c0_11, %c0_12] : memref<1x256xf32, #tpu.memory_space<vmem>>, vector<1x256xf32>
      %14 = vector.broadcast %13 : vector<1x256xf32> to vector<8x256xf32>
      %15 = arith.addf %12, %14 : vector<8x256xf32>
      %c0_13 = arith.constant 0 : index
      %c0_14 = arith.constant 0 : index
      %16 = vector.load %arg6[%c0_13, %c0_14] : memref<8x256xbf16, #tpu.memory_space<vmem>>, vector<8x256xbf16>
      %17 = arith.extf %16 : vector<8x256xbf16> to vector<8x256xf32>
      %18 = arith.addf %15, %17 : vector<8x256xf32>
      %19 = arith.negf %18 : vector<8x256xf32>
      %20 = math.exp %19 : vector<8x256xf32>
      %cst_15 = arith.constant 1.000000e+00 : f32
      %21 = vector.broadcast %cst_15 : f32 to vector<8x256xf32>
      %22 = arith.addf %21, %20 : vector<8x256xf32>
      %23 = arith.divf %21, %22 : vector<8x256xf32>
      %24 = arith.mulf %18, %23 : vector<8x256xf32>
      %25 = arith.truncf %24 : vector<8x256xf32> to vector<8x256xbf16>
      %c0_16 = arith.constant 0 : index
      %c0_17 = arith.constant 0 : index
      %26 = vector.load %arg7[%c0_16, %c0_17] : memref<8x256xbf16, #tpu.memory_space<vmem>>, vector<8x256xbf16>
      tpu.vector_store %arg7[%c0_16, %c0_17], %25 {strides = array<i32>} : memref<8x256xbf16, #tpu.memory_space<vmem>>, vector<8x256xbf16>,
    } else {
    }
    return
  }
  func.func @transform_0(%arg0: i32, %arg1: i32, %arg2: i32) -> (i32, i32) {
    %c0_i32 = arith.constant 0 : i32
    return %arg0, %arg2 : i32, i32
  }
  func.func @transform_1(%arg0: i32, %arg1: i32, %arg2: i32) -> (i32, i32) {
    %c0_i32 = arith.constant 0 : i32
    return %arg2, %arg1 : i32, i32
  }
  func.func @transform_2(%arg0: i32, %arg1: i32, %arg2: i32) -> (i32, i32) {
    %c0_i32 = arith.constant 0 : i32
    %c0_i32_0 = arith.constant 0 : i32
    return %c0_i32, %arg1 : i32, i32
  }
  func.func @transform_3(%arg0: i32, %arg1: i32, %arg2: i32) -> (i32, i32) {
    %c0_i32 = arith.constant 0 : i32
    return %arg0, %arg1 : i32, i32
  }
  func.func @transform_4(%arg0: i32, %arg1: i32, %arg2: i32) -> (i32, i32) {
    %c0_i32 = arith.constant 0 : i32
    return %arg0, %arg1 : i32, i32
  }
}

module attributes {stable_mosaic.version = 11 : i64} {
  func.func @_head_kernel(%arg0: memref<8x1x512xbf16, #tpu.memory_space<vmem>>, %arg1: memref<512x128xbf16, #tpu.memory_space<vmem>>, %arg2: memref<1x128xf32, #tpu.memory_space<vmem>>, %arg3: memref<8x128xf32, #tpu.memory_space<vmem>>) attributes {dimension_semantics = [], scalar_prefetch = 0 : i64, scratch_operands = 0 : i64, tpu.core_type = #tpu.core_type<tc>} {
    %c0 = arith.constant 0 : index
    %c0_0 = arith.constant 0 : index
    %c0_1 = arith.constant 0 : index
    %0 = vector.load %arg0[%c0, %c0_0, %c0_1] : memref<8x1x512xbf16, #tpu.memory_space<vmem>>, vector<8x1x512xbf16>
    %1 = arith.extf %0 : vector<8x1x512xbf16> to vector<8x1x512xf32>
    %cst = arith.constant dense<0.000000e+00> : vector<8x512xf32>
    %2 = vector.multi_reduction <add>, %1, %cst [1] : vector<8x1x512xf32> to vector<8x512xf32>
    %cst_2 = arith.constant 1.000000e+00 : f32
    %3 = vector.broadcast %cst_2 : f32 to vector<8x512xf32>
    %4 = arith.mulf %2, %3 : vector<8x512xf32>
    %5 = arith.truncf %4 : vector<8x512xf32> to vector<8x512xbf16>
    %c0_3 = arith.constant 0 : index
    %c0_4 = arith.constant 0 : index
    %6 = vector.load %arg1[%c0_3, %c0_4] : memref<512x128xbf16, #tpu.memory_space<vmem>>, vector<512x128xbf16>
    %cst_5 = arith.constant dense<0.000000e+00> : vector<8x128xf32>
    %7 = tpu.matmul %5, %6, %cst_5 {dimension_numbers = #tpu.dot_dimension_numbers<[1], [0], [0], [1], [0, 0, 1, 1], [], []>} : vector<8x512xbf16>, vector<512x128xbf16>, vector<8x128xf32> -> vector<8x128xf32>
    %c0_6 = arith.constant 0 : index
    %c0_7 = arith.constant 0 : index
    %8 = vector.load %arg2[%c0_6, %c0_7] : memref<1x128xf32, #tpu.memory_space<vmem>>, vector<1x128xf32>
    %9 = vector.broadcast %8 : vector<1x128xf32> to vector<8x128xf32>
    %10 = arith.addf %7, %9 : vector<8x128xf32>
    %c0_8 = arith.constant 0 : index
    %c0_9 = arith.constant 0 : index
    %11 = vector.load %arg3[%c0_8, %c0_9] : memref<8x128xf32, #tpu.memory_space<vmem>>, vector<8x128xf32>
    tpu.vector_store %arg3[%c0_8, %c0_9], %10 {strides = array<i32>} : memref<8x128xf32, #tpu.memory_space<vmem>>, vector<8x128xf32>,
    return
  }
}

</mosaic_0001>

<bundles_post_ra>
// kernel: resnet18_forward.20
= control target key start
LH: loop header
LB: loop body
LE: loop exit
PB: predicated region body
PF: predicated region fallthrough
CT: control target
= control target key end

     0   :  { %s285_s0 = inlined_call_operand.vmem [shape: bf16[32,128], index: 0, kind: input, shape index: {}]   ;;  %s286_s1 = inlined_call_operand.vmem [shape: bf16[32,128], index: 1, kind: input, shape index: {}]   ;;  %s287_s2 = inlined_call_operand.vmem [shape: bf16[32,128], index: 2, kind: input, shape index: {}]   ;;  %s288_s3 = inlined_call_operand.vmem [shape: bf16[32,128], index: 3, kind: input, shape index: {}]   ;;  %s289_s4 = inlined_call_operand.vmem [shape: bf16[32,128], index: 4, kind: input, shape index: {}]   ;;  %s290_s5 = inlined_call_operand.vmem [shape: bf16[32,128], index: 5, kind: input, shape index: {}]   ;;  %s291_s6 = inlined_call_operand.vmem [shape: bf16[32,128], index: 6, kind: input, shape index: {}]   ;;  %s292_s7 = inlined_call_operand.vmem [shape: bf16[32,128], index: 7, kind: input, shape index: {}]   ;;  %s293_s8 = inlined_call_operand.vmem [shape: bf16[32,128], index: 8, kind: input, shape index: {}]   ;;  %s294_s9 = inlined_call_operand.vmem [shape: bf16[32,128], index: 9, kind: output, shape index: {}]  }
   0x1   :  { %v32_v0 = vld [vmem:[%s285_s0] sm:$0xf]  ;;  %v33_v1 = vld [vmem:[%s285_s0 + $0x4] sm:$0xf]  ;;  %v34_v18 = vld [vmem:[%s285_s0 + $0x8] sm:$0xf] }
   0x2   :  { %v36_v2 = vld [vmem:[%s286_s1] sm:$0xf]  ;;  %v37_v3 = vld [vmem:[%s286_s1 + $0x4] sm:$0xf]  ;;  %v35_v19 = vld [vmem:[%s285_s0 + $0xc] sm:$0xf] }
   0x3   :  { %v40_v4 = vmax.bf16 %v36_v2, %v32_v0  ;;  %v44_v5 = vld [vmem:[%s287_s2] sm:$0xf]  ;;  %v45_v6 = vld [vmem:[%s287_s2 + $0x4] sm:$0xf]  ;;  %v41_v7 = vmax.bf16 %v37_v3, %v33_v1  ;;  %v38_v20 = vld [vmem:[%s286_s1 + $0x8] sm:$0xf] }
   0x4   :  { %v52_v8 = vld [vmem:[%s288_s3] sm:$0xf]  ;;  %v53_v10 = vld [vmem:[%s288_s3 + $0x4] sm:$0xf]  ;;  %v39_v22 = vld [vmem:[%s286_s1 + $0xc] sm:$0xf]  ;;  %v42_v23 = vmax.bf16 %v38_v20, %v34_v18 }
   0x5   :  { %v48_v9 = vmax.bf16 %v44_v5, %v40_v4  ;;  %v49_v11 = vmax.bf16 %v45_v6, %v41_v7  ;;  %v60_v12 = vld [vmem:[%s289_s4] sm:$0xf]  ;;  %v61_v14 = vld [vmem:[%s289_s4 + $0x4] sm:$0xf]  ;;  %v46_v24 = vld [vmem:[%s287_s2 + $0x8] sm:$0xf]  ;;  %v43_v28 = vmax.bf16 %v39_v22, %v35_v19 }
   0x6   :  { %v68_v15 = vld [vmem:[%s290_s5] sm:$0xf]  ;;  %v69_v16 = vld [vmem:[%s290_s5 + $0x4] sm:$0xf]  ;;  %v47_v25 = vld [vmem:[%s287_s2 + $0xc] sm:$0xf]  ;;  %v50_v32 = vmax.bf16 %v46_v24, %v42_v23 }
   0x7   :  { %v56_v13 = vmax.bf16 %v52_v8, %v48_v9  ;;  %v57_v17 = vmax.bf16 %v53_v10, %v49_v11  ;;  %v76_v27 = vld [vmem:[%s291_s6] sm:$0xf]  ;;  %v54_v29 = vld [vmem:[%s288_s3 + $0x8] sm:$0xf]  ;;  %v77_v31 = vld [vmem:[%s291_s6 + $0x4] sm:$0xf]  ;;  %v51_v36 = vmax.bf16 %v47_v25, %v43_v28 }
   0x8   :  { %v55_v33 = vld [vmem:[%s288_s3 + $0xc] sm:$0xf]  ;;  %v84_v35 = vld [vmem:[%s292_s7] sm:$0xf]  ;;  %v62_v37 = vld [vmem:[%s289_s4 + $0x8] sm:$0xf]  ;;  %v58_v40 = vmax.bf16 %v54_v29, %v50_v32 }
   0x9   :  { %v64_v21 = vmax.bf16 %v60_v12, %v56_v13  ;;  %v65_v26 = vmax.bf16 %v61_v14, %v57_v17  ;;  %v85_v39 = vld [vmem:[%s292_s7 + $0x4] sm:$0xf]  ;;  %v63_v41 = vld [vmem:[%s289_s4 + $0xc] sm:$0xf]  ;;  %v92_v43 = vld [vmem:[%s293_s8] sm:$0xf]  ;;  %v59_v44 = vmax.bf16 %v55_v33, %v51_v36 }
   0xa   :  { %v70_v45 = vld [vmem:[%s290_s5 + $0x8] sm:$0xf]  ;;  %v93_v47 = vld [vmem:[%s293_s8 + $0x4] sm:$0xf]  ;;  %v66_v48 = vmax.bf16 %v62_v37, %v58_v40  ;;  %v71_v49 = vld [vmem:[%s290_s5 + $0xc] sm:$0xf] }
   0xb   :  { %v72_v30 = vmax.bf16 %v68_v15, %v64_v21  ;;  %v73_v34 = vmax.bf16 %v69_v16, %v65_v26  ;;  %v67_v51 = vmax.bf16 %v63_v41, %v59_v44  ;;  %v78_v52 = vld [vmem:[%s291_s6 + $0x8] sm:$0xf]  ;;  %v79_v55 = vld [vmem:[%s291_s6 + $0xc] sm:$0xf] }
   0xc   :  { %v74_v54 = vmax.bf16 %v70_v45, %v66_v48  ;;  %v86_v58 = vld [vmem:[%s292_s7 + $0x8] sm:$0xf]  ;;  %v87_v60 = vld [vmem:[%s292_s7 + $0xc] sm:$0xf] }
   0xd   :  { %v80_v38 = vmax.bf16 %v76_v27, %v72_v30  ;;  %v81_v42 = vmax.bf16 %v77_v31, %v73_v34  ;;  %v75_v57 = vmax.bf16 %v71_v49, %v67_v51  ;;  %v94_v63 = vld [vmem:[%s293_s8 + $0x8] sm:$0xf]  ;;  %v95_v1 = vld [vmem:[%s293_s8 + $0xc] sm:$0xf] }
   0xe   :  { %v82_v59 = vmax.bf16 %v78_v52, %v74_v54 }
   0xf   :  { %v88_v46 = vmax.bf16 %v84_v35, %v80_v38  ;;  %v89_v50 = vmax.bf16 %v85_v39, %v81_v42  ;;  %v83_v62 = vmax.bf16 %v79_v55, %v75_v57 }
  0x10   :  { %v90_v0 = vmax.bf16 %v86_v58, %v82_v59 }
  0x11   :  { %v96_v53 = vmax.bf16 %v92_v43, %v88_v46  ;;  %v97_v56 = vmax.bf16 %v93_v47, %v89_v50  ;;  %v91_v2 = vmax.bf16 %v87_v60, %v83_v62 }
  0x12   :  { %v98_v3 = vmax.bf16 %v94_v63, %v90_v0 }
  0x13   :  { %v118_v61 = vcombine.low %v96_v53, %v97_v56  ;;  %v99_v4 = vmax.bf16 %v95_v1, %v91_v2 }
  0x15   :  { %112 = vst [vmem:[%s294_s9] sm:$0xff] %v118_v61   ;;  %v119_v5 = vcombine.low %v98_v3, %v99_v4 }
  0x17   :  { %120 = vst [vmem:[%s294_s9 + $0x8] sm:$0xff] %v119_v5  }

// kernel: resnet18_forward.19
= control target key start
LH: loop header
LB: loop body
LE: loop exit
PB: predicated region body
PF: predicated region fallthrough
CT: control target
= control target key end

     0   :  { %s1179_s1 = inlined_call_operand.vmem [shape: bf16[256,128], index: 1, kind: input, shape index: {}]   ;;  %s1180_s0 = inlined_call_operand.vmem [shape: bf16[128,256], index: 0, kind: input, shape index: {}]   ;;  %s1181_s2 = inlined_call_operand.vmem [shape: f32[1,128], index: 2, kind: input, shape index: {}]   ;;  %s1182_s3 = inlined_call_operand.vmem [shape: bf16[128,128], index: 3, kind: output, shape index: {}]  }
   0x1   :  { %v850_v0 = vld [vmem:[%s1179_s1 + $0x40] sm:$0xff]   ;;  %v852_v2 = vld [vmem:[%s1179_s1 + $0x48] sm:$0xff]   ;;  %v854_v4 = vld [vmem:[%s1179_s1 + $0x50] sm:$0xff]  }
   0x2   :  { %v851_v1 = vld [vmem:[%s1179_s1] sm:$0xff]   ;;  %770 = vmatprep.subr.bf16.mxu0 %v850_v0  ;;  %834 = vmatprep.subr.bf16.mxu1 %v850_v0  ;;  %v853_v3 = vld [vmem:[%s1179_s1 + $0x8] sm:$0xff]   ;;  %v855_v5 = vld [vmem:[%s1179_s1 + $0x10] sm:$0xff]  }
   0x3   :  { %771 = vmatpush3.bf16.msra.mxu0 %v851_v1  ;;  %842 = vmatpush3.bf16.msra.mxu1 %v851_v1  ;;  %v856_v6 = vld [vmem:[%s1179_s1 + $0x58] sm:$0xff]   ;;  %v858_v8 = vld [vmem:[%s1179_s1 + $0x60] sm:$0xff]   ;;  %v860_v10 = vld [vmem:[%s1179_s1 + $0x68] sm:$0xff]  }
   0x4   :  { %772 = vmatprep.subr.bf16.mxu0 %v852_v2  ;;  %835 = vmatprep.subr.bf16.mxu1 %v852_v2  ;;  %v857_v7 = vld [vmem:[%s1179_s1 + $0x18] sm:$0xff]   ;;  %v859_v9 = vld [vmem:[%s1179_s1 + $0x20] sm:$0xff]   ;;  %v861_v13 = vld [vmem:[%s1179_s1 + $0x28] sm:$0xff]  }
   0x5   :  { %v868_v11 = vld [vmem:[%s1180_s0 + $0x4] ss:$8 sps:$4 sm:$0xff]   ;;  %v862_v14 = vld [vmem:[%s1179_s1 + $0x70] sm:$0xff]   ;;  %v864_v16 = vld [vmem:[%s1179_s1 + $0x78] sm:$0xff]  }
   0x6   :  { %v871_v12 = vld [vmem:[%s1180_s0 + $0x44] ss:$8 sps:$4 sm:$0xff]   ;;  %307 = vmatprep.mubr.bf16.mxu0 %v868_v11  ;;  %v863_v15 = vld [vmem:[%s1179_s1 + $0x30] sm:$0xff]   ;;  %v865_v17 = vld [vmem:[%s1179_s1 + $0x38] sm:$0xff]  }
   0x7   :  { %773 = vmatpush3.bf16.msra.mxu0 %v853_v3  ;;  %843 = vmatpush3.bf16.msra.mxu1 %v853_v3  ;;  %v866_v18 = vld [vmem:[%s1180_s0] ss:$8 sps:$4 sm:$0xff]   ;;  %v872_v20 = vld [vmem:[%s1180_s0 + $0x14] ss:$8 sps:$4 sm:$0xff]   ;;  %v876_v22 = vld [vmem:[%s1180_s0 + $0x10] ss:$8 sps:$4 sm:$0xff]  }
   0x8   :  { %774 = vmatprep.subr.bf16.mxu0 %v854_v4  ;;  %836 = vmatprep.subr.bf16.mxu1 %v854_v4  ;;  %v869_v19 = vld [vmem:[%s1180_s0 + $0x40] ss:$8 sps:$4 sm:$0xff]   ;;  %v874_v21 = vld [vmem:[%s1180_s0 + $0x54] ss:$8 sps:$4 sm:$0xff]   ;;  %v877_v23 = vld [vmem:[%s1180_s0 + $0x50] ss:$8 sps:$4 sm:$0xff]  }
   0x9   :  { %339 = vmatprep.mubr.bf16.mxu1 %v871_v12  ;;  %v878_v24 = vld [vmem:[%s1180_s0 + $0x24] ss:$8 sps:$4 sm:$0xff]   ;;  %v882_v26 = vld [vmem:[%s1180_s0 + $0x20] ss:$8 sps:$4 sm:$0xff]   ;;  %v884_v28 = vld [vmem:[%s1180_s0 + $0x34] ss:$8 sps:$4 sm:$0xff]  }
   0xa   :  { %v880_v25 = vld [vmem:[%s1180_s0 + $0x64] ss:$8 sps:$4 sm:$0xff]   ;;  %v883_v27 = vld [vmem:[%s1180_s0 + $0x60] ss:$8 sps:$4 sm:$0xff]   ;;  %v886_v29 = vld [vmem:[%s1180_s0 + $0x74] ss:$8 sps:$4 sm:$0xff]  }
   0xb   :  { %775 = vmatpush3.bf16.msra.mxu0 %v855_v5  ;;  %844 = vmatpush3.bf16.msra.mxu1 %v855_v5  ;;  %v888_v30 = vld [vmem:[%s1180_s0 + $0x30] ss:$8 sps:$4 sm:$0xff]   ;;  %v1073_v35 = vld [vmem:[%s1181_s2] ss:$0 sm:$0xff] }
   0xc   :  { %776 = vmatprep.subr.bf16.mxu0 %v856_v6  ;;  %837 = vmatprep.subr.bf16.mxu1 %v856_v6  ;;  %v889_v31 = vld [vmem:[%s1180_s0 + $0x70] ss:$8 sps:$4 sm:$0xff]  }
   0xf   :  { %777 = vmatpush3.bf16.msra.mxu0 %v857_v7  ;;  %845 = vmatpush3.bf16.msra.mxu1 %v857_v7 }
  0x10   :  { %778 = vmatprep.subr.bf16.mxu0 %v858_v8  ;;  %838 = vmatprep.subr.bf16.mxu1 %v858_v8 }
  0x13   :  { %779 = vmatpush3.bf16.msra.mxu0 %v859_v9  ;;  %846 = vmatpush3.bf16.msra.mxu1 %v859_v9 }
  0x14   :  { %780 = vmatprep.subr.bf16.mxu0 %v860_v10  ;;  %839 = vmatprep.subr.bf16.mxu1 %v860_v10 }
  0x17   :  { %781 = vmatpush3.bf16.msra.mxu0 %v861_v13  ;;  %847 = vmatpush3.bf16.msra.mxu1 %v861_v13 }
  0x18   :  { %782 = vmatprep.subr.bf16.mxu0 %v862_v14  ;;  %840 = vmatprep.subr.bf16.mxu1 %v862_v14 }
  0x1b   :  { %783 = vmatpush3.bf16.msra.mxu0 %v863_v15  ;;  %848 = vmatpush3.bf16.msra.mxu1 %v863_v15 }
  0x1c   :  { %784 = vmatprep.subr.bf16.mxu0 %v864_v16  ;;  %841 = vmatprep.subr.bf16.mxu1 %v864_v16 }
  0x1f   :  { %785 = vmatpush3.bf16.msra.mxu0 %v865_v17  ;;  %849 = vmatpush3.bf16.msra.mxu1 %v865_v17 }
  0x22   :  { %308 = vmatmul.mubr.bf16.vlgmr.msra.gmra.mrb[0].mxu0 %v866_v18  ;;  %340 = vmatmul.mubr.bf16.vlgmr.msra.gmra.mrb[0].mxu1 %v869_v19 }
  0x23   :  { %315 = vmatprep.mubr.bf16.mxu0 %v872_v20  ;;  %347 = vmatprep.mubr.bf16.mxu1 %v874_v21 }
  0x2a   :  { %316 = vmatmul.mubr.bf16.gmra.mrb[4].mxu0 %v876_v22  ;;  %348 = vmatmul.mubr.bf16.gmra.mrb[4].mxu1 %v877_v23 }
  0x2b   :  { %323 = vmatprep.mubr.bf16.mxu0 %v878_v24  ;;  %355 = vmatprep.mubr.bf16.mxu1 %v880_v25 }
  0x32   :  { %324 = vmatmul.mubr.bf16.gmra.mrb[8].mxu0 %v882_v26  ;;  %356 = vmatmul.mubr.bf16.gmra.mrb[8].mxu1 %v883_v27 }
  0x33   :  { %331 = vmatprep.mubr.bf16.mxu0 %v884_v28  ;;  %363 = vmatprep.mubr.bf16.mxu1 %v886_v29 }
  0x3a   :  { %332 = vmatmul.mubr.bf16.gmra.mrb[12].mxu0 %v888_v30  ;;  %364 = vmatmul.mubr.bf16.gmra.mrb[12].mxu1 %v889_v31 }
  0xf5   :  { %v786_v32 = vpop.f32.mrb[0].mxu0  ;;  %v810_v33 = vpop.f32.mrb[0].mxu1 }
  0xf6   :  { %v787_v34 = vpop.f32.mrb[1].mxu0  ;;  %v811_v36 = vpop.f32.mrb[1].mxu1 }
  0xf7   :  { %v788_v37 = vadd.f32 %v787_v34, %v786_v32  ;;  %v812_v38 = vadd.f32 %v811_v36, %v810_v33  ;;  %v789_v39 = vpop.f32.mrb[2].mxu0  ;;  %v813_v40 = vpop.f32.mrb[2].mxu1 }
  0xf8   :  { %v790_v41 = vpop.f32.mrb[3].mxu0  ;;  %v814_v42 = vpop.f32.mrb[3].mxu1 }
  0xf9   :  { %v1076_v43 = vadd.f32 %v788_v37, %v1073_v35  ;;  %v1079_v44 = vadd.f32 %v812_v38, %v1073_v35  ;;  %v791_v45 = vadd.f32 %v790_v41, %v789_v39  ;;  %v815_v46 = vadd.f32 %v814_v42, %v813_v40 }
  0xfb   :  { %v675_v47 = vmul.f32 -1.442695, %v1076_v43  ;;  %v683_v48 = vmul.f32 -1.442695, %v1079_v44  ;;  %v1084_v49 = vadd.f32 %v791_v45, %v1073_v35  ;;  %v1087_v50 = vadd.f32 %v815_v46, %v1073_v35 }
  0xfd   :  { %890 = vpow2.f32 %v675_v47  ;;  %v676_v51 = vmul.f32 -1.442695, %v1084_v49  ;;  %v684_v52 = vmul.f32 -1.442695, %v1087_v50  ;;  %v792_v53 = vpop.f32.mrb[4].mxu0  ;;  %v816_v54 = vpop.f32.mrb[4].mxu1 }
  0xfe   :  { %892 = vpow2.f32 %v683_v48  ;;  %v793_v55 = vpop.f32.mrb[5].mxu0  ;;  %v817_v56 = vpop.f32.mrb[5].mxu1 }
  0xff   :  { %894 = vpow2.f32 %v676_v51  ;;  %v794_v57 = vadd.f32 %v793_v55, %v792_v53  ;;  %v818_v58 = vadd.f32 %v817_v56, %v816_v54  ;;  %v795_v59 = vpop.f32.mrb[6].mxu0  ;;  %v819_v60 = vpop.f32.mrb[6].mxu1 }
 0x100   :  { %896 = vpow2.f32 %v684_v52  ;;  %v796_v61 = vpop.f32.mrb[7].mxu0  ;;  %v820_v62 = vpop.f32.mrb[7].mxu1 }
 0x101   :  { %v1092_v63 = vadd.f32 %v794_v57, %v1073_v35  ;;  %v1095_v0 = vadd.f32 %v818_v58, %v1073_v35  ;;  %v797_v1 = vadd.f32 %v796_v61, %v795_v59  ;;  %v821_v2 = vadd.f32 %v820_v62, %v819_v60 }
 0x103   :  { %v677_v3 = vmul.f32 -1.442695, %v1092_v63  ;;  %v685_v4 = vmul.f32 -1.442695, %v1095_v0  ;;  %v1100_v5 = vadd.f32 %v797_v1, %v1073_v35  ;;  %v1103_v6 = vadd.f32 %v821_v2, %v1073_v35 }
 0x105   :  { %898 = vpow2.f32 %v677_v3  ;;  %v678_v7 = vmul.f32 -1.442695, %v1100_v5  ;;  %v686_v8 = vmul.f32 -1.442695, %v1103_v6  ;;  %v798_v9 = vpop.f32.mrb[8].mxu0  ;;  %v822_v10 = vpop.f32.mrb[8].mxu1 }
 0x106   :  { %900 = vpow2.f32 %v685_v4  ;;  %v799_v11 = vpop.f32.mrb[9].mxu0  ;;  %v823_v12 = vpop.f32.mrb[9].mxu1 }
 0x107   :  { %v891_v13 = vpop.eup %890  ;;  %902 = vpow2.f32 %v678_v7  ;;  %v800_v14 = vadd.f32 %v799_v11, %v798_v9  ;;  %v824_v15 = vadd.f32 %v823_v12, %v822_v10  ;;  %v801_v16 = vpop.f32.mrb[10].mxu0 }
 0x108   :  { %v825_v17 = vpop.f32.mrb[10].mxu1  ;;  %v893_v18 = vpop.eup %892  ;;  %v494_v19 = vadd.f32 1.0, %v891_v13  ;;  %904 = vpow2.f32 %v686_v8 }
 0x109   :  { %v802_v20 = vpop.f32.mrb[11].mxu0  ;;  %v826_v21 = vpop.f32.mrb[11].mxu1  ;;  %v502_v23 = vadd.f32 1.0, %v893_v18  ;;  %v1108_v24 = vadd.f32 %v800_v14, %v1073_v35  ;;  %v1111_v25 = vadd.f32 %v824_v15, %v1073_v35 }
 0x10a   :  { %v895_v22 = vpop.eup %894  ;;  %v803_v26 = vadd.f32 %v802_v20, %v801_v16  ;;  %906 = vrcp.f32 %v494_v19  ;;  %v827_v29 = vadd.f32 %v826_v21, %v825_v17 }
 0x10b   :  { %v897_v27 = vpop.eup %896  ;;  %v495_v28 = vadd.f32 1.0, %v895_v22  ;;  %908 = vrcp.f32 %v502_v23  ;;  %v679_v31 = vmul.f32 -1.442695, %v1108_v24  ;;  %v687_v32 = vmul.f32 -1.442695, %v1111_v25 }
 0x10c   :  { %v503_v30 = vadd.f32 1.0, %v897_v27  ;;  %v1116_v33 = vadd.f32 %v803_v26, %v1073_v35  ;;  %v1119_v34 = vadd.f32 %v827_v29, %v1073_v35 }
 0x10d   :  { %910 = vrcp.f32 %v495_v28  ;;  %v804_v36 = vpop.f32.mrb[12].mxu0  ;;  %v828_v37 = vpop.f32.mrb[12].mxu1 }
 0x10e   :  { %912 = vrcp.f32 %v503_v30  ;;  %v680_v38 = vmul.f32 -1.442695, %v1116_v33  ;;  %v688_v39 = vmul.f32 -1.442695, %v1119_v34  ;;  %v805_v40 = vpop.f32.mrb[13].mxu0  ;;  %v829_v41 = vpop.f32.mrb[13].mxu1 }
 0x10f   :  { %914 = vpow2.f32 %v679_v31  ;;  %v899_v42 = vpop.eup %898  ;;  %v806_v45 = vadd.f32 %v805_v40, %v804_v36  ;;  %v830_v46 = vadd.f32 %v829_v41, %v828_v37  ;;  %v807_v47 = vpop.f32.mrb[14].mxu0 }
 0x110   :  { %916 = vpow2.f32 %v687_v32  ;;  %v831_v48 = vpop.f32.mrb[14].mxu1  ;;  %v901_v51 = vpop.eup %900  ;;  %v496_v52 = vadd.f32 1.0, %v899_v42 }
 0x111   :  { %918 = vpow2.f32 %v680_v38  ;;  %v808_v53 = vpop.f32.mrb[15].mxu0  ;;  %v832_v54 = vpop.f32.mrb[15].mxu1  ;;  %v504_v56 = vadd.f32 1.0, %v901_v51  ;;  %v1124_v57 = vadd.f32 %v806_v45, %v1073_v35  ;;  %v1127_v58 = vadd.f32 %v830_v46, %v1073_v35 }
 0x112   :  { %v903_v55 = vpop.eup %902  ;;  %920 = vpow2.f32 %v688_v39  ;;  %v809_v61 = vadd.f32 %v808_v53, %v807_v47  ;;  %v833_v62 = vadd.f32 %v832_v54, %v831_v48 }
 0x113   :  { %v905_v59 = vpop.eup %904  ;;  %922 = vrcp.f32 %v496_v52  ;;  %v497_v60 = vadd.f32 1.0, %v903_v55  ;;  %v681_v2 = vmul.f32 -1.442695, %v1124_v57  ;;  %v689_v3 = vmul.f32 -1.442695, %v1127_v58 }
 0x114   :  { %924 = vrcp.f32 %v504_v56  ;;  %v505_v1 = vadd.f32 1.0, %v905_v59  ;;  %v907_v4 = vpop.eup %906  ;;  %v1132_v7 = vadd.f32 %v809_v61, %v1073_v35  ;;  %v1135_v8 = vadd.f32 %v833_v62, %v1073_v35 }
 0x115   :  { %926 = vrcp.f32 %v497_v60  ;;  %v909_v9 = vpop.eup %908  ;;  %v542_v14 = vmul.f32 %v907_v4, %v1076_v43 }
 0x116   :  { %928 = vrcp.f32 %v505_v1  ;;  %v682_v11 = vmul.f32 -1.442695, %v1132_v7  ;;  %v690_v12 = vmul.f32 -1.442695, %v1135_v8  ;;  %v550_v17 = vmul.f32 %v909_v9, %v1079_v44 }
 0x117   :  { %v911_v10 = vpop.eup %910  ;;  %930 = vpow2.f32 %v681_v2 }
 0x118   :  { %v913_v13 = vpop.eup %912  ;;  %v543_v15 = vmul.f32 %v911_v10, %v1084_v49  ;;  %932 = vpow2.f32 %v689_v3 }
 0x119   :  { %v915_v16 = vpop.eup %914  ;;  %v551_v35 = vmul.f32 %v913_v13, %v1087_v50  ;;  %934 = vpow2.f32 %v682_v11 }
 0x11a   :  { %v917_v18 = vpop.eup %916  ;;  %v726_v19 = vpack.c.bf16 %v543_v15, %v542_v14  ;;  %v498_v20 = vadd.f32 1.0, %v915_v16  ;;  %936 = vpow2.f32 %v690_v12 }
 0x11b   :  { %v919_v21 = vpop.eup %918  ;;  %v746_v22 = vpack.c.bf16 %v551_v35, %v550_v17  ;;  %v506_v23 = vadd.f32 1.0, %v917_v18 }
 0x11c   :  { %v921_v26 = vpop.eup %920  ;;  %727 = vst [vmem:[%s1182_s3] sm:$0xff] %v726_v19   ;;  %938 = vrcp.f32 %v498_v20  ;;  %v499_v43 = vadd.f32 1.0, %v919_v21 }
 0x11d   :  { %v923_v49 = vpop.eup %922  ;;  %766 = vst [vmem:[%s1182_s3 + $0x20] sm:$0xff] %v746_v22   ;;  %940 = vrcp.f32 %v506_v23  ;;  %v507_v44 = vadd.f32 1.0, %v921_v26 }
 0x11e   :  { %v925_v50 = vpop.eup %924  ;;  %942 = vrcp.f32 %v499_v43  ;;  %v544_v29 = vmul.f32 %v923_v49, %v1092_v63 }
 0x11f   :  { %v927_v27 = vpop.eup %926  ;;  %944 = vrcp.f32 %v507_v44  ;;  %v552_v32 = vmul.f32 %v925_v50, %v1095_v0 }
 0x120   :  { %v929_v28 = vpop.eup %928  ;;  %v545_v30 = vmul.f32 %v927_v27, %v1100_v5 }
 0x121   :  { %v931_v31 = vpop.eup %930  ;;  %v553_v36 = vmul.f32 %v929_v28, %v1103_v6 }
 0x122   :  { %v933_v37 = vpop.eup %932  ;;  %v731_v38 = vpack.c.bf16 %v545_v30, %v544_v29  ;;  %v500_v39 = vadd.f32 1.0, %v931_v31 }
 0x123   :  { %v935_v40 = vpop.eup %934  ;;  %v751_v41 = vpack.c.bf16 %v553_v36, %v552_v32  ;;  %v508_v42 = vadd.f32 1.0, %v933_v37 }
 0x124   :  { %v937_v45 = vpop.eup %936  ;;  %763 = vst [vmem:[%s1182_s3 + $0x8] sm:$0xff] %v731_v38   ;;  %946 = vrcp.f32 %v500_v39  ;;  %v501_v63 = vadd.f32 1.0, %v935_v40 }
 0x125   :  { %767 = vst [vmem:[%s1182_s3 + $0x28] sm:$0xff] %v751_v41   ;;  %948 = vrcp.f32 %v508_v42  ;;  %v509_v0 = vadd.f32 1.0, %v937_v45 }
 0x126   :  { %v939_v5 = vpop.eup %938  ;;  %950 = vrcp.f32 %v501_v63 }
 0x127   :  { %v941_v6 = vpop.eup %940  ;;  %952 = vrcp.f32 %v509_v0  ;;  %v546_v48 = vmul.f32 %v939_v5, %v1108_v24 }
 0x128   :  { %v943_v46 = vpop.eup %942  ;;  %v554_v52 = vmul.f32 %v941_v6, %v1111_v25 }
 0x129   :  { %v945_v47 = vpop.eup %944  ;;  %v547_v51 = vmul.f32 %v943_v46, %v1116_v33 }
 0x12a   :  { %v555_v53 = vmul.f32 %v945_v47, %v1119_v34 }
 0x12b   :  { %v736_v54 = vpack.c.bf16 %v547_v51, %v546_v48 }
 0x12c   :  { %v756_v55 = vpack.c.bf16 %v555_v53, %v554_v52 }
 0x12d   :  { %764 = vst [vmem:[%s1182_s3 + $0x10] sm:$0xff] %v736_v54  }
 0x12e   :  { %v947_v56 = vpop.eup %946  ;;  %768 = vst [vmem:[%s1182_s3 + $0x30] sm:$0xff] %v756_v55  }
 0x12f   :  { %v949_v59 = vpop.eup %948  ;;  %v548_v33 = vmul.f32 %v947_v56, %v1124_v57 }
 0x130   :  { %v951_v60 = vpop.eup %950  ;;  %v556_v34 = vmul.f32 %v949_v59, %v1127_v58 }
 0x131   :  { %v953_v24 = vpop.eup %952  ;;  %v549_v25 = vmul.f32 %v951_v60, %v1132_v7 }
 0x132   :  { %v557_v61 = vmul.f32 %v953_v24, %v1135_v8 }
 0x133   :  { %v741_v62 = vpack.c.bf16 %v549_v25, %v548_v33 }
 0x134   :  { %v761_v1 = vpack.c.bf16 %v557_v61, %v556_v34 }
 0x135   :  { %765 = vst [vmem:[%s1182_s3 + $0x18] sm:$0xff] %v741_v62  }
 0x136   :  { %769 = vst [vmem:[%s1182_s3 + $0x38] sm:$0xff] %v761_v1  }

// kernel: resnet18_forward.21
= control target key start
LH: loop header
LB: loop body
LE: loop exit
PB: predicated region body
PF: predicated region fallthrough
CT: control target
= control target key end

     0   :  { %s1115_s12 = smov 0   ;;  %s1117_s13 = smov 0   ;;  %s1225_s0 = inlined_call_operand.vmem [shape: bf16[32,1152], index: 0, kind: input, shape index: {}]   ;;  %s1226_s1 = inlined_call_operand.vmem [shape: bf16[1152,128], index: 1, kind: input, shape index: {}]   ;;  %s1227_s2 = inlined_call_operand.vmem [shape: f32[1,128], index: 2, kind: input, shape index: {}]   ;;  %s1228_s3 = inlined_call_operand.vmem [shape: bf16[32,128], index: 3, kind: output, shape index: {}]  }
   0x1   :  { %s1119_s14 = smov 0   ;;  %s1121_s15 = smov 0  }
   0x2   :  { %s1123_s16 = smov 0  }
   0x3 LB: > { %s25_s17 = sadd.s32 1, %s1088_s15  ;;  %p48_p1 = scmp.ne.s32.totalorder %s1080_s13, %s1076_s12  ;;  %s1092_s16 = sphi %s1123_s16, %s13_s16   ;;  %s1088_s15 = sphi %s1121_s15, %s1232_s15   ;;  %s1084_s14 = sphi %s1119_s14, %s1231_s14   ;;  %s1080_s13 = sphi %s1117_s13, %s1230_s13   ;;  %s1076_s12 = sphi %s1115_s12, %s1229_s12  }
   0x4   : > { %p26_p0 = scmp.ge.s32.totalorder %s25_s17, 3  ;;  %p49_p2 = scmp.eq.s32.totalorder %s1092_s16, 0 }
   0x5   : > { %s41_s19 = sadd.s32 1, %s1080_s13  ;;  %p832_p5 = scmp.ge.s32.totalorder %s1092_s16, 3 }
   0x6   : > { %s1234_s17 = smov (%p26_p0, %s25_s17), 0  ;;  %p50_p3 = por %p49_p2, %p48_p1 }
   0x7   : > { %s37_s18 = ssub.s32 %s1088_s15, %s1234_s17  ;;  %162 = sbr.rel (%p832_p5) target bundleno = 23 (0x17), region = 20 }
   0x8   : > { %p39_p4 = scmp.eq.s32.totalorder %s37_s18, 0 }
   0xa   : > { %s1150_s20 = scalar_select %p39_p4, %s1080_s13, %s41_s19  }
   0xe   : > { %165 = sbr.rel (!%p50_p3) target bundleno = 23 (0x17), region = 24  ;;  %s167_s21 = sand.u32 (%p50_p3), 1, %s1080_s13  }
   0xf   : > { %s889_s22 = smul.u32 (%p50_p3), 12, %s1088_s15 }
  0x10   : > { %s963_s23 = smul.u32 (%p50_p3), 48, %s167_s21 }
  0x11   : > { %s175_s26 = scalar_lea.vmem (%p50_p3), %s1225_s0, %s889_s22 }
  0x12   : > { %v190_v0 = vld [vmem:[%s175_s26] sm:$0xff] (%p50_p3)  ;;  %v194_v2 = vld [vmem:[%s175_s26 + $0x48] sm:$0xff] (%p50_p3)  ;;  %s169_s27 = scalar_lea.vmem (%p50_p3), [#allocation3], %s963_s23  ;;  %v838_v6 = vld [vmem:[%s175_s26 + $0x50] sm:$0xf] (%p50_p3) }
  0x13   : > { %v192_v1 = vld [vmem:[%s175_s26 + $0x24] sm:$0xff] (%p50_p3)  ;;  %191 = vst [vmem:[%s169_s27] sm:$0xff] (%p50_p3), %v190_v0  ;;  %195 = vst [vmem:[%s169_s27 + $0x18] sm:$0xff] (%p50_p3), %v194_v2  ;;  %v196_v3 = vld [vmem:[%s175_s26 + $0x6c] sm:$0xff] (%p50_p3) }
  0x14   : > { %193 = vst [vmem:[%s169_s27 + $0xc] sm:$0xff] (%p50_p3), %v192_v1  ;;  %v834_v4 = vld [vmem:[%s175_s26 + $0x8] sm:$0xf] (%p50_p3)  ;;  %v836_v5 = vld [vmem:[%s175_s26 + $0x2c] sm:$0xf] (%p50_p3)  ;;  %197 = vst [vmem:[%s169_s27 + $0x24] sm:$0xff] (%p50_p3), %v196_v3 }
  0x15   : > { %835 = vst [vmem:[%s169_s27 + $0x8] sm:$0xf] %v834_v4  ;;  %837 = vst [vmem:[%s169_s27 + $0x14] sm:$0xf] %v836_v5  ;;  %v840_v7 = vld [vmem:[%s175_s26 + $0x74] sm:$0xf] }
  0x16   : > { %839 = vst [vmem:[%s169_s27 + $0x20] sm:$0xf] %v838_v6  ;;  %841 = vst [vmem:[%s169_s27 + $0x2c] sm:$0xf] %v840_v7 }
  0x17 PF: > { %p842_p6 = scmp.ge.s32.totalorder %s1092_s16, 1  ;;  %p229_p7 = scmp.lt.s32.totalorder %s1092_s16, 4 }
  0x19   : > { %p230_p8 = pnand %p842_p6, %p229_p7 }
  0x1a   : > { %s236_s28 = sand.u32 (!%p230_p8), 1, %s1076_s12   ;;  %s275_s29 = smul.u32 (!%p230_p8), 48, %s1084_s14 }
  0x1b   : > { %233 = sbr.rel (%p230_p8) target bundleno = 344 (0x158), region = 54  ;;  %p844_p10 = scmp.ne.s32.totalorder (!%p230_p8), %s1084_s14, 0 }
  0x1c   : > { %s964_s30 = smul.u32 (!%p230_p8), 48, %s236_s28  ;;  %p276_p9 = scmp.lt.s32.totalorder (!%p230_p8), %s275_s29, 143 }
  0x1e   : > { %s1167_s8 = scalar_lea.vmem (!%p230_p8), [#allocation3], %s964_s30 }
  0x22   : > { %s1236_s29 = smov (!%p276_p9, %s275_s29), 143  ;;  %300 = sbr.rel (%p844_p10) target bundleno = 41 (0x29), region = 62 }
  0x23   : > { %s843_s4 = sshll.u32 %s1236_s29, 2  ;;  %v1094_v8 = vmov (!%p844_p10), 0.0  }
  0x24   : > { %s1165_s7 = scalar_lea.vmem %s1226_s1, %s843_s4  ;;  %301 = vst [vmem:[#allocation2] sm:$0xff] (!%p844_p10), %v1094_v8  ;;  %302 = vst [vmem:[#allocation2 + $0x8] sm:$0xff] (!%p844_p10), %v1094_v8 }
  0x25   : > { %303 = vst [vmem:[#allocation2 + $0x10] sm:$0xff] (!%p844_p10), %v1094_v8  ;;  %304 = vst [vmem:[#allocation2 + $0x18] sm:$0xff] (!%p844_p10), %v1094_v8 }
  0x29 PF: > { %v1006_v9 = vld [vmem:[%s1165_s7 + $0x40] sm:$0xff]   ;;  %v1009_v12 = vld [vmem:[%s1165_s7 + $0x48] sm:$0xff]   ;;  %v1012_v15 = vld [vmem:[%s1165_s7 + $0x50] sm:$0xff]   ;;  %p875_p11 = scmp.ne.s32.totalorder %s1084_s14, 2 }
  0x2a   : > { %v1007_v10 = vld [vmem:[%s1165_s7] sm:$0xff]   ;;  %905 = vmatprep.subr.bf16.mxu0 %v1006_v9  ;;  %v1010_v13 = vld [vmem:[%s1165_s7 + $0x8] sm:$0xff]   ;;  %v1013_v16 = vld [vmem:[%s1165_s7 + $0x10] sm:$0xff]  }
  0x2b   : > { %v1008_v11 = vld [vmem:[%s1165_s7 + $0x80] sm:$0xff]   ;;  %906 = vmatpush3.bf16.msra.mxu0 %v1007_v10  ;;  %v1011_v14 = vld [vmem:[%s1165_s7 + $0x88] sm:$0xff]   ;;  %v1014_v17 = vld [vmem:[%s1165_s7 + $0x90] sm:$0xff]  }
  0x2c   : > { %943 = vmatprep.subr.bf16.mxu1 %v1008_v11  ;;  %907 = vmatprep.subr.bf16.mxu0 %v1009_v12  ;;  %v1015_v18 = vld [vmem:[%s1165_s7 + $0x58] sm:$0xff]   ;;  %v1018_v21 = vld [vmem:[%s1165_s7 + $0x60] sm:$0xff]   ;;  %v1021_v24 = vld [vmem:[%s1165_s7 + $0x68] sm:$0xff]  }
  0x2d   : > { %944 = vmatpush3.bf16.msra.mxu1 %v1008_v11  ;;  %v1016_v19 = vld [vmem:[%s1165_s7 + $0x18] sm:$0xff]   ;;  %v1020_v22 = vld [vmem:[%s1165_s7 + $0xa0] sm:$0xff]   ;;  %v1023_v25 = vld [vmem:[%s1165_s7 + $0xa8] sm:$0xff]  }
  0x2e   : > { %945 = vmatprep.subr.bf16.mxu1 %v1011_v14  ;;  %v1017_v20 = vld [vmem:[%s1165_s7 + $0x98] sm:$0xff]   ;;  %v1019_v23 = vld [vmem:[%s1165_s7 + $0x20] sm:$0xff]   ;;  %v1022_v26 = vld [vmem:[%s1165_s7 + $0x28] sm:$0xff]  }
  0x2f   : > { %908 = vmatpush3.bf16.msra.mxu0 %v1010_v13  ;;  %v1024_v27 = vld [vmem:[%s1165_s7 + $0x70] sm:$0xff]   ;;  %v1027_v30 = vld [vmem:[%s1165_s7 + $0x78] sm:$0xff]   ;;  %v305_v45 = vld [vmem:[#allocation2] sm:$0xff] }
  0x30   : > { %909 = vmatprep.subr.bf16.mxu0 %v1012_v15  ;;  %v1025_v28 = vld [vmem:[%s1165_s7 + $0x30] sm:$0xff]   ;;  %v1029_v31 = vld [vmem:[%s1165_s7 + $0xb8] sm:$0xff]   ;;  %v306_v50 = vld [vmem:[#allocation2 + $0x8] sm:$0xff] }
  0x31   : > { %946 = vmatpush3.bf16.msra.mxu1 %v1011_v14  ;;  %v1026_v29 = vld [vmem:[%s1165_s7 + $0xb0] sm:$0xff]   ;;  %v1028_v34 = vld [vmem:[%s1165_s7 + $0x38] sm:$0xff]   ;;  %v876_v5 = vld [vmem:[%s1227_s2] ss:$0 sm:$0xff] (!%p875_p11) }
  0x32   : > { %947 = vmatprep.subr.bf16.mxu1 %v1014_v17  ;;  %v1032_v32 = vld [vmem:[%s1167_s8 + $0x4] ss:$12 sps:$4 sm:$0xff]   ;;  %v1033_v33 = vld [vmem:[%s1167_s8 + $0x8] ss:$12 sps:$4 sm:$0xff]   ;;  %v1030_v35 = vld [vmem:[%s1167_s8] ss:$12 sps:$4 sm:$0xff]  }
  0x33   : > { %910 = vmatpush3.bf16.msra.mxu0 %v1013_v16  ;;  %573 = vmatprep.mubr.bf16.mxu0 %v1032_v32  ;;  %v1035_v36 = vld [vmem:[%s1167_s8 + $0x1c] ss:$12 sps:$4 sm:$0xff]   ;;  %v1034_v37 = vld [vmem:[%s1167_s8 + $0x20] ss:$12 sps:$4 sm:$0xff]   ;;  %v1037_v38 = vld [vmem:[%s1167_s8 + $0x18] ss:$12 sps:$4 sm:$0xff]  }
  0x34   : > { %911 = vmatprep.subr.bf16.mxu0 %v1015_v18  ;;  %959 = vmatprep.mubr.bf16.mxu1 %v1033_v33  ;;  %v307_v59 = vld [vmem:[#allocation2 + $0x10] sm:$0xff]  ;;  %v308_v63 = vld [vmem:[#allocation2 + $0x18] sm:$0xff] }
  0x35   : > { %948 = vmatpush3.bf16.msra.mxu1 %v1014_v17 }
  0x36   : > { %949 = vmatprep.subr.bf16.mxu1 %v1017_v20 }
  0x37   : > { %912 = vmatpush3.bf16.msra.mxu0 %v1016_v19 }
  0x38   : > { %913 = vmatprep.subr.bf16.mxu0 %v1018_v21 }
  0x39   : > { %950 = vmatpush3.bf16.msra.mxu1 %v1017_v20 }
  0x3a   : > { %951 = vmatprep.subr.bf16.mxu1 %v1020_v22 }
  0x3b   : > { %914 = vmatpush3.bf16.msra.mxu0 %v1019_v23 }
  0x3c   : > { %915 = vmatprep.subr.bf16.mxu0 %v1021_v24 }
  0x3d   : > { %952 = vmatpush3.bf16.msra.mxu1 %v1020_v22 }
  0x3e   : > { %953 = vmatprep.subr.bf16.mxu1 %v1023_v25 }
  0x3f   : > { %916 = vmatpush3.bf16.msra.mxu0 %v1022_v26 }
  0x40   : > { %917 = vmatprep.subr.bf16.mxu0 %v1024_v27 }
  0x41   : > { %954 = vmatpush3.bf16.msra.mxu1 %v1023_v25 }
  0x42   : > { %955 = vmatprep.subr.bf16.mxu1 %v1026_v29 }
  0x43   : > { %918 = vmatpush3.bf16.msra.mxu0 %v1025_v28 }
  0x44   : > { %919 = vmatprep.subr.bf16.mxu0 %v1027_v30 }
  0x45   : > { %956 = vmatpush3.bf16.msra.mxu1 %v1026_v29 }
  0x46   : > { %957 = vmatprep.subr.bf16.mxu1 %v1029_v31 }
  0x47   : > { %920 = vmatpush3.bf16.msra.mxu0 %v1028_v34 }
  0x49   : > { %958 = vmatpush3.bf16.msra.mxu1 %v1029_v31 }
  0x4a   : > { %574 = vmatmul.mubr.bf16.vlgmr.msra.gmra.mrb[0].mxu0 %v1030_v35 }
  0x4b   : > { %581 = vmatprep.mubr.bf16.mxu0 %v1035_v36 }
  0x4c   : > { %960 = vmatmul.mubr.bf16.vlgmr.msra.gmra.mrb[0].mxu1 %v1034_v37 }
  0x52   : > { %582 = vmatmul.mubr.bf16.gmra.mrb[4].mxu0 %v1037_v38 }
 0x11d   : > { %v921_v39 = vpop.f32.mrb[0].mxu0 }
 0x11e   : > { %v922_v40 = vpop.f32.mrb[1].mxu0 }
 0x11f   : > { %v923_v41 = vadd.f32 %v922_v40, %v921_v39  ;;  %v924_v42 = vpop.f32.mrb[2].mxu0  ;;  %v961_v43 = vpop.f32.mrb[0].mxu1 }
 0x120   : > { %v925_v44 = vpop.f32.mrb[3].mxu0  ;;  %v624_v46 = vpop.f32.mrb[1].mxu1 }
 0x121   : > { %v926_v47 = vadd.f32 %v925_v44, %v924_v42  ;;  %v625_v48 = vadd.f32 %v923_v41, %v624_v46  ;;  %v962_v49 = vpop.f32.mrb[2].mxu1 }
 0x122   : > { %v627_v51 = vpop.f32.mrb[3].mxu1 }
 0x123   : > { %v639_v52 = vadd.f32 %v625_v48, %v305_v45  ;;  %v628_v53 = vadd.f32 %v926_v47, %v627_v51 }
 0x125   : > { %643 = vst [vmem:[#allocation2] sm:$0xff] %v639_v52  ;;  %v640_v54 = vadd.f32 %v628_v53, %v306_v50  ;;  %v927_v55 = vpop.f32.mrb[4].mxu0 }
 0x126   : > { %v928_v56 = vpop.f32.mrb[5].mxu0 }
 0x127   : > { %644 = vst [vmem:[#allocation2 + $0x8] sm:$0xff] %v640_v54  ;;  %v929_v57 = vadd.f32 %v928_v56, %v927_v55  ;;  %v930_v58 = vpop.f32.mrb[6].mxu0 }
 0x128   : > { %v931_v60 = vpop.f32.mrb[7].mxu0 }
 0x129   : > { %v633_v61 = vadd.f32 %v961_v43, %v929_v57  ;;  %v932_v62 = vadd.f32 %v931_v60, %v930_v58  ;;  %650 = sbr.rel (%p875_p11) target bundleno = 344 (0x158), region = 66 }
 0x12b   : > { %v641_v0 = vadd.f32 %v633_v61, %v307_v59  ;;  %v636_v1 = vadd.f32 %v962_v49, %v932_v62 }
 0x12c   : > { %v651_v3 = vld [vmem:[#allocation2] sm:$0xff] (!%p875_p11) }
 0x12d   : > { %645 = vst [vmem:[#allocation2 + $0x10] sm:$0xff] %v641_v0  ;;  %v642_v2 = vadd.f32 %v636_v1, %v308_v63  ;;  %v662_v6 = vadd.f32 (!%p875_p11), %v876_v5, %v651_v3 }
 0x12e   : > { %v652_v4 = vld [vmem:[#allocation2 + $0x8] sm:$0xff] (!%p875_p11) }
 0x12f   : > { %646 = vst [vmem:[#allocation2 + $0x18] sm:$0xff] %v642_v2  ;;  %v663_v7 = vadd.f32 (!%p875_p11), %v876_v5, %v652_v4  ;;  %v877_v12 = vmul.f32 (!%p875_p11), -1.442695, %v662_v6 }
 0x131   : > { %v878_v13 = vmul.f32 -1.442695, %v663_v7  ;;  %1038 = vpow2.f32 %v877_v12 }
 0x133   : > { %1040 = vpow2.f32 %v878_v13 }
 0x134   : > { %v653_v8 = vld [vmem:[#allocation2 + $0x10] sm:$0xff] }
 0x135   : > { %v664_v10 = vadd.f32 %v876_v5, %v653_v8 }
 0x136   : > { %v654_v9 = vld [vmem:[#allocation2 + $0x18] sm:$0xff] }
 0x137   : > { %v665_v11 = vadd.f32 %v876_v5, %v654_v9  ;;  %v879_v14 = vmul.f32 -1.442695, %v664_v10 }
 0x139   : > { %v880_v15 = vmul.f32 -1.442695, %v665_v11  ;;  %1042 = vpow2.f32 %v879_v14 }
 0x13b   : > { %1044 = vpow2.f32 %v880_v15  ;;  %v1039_v16 = vpop.eup %1038 }
 0x13c   : > { %v678_v18 = vadd.f32 1.0, %v1039_v16 }
 0x13d   : > { %v1041_v17 = vpop.eup %1040 }
 0x13e   : > { %v679_v20 = vadd.f32 1.0, %v1041_v17  ;;  %1046 = vrcp.f32 %v678_v18 }
 0x140   : > { %1048 = vrcp.f32 %v679_v20 }
 0x143   : > { %v1043_v19 = vpop.eup %1042 }
 0x144   : > { %v680_v22 = vadd.f32 1.0, %v1043_v19 }
 0x145   : > { %v1045_v21 = vpop.eup %1044 }
 0x146   : > { %v681_v23 = vadd.f32 1.0, %v1045_v21  ;;  %1050 = vrcp.f32 %v680_v22 }
 0x148   : > { %1052 = vrcp.f32 %v681_v23  ;;  %v1047_v24 = vpop.eup %1046 }
 0x149   : > { %v690_v26 = vmul.f32 %v1047_v24, %v662_v6 }
 0x14a   : > { %v1049_v25 = vpop.eup %1048 }
 0x14b   : > { %v691_v28 = vmul.f32 %v1049_v25, %v663_v7 }
 0x14d   : > { %v897_v31 = vpack.c.bf16 %v691_v28, %v690_v26 }
 0x14f   : > { %898 = vst [vmem:[%s1228_s3] sm:$0xff] %v897_v31  }
 0x150   : > { %v1051_v27 = vpop.eup %1050 }
 0x151   : > { %v692_v30 = vmul.f32 %v1051_v27, %v664_v10 }
 0x152   : > { %v1053_v29 = vpop.eup %1052 }
 0x153   : > { %v693_v32 = vmul.f32 %v1053_v29, %v665_v11 }
 0x155   : > { %v902_v33 = vpack.c.bf16 %v693_v32, %v692_v30 }
 0x157   : > { %904 = vst [vmem:[%s1228_s3 + $0x8] sm:$0xff] %v902_v33  }
 0x158 PF: > { %s13_s16 = sadd.s32 1, %s1092_s16   ;;  %s1229_s12 = smov %s1080_s13 }
 0x159   : > { %p10_p12 = scmp.ge.s32.totalorder %s13_s16, 5   ;;  %s1230_s13 = smov %s1150_s20 }
 0x15a   : > { %s1231_s14 = smov %s1088_s15  ;;  %s1232_s15 = smov %s1234_s17 }
 0x15b   :  { %12 = sbr.rel (!%p10_p12) target bundleno = 3 (0x3), region = 113 }

// kernel: resnet18_forward.22
= control target key start
LH: loop header
LB: loop body
LE: loop exit
PB: predicated region body
PF: predicated region fallthrough
CT: control target
= control target key end

     0   :  { %s1220_s15 = smov 0   ;;  %s1222_s16 = smov 0   ;;  %s1336_s0 = inlined_call_operand.vmem [shape: bf16[32,1152], index: 0, kind: input, shape index: {}]   ;;  %s1337_s1 = inlined_call_operand.vmem [shape: bf16[1152,128], index: 1, kind: input, shape index: {}]   ;;  %s1338_s2 = inlined_call_operand.vmem [shape: f32[1,128], index: 2, kind: input, shape index: {}]   ;;  %s1339_s3 = inlined_call_operand.vmem [shape: bf16[32,128], index: 3, kind: input, shape index: {}]   ;;  %s1340_s4 = inlined_call_operand.vmem [shape: bf16[32,128], index: 4, kind: output, shape index: {}]  }
   0x1   :  { %s1224_s17 = smov 0   ;;  %s1226_s18 = smov 0  }
   0x2   :  { %s1228_s19 = smov 0  }
   0x3 LB: > { %s26_s20 = sadd.s32 1, %s1188_s18  ;;  %p49_p1 = scmp.ne.s32.totalorder %s1180_s16, %s1176_s15  ;;  %s1192_s19 = sphi %s1228_s19, %s14_s19   ;;  %s1188_s18 = sphi %s1226_s18, %s1344_s18   ;;  %s1184_s17 = sphi %s1224_s17, %s1343_s17   ;;  %s1180_s16 = sphi %s1222_s16, %s1342_s16   ;;  %s1176_s15 = sphi %s1220_s15, %s1341_s15  }
   0x4   : > { %p27_p0 = scmp.ge.s32.totalorder %s26_s20, 3  ;;  %p50_p2 = scmp.eq.s32.totalorder %s1192_s19, 0 }
   0x5   : > { %s42_s22 = sadd.s32 1, %s1180_s16  ;;  %p923_p5 = scmp.ge.s32.totalorder %s1192_s19, 3 }
   0x6   : > { %s1346_s20 = smov (%p27_p0, %s26_s20), 0  ;;  %p51_p3 = por %p50_p2, %p49_p1 }
   0x7   : > { %s38_s21 = ssub.s32 %s1188_s18, %s1346_s20  ;;  %203 = sbr.rel (%p923_p5) target bundleno = 23 (0x17), region = 24 }
   0x8   : > { %p40_p4 = scmp.eq.s32.totalorder %s38_s21, 0 }
   0xa   : > { %s1255_s23 = scalar_select %p40_p4, %s1180_s16, %s42_s22  }
   0xe   : > { %206 = sbr.rel (!%p51_p3) target bundleno = 23 (0x17), region = 28  ;;  %s208_s24 = sand.u32 (%p51_p3), 1, %s1180_s16  }
   0xf   : > { %s980_s25 = smul.u32 (%p51_p3), 12, %s1188_s18 }
  0x10   : > { %s1063_s26 = smul.u32 (%p51_p3), 48, %s208_s24 }
  0x11   : > { %s216_s29 = scalar_lea.vmem (%p51_p3), %s1336_s0, %s980_s25 }
  0x12   : > { %v231_v0 = vld [vmem:[%s216_s29] sm:$0xff] (%p51_p3)  ;;  %v235_v2 = vld [vmem:[%s216_s29 + $0x48] sm:$0xff] (%p51_p3)  ;;  %s210_s30 = scalar_lea.vmem (%p51_p3), [#allocation3], %s1063_s26  ;;  %v929_v6 = vld [vmem:[%s216_s29 + $0x50] sm:$0xf] (%p51_p3) }
  0x13   : > { %v233_v1 = vld [vmem:[%s216_s29 + $0x24] sm:$0xff] (%p51_p3)  ;;  %232 = vst [vmem:[%s210_s30] sm:$0xff] (%p51_p3), %v231_v0  ;;  %236 = vst [vmem:[%s210_s30 + $0x18] sm:$0xff] (%p51_p3), %v235_v2  ;;  %v237_v3 = vld [vmem:[%s216_s29 + $0x6c] sm:$0xff] (%p51_p3) }
  0x14   : > { %234 = vst [vmem:[%s210_s30 + $0xc] sm:$0xff] (%p51_p3), %v233_v1  ;;  %v925_v4 = vld [vmem:[%s216_s29 + $0x8] sm:$0xf] (%p51_p3)  ;;  %v927_v5 = vld [vmem:[%s216_s29 + $0x2c] sm:$0xf] (%p51_p3)  ;;  %238 = vst [vmem:[%s210_s30 + $0x24] sm:$0xff] (%p51_p3), %v237_v3 }
  0x15   : > { %926 = vst [vmem:[%s210_s30 + $0x8] sm:$0xf] %v925_v4  ;;  %928 = vst [vmem:[%s210_s30 + $0x14] sm:$0xf] %v927_v5  ;;  %v931_v7 = vld [vmem:[%s216_s29 + $0x74] sm:$0xf] }
  0x16   : > { %930 = vst [vmem:[%s210_s30 + $0x20] sm:$0xf] %v929_v6  ;;  %932 = vst [vmem:[%s210_s30 + $0x2c] sm:$0xf] %v931_v7 }
  0x17 PF: > { %p933_p6 = scmp.ge.s32.totalorder %s1192_s19, 1  ;;  %p270_p7 = scmp.lt.s32.totalorder %s1192_s19, 4 }
  0x19   : > { %p271_p8 = pnand %p933_p6, %p270_p7 }
  0x1a   : > { %s277_s5 = sand.u32 (!%p271_p8), 1, %s1176_s15   ;;  %s326_s6 = smul.u32 (!%p271_p8), 48, %s1184_s17 }
  0x1b   : > { %274 = sbr.rel (%p271_p8) target bundleno = 346 (0x15a), region = 58  ;;  %p935_p10 = scmp.ne.s32.totalorder (!%p271_p8), %s1184_s17, 0 }
  0x1c   : > { %s1064_s7 = smul.u32 (!%p271_p8), 48, %s277_s5  ;;  %p327_p9 = scmp.lt.s32.totalorder (!%p271_p8), %s326_s6, 143 }
  0x1e   : > { %s1272_s12 = scalar_lea.vmem (!%p271_p8), [#allocation3], %s1064_s7 }
  0x22   : > { %s1348_s6 = smov (!%p327_p9, %s326_s6), 143  ;;  %360 = sbr.rel (%p935_p10) target bundleno = 41 (0x29), region = 66 }
  0x23   : > { %s934_s8 = sshll.u32 %s1348_s6, 2  ;;  %v1194_v8 = vmov (!%p935_p10), 0.0  }
  0x24   : > { %s1270_s11 = scalar_lea.vmem %s1337_s1, %s934_s8  ;;  %361 = vst [vmem:[#allocation2] sm:$0xff] (!%p935_p10), %v1194_v8  ;;  %362 = vst [vmem:[#allocation2 + $0x8] sm:$0xff] (!%p935_p10), %v1194_v8 }
  0x25   : > { %363 = vst [vmem:[#allocation2 + $0x10] sm:$0xff] (!%p935_p10), %v1194_v8  ;;  %364 = vst [vmem:[#allocation2 + $0x18] sm:$0xff] (!%p935_p10), %v1194_v8 }
  0x29 PF: > { %v1106_v9 = vld [vmem:[%s1270_s11 + $0x40] sm:$0xff]   ;;  %v1109_v12 = vld [vmem:[%s1270_s11 + $0x48] sm:$0xff]   ;;  %v1112_v15 = vld [vmem:[%s1270_s11 + $0x50] sm:$0xff]   ;;  %p966_p11 = scmp.ne.s32.totalorder %s1184_s17, 2 }
  0x2a   : > { %v1107_v10 = vld [vmem:[%s1270_s11] sm:$0xff]   ;;  %1005 = vmatprep.subr.bf16.mxu0 %v1106_v9  ;;  %v1110_v13 = vld [vmem:[%s1270_s11 + $0x8] sm:$0xff]   ;;  %v1113_v16 = vld [vmem:[%s1270_s11 + $0x10] sm:$0xff]  }
  0x2b   : > { %v1108_v11 = vld [vmem:[%s1270_s11 + $0x80] sm:$0xff]   ;;  %1006 = vmatpush3.bf16.msra.mxu0 %v1107_v10  ;;  %v1111_v14 = vld [vmem:[%s1270_s11 + $0x88] sm:$0xff]   ;;  %v1114_v17 = vld [vmem:[%s1270_s11 + $0x90] sm:$0xff]  }
  0x2c   : > { %1043 = vmatprep.subr.bf16.mxu1 %v1108_v11  ;;  %1007 = vmatprep.subr.bf16.mxu0 %v1109_v12  ;;  %v1115_v18 = vld [vmem:[%s1270_s11 + $0x58] sm:$0xff]   ;;  %v1118_v21 = vld [vmem:[%s1270_s11 + $0x60] sm:$0xff]   ;;  %v1121_v24 = vld [vmem:[%s1270_s11 + $0x68] sm:$0xff]  }
  0x2d   : > { %1044 = vmatpush3.bf16.msra.mxu1 %v1108_v11  ;;  %v1116_v19 = vld [vmem:[%s1270_s11 + $0x18] sm:$0xff]   ;;  %v1120_v22 = vld [vmem:[%s1270_s11 + $0xa0] sm:$0xff]   ;;  %v1123_v25 = vld [vmem:[%s1270_s11 + $0xa8] sm:$0xff]  }
  0x2e   : > { %1045 = vmatprep.subr.bf16.mxu1 %v1111_v14  ;;  %v1117_v20 = vld [vmem:[%s1270_s11 + $0x98] sm:$0xff]   ;;  %v1119_v23 = vld [vmem:[%s1270_s11 + $0x20] sm:$0xff]   ;;  %v1122_v26 = vld [vmem:[%s1270_s11 + $0x28] sm:$0xff]  }
  0x2f   : > { %1008 = vmatpush3.bf16.msra.mxu0 %v1110_v13  ;;  %v1124_v27 = vld [vmem:[%s1270_s11 + $0x70] sm:$0xff]   ;;  %v1127_v30 = vld [vmem:[%s1270_s11 + $0x78] sm:$0xff]   ;;  %v365_v45 = vld [vmem:[#allocation2] sm:$0xff] }
  0x30   : > { %1009 = vmatprep.subr.bf16.mxu0 %v1112_v15  ;;  %v1125_v28 = vld [vmem:[%s1270_s11 + $0x30] sm:$0xff]   ;;  %v1129_v31 = vld [vmem:[%s1270_s11 + $0xb8] sm:$0xff]   ;;  %v366_v50 = vld [vmem:[#allocation2 + $0x8] sm:$0xff] }
  0x31   : > { %1046 = vmatpush3.bf16.msra.mxu1 %v1111_v14  ;;  %v1126_v29 = vld [vmem:[%s1270_s11 + $0xb0] sm:$0xff]   ;;  %v1128_v34 = vld [vmem:[%s1270_s11 + $0x38] sm:$0xff]   ;;  %v967_v5 = vld [vmem:[%s1338_s2] ss:$0 sm:$0xff] (!%p966_p11) }
  0x32   : > { %1047 = vmatprep.subr.bf16.mxu1 %v1114_v17  ;;  %v1132_v32 = vld [vmem:[%s1272_s12 + $0x4] ss:$12 sps:$4 sm:$0xff]   ;;  %v1133_v33 = vld [vmem:[%s1272_s12 + $0x8] ss:$12 sps:$4 sm:$0xff]   ;;  %v1130_v35 = vld [vmem:[%s1272_s12] ss:$12 sps:$4 sm:$0xff]  }
  0x33   : > { %1010 = vmatpush3.bf16.msra.mxu0 %v1113_v16  ;;  %633 = vmatprep.mubr.bf16.mxu0 %v1132_v32  ;;  %v1135_v36 = vld [vmem:[%s1272_s12 + $0x1c] ss:$12 sps:$4 sm:$0xff]   ;;  %v1134_v37 = vld [vmem:[%s1272_s12 + $0x20] ss:$12 sps:$4 sm:$0xff]   ;;  %v1137_v38 = vld [vmem:[%s1272_s12 + $0x18] ss:$12 sps:$4 sm:$0xff]  }
  0x34   : > { %1011 = vmatprep.subr.bf16.mxu0 %v1115_v18  ;;  %1059 = vmatprep.mubr.bf16.mxu1 %v1133_v33  ;;  %v367_v59 = vld [vmem:[#allocation2 + $0x10] sm:$0xff]  ;;  %v368_v63 = vld [vmem:[#allocation2 + $0x18] sm:$0xff]  ;;  %v986_v8 = vld [vmem:[%s1339_s3] sm:$0xff] (!%p966_p11)  }
  0x35   : > { %1048 = vmatpush3.bf16.msra.mxu1 %v1114_v17  ;;  %v987_v11 = vunpack.c.l.bf16 (!%p966_p11), %v986_v8  ;;  %v988_v12 = vunpack.c.h.bf16 (!%p966_p11), %v986_v8  ;;  %v1003_v15 = vld [vmem:[%s1339_s3 + $0x8] sm:$0xff] (!%p966_p11)  }
  0x36   : > { %1049 = vmatprep.subr.bf16.mxu1 %v1117_v20  ;;  %v991_v16 = vunpack.c.l.bf16 (!%p966_p11), %v1003_v15  ;;  %v992_v17 = vunpack.c.h.bf16 (!%p966_p11), %v1003_v15 }
  0x37   : > { %1012 = vmatpush3.bf16.msra.mxu0 %v1116_v19 }
  0x38   : > { %1013 = vmatprep.subr.bf16.mxu0 %v1118_v21 }
  0x39   : > { %1050 = vmatpush3.bf16.msra.mxu1 %v1117_v20 }
  0x3a   : > { %1051 = vmatprep.subr.bf16.mxu1 %v1120_v22 }
  0x3b   : > { %1014 = vmatpush3.bf16.msra.mxu0 %v1119_v23 }
  0x3c   : > { %1015 = vmatprep.subr.bf16.mxu0 %v1121_v24 }
  0x3d   : > { %1052 = vmatpush3.bf16.msra.mxu1 %v1120_v22 }
  0x3e   : > { %1053 = vmatprep.subr.bf16.mxu1 %v1123_v25 }
  0x3f   : > { %1016 = vmatpush3.bf16.msra.mxu0 %v1122_v26 }
  0x40   : > { %1017 = vmatprep.subr.bf16.mxu0 %v1124_v27 }
  0x41   : > { %1054 = vmatpush3.bf16.msra.mxu1 %v1123_v25 }
  0x42   : > { %1055 = vmatprep.subr.bf16.mxu1 %v1126_v29 }
  0x43   : > { %1018 = vmatpush3.bf16.msra.mxu0 %v1125_v28 }
  0x44   : > { %1019 = vmatprep.subr.bf16.mxu0 %v1127_v30 }
  0x45   : > { %1056 = vmatpush3.bf16.msra.mxu1 %v1126_v29 }
  0x46   : > { %1057 = vmatprep.subr.bf16.mxu1 %v1129_v31 }
  0x47   : > { %1020 = vmatpush3.bf16.msra.mxu0 %v1128_v34 }
  0x49   : > { %1058 = vmatpush3.bf16.msra.mxu1 %v1129_v31 }
  0x4a   : > { %634 = vmatmul.mubr.bf16.vlgmr.msra.gmra.mrb[0].mxu0 %v1130_v35 }
  0x4b   : > { %641 = vmatprep.mubr.bf16.mxu0 %v1135_v36 }
  0x4c   : > { %1060 = vmatmul.mubr.bf16.vlgmr.msra.gmra.mrb[0].mxu1 %v1134_v37 }
  0x52   : > { %642 = vmatmul.mubr.bf16.gmra.mrb[4].mxu0 %v1137_v38 }
 0x11d   : > { %v1021_v39 = vpop.f32.mrb[0].mxu0 }
 0x11e   : > { %v1022_v40 = vpop.f32.mrb[1].mxu0 }
 0x11f   : > { %v1023_v41 = vadd.f32 %v1022_v40, %v1021_v39  ;;  %v1024_v42 = vpop.f32.mrb[2].mxu0  ;;  %v1061_v43 = vpop.f32.mrb[0].mxu1 }
 0x120   : > { %v1025_v44 = vpop.f32.mrb[3].mxu0  ;;  %v684_v46 = vpop.f32.mrb[1].mxu1 }
 0x121   : > { %v1026_v47 = vadd.f32 %v1025_v44, %v1024_v42  ;;  %v685_v48 = vadd.f32 %v1023_v41, %v684_v46  ;;  %v1062_v49 = vpop.f32.mrb[2].mxu1 }
 0x122   : > { %v687_v51 = vpop.f32.mrb[3].mxu1 }
 0x123   : > { %v699_v52 = vadd.f32 %v685_v48, %v365_v45  ;;  %v688_v53 = vadd.f32 %v1026_v47, %v687_v51 }
 0x125   : > { %703 = vst [vmem:[#allocation2] sm:$0xff] %v699_v52  ;;  %v700_v54 = vadd.f32 %v688_v53, %v366_v50  ;;  %v1027_v55 = vpop.f32.mrb[4].mxu0 }
 0x126   : > { %v1028_v56 = vpop.f32.mrb[5].mxu0 }
 0x127   : > { %704 = vst [vmem:[#allocation2 + $0x8] sm:$0xff] %v700_v54  ;;  %v1029_v57 = vadd.f32 %v1028_v56, %v1027_v55  ;;  %v1030_v58 = vpop.f32.mrb[6].mxu0 }
 0x128   : > { %v1031_v60 = vpop.f32.mrb[7].mxu0 }
 0x129   : > { %v693_v61 = vadd.f32 %v1061_v43, %v1029_v57  ;;  %v1032_v62 = vadd.f32 %v1031_v60, %v1030_v58  ;;  %710 = sbr.rel (%p966_p11) target bundleno = 346 (0x15a), region = 70 }
 0x12b   : > { %v701_v0 = vadd.f32 %v693_v61, %v367_v59  ;;  %v696_v1 = vadd.f32 %v1062_v49, %v1032_v62 }
 0x12c   : > { %v711_v3 = vld [vmem:[#allocation2] sm:$0xff] (!%p966_p11) }
 0x12d   : > { %705 = vst [vmem:[#allocation2 + $0x10] sm:$0xff] %v701_v0  ;;  %v702_v2 = vadd.f32 %v696_v1, %v368_v63  ;;  %v722_v6 = vadd.f32 (!%p966_p11), %v967_v5, %v711_v3 }
 0x12e   : > { %v712_v4 = vld [vmem:[#allocation2 + $0x8] sm:$0xff] (!%p966_p11) }
 0x12f   : > { %706 = vst [vmem:[#allocation2 + $0x18] sm:$0xff] %v702_v2  ;;  %v723_v7 = vadd.f32 (!%p966_p11), %v967_v5, %v712_v4  ;;  %v734_v18 = vadd.f32 (!%p966_p11), %v987_v11, %v722_v6 }
 0x131   : > { %v735_v19 = vadd.f32 %v988_v12, %v723_v7  ;;  %v968_v22 = vmul.f32 -1.442695, %v734_v18 }
 0x133   : > { %v969_v23 = vmul.f32 -1.442695, %v735_v19  ;;  %1138 = vpow2.f32 %v968_v22 }
 0x134   : > { %v713_v9 = vld [vmem:[#allocation2 + $0x10] sm:$0xff] }
 0x135   : > { %v724_v13 = vadd.f32 %v967_v5, %v713_v9  ;;  %1140 = vpow2.f32 %v969_v23 }
 0x136   : > { %v714_v10 = vld [vmem:[#allocation2 + $0x18] sm:$0xff] }
 0x137   : > { %v725_v14 = vadd.f32 %v967_v5, %v714_v10  ;;  %v736_v20 = vadd.f32 %v991_v16, %v724_v13 }
 0x139   : > { %v737_v21 = vadd.f32 %v992_v17, %v725_v14  ;;  %v970_v24 = vmul.f32 -1.442695, %v736_v20 }
 0x13b   : > { %v971_v25 = vmul.f32 -1.442695, %v737_v21  ;;  %1142 = vpow2.f32 %v970_v24 }
 0x13d   : > { %1144 = vpow2.f32 %v971_v25  ;;  %v1139_v26 = vpop.eup %1138 }
 0x13e   : > { %v750_v28 = vadd.f32 1.0, %v1139_v26 }
 0x13f   : > { %v1141_v27 = vpop.eup %1140 }
 0x140   : > { %v751_v30 = vadd.f32 1.0, %v1141_v27  ;;  %1146 = vrcp.f32 %v750_v28 }
 0x142   : > { %1148 = vrcp.f32 %v751_v30 }
 0x145   : > { %v1143_v29 = vpop.eup %1142 }
 0x146   : > { %v752_v32 = vadd.f32 1.0, %v1143_v29 }
 0x147   : > { %v1145_v31 = vpop.eup %1144 }
 0x148   : > { %v753_v33 = vadd.f32 1.0, %v1145_v31  ;;  %1150 = vrcp.f32 %v752_v32 }
 0x14a   : > { %1152 = vrcp.f32 %v753_v33  ;;  %v1147_v34 = vpop.eup %1146 }
 0x14b   : > { %v762_v36 = vmul.f32 %v1147_v34, %v734_v18 }
 0x14c   : > { %v1149_v35 = vpop.eup %1148 }
 0x14d   : > { %v763_v38 = vmul.f32 %v1149_v35, %v735_v19 }
 0x14f   : > { %v996_v41 = vpack.c.bf16 %v763_v38, %v762_v36 }
 0x151   : > { %997 = vst [vmem:[%s1340_s4] sm:$0xff] %v996_v41  }
 0x152   : > { %v1151_v37 = vpop.eup %1150 }
 0x153   : > { %v764_v40 = vmul.f32 %v1151_v37, %v736_v20 }
 0x154   : > { %v1153_v39 = vpop.eup %1152 }
 0x155   : > { %v765_v42 = vmul.f32 %v1153_v39, %v737_v21 }
 0x157   : > { %v1001_v43 = vpack.c.bf16 %v765_v42, %v764_v40 }
 0x159   : > { %1004 = vst [vmem:[%s1340_s4 + $0x8] sm:$0xff] %v1001_v43  }
 0x15a PF: > { %s14_s19 = sadd.s32 1, %s1192_s19   ;;  %s1341_s15 = smov %s1180_s16 }
 0x15b   : > { %p11_p12 = scmp.ge.s32.totalorder %s14_s19, 5   ;;  %s1342_s16 = smov %s1255_s23 }
 0x15c   : > { %s1343_s17 = smov %s1188_s18  ;;  %s1344_s18 = smov %s1346_s20 }
 0x15d   :  { %13 = sbr.rel (!%p11_p12) target bundleno = 3 (0x3), region = 120 }

// kernel: resnet18_forward.25
= control target key start
LH: loop header
LB: loop body
LE: loop exit
PB: predicated region body
PF: predicated region fallthrough
CT: control target
= control target key end

     0   :  { %s877_s12 = smov 0   ;;  %s879_s13 = smov 0   ;;  %s952_s0 = inlined_call_operand.vmem [shape: bf16[8,1152], index: 0, kind: input, shape index: {}]   ;;  %s953_s1 = inlined_call_operand.vmem [shape: bf16[1152,128], index: 1, kind: input, shape index: {}]   ;;  %s954_s2 = inlined_call_operand.vmem [shape: f32[1,128], index: 2, kind: input, shape index: {}]   ;;  %s955_s3 = inlined_call_operand.vmem [shape: bf16[8,128], index: 3, kind: output, shape index: {}]  }
   0x1   :  { %s881_s14 = smov 0  }
   0x2 LB: > { %s25_s15 = sadd.s32 1, %s848_s13  ;;  %p684_p0 = scmp.ge.s32.totalorder %s852_s14, 1  ;;  %s852_s14 = sphi %s881_s14, %s13_s14   ;;  %s848_s13 = sphi %s879_s13, %s957_s13   ;;  %s844_s12 = sphi %s877_s12, %s956_s12  }
   0x3   : > { %p26_p1 = scmp.ge.s32.totalorder %s25_s15, 3  ;;  %p189_p2 = scmp.lt.s32.totalorder %s852_s14, 4 }
   0x5   : > { %s959_s15 = smov (%p26_p1, %s25_s15), 0  ;;  %p190_p3 = pnand %p684_p0, %p189_p2 }
   0x6   : > { %s230_s16 = smul.u32 (!%p190_p3), 3, %s844_s12  ;;  %p687_p6 = scmp.ne.s32.totalorder (!%p190_p3), %s844_s12, 0 }
   0x7   : > { %193 = sbr.rel (%p190_p3) target bundleno = 317 (0x13d), region = 32 }
   0x8   : > { %s240_s17 = smul.u32 (!%p190_p3), 48, %s844_s12  ;;  %p233_p4 = scmp.lt.s32.totalorder (!%p190_p3), %s230_s16, 8 }
   0xa   : > { %p241_p5 = scmp.lt.s32.totalorder (!%p190_p3), %s240_s17, 143 }
   0xe   : > { %s961_s16 = smov (!%p233_p4, %s230_s16), 8  ;;  %s963_s17 = smov (!%p241_p5, %s240_s17), 143 }
   0xf   : > { %s685_s18 = sshll.u32 %s961_s16, 2  ;;  %s686_s22 = sshll.u32 %s963_s17, 2  ;;  %v854_v0 = vmov (!%p687_p6), 0.0  }
  0x10   : > { %s902_s21 = scalar_lea.vmem %s952_s0, %s685_s18  ;;  %s907_s25 = scalar_lea.vmem %s953_s1, %s686_s22  ;;  %264 = vst [vmem:[#allocation2] sm:$0xff] (!%p687_p6), %v854_v0 }
  0x11   : > { %263 = sbr.rel (%p687_p6) target bundleno = 24 (0x18), region = 36 }
  0x18 PF: > { %v799_v1 = vld [vmem:[%s907_s25 + $0x40] sm:$0xff]   ;;  %v855_v2 = vmov 0.0   ;;  %vm856_vm0 = vmmov 0   ;;  %v802_v5 = vld [vmem:[%s907_s25 + $0x48] sm:$0xff]   ;;  %v805_v8 = vld [vmem:[%s907_s25 + $0x50] sm:$0xff]   ;;  %p715_p7 = scmp.ne.s32.totalorder %s844_s12, 2 }
  0x19   : > { %752 = vmatprep.subr.bf16.mxu1 %v855_v2  ;;  %v800_v3 = vld [vmem:[%s907_s25] sm:$0xff]   ;;  %721 = vmatprep.subr.bf16.mxu0 %v799_v1  ;;  %v803_v6 = vld [vmem:[%s907_s25 + $0x8] sm:$0xff]   ;;  %v806_v9 = vld [vmem:[%s907_s25 + $0x10] sm:$0xff]  }
  0x1a   : > { %v801_v4 = vld [vmem:[%s907_s25 + $0x80] sm:$0xff]   ;;  %768 = vmatprep.mubr.msk.bf16.mxu1 %vm856_vm0, %v855_v2  ;;  %722 = vmatpush3.bf16.msra.mxu0 %v800_v3  ;;  %v804_v7 = vld [vmem:[%s907_s25 + $0x88] sm:$0xff]   ;;  %v807_v10 = vld [vmem:[%s907_s25 + $0x90] sm:$0xff]  }
  0x1b   : > { %753 = vmatpush3.bf16.msra.mxu1 %v801_v4  ;;  %723 = vmatprep.subr.bf16.mxu0 %v802_v5  ;;  %v808_v11 = vld [vmem:[%s907_s25 + $0x58] sm:$0xff]   ;;  %v811_v14 = vld [vmem:[%s907_s25 + $0x60] sm:$0xff]   ;;  %v814_v17 = vld [vmem:[%s907_s25 + $0x68] sm:$0xff]  }
  0x1c   : > { %754 = vmatprep.subr.bf16.mxu1 %v855_v2  ;;  %v809_v12 = vld [vmem:[%s907_s25 + $0x18] sm:$0xff]   ;;  %v812_v15 = vld [vmem:[%s907_s25 + $0x20] sm:$0xff]   ;;  %v815_v18 = vld [vmem:[%s907_s25 + $0x28] sm:$0xff]  }
  0x1d   : > { %v810_v13 = vld [vmem:[%s907_s25 + $0x98] sm:$0xff]   ;;  %v813_v16 = vld [vmem:[%s907_s25 + $0xa0] sm:$0xff]   ;;  %v816_v19 = vld [vmem:[%s907_s25 + $0xa8] sm:$0xff]  }
  0x1e   : > { %724 = vmatpush3.bf16.msra.mxu0 %v803_v6  ;;  %v817_v20 = vld [vmem:[%s907_s25 + $0x70] sm:$0xff]   ;;  %v820_v23 = vld [vmem:[%s907_s25 + $0x78] sm:$0xff]   ;;  %v266_v24 = vld [vmem:[%s902_s21] sm:$0xff] }
  0x1f   : > { %755 = vmatpush3.bf16.msra.mxu1 %v804_v7  ;;  %725 = vmatprep.subr.bf16.mxu0 %v805_v8  ;;  %v818_v21 = vld [vmem:[%s907_s25 + $0x30] sm:$0xff]   ;;  %v689_v25 = vcombine.high %v266_v24, %v266_v24  ;;  %v821_v26 = vld [vmem:[%s907_s25 + $0x38] sm:$0xff]   ;;  %v688_v28 = vcombine.low %v266_v24, %v266_v24  ;;  %v825_v29 = vld [vmem:[%s902_s21 + $0x8] ss:$0 sps:$4 sm:$0xff]  }
  0x20   : > { %756 = vmatprep.subr.bf16.mxu1 %v855_v2  ;;  %v819_v22 = vld [vmem:[%s907_s25 + $0xb0] sm:$0xff]   ;;  %v822_v27 = vld [vmem:[%s907_s25 + $0xb8] sm:$0xff]   ;;  %v265_v36 = vld [vmem:[#allocation2] sm:$0xff] }
  0x21   : > { %503 = vmatprep.mubr.bf16.mxu0 %v689_v25  ;;  %v716_v43 = vld [vmem:[%s954_s2] ss:$0 sm:$0xff] (!%p715_p7) }
  0x22   : > { %726 = vmatpush3.bf16.msra.mxu0 %v806_v9 }
  0x23   : > { %757 = vmatpush3.bf16.msra.mxu1 %v807_v10  ;;  %727 = vmatprep.subr.bf16.mxu0 %v808_v11 }
  0x24   : > { %758 = vmatprep.subr.bf16.mxu1 %v855_v2 }
  0x26   : > { %728 = vmatpush3.bf16.msra.mxu0 %v809_v12 }
  0x27   : > { %759 = vmatpush3.bf16.msra.mxu1 %v810_v13  ;;  %729 = vmatprep.subr.bf16.mxu0 %v811_v14 }
  0x28   : > { %760 = vmatprep.subr.bf16.mxu1 %v855_v2 }
  0x2a   : > { %730 = vmatpush3.bf16.msra.mxu0 %v812_v15 }
  0x2b   : > { %761 = vmatpush3.bf16.msra.mxu1 %v813_v16  ;;  %731 = vmatprep.subr.bf16.mxu0 %v814_v17 }
  0x2c   : > { %762 = vmatprep.subr.bf16.mxu1 %v855_v2 }
  0x2e   : > { %732 = vmatpush3.bf16.msra.mxu0 %v815_v18 }
  0x2f   : > { %763 = vmatpush3.bf16.msra.mxu1 %v816_v19  ;;  %733 = vmatprep.subr.bf16.mxu0 %v817_v20 }
  0x30   : > { %764 = vmatprep.subr.bf16.mxu1 %v855_v2 }
  0x32   : > { %734 = vmatpush3.bf16.msra.mxu0 %v818_v21 }
  0x33   : > { %765 = vmatpush3.bf16.msra.mxu1 %v819_v22  ;;  %735 = vmatprep.subr.bf16.mxu0 %v820_v23 }
  0x34   : > { %766 = vmatprep.subr.bf16.mxu1 %v855_v2 }
  0x36   : > { %736 = vmatpush3.bf16.msra.mxu0 %v821_v26 }
  0x37   : > { %767 = vmatpush3.bf16.msra.mxu1 %v822_v27 }
  0x39   : > { %504 = vmatmul.mubr.bf16.vlgmr.msra.gmra.mrb[0].mxu0 %v688_v28 }
  0x3a   : > { %769 = vmatmul.mubr.bf16.vlgmr.msra.gmra.mrb[0].mxu1 %v825_v29 }
 0x10c   : > { %v737_v30 = vpop.f32.mrb[0].mxu0 }
 0x10d   : > { %v545_v31 = vpop.f32.mrb[0].mxu1  ;;  %v738_v32 = vpop.f32.mrb[1].mxu0 }
 0x10e   : > { %v739_v33 = vadd.f32 %v738_v32, %v737_v30  ;;  %v770_v34 = vpop.f32.mrb[1].mxu1  ;;  %v740_v35 = vpop.f32.mrb[2].mxu0  ;;  %556 = sbr.rel (%p715_p7) target bundleno = 317 (0x13d), region = 40 }
 0x10f   : > { %v548_v37 = vpop.f32.mrb[2].mxu1  ;;  %v741_v38 = vpop.f32.mrb[3].mxu0 }
 0x110   : > { %v546_v39 = vadd.f32 %v739_v33, %v545_v31  ;;  %v771_v40 = vpop.f32.mrb[3].mxu1 }
 0x112   : > { %v551_v41 = vadd.f32 %v546_v39, %v265_v36 }
 0x114   : > { %552 = vst [vmem:[#allocation2] sm:$0xff] %v551_v41 }
 0x11b   : > { %v557_v42 = vld [vmem:[#allocation2] sm:$0xff] }
 0x11c   : > { %v565_v44 = vadd.f32 %v716_v43, %v557_v42 }
 0x11e   : > { %v717_v45 = vmul.f32 -1.442695, %v565_v44 }
 0x120   : > { %826 = vpow2.f32 %v717_v45 }
 0x12a   : > { %v827_v46 = vpop.eup %826 }
 0x12b   : > { %v569_v47 = vadd.f32 1.0, %v827_v46 }
 0x12d   : > { %828 = vrcp.f32 %v569_v47 }
 0x137   : > { %v829_v48 = vpop.eup %828 }
 0x138   : > { %v572_v49 = vmul.f32 %v829_v48, %v565_v44 }
 0x13a   : > { %v573_v50 = vpack.c.bf16 %v572_v49, %v572_v49 }
 0x13c   : > { %574 = vst [vmem:[%s955_s3] sm:$0xf] %v573_v50 }
 0x13d PF: > { %s13_s14 = sadd.s32 1, %s852_s14   ;;  %s956_s12 = smov %s848_s13 }
 0x13e   : > { %p10_p8 = scmp.ge.s32.totalorder %s13_s14, 5   ;;  %s957_s13 = smov %s959_s15 }
 0x140   :  { %12 = sbr.rel (!%p10_p8) target bundleno = 2 (0x2), region = 76 }

// kernel: resnet18_forward.26
= control target key start
LH: loop header
LB: loop body
LE: loop exit
PB: predicated region body
PF: predicated region fallthrough
CT: control target
= control target key end

     0   :  { %s1159_s18 = smov 0   ;;  %s1161_s19 = smov 0   ;;  %s1261_s0 = inlined_call_operand.vmem [shape: bf16[8,1152], index: 0, kind: input, shape index: {}]   ;;  %s1262_s1 = inlined_call_operand.vmem [shape: bf16[1152,128], index: 1, kind: input, shape index: {}]   ;;  %s1263_s2 = inlined_call_operand.vmem [shape: f32[1,128], index: 2, kind: input, shape index: {}]   ;;  %s1264_s3 = inlined_call_operand.vmem [shape: bf16[8,128], index: 3, kind: input, shape index: {}]   ;;  %s1265_s4 = inlined_call_operand.vmem [shape: bf16[128,128], index: 4, kind: input, shape index: {}]   ;;  %s1266_s5 = inlined_call_operand.vmem [shape: bf16[8,128], index: 5, kind: output, shape index: {}]  }
   0x1   :  { %s1163_s20 = smov 0  }
   0x2 LB: > { %s27_s21 = sadd.s32 1, %s1119_s19  ;;  %p909_p0 = scmp.ge.s32.totalorder %s1123_s20, 1  ;;  %s1123_s20 = sphi %s1163_s20, %s15_s20   ;;  %s1119_s19 = sphi %s1161_s19, %s1268_s19   ;;  %s1115_s18 = sphi %s1159_s18, %s1267_s18  }
   0x3   : > { %p28_p1 = scmp.ge.s32.totalorder %s27_s21, 3  ;;  %p257_p2 = scmp.lt.s32.totalorder %s1123_s20, 4 }
   0x5   : > { %s1270_s21 = smov (%p28_p1, %s27_s21), 0  ;;  %p258_p3 = pnand %p909_p0, %p257_p2 }
   0x6   : > { %s310_s22 = smul.u32 (!%p258_p3), 3, %s1115_s18  ;;  %p912_p6 = scmp.ne.s32.totalorder (!%p258_p3), %s1115_s18, 0 }
   0x7   : > { %261 = sbr.rel (%p258_p3) target bundleno = 556 (0x22c), region = 40 }
   0x8   : > { %s320_s23 = smul.u32 (!%p258_p3), 48, %s1115_s18  ;;  %p313_p4 = scmp.lt.s32.totalorder (!%p258_p3), %s310_s22, 8 }
   0xa   : > { %p321_p5 = scmp.lt.s32.totalorder (!%p258_p3), %s320_s23, 143 }
   0xe   : > { %s1272_s22 = smov (!%p313_p4, %s310_s22), 8  ;;  %s1274_s23 = smov (!%p321_p5, %s320_s23), 143 }
   0xf   : > { %s910_s24 = sshll.u32 %s1272_s22, 2  ;;  %s911_s28 = sshll.u32 %s1274_s23, 2  ;;  %v1062_v0 = vld [vmem:[%s1265_s4] sm:$0xff] (!%p912_p6)   ;;  %v1125_v1 = vmov (!%p912_p6), 0.0   ;;  %v1063_v2 = vld [vmem:[%s1265_s4 + $0x8] sm:$0xff] (!%p912_p6)   ;;  %vm1126_vm0 = vmmov (!%p912_p6), 0  }
  0x10   : > { %s1184_s27 = scalar_lea.vmem %s1261_s0, %s910_s24  ;;  %s1189_s6 = scalar_lea.vmem %s1262_s1, %s911_s28  ;;  %994 = vmatprep.subr.bf16.mxu0 (!%p912_p6), %v1125_v1  ;;  %1010 = vmatprep.mubr.msk.bf16.mxu0 (!%p912_p6), %vm1126_vm0, %v1125_v1  ;;  %v1064_v3 = vld [vmem:[%s1265_s4 + $0x10] sm:$0xff] (!%p912_p6)   ;;  %v1065_v4 = vld [vmem:[%s1265_s4 + $0x18] sm:$0xff] (!%p912_p6)   ;;  %v1066_v5 = vld [vmem:[%s1265_s4 + $0x20] sm:$0xff] (!%p912_p6)  }
  0x11   : > { %351 = sbr.rel (%p912_p6) target bundleno = 263 (0x107), region = 44  ;;  %995 = vmatpush3.bf16.msra.mxu0 (!%p912_p6), %v1062_v0  ;;  %v1067_v6 = vld [vmem:[%s1265_s4 + $0x28] sm:$0xff] (!%p912_p6)   ;;  %v1068_v7 = vld [vmem:[%s1265_s4 + $0x30] sm:$0xff] (!%p912_p6)   ;;  %v1069_v8 = vld [vmem:[%s1265_s4 + $0x38] sm:$0xff] (!%p912_p6)  }
  0x12   : > { %996 = vmatprep.subr.bf16.mxu0 (!%p912_p6), %v1125_v1  ;;  %v352_v9 = vld [vmem:[%s1264_s3] sm:$0xf] (!%p912_p6) }
  0x15   : > { %997 = vmatpush3.bf16.msra.mxu0 (!%p912_p6), %v1063_v2 }
  0x16   : > { %998 = vmatprep.subr.bf16.mxu0 (!%p912_p6), %v1125_v1 }
  0x19   : > { %999 = vmatpush3.bf16.msra.mxu0 %v1064_v3 }
  0x1a   : > { %1000 = vmatprep.subr.bf16.mxu0 %v1125_v1 }
  0x1d   : > { %1001 = vmatpush3.bf16.msra.mxu0 %v1065_v4 }
  0x1e   : > { %1002 = vmatprep.subr.bf16.mxu0 %v1125_v1 }
  0x21   : > { %1003 = vmatpush3.bf16.msra.mxu0 %v1066_v5 }
  0x22   : > { %1004 = vmatprep.subr.bf16.mxu0 %v1125_v1 }
  0x25   : > { %1005 = vmatpush3.bf16.msra.mxu0 %v1067_v6 }
  0x26   : > { %1006 = vmatprep.subr.bf16.mxu0 %v1125_v1 }
  0x29   : > { %1007 = vmatpush3.bf16.msra.mxu0 %v1068_v7 }
  0x2a   : > { %1008 = vmatprep.subr.bf16.mxu0 %v1125_v1 }
  0x2d   : > { %1009 = vmatpush3.bf16.msra.mxu0 %v1069_v8 }
  0x30   : > { %1011 = vmatmul.mubr.bf16.vlgmr.msra.gmra.mrb[0].mxu0 %v352_v9 }
 0x103   : > { %v451_v10 = vpop.f32.mrb[0].mxu0 }
 0x104   : > { %457 = vst [vmem:[#allocation2] sm:$0xff] %v451_v10  ;;  %v1012_v11 = vpop.f32.mrb[1].mxu0 }
 0x105   : > { %v454_v12 = vpop.f32.mrb[2].mxu0 }
 0x106   : > { %v1013_v13 = vpop.f32.mrb[3].mxu0 }
 0x107 PF: > { %v1070_v14 = vld [vmem:[%s1189_s6 + $0x40] sm:$0xff]   ;;  %v1127_v15 = vmov 0.0   ;;  %vm1128_vm1 = vmmov 0   ;;  %v1073_v18 = vld [vmem:[%s1189_s6 + $0x48] sm:$0xff]   ;;  %v1076_v21 = vld [vmem:[%s1189_s6 + $0x50] sm:$0xff]   ;;  %p948_p7 = scmp.ne.s32.totalorder %s1115_s18, 2 }
 0x108   : > { %1014 = vmatprep.subr.bf16.mxu1 %v1127_v15  ;;  %v1071_v16 = vld [vmem:[%s1189_s6] sm:$0xff]   ;;  %963 = vmatprep.subr.bf16.mxu0 %v1070_v14  ;;  %v1074_v19 = vld [vmem:[%s1189_s6 + $0x8] sm:$0xff]   ;;  %v1077_v22 = vld [vmem:[%s1189_s6 + $0x10] sm:$0xff]  }
 0x109   : > { %v1072_v17 = vld [vmem:[%s1189_s6 + $0x80] sm:$0xff]   ;;  %1030 = vmatprep.mubr.msk.bf16.mxu1 %vm1128_vm1, %v1127_v15  ;;  %964 = vmatpush3.bf16.msra.mxu0 %v1071_v16  ;;  %v1075_v20 = vld [vmem:[%s1189_s6 + $0x88] sm:$0xff]   ;;  %v1078_v23 = vld [vmem:[%s1189_s6 + $0x90] sm:$0xff]  }
 0x10a   : > { %1015 = vmatpush3.bf16.msra.mxu1 %v1072_v17  ;;  %965 = vmatprep.subr.bf16.mxu0 %v1073_v18  ;;  %v1079_v24 = vld [vmem:[%s1189_s6 + $0x58] sm:$0xff]   ;;  %v1082_v27 = vld [vmem:[%s1189_s6 + $0x60] sm:$0xff]   ;;  %v1085_v30 = vld [vmem:[%s1189_s6 + $0x68] sm:$0xff]  }
 0x10b   : > { %1016 = vmatprep.subr.bf16.mxu1 %v1127_v15  ;;  %v1080_v25 = vld [vmem:[%s1189_s6 + $0x18] sm:$0xff]   ;;  %v1083_v28 = vld [vmem:[%s1189_s6 + $0x20] sm:$0xff]   ;;  %v1086_v31 = vld [vmem:[%s1189_s6 + $0x28] sm:$0xff]  }
 0x10c   : > { %v1081_v26 = vld [vmem:[%s1189_s6 + $0x98] sm:$0xff]   ;;  %v1084_v29 = vld [vmem:[%s1189_s6 + $0xa0] sm:$0xff]   ;;  %v1087_v32 = vld [vmem:[%s1189_s6 + $0xa8] sm:$0xff]  }
 0x10d   : > { %966 = vmatpush3.bf16.msra.mxu0 %v1074_v19  ;;  %v1088_v33 = vld [vmem:[%s1189_s6 + $0x70] sm:$0xff]   ;;  %v1091_v36 = vld [vmem:[%s1189_s6 + $0x78] sm:$0xff]   ;;  %v459_v37 = vld [vmem:[%s1184_s27] sm:$0xff] }
 0x10e   : > { %1017 = vmatpush3.bf16.msra.mxu1 %v1075_v20  ;;  %967 = vmatprep.subr.bf16.mxu0 %v1076_v21  ;;  %v1089_v34 = vld [vmem:[%s1189_s6 + $0x30] sm:$0xff]   ;;  %v922_v38 = vcombine.high %v459_v37, %v459_v37  ;;  %v1092_v39 = vld [vmem:[%s1189_s6 + $0x38] sm:$0xff]   ;;  %v921_v41 = vcombine.low %v459_v37, %v459_v37  ;;  %v1096_v42 = vld [vmem:[%s1184_s27 + $0x8] ss:$0 sps:$4 sm:$0xff]  }
 0x10f   : > { %1018 = vmatprep.subr.bf16.mxu1 %v1127_v15  ;;  %v1090_v35 = vld [vmem:[%s1189_s6 + $0xb0] sm:$0xff]   ;;  %v1093_v40 = vld [vmem:[%s1189_s6 + $0xb8] sm:$0xff]   ;;  %v458_v49 = vld [vmem:[#allocation2] sm:$0xff] }
 0x110   : > { %696 = vmatprep.mubr.bf16.mxu0 %v922_v38  ;;  %v949_v56 = vld [vmem:[%s1263_s2] ss:$0 sm:$0xff] (!%p948_p7) }
 0x111   : > { %968 = vmatpush3.bf16.msra.mxu0 %v1077_v22 }
 0x112   : > { %1019 = vmatpush3.bf16.msra.mxu1 %v1078_v23  ;;  %969 = vmatprep.subr.bf16.mxu0 %v1079_v24 }
 0x113   : > { %1020 = vmatprep.subr.bf16.mxu1 %v1127_v15 }
 0x115   : > { %970 = vmatpush3.bf16.msra.mxu0 %v1080_v25 }
 0x116   : > { %1021 = vmatpush3.bf16.msra.mxu1 %v1081_v26  ;;  %971 = vmatprep.subr.bf16.mxu0 %v1082_v27 }
 0x117   : > { %1022 = vmatprep.subr.bf16.mxu1 %v1127_v15 }
 0x119   : > { %972 = vmatpush3.bf16.msra.mxu0 %v1083_v28 }
 0x11a   : > { %1023 = vmatpush3.bf16.msra.mxu1 %v1084_v29  ;;  %973 = vmatprep.subr.bf16.mxu0 %v1085_v30 }
 0x11b   : > { %1024 = vmatprep.subr.bf16.mxu1 %v1127_v15 }
 0x11d   : > { %974 = vmatpush3.bf16.msra.mxu0 %v1086_v31 }
 0x11e   : > { %1025 = vmatpush3.bf16.msra.mxu1 %v1087_v32  ;;  %975 = vmatprep.subr.bf16.mxu0 %v1088_v33 }
 0x11f   : > { %1026 = vmatprep.subr.bf16.mxu1 %v1127_v15 }
 0x121   : > { %976 = vmatpush3.bf16.msra.mxu0 %v1089_v34 }
 0x122   : > { %1027 = vmatpush3.bf16.msra.mxu1 %v1090_v35  ;;  %977 = vmatprep.subr.bf16.mxu0 %v1091_v36 }
 0x123   : > { %1028 = vmatprep.subr.bf16.mxu1 %v1127_v15 }
 0x125   : > { %978 = vmatpush3.bf16.msra.mxu0 %v1092_v39 }
 0x126   : > { %1029 = vmatpush3.bf16.msra.mxu1 %v1093_v40 }
 0x128   : > { %697 = vmatmul.mubr.bf16.vlgmr.msra.gmra.mrb[0].mxu0 %v921_v41 }
 0x129   : > { %1031 = vmatmul.mubr.bf16.vlgmr.msra.gmra.mrb[0].mxu1 %v1096_v42 }
 0x1fb   : > { %v979_v43 = vpop.f32.mrb[0].mxu0 }
 0x1fc   : > { %v738_v44 = vpop.f32.mrb[0].mxu1  ;;  %v980_v45 = vpop.f32.mrb[1].mxu0 }
 0x1fd   : > { %v981_v46 = vadd.f32 %v980_v45, %v979_v43  ;;  %v1032_v47 = vpop.f32.mrb[1].mxu1  ;;  %v982_v48 = vpop.f32.mrb[2].mxu0  ;;  %749 = sbr.rel (%p948_p7) target bundleno = 556 (0x22c), region = 48 }
 0x1fe   : > { %v741_v50 = vpop.f32.mrb[2].mxu1  ;;  %v983_v51 = vpop.f32.mrb[3].mxu0 }
 0x1ff   : > { %v739_v52 = vadd.f32 %v981_v46, %v738_v44  ;;  %v1033_v53 = vpop.f32.mrb[3].mxu1 }
 0x201   : > { %v744_v54 = vadd.f32 %v739_v52, %v458_v49 }
 0x203   : > { %745 = vst [vmem:[#allocation2] sm:$0xff] %v744_v54 }
 0x20a   : > { %v750_v55 = vld [vmem:[#allocation2] sm:$0xff] }
 0x20b   : > { %v758_v57 = vadd.f32 %v949_v56, %v750_v55 }
 0x20d   : > { %v950_v58 = vmul.f32 -1.442695, %v758_v57 }
 0x20f   : > { %1097 = vpow2.f32 %v950_v58 }
 0x219   : > { %v1098_v59 = vpop.eup %1097 }
 0x21a   : > { %v762_v60 = vadd.f32 1.0, %v1098_v59 }
 0x21c   : > { %1099 = vrcp.f32 %v762_v60 }
 0x226   : > { %v1100_v61 = vpop.eup %1099 }
 0x227   : > { %v765_v62 = vmul.f32 %v1100_v61, %v758_v57 }
 0x229   : > { %v766_v63 = vpack.c.bf16 %v765_v62, %v765_v62 }
 0x22b   : > { %767 = vst [vmem:[%s1266_s5] sm:$0xf] %v766_v63 }
 0x22c PF: > { %s15_s20 = sadd.s32 1, %s1123_s20   ;;  %s1267_s18 = smov %s1119_s19 }
 0x22d   : > { %p12_p8 = scmp.ge.s32.totalorder %s15_s20, 5   ;;  %s1268_s19 = smov %s1270_s21 }
 0x22f   :  { %14 = sbr.rel (!%p12_p8) target bundleno = 2 (0x2), region = 90 }

// kernel: resnet18_forward.28
= control target key start
LH: loop header
LB: loop body
LE: loop exit
PB: predicated region body
PF: predicated region fallthrough
CT: control target
= control target key end

     0   :  { %s959_s15 = smov 0   ;;  %s961_s16 = smov 0   ;;  %s1037_s0 = inlined_call_operand.vmem [shape: bf16[8,1152], index: 0, kind: input, shape index: {}]   ;;  %s1038_s1 = inlined_call_operand.vmem [shape: bf16[1152,128], index: 1, kind: input, shape index: {}]   ;;  %s1039_s2 = inlined_call_operand.vmem [shape: f32[1,128], index: 2, kind: input, shape index: {}]   ;;  %s1040_s3 = inlined_call_operand.vmem [shape: bf16[8,128], index: 3, kind: input, shape index: {}]   ;;  %s1041_s4 = inlined_call_operand.vmem [shape: bf16[8,128], index: 4, kind: output, shape index: {}]  }
   0x1   :  { %s963_s17 = smov 0  }
   0x2 LB: > { %s26_s18 = sadd.s32 1, %s925_s16  ;;  %p761_p0 = scmp.ge.s32.totalorder %s929_s17, 1  ;;  %s929_s17 = sphi %s963_s17, %s14_s17   ;;  %s925_s16 = sphi %s961_s16, %s1043_s16   ;;  %s921_s15 = sphi %s959_s15, %s1042_s15  }
   0x3   : > { %p27_p1 = scmp.ge.s32.totalorder %s26_s18, 3  ;;  %p228_p2 = scmp.lt.s32.totalorder %s929_s17, 4 }
   0x5   : > { %s1045_s18 = smov (%p27_p1, %s26_s18), 0  ;;  %p229_p3 = pnand %p761_p0, %p228_p2 }
   0x6   : > { %s278_s19 = smul.u32 (!%p229_p3), 3, %s921_s15  ;;  %p764_p6 = scmp.ne.s32.totalorder (!%p229_p3), %s921_s15, 0 }
   0x7   : > { %232 = sbr.rel (%p229_p3) target bundleno = 319 (0x13f), region = 36 }
   0x8   : > { %s288_s20 = smul.u32 (!%p229_p3), 48, %s921_s15  ;;  %p281_p4 = scmp.lt.s32.totalorder (!%p229_p3), %s278_s19, 8 }
   0xa   : > { %p289_p5 = scmp.lt.s32.totalorder (!%p229_p3), %s288_s20, 143 }
   0xe   : > { %s1047_s19 = smov (!%p281_p4, %s278_s19), 8  ;;  %s1049_s20 = smov (!%p289_p5, %s288_s20), 143 }
   0xf   : > { %s762_s21 = sshll.u32 %s1047_s19, 2  ;;  %s763_s25 = sshll.u32 %s1049_s20, 2  ;;  %v931_v0 = vmov (!%p764_p6), 0.0  }
  0x10   : > { %s984_s24 = scalar_lea.vmem %s1037_s0, %s762_s21  ;;  %s989_s28 = scalar_lea.vmem %s1038_s1, %s763_s25  ;;  %319 = vst [vmem:[#allocation2] sm:$0xff] (!%p764_p6), %v931_v0 }
  0x11   : > { %318 = sbr.rel (%p764_p6) target bundleno = 24 (0x18), region = 40 }
  0x18 PF: > { %v876_v1 = vld [vmem:[%s989_s28 + $0x40] sm:$0xff]   ;;  %v932_v2 = vmov 0.0   ;;  %vm933_vm0 = vmmov 0   ;;  %v879_v5 = vld [vmem:[%s989_s28 + $0x48] sm:$0xff]   ;;  %v882_v8 = vld [vmem:[%s989_s28 + $0x50] sm:$0xff]   ;;  %p792_p7 = scmp.ne.s32.totalorder %s921_s15, 2 }
  0x19   : > { %829 = vmatprep.subr.bf16.mxu1 %v932_v2  ;;  %v877_v3 = vld [vmem:[%s989_s28] sm:$0xff]   ;;  %798 = vmatprep.subr.bf16.mxu0 %v876_v1  ;;  %v880_v6 = vld [vmem:[%s989_s28 + $0x8] sm:$0xff]   ;;  %v883_v9 = vld [vmem:[%s989_s28 + $0x10] sm:$0xff]  }
  0x1a   : > { %v878_v4 = vld [vmem:[%s989_s28 + $0x80] sm:$0xff]   ;;  %845 = vmatprep.mubr.msk.bf16.mxu1 %vm933_vm0, %v932_v2  ;;  %799 = vmatpush3.bf16.msra.mxu0 %v877_v3  ;;  %v881_v7 = vld [vmem:[%s989_s28 + $0x88] sm:$0xff]   ;;  %v884_v10 = vld [vmem:[%s989_s28 + $0x90] sm:$0xff]  }
  0x1b   : > { %830 = vmatpush3.bf16.msra.mxu1 %v878_v4  ;;  %800 = vmatprep.subr.bf16.mxu0 %v879_v5  ;;  %v885_v11 = vld [vmem:[%s989_s28 + $0x58] sm:$0xff]   ;;  %v888_v14 = vld [vmem:[%s989_s28 + $0x60] sm:$0xff]   ;;  %v891_v17 = vld [vmem:[%s989_s28 + $0x68] sm:$0xff]  }
  0x1c   : > { %831 = vmatprep.subr.bf16.mxu1 %v932_v2  ;;  %v886_v12 = vld [vmem:[%s989_s28 + $0x18] sm:$0xff]   ;;  %v889_v15 = vld [vmem:[%s989_s28 + $0x20] sm:$0xff]   ;;  %v892_v18 = vld [vmem:[%s989_s28 + $0x28] sm:$0xff]  }
  0x1d   : > { %v887_v13 = vld [vmem:[%s989_s28 + $0x98] sm:$0xff]   ;;  %v890_v16 = vld [vmem:[%s989_s28 + $0xa0] sm:$0xff]   ;;  %v893_v19 = vld [vmem:[%s989_s28 + $0xa8] sm:$0xff]  }
  0x1e   : > { %801 = vmatpush3.bf16.msra.mxu0 %v880_v6  ;;  %v894_v20 = vld [vmem:[%s989_s28 + $0x70] sm:$0xff]   ;;  %v897_v23 = vld [vmem:[%s989_s28 + $0x78] sm:$0xff]   ;;  %v321_v24 = vld [vmem:[%s984_s24] sm:$0xff] }
  0x1f   : > { %832 = vmatpush3.bf16.msra.mxu1 %v881_v7  ;;  %802 = vmatprep.subr.bf16.mxu0 %v882_v8  ;;  %v895_v21 = vld [vmem:[%s989_s28 + $0x30] sm:$0xff]   ;;  %v766_v25 = vcombine.high %v321_v24, %v321_v24  ;;  %v898_v26 = vld [vmem:[%s989_s28 + $0x38] sm:$0xff]   ;;  %v765_v28 = vcombine.low %v321_v24, %v321_v24  ;;  %v902_v29 = vld [vmem:[%s984_s24 + $0x8] ss:$0 sps:$4 sm:$0xff]  }
  0x20   : > { %833 = vmatprep.subr.bf16.mxu1 %v932_v2  ;;  %v896_v22 = vld [vmem:[%s989_s28 + $0xb0] sm:$0xff]   ;;  %v899_v27 = vld [vmem:[%s989_s28 + $0xb8] sm:$0xff]   ;;  %v320_v36 = vld [vmem:[#allocation2] sm:$0xff] }
  0x21   : > { %558 = vmatprep.mubr.bf16.mxu0 %v766_v25  ;;  %v793_v43 = vld [vmem:[%s1039_s2] ss:$0 sm:$0xff] (!%p792_p7) }
  0x22   : > { %803 = vmatpush3.bf16.msra.mxu0 %v883_v9  ;;  %v621_v44 = vld [vmem:[%s1040_s3] sm:$0xf] (!%p792_p7) }
  0x23   : > { %834 = vmatpush3.bf16.msra.mxu1 %v884_v10  ;;  %804 = vmatprep.subr.bf16.mxu0 %v885_v11  ;;  %v622_v46 = vunpack.c.l.bf16 (!%p792_p7), %v621_v44 }
  0x24   : > { %835 = vmatprep.subr.bf16.mxu1 %v932_v2 }
  0x26   : > { %805 = vmatpush3.bf16.msra.mxu0 %v886_v12 }
  0x27   : > { %836 = vmatpush3.bf16.msra.mxu1 %v887_v13  ;;  %806 = vmatprep.subr.bf16.mxu0 %v888_v14 }
  0x28   : > { %837 = vmatprep.subr.bf16.mxu1 %v932_v2 }
  0x2a   : > { %807 = vmatpush3.bf16.msra.mxu0 %v889_v15 }
  0x2b   : > { %838 = vmatpush3.bf16.msra.mxu1 %v890_v16  ;;  %808 = vmatprep.subr.bf16.mxu0 %v891_v17 }
  0x2c   : > { %839 = vmatprep.subr.bf16.mxu1 %v932_v2 }
  0x2e   : > { %809 = vmatpush3.bf16.msra.mxu0 %v892_v18 }
  0x2f   : > { %840 = vmatpush3.bf16.msra.mxu1 %v893_v19  ;;  %810 = vmatprep.subr.bf16.mxu0 %v894_v20 }
  0x30   : > { %841 = vmatprep.subr.bf16.mxu1 %v932_v2 }
  0x32   : > { %811 = vmatpush3.bf16.msra.mxu0 %v895_v21 }
  0x33   : > { %842 = vmatpush3.bf16.msra.mxu1 %v896_v22  ;;  %812 = vmatprep.subr.bf16.mxu0 %v897_v23 }
  0x34   : > { %843 = vmatprep.subr.bf16.mxu1 %v932_v2 }
  0x36   : > { %813 = vmatpush3.bf16.msra.mxu0 %v898_v26 }
  0x37   : > { %844 = vmatpush3.bf16.msra.mxu1 %v899_v27 }
  0x39   : > { %559 = vmatmul.mubr.bf16.vlgmr.msra.gmra.mrb[0].mxu0 %v765_v28 }
  0x3a   : > { %846 = vmatmul.mubr.bf16.vlgmr.msra.gmra.mrb[0].mxu1 %v902_v29 }
 0x10c   : > { %v814_v30 = vpop.f32.mrb[0].mxu0 }
 0x10d   : > { %v600_v31 = vpop.f32.mrb[0].mxu1  ;;  %v815_v32 = vpop.f32.mrb[1].mxu0 }
 0x10e   : > { %v816_v33 = vadd.f32 %v815_v32, %v814_v30  ;;  %v847_v34 = vpop.f32.mrb[1].mxu1  ;;  %v817_v35 = vpop.f32.mrb[2].mxu0  ;;  %611 = sbr.rel (%p792_p7) target bundleno = 319 (0x13f), region = 44 }
 0x10f   : > { %v603_v37 = vpop.f32.mrb[2].mxu1  ;;  %v818_v38 = vpop.f32.mrb[3].mxu0 }
 0x110   : > { %v601_v39 = vadd.f32 %v816_v33, %v600_v31  ;;  %v848_v40 = vpop.f32.mrb[3].mxu1 }
 0x112   : > { %v606_v41 = vadd.f32 %v601_v39, %v320_v36 }
 0x114   : > { %607 = vst [vmem:[#allocation2] sm:$0xff] %v606_v41 }
 0x11b   : > { %v612_v42 = vld [vmem:[#allocation2] sm:$0xff] }
 0x11c   : > { %v620_v45 = vadd.f32 %v793_v43, %v612_v42 }
 0x11e   : > { %v623_v47 = vadd.f32 %v622_v46, %v620_v45 }
 0x120   : > { %v794_v48 = vmul.f32 -1.442695, %v623_v47 }
 0x122   : > { %903 = vpow2.f32 %v794_v48 }
 0x12c   : > { %v904_v49 = vpop.eup %903 }
 0x12d   : > { %v627_v50 = vadd.f32 1.0, %v904_v49 }
 0x12f   : > { %905 = vrcp.f32 %v627_v50 }
 0x139   : > { %v906_v51 = vpop.eup %905 }
 0x13a   : > { %v630_v52 = vmul.f32 %v906_v51, %v623_v47 }
 0x13c   : > { %v631_v53 = vpack.c.bf16 %v630_v52, %v630_v52 }
 0x13e   : > { %632 = vst [vmem:[%s1041_s4] sm:$0xf] %v631_v53 }
 0x13f PF: > { %s14_s17 = sadd.s32 1, %s929_s17   ;;  %s1042_s15 = smov %s925_s16 }
 0x140   : > { %p11_p8 = scmp.ge.s32.totalorder %s14_s17, 5   ;;  %s1043_s16 = smov %s1045_s18 }
 0x142   :  { %13 = sbr.rel (!%p11_p8) target bundleno = 2 (0x2), region = 83 }

// kernel: resnet18_forward.29
= control target key start
LH: loop header
LB: loop body
LE: loop exit
PB: predicated region body
PF: predicated region fallthrough
CT: control target
= control target key end

     0   :  { %s1058_s12 = smov 0   ;;  %s1060_s13 = smov 0   ;;  %s1157_s0 = inlined_call_operand.vmem [shape: bf16[8,1152], index: 0, kind: input, shape index: {}]   ;;  %s1158_s1 = inlined_call_operand.vmem [shape: bf16[1152,256], index: 1, kind: input, shape index: {}]   ;;  %s1159_s2 = inlined_call_operand.vmem [shape: f32[1,256], index: 2, kind: input, shape index: {}]   ;;  %s1160_s3 = inlined_call_operand.vmem [shape: bf16[8,256], index: 3, kind: output, shape index: {}]  }
   0x1   :  { %s1062_s14 = smov 0  }
   0x2 LB: > { %s25_s15 = sadd.s32 1, %s1030_s13  ;;  %p837_p0 = scmp.ge.s32.totalorder %s1034_s14, 1  ;;  %s1034_s14 = sphi %s1062_s14, %s13_s14   ;;  %s1030_s13 = sphi %s1060_s13, %s1162_s13   ;;  %s1026_s12 = sphi %s1058_s12, %s1161_s12  }
   0x3   : > { %p26_p1 = scmp.ge.s32.totalorder %s25_s15, 3  ;;  %p194_p2 = scmp.lt.s32.totalorder %s1034_s14, 4 }
   0x5   : > { %s1164_s15 = smov (%p26_p1, %s25_s15), 0  ;;  %p195_p3 = pnand %p837_p0, %p194_p2 }
   0x6   : > { %s240_s16 = smul.u32 (!%p195_p3), 3, %s1026_s12  ;;  %p841_p6 = scmp.ne.s32.totalorder (!%p195_p3), %s1026_s12, 0 }
   0x7   : > { %198 = sbr.rel (%p195_p3) target bundleno = 347 (0x15b), region = 32 }
   0x8   : > { %s250_s17 = smul.u32 (!%p195_p3), 48, %s1026_s12  ;;  %p243_p4 = scmp.lt.s32.totalorder (!%p195_p3), %s240_s16, 8 }
   0xa   : > { %p252_p5 = scmp.lt.s32.totalorder (!%p195_p3), %s250_s17, 143 }
   0xe   : > { %s1166_s16 = smov (!%p243_p4, %s240_s16), 8  ;;  %s1168_s17 = smov (!%p252_p5, %s250_s17), 143 }
   0xf   : > { %s838_s18 = sshll.u32 %s1166_s16, 2  ;;  %s901_s22 = sshll.u32 %s1168_s17, 3  ;;  %v1036_v0 = vmov (!%p841_p6), 0.0  }
  0x10   : > { %s1083_s21 = scalar_lea.vmem %s1157_s0, %s838_s18  ;;  %s1088_s25 = scalar_lea.vmem %s1158_s1, %s901_s22  ;;  %282 = vst [vmem:[#allocation2] sm:$0xff] (!%p841_p6), %v1036_v0  ;;  %283 = vst [vmem:[#allocation2 + $0x8] sm:$0xff] (!%p841_p6), %v1036_v0 }
  0x11   : > { %281 = sbr.rel (%p841_p6) target bundleno = 24 (0x18), region = 36 }
  0x18 PF: > { %v929_v1 = vld [vmem:[%s1088_s25 + $0x4] ss:$8 sps:$4 sm:$0xff]   ;;  %v931_v2 = vld [vmem:[%s1088_s25] ss:$8 sps:$4 sm:$0xff]   ;;  %v1037_v3 = vmov 0   ;;  %p893_p7 = scmp.ne.s32.totalorder %s1026_s12, 2 }
  0x19   : > { %660 = vmatprep.mubr.bf16.mxu1 %v1037_v3  ;;  %587 = vmatprep.subr.bf16.mxu0 %v929_v1  ;;  %v932_v4 = vld [vmem:[%s1088_s25 + $0x14] ss:$8 sps:$4 sm:$0xff]   ;;  %v934_v5 = vld [vmem:[%s1088_s25 + $0x10] ss:$8 sps:$4 sm:$0xff]   ;;  %v935_v6 = vld [vmem:[%s1088_s25 + $0x24] ss:$8 sps:$4 sm:$0xff]  }
  0x1a   : > { %588 = vmatpush1.bf16.msra.mxu0 %v931_v2  ;;  %v937_v7 = vld [vmem:[%s1088_s25 + $0x20] ss:$8 sps:$4 sm:$0xff]   ;;  %v938_v8 = vld [vmem:[%s1088_s25 + $0x34] ss:$8 sps:$4 sm:$0xff]   ;;  %v940_v9 = vld [vmem:[%s1088_s25 + $0x30] ss:$8 sps:$4 sm:$0xff]  }
  0x1b   : > { %589 = vmatprep.subr.bf16.mxu0 %v932_v4  ;;  %v953_v10 = vld [vmem:[%s1088_s25 + $0x104] ss:$8 sps:$4 sm:$0xff]   ;;  %v955_v11 = vld [vmem:[%s1088_s25 + $0x100] ss:$8 sps:$4 sm:$0xff]   ;;  %v959_v13 = vld [vmem:[%s1088_s25 + $0x114] ss:$8 sps:$4 sm:$0xff]   ;;  %v681_v4 = vlaneseq (!%p893_p7) }
  0x1c   : > { %v941_v12 = vld [vmem:[%s1088_s25 + $0x44] ss:$8 sps:$4 sm:$0xff]   ;;  %628 = vmatprep.subr.bf16.mxu1 %v953_v10  ;;  %v961_v14 = vld [vmem:[%s1088_s25 + $0x110] ss:$8 sps:$4 sm:$0xff]   ;;  %v943_v15 = vld [vmem:[%s1088_s25 + $0x40] ss:$8 sps:$4 sm:$0xff]  }
  0x1d   : > { %629 = vmatpush1.bf16.msra.mxu1 %v955_v11  ;;  %v944_v16 = vld [vmem:[%s1088_s25 + $0x54] ss:$8 sps:$4 sm:$0xff]   ;;  %v965_v17 = vld [vmem:[%s1088_s25 + $0x124] ss:$8 sps:$4 sm:$0xff]   ;;  %v967_v18 = vld [vmem:[%s1088_s25 + $0x120] ss:$8 sps:$4 sm:$0xff]  }
  0x1e   : > { %590 = vmatpush1.bf16.msra.mxu0 %v934_v5  ;;  %630 = vmatprep.subr.bf16.mxu1 %v959_v13  ;;  %v946_v19 = vld [vmem:[%s1088_s25 + $0x50] ss:$8 sps:$4 sm:$0xff]   ;;  %v971_v20 = vld [vmem:[%s1088_s25 + $0x134] ss:$8 sps:$4 sm:$0xff]   ;;  %v947_v21 = vld [vmem:[%s1088_s25 + $0x64] ss:$8 sps:$4 sm:$0xff]  }
  0x1f   : > { %591 = vmatprep.subr.bf16.mxu0 %v935_v6  ;;  %v973_v22 = vld [vmem:[%s1088_s25 + $0x130] ss:$8 sps:$4 sm:$0xff]   ;;  %v949_v23 = vld [vmem:[%s1088_s25 + $0x60] ss:$8 sps:$4 sm:$0xff]   ;;  %v977_v24 = vld [vmem:[%s1088_s25 + $0x144] ss:$8 sps:$4 sm:$0xff]  }
  0x20   : > { %v950_v25 = vld [vmem:[%s1088_s25 + $0x74] ss:$8 sps:$4 sm:$0xff]   ;;  %v979_v26 = vld [vmem:[%s1088_s25 + $0x140] ss:$8 sps:$4 sm:$0xff]   ;;  %v952_v27 = vld [vmem:[%s1088_s25 + $0x70] ss:$8 sps:$4 sm:$0xff]  }
  0x21   : > { %631 = vmatpush1.bf16.msra.mxu1 %v961_v14  ;;  %v983_v28 = vld [vmem:[%s1088_s25 + $0x154] ss:$8 sps:$4 sm:$0xff]   ;;  %v956_v29 = vld [vmem:[%s1088_s25 + $0x84] ss:$8 sps:$4 sm:$0xff]   ;;  %v985_v30 = vld [vmem:[%s1088_s25 + $0x150] ss:$8 sps:$4 sm:$0xff]  }
  0x22   : > { %592 = vmatpush1.bf16.msra.mxu0 %v937_v7  ;;  %632 = vmatprep.subr.bf16.mxu1 %v965_v17  ;;  %v958_v31 = vld [vmem:[%s1088_s25 + $0x80] ss:$8 sps:$4 sm:$0xff]   ;;  %v989_v32 = vld [vmem:[%s1088_s25 + $0x164] ss:$8 sps:$4 sm:$0xff]   ;;  %v962_v33 = vld [vmem:[%s1088_s25 + $0x94] ss:$8 sps:$4 sm:$0xff]  }
  0x23   : > { %593 = vmatprep.subr.bf16.mxu0 %v938_v8  ;;  %v286_v34 = vld [vmem:[%s1083_s21] sm:$0xff]  ;;  %v964_v37 = vld [vmem:[%s1088_s25 + $0x90] ss:$8 sps:$4 sm:$0xff]   ;;  %v995_v38 = vld [vmem:[%s1088_s25 + $0x174] ss:$8 sps:$4 sm:$0xff]   ;;  %v682_v5 = vshrl.u32 (!%p893_p7), %v681_v4, 7 }
  0x24   : > { %v843_v35 = vcombine.high %v286_v34, %v286_v34  ;;  %v991_v36 = vld [vmem:[%s1088_s25 + $0x160] ss:$8 sps:$4 sm:$0xff]   ;;  %v968_v39 = vld [vmem:[%s1088_s25 + $0xa4] ss:$8 sps:$4 sm:$0xff]   ;;  %v997_v40 = vld [vmem:[%s1088_s25 + $0x170] ss:$8 sps:$4 sm:$0xff]   ;;  %v842_v53 = vcombine.low %v286_v34, %v286_v34 }
  0x25   : > { %633 = vmatpush1.bf16.msra.mxu1 %v967_v18  ;;  %v970_v41 = vld [vmem:[%s1088_s25 + $0xa0] ss:$8 sps:$4 sm:$0xff]   ;;  %v974_v42 = vld [vmem:[%s1088_s25 + $0xb4] ss:$8 sps:$4 sm:$0xff]   ;;  %v976_v44 = vld [vmem:[%s1088_s25 + $0xb0] ss:$8 sps:$4 sm:$0xff]  }
  0x26   : > { %594 = vmatpush1.bf16.msra.mxu0 %v940_v9  ;;  %634 = vmatprep.subr.bf16.mxu1 %v971_v20  ;;  %v1001_v43 = vld [vmem:[%s1083_s21 + $0x8] ss:$0 sps:$4 sm:$0xff]   ;;  %v980_v45 = vld [vmem:[%s1088_s25 + $0xc4] ss:$8 sps:$4 sm:$0xff]   ;;  %v986_v47 = vld [vmem:[%s1088_s25 + $0xd4] ss:$8 sps:$4 sm:$0xff]  }
  0x27   : > { %595 = vmatprep.subr.bf16.mxu0 %v941_v12  ;;  %619 = vmatprep.mubr.bf16.mxu0 %v843_v35  ;;  %v982_v46 = vld [vmem:[%s1088_s25 + $0xc0] ss:$8 sps:$4 sm:$0xff]   ;;  %v988_v48 = vld [vmem:[%s1088_s25 + $0xd0] ss:$8 sps:$4 sm:$0xff]   ;;  %v992_v49 = vld [vmem:[%s1088_s25 + $0xe4] ss:$8 sps:$4 sm:$0xff]  }
  0x28   : > { %v994_v50 = vld [vmem:[%s1088_s25 + $0xe0] ss:$8 sps:$4 sm:$0xff]   ;;  %v998_v51 = vld [vmem:[%s1088_s25 + $0xf4] ss:$8 sps:$4 sm:$0xff]   ;;  %v1000_v52 = vld [vmem:[%s1088_s25 + $0xf0] ss:$8 sps:$4 sm:$0xff]  }
  0x29   : > { %635 = vmatpush1.bf16.msra.mxu1 %v973_v22  ;;  %v284_v58 = vld [vmem:[#allocation2] sm:$0xff]  ;;  %v285_v61 = vld [vmem:[#allocation2 + $0x8] sm:$0xff]  ;;  %v683_v7 = vsub.s32 (!%p893_p7), 0, %v682_v5  ;;  %v687_v8 = vsub.s32 (!%p893_p7), 1, %v682_v5 }
  0x2a   : > { %596 = vmatpush1.bf16.msra.mxu0 %v943_v15  ;;  %636 = vmatprep.subr.bf16.mxu1 %v977_v24  ;;  %v679_v6 = vld [vmem:[%s1159_s2] sm:$0x3] (!%p893_p7) }
  0x2b   : > { %597 = vmatprep.subr.bf16.mxu0 %v944_v16  ;;  %v684_v11 = vrot.slane (!%p893_p7), %v679_v6, %v683_v7  ;;  %v688_v12 = vrot.slane (!%p893_p7), %v679_v6, %v687_v8 }
  0x2d   : > { %637 = vmatpush1.bf16.msra.mxu1 %v979_v26 }
  0x2e   : > { %598 = vmatpush1.bf16.msra.mxu0 %v946_v19  ;;  %638 = vmatprep.subr.bf16.mxu1 %v983_v28 }
  0x2f   : > { %599 = vmatprep.subr.bf16.mxu0 %v947_v21 }
  0x31   : > { %639 = vmatpush1.bf16.msra.mxu1 %v985_v30 }
  0x32   : > { %600 = vmatpush1.bf16.msra.mxu0 %v949_v23  ;;  %640 = vmatprep.subr.bf16.mxu1 %v989_v32 }
  0x33   : > { %601 = vmatprep.subr.bf16.mxu0 %v950_v25 }
  0x35   : > { %641 = vmatpush1.bf16.msra.mxu1 %v991_v36 }
  0x36   : > { %602 = vmatpush1.bf16.msra.mxu0 %v952_v27  ;;  %642 = vmatprep.subr.bf16.mxu1 %v995_v38 }
  0x37   : > { %603 = vmatprep.subr.bf16.mxu0 %v956_v29 }
  0x39   : > { %643 = vmatpush1.bf16.msra.mxu1 %v997_v40 }
  0x3a   : > { %604 = vmatpush1.bf16.msra.mxu0 %v958_v31 }
  0x3b   : > { %605 = vmatprep.subr.bf16.mxu0 %v962_v33 }
  0x3c   : > { %661 = vmatmul.mubr.bf16.vlgmr.msra.gmra.mrb[0].mxu1 %v1001_v43 }
  0x3e   : > { %606 = vmatpush1.bf16.msra.mxu0 %v964_v37 }
  0x3f   : > { %607 = vmatprep.subr.bf16.mxu0 %v968_v39 }
  0x42   : > { %608 = vmatpush1.bf16.msra.mxu0 %v970_v41 }
  0x43   : > { %609 = vmatprep.subr.bf16.mxu0 %v974_v42 }
  0x46   : > { %610 = vmatpush1.bf16.msra.mxu0 %v976_v44 }
  0x47   : > { %611 = vmatprep.subr.bf16.mxu0 %v980_v45 }
  0x4a   : > { %612 = vmatpush1.bf16.msra.mxu0 %v982_v46 }
  0x4b   : > { %613 = vmatprep.subr.bf16.mxu0 %v986_v47 }
  0x4e   : > { %614 = vmatpush1.bf16.msra.mxu0 %v988_v48 }
  0x4f   : > { %615 = vmatprep.subr.bf16.mxu0 %v992_v49 }
  0x52   : > { %616 = vmatpush1.bf16.msra.mxu0 %v994_v50 }
  0x53   : > { %617 = vmatprep.subr.bf16.mxu0 %v998_v51 }
  0x56   : > { %618 = vmatpush1.bf16.msra.mxu0 %v1000_v52 }
  0x59   : > { %620 = vmatmul.mubr.bf16.vlgmr.msra.gmra.mrb[0].mxu0 %v842_v53 }
 0x10f   : > { %v662_v54 = vpop.f32.mrb[0].mxu1 }
 0x110   : > { %v664_v55 = vpop.f32.mrb[1].mxu1 }
 0x111   : > { %v666_v56 = vpop.f32.mrb[2].mxu1 }
 0x112   : > { %v667_v57 = vpop.f32.mrb[3].mxu1 }
 0x12c   : > { %v621_v59 = vpop.f32.mrb[0].mxu0  ;;  %676 = sbr.rel (%p893_p7) target bundleno = 347 (0x15b), region = 40 }
 0x12d   : > { %v663_v60 = vadd.f32 %v662_v54, %v621_v59  ;;  %v623_v62 = vpop.f32.mrb[1].mxu0 }
 0x12e   : > { %v665_v63 = vadd.f32 %v664_v55, %v623_v62  ;;  %v625_v0 = vpop.f32.mrb[2].mxu0 }
 0x12f   : > { %v669_v1 = vadd.f32 %v663_v60, %v284_v58  ;;  %v626_v2 = vpop.f32.mrb[3].mxu0 }
 0x130   : > { %v670_v3 = vadd.f32 %v665_v63, %v285_v61 }
 0x131   : > { %671 = vst [vmem:[#allocation2] sm:$0xff] %v669_v1 }
 0x132   : > { %672 = vst [vmem:[#allocation2 + $0x8] sm:$0xff] %v670_v3 }
 0x138   : > { %v677_v9 = vld [vmem:[#allocation2] sm:$0xff] }
 0x139   : > { %v678_v10 = vld [vmem:[#allocation2 + $0x8] sm:$0xff]  ;;  %v691_v13 = vadd.f32 %v684_v11, %v677_v9 }
 0x13a   : > { %v692_v14 = vadd.f32 %v688_v12, %v678_v10 }
 0x13b   : > { %v894_v15 = vmul.f32 -1.442695, %v691_v13 }
 0x13c   : > { %v895_v16 = vmul.f32 -1.442695, %v692_v14 }
 0x13d   : > { %1004 = vpow2.f32 %v894_v15 }
 0x13e   : > { %1006 = vpow2.f32 %v895_v16 }
 0x147   : > { %v1005_v17 = vpop.eup %1004 }
 0x148   : > { %v1007_v18 = vpop.eup %1006  ;;  %v699_v19 = vadd.f32 1.0, %v1005_v17 }
 0x149   : > { %v700_v20 = vadd.f32 1.0, %v1007_v18 }
 0x14a   : > { %1008 = vrcp.f32 %v699_v19 }
 0x14b   : > { %1010 = vrcp.f32 %v700_v20 }
 0x154   : > { %v1009_v21 = vpop.eup %1008 }
 0x155   : > { %v1011_v22 = vpop.eup %1010  ;;  %v705_v23 = vmul.f32 %v1009_v21, %v691_v13 }
 0x156   : > { %v706_v24 = vmul.f32 %v1011_v22, %v692_v14 }
 0x158   : > { %v902_v25 = vpack.c.bf16 %v706_v24, %v705_v23 }
 0x15a   : > { %715 = vst [vmem:[%s1160_s3] sm:$0xff] %v902_v25 }
 0x15b PF: > { %s13_s14 = sadd.s32 1, %s1034_s14   ;;  %s1161_s12 = smov %s1030_s13 }
 0x15c   : > { %p10_p8 = scmp.ge.s32.totalorder %s13_s14, 5   ;;  %s1162_s13 = smov %s1164_s15 }
 0x15e   :  { %12 = sbr.rel (!%p10_p8) target bundleno = 2 (0x2), region = 76 }

// kernel: resnet18_forward.32
= control target key start
LH: loop header
LB: loop body
LE: loop exit
PB: predicated region body
PF: predicated region fallthrough
CT: control target
= control target key end

     0   :  { %s1153_s15 = smov 0   ;;  %s1155_s16 = smov 0   ;;  %s1255_s0 = inlined_call_operand.vmem [shape: bf16[8,2304], index: 0, kind: input, shape index: {}]   ;;  %s1256_s1 = inlined_call_operand.vmem [shape: bf16[2304,256], index: 1, kind: input, shape index: {}]   ;;  %s1257_s2 = inlined_call_operand.vmem [shape: f32[1,256], index: 2, kind: input, shape index: {}]   ;;  %s1258_s3 = inlined_call_operand.vmem [shape: bf16[8,256], index: 3, kind: input, shape index: {}]   ;;  %s1259_s4 = inlined_call_operand.vmem [shape: bf16[8,256], index: 4, kind: output, shape index: {}]  }
   0x1   :  { %s1157_s17 = smov 0  }
   0x2 LB: > { %s26_s18 = sadd.s32 1, %s1120_s16  ;;  %p927_p0 = scmp.ge.s32.totalorder %s1124_s17, 1  ;;  %s1124_s17 = sphi %s1157_s17, %s14_s17   ;;  %s1120_s16 = sphi %s1155_s16, %s1261_s16   ;;  %s1116_s15 = sphi %s1153_s15, %s1260_s15  }
   0x3   : > { %p27_p1 = scmp.ge.s32.totalorder %s26_s18, 6  ;;  %p236_p2 = scmp.lt.s32.totalorder %s1124_s17, 7 }
   0x5   : > { %s1263_s18 = smov (%p27_p1, %s26_s18), 0  ;;  %p237_p3 = pnand %p927_p0, %p236_p2 }
   0x6   : > { %s293_s19 = smul.u32 (!%p237_p3), 3, %s1116_s15  ;;  %p931_p6 = scmp.ne.s32.totalorder (!%p237_p3), %s1116_s15, 0 }
   0x7   : > { %240 = sbr.rel (%p237_p3) target bundleno = 349 (0x15d), region = 36 }
   0x8   : > { %s303_s20 = smul.u32 (!%p237_p3), 48, %s1116_s15  ;;  %p296_p4 = scmp.lt.s32.totalorder (!%p237_p3), %s293_s19, 17 }
   0xa   : > { %p305_p5 = scmp.lt.s32.totalorder (!%p237_p3), %s303_s20, 287 }
   0xe   : > { %s1265_s19 = smov (!%p296_p4, %s293_s19), 17  ;;  %s1267_s20 = smov (!%p305_p5, %s303_s20), 287 }
   0xf   : > { %s928_s21 = sshll.u32 %s1265_s19, 2  ;;  %s991_s25 = sshll.u32 %s1267_s20, 3  ;;  %v1126_v0 = vmov (!%p931_p6), 0.0  }
  0x10   : > { %s1178_s24 = scalar_lea.vmem %s1255_s0, %s928_s21  ;;  %s1183_s28 = scalar_lea.vmem %s1256_s1, %s991_s25  ;;  %345 = vst [vmem:[#allocation2] sm:$0xff] (!%p931_p6), %v1126_v0  ;;  %346 = vst [vmem:[#allocation2 + $0x8] sm:$0xff] (!%p931_p6), %v1126_v0 }
  0x11   : > { %344 = sbr.rel (%p931_p6) target bundleno = 24 (0x18), region = 40 }
  0x18 PF: > { %v1019_v1 = vld [vmem:[%s1183_s28 + $0x4] ss:$8 sps:$4 sm:$0xff]   ;;  %v1021_v2 = vld [vmem:[%s1183_s28] ss:$8 sps:$4 sm:$0xff]   ;;  %v1127_v3 = vmov 0   ;;  %p983_p7 = scmp.ne.s32.totalorder %s1116_s15, 5 }
  0x19   : > { %723 = vmatprep.mubr.bf16.mxu1 %v1127_v3  ;;  %650 = vmatprep.subr.bf16.mxu0 %v1019_v1  ;;  %v1022_v4 = vld [vmem:[%s1183_s28 + $0x14] ss:$8 sps:$4 sm:$0xff]   ;;  %v1024_v5 = vld [vmem:[%s1183_s28 + $0x10] ss:$8 sps:$4 sm:$0xff]   ;;  %v1025_v6 = vld [vmem:[%s1183_s28 + $0x24] ss:$8 sps:$4 sm:$0xff]  }
  0x1a   : > { %651 = vmatpush1.bf16.msra.mxu0 %v1021_v2  ;;  %v1027_v7 = vld [vmem:[%s1183_s28 + $0x20] ss:$8 sps:$4 sm:$0xff]   ;;  %v1028_v8 = vld [vmem:[%s1183_s28 + $0x34] ss:$8 sps:$4 sm:$0xff]   ;;  %v1030_v9 = vld [vmem:[%s1183_s28 + $0x30] ss:$8 sps:$4 sm:$0xff]  }
  0x1b   : > { %652 = vmatprep.subr.bf16.mxu0 %v1022_v4  ;;  %v1043_v10 = vld [vmem:[%s1183_s28 + $0x104] ss:$8 sps:$4 sm:$0xff]   ;;  %v1045_v11 = vld [vmem:[%s1183_s28 + $0x100] ss:$8 sps:$4 sm:$0xff]   ;;  %v1049_v13 = vld [vmem:[%s1183_s28 + $0x114] ss:$8 sps:$4 sm:$0xff]   ;;  %v744_v4 = vlaneseq (!%p983_p7) }
  0x1c   : > { %v1031_v12 = vld [vmem:[%s1183_s28 + $0x44] ss:$8 sps:$4 sm:$0xff]   ;;  %691 = vmatprep.subr.bf16.mxu1 %v1043_v10  ;;  %v1051_v14 = vld [vmem:[%s1183_s28 + $0x110] ss:$8 sps:$4 sm:$0xff]   ;;  %v1033_v15 = vld [vmem:[%s1183_s28 + $0x40] ss:$8 sps:$4 sm:$0xff]  }
  0x1d   : > { %692 = vmatpush1.bf16.msra.mxu1 %v1045_v11  ;;  %v1034_v16 = vld [vmem:[%s1183_s28 + $0x54] ss:$8 sps:$4 sm:$0xff]   ;;  %v1055_v17 = vld [vmem:[%s1183_s28 + $0x124] ss:$8 sps:$4 sm:$0xff]   ;;  %v1057_v18 = vld [vmem:[%s1183_s28 + $0x120] ss:$8 sps:$4 sm:$0xff]  }
  0x1e   : > { %653 = vmatpush1.bf16.msra.mxu0 %v1024_v5  ;;  %693 = vmatprep.subr.bf16.mxu1 %v1049_v13  ;;  %v1036_v19 = vld [vmem:[%s1183_s28 + $0x50] ss:$8 sps:$4 sm:$0xff]   ;;  %v1061_v20 = vld [vmem:[%s1183_s28 + $0x134] ss:$8 sps:$4 sm:$0xff]   ;;  %v1037_v21 = vld [vmem:[%s1183_s28 + $0x64] ss:$8 sps:$4 sm:$0xff]  }
  0x1f   : > { %654 = vmatprep.subr.bf16.mxu0 %v1025_v6  ;;  %v1063_v22 = vld [vmem:[%s1183_s28 + $0x130] ss:$8 sps:$4 sm:$0xff]   ;;  %v1039_v23 = vld [vmem:[%s1183_s28 + $0x60] ss:$8 sps:$4 sm:$0xff]   ;;  %v1067_v24 = vld [vmem:[%s1183_s28 + $0x144] ss:$8 sps:$4 sm:$0xff]  }
  0x20   : > { %v1040_v25 = vld [vmem:[%s1183_s28 + $0x74] ss:$8 sps:$4 sm:$0xff]   ;;  %v1069_v26 = vld [vmem:[%s1183_s28 + $0x140] ss:$8 sps:$4 sm:$0xff]   ;;  %v1042_v27 = vld [vmem:[%s1183_s28 + $0x70] ss:$8 sps:$4 sm:$0xff]  }
  0x21   : > { %694 = vmatpush1.bf16.msra.mxu1 %v1051_v14  ;;  %v1073_v28 = vld [vmem:[%s1183_s28 + $0x154] ss:$8 sps:$4 sm:$0xff]   ;;  %v1046_v29 = vld [vmem:[%s1183_s28 + $0x84] ss:$8 sps:$4 sm:$0xff]   ;;  %v1075_v30 = vld [vmem:[%s1183_s28 + $0x150] ss:$8 sps:$4 sm:$0xff]  }
  0x22   : > { %655 = vmatpush1.bf16.msra.mxu0 %v1027_v7  ;;  %695 = vmatprep.subr.bf16.mxu1 %v1055_v17  ;;  %v1048_v31 = vld [vmem:[%s1183_s28 + $0x80] ss:$8 sps:$4 sm:$0xff]   ;;  %v1079_v32 = vld [vmem:[%s1183_s28 + $0x164] ss:$8 sps:$4 sm:$0xff]   ;;  %v1052_v33 = vld [vmem:[%s1183_s28 + $0x94] ss:$8 sps:$4 sm:$0xff]  }
  0x23   : > { %656 = vmatprep.subr.bf16.mxu0 %v1028_v8  ;;  %v349_v34 = vld [vmem:[%s1178_s24] sm:$0xff]  ;;  %v1054_v37 = vld [vmem:[%s1183_s28 + $0x90] ss:$8 sps:$4 sm:$0xff]   ;;  %v1085_v38 = vld [vmem:[%s1183_s28 + $0x174] ss:$8 sps:$4 sm:$0xff]   ;;  %v745_v5 = vshrl.u32 (!%p983_p7), %v744_v4, 7 }
  0x24   : > { %v933_v35 = vcombine.high %v349_v34, %v349_v34  ;;  %v1081_v36 = vld [vmem:[%s1183_s28 + $0x160] ss:$8 sps:$4 sm:$0xff]   ;;  %v1058_v39 = vld [vmem:[%s1183_s28 + $0xa4] ss:$8 sps:$4 sm:$0xff]   ;;  %v1087_v40 = vld [vmem:[%s1183_s28 + $0x170] ss:$8 sps:$4 sm:$0xff]   ;;  %v932_v53 = vcombine.low %v349_v34, %v349_v34 }
  0x25   : > { %696 = vmatpush1.bf16.msra.mxu1 %v1057_v18  ;;  %v1060_v41 = vld [vmem:[%s1183_s28 + $0xa0] ss:$8 sps:$4 sm:$0xff]   ;;  %v1064_v42 = vld [vmem:[%s1183_s28 + $0xb4] ss:$8 sps:$4 sm:$0xff]   ;;  %v1066_v44 = vld [vmem:[%s1183_s28 + $0xb0] ss:$8 sps:$4 sm:$0xff]  }
  0x26   : > { %657 = vmatpush1.bf16.msra.mxu0 %v1030_v9  ;;  %697 = vmatprep.subr.bf16.mxu1 %v1061_v20  ;;  %v1091_v43 = vld [vmem:[%s1178_s24 + $0x8] ss:$0 sps:$4 sm:$0xff]   ;;  %v1070_v45 = vld [vmem:[%s1183_s28 + $0xc4] ss:$8 sps:$4 sm:$0xff]   ;;  %v1076_v47 = vld [vmem:[%s1183_s28 + $0xd4] ss:$8 sps:$4 sm:$0xff]  }
  0x27   : > { %658 = vmatprep.subr.bf16.mxu0 %v1031_v12  ;;  %682 = vmatprep.mubr.bf16.mxu0 %v933_v35  ;;  %v1072_v46 = vld [vmem:[%s1183_s28 + $0xc0] ss:$8 sps:$4 sm:$0xff]   ;;  %v1078_v48 = vld [vmem:[%s1183_s28 + $0xd0] ss:$8 sps:$4 sm:$0xff]   ;;  %v1082_v49 = vld [vmem:[%s1183_s28 + $0xe4] ss:$8 sps:$4 sm:$0xff]  }
  0x28   : > { %v1084_v50 = vld [vmem:[%s1183_s28 + $0xe0] ss:$8 sps:$4 sm:$0xff]   ;;  %v1088_v51 = vld [vmem:[%s1183_s28 + $0xf4] ss:$8 sps:$4 sm:$0xff]   ;;  %v1090_v52 = vld [vmem:[%s1183_s28 + $0xf0] ss:$8 sps:$4 sm:$0xff]  }
  0x29   : > { %698 = vmatpush1.bf16.msra.mxu1 %v1063_v22  ;;  %v347_v58 = vld [vmem:[#allocation2] sm:$0xff]  ;;  %v348_v61 = vld [vmem:[#allocation2 + $0x8] sm:$0xff]  ;;  %v746_v8 = vsub.s32 (!%p983_p7), 0, %v745_v5  ;;  %v750_v9 = vsub.s32 (!%p983_p7), 1, %v745_v5 }
  0x2a   : > { %659 = vmatpush1.bf16.msra.mxu0 %v1033_v15  ;;  %699 = vmatprep.subr.bf16.mxu1 %v1067_v24  ;;  %v742_v6 = vld [vmem:[%s1257_s2] sm:$0x3] (!%p983_p7) }
  0x2b   : > { %660 = vmatprep.subr.bf16.mxu0 %v1034_v16  ;;  %v756_v7 = vld [vmem:[%s1258_s3] sm:$0xff] (!%p983_p7)  ;;  %v747_v12 = vrot.slane (!%p983_p7), %v742_v6, %v746_v8  ;;  %v751_v13 = vrot.slane (!%p983_p7), %v742_v6, %v750_v9 }
  0x2c   : > { %v757_v14 = vunpack.c.l.bf16 (!%p983_p7), %v756_v7  ;;  %v758_v15 = vunpack.c.h.bf16 (!%p983_p7), %v756_v7 }
  0x2d   : > { %700 = vmatpush1.bf16.msra.mxu1 %v1069_v26 }
  0x2e   : > { %661 = vmatpush1.bf16.msra.mxu0 %v1036_v19  ;;  %701 = vmatprep.subr.bf16.mxu1 %v1073_v28 }
  0x2f   : > { %662 = vmatprep.subr.bf16.mxu0 %v1037_v21 }
  0x31   : > { %702 = vmatpush1.bf16.msra.mxu1 %v1075_v30 }
  0x32   : > { %663 = vmatpush1.bf16.msra.mxu0 %v1039_v23  ;;  %703 = vmatprep.subr.bf16.mxu1 %v1079_v32 }
  0x33   : > { %664 = vmatprep.subr.bf16.mxu0 %v1040_v25 }
  0x35   : > { %704 = vmatpush1.bf16.msra.mxu1 %v1081_v36 }
  0x36   : > { %665 = vmatpush1.bf16.msra.mxu0 %v1042_v27  ;;  %705 = vmatprep.subr.bf16.mxu1 %v1085_v38 }
  0x37   : > { %666 = vmatprep.subr.bf16.mxu0 %v1046_v29 }
  0x39   : > { %706 = vmatpush1.bf16.msra.mxu1 %v1087_v40 }
  0x3a   : > { %667 = vmatpush1.bf16.msra.mxu0 %v1048_v31 }
  0x3b   : > { %668 = vmatprep.subr.bf16.mxu0 %v1052_v33 }
  0x3c   : > { %724 = vmatmul.mubr.bf16.vlgmr.msra.gmra.mrb[0].mxu1 %v1091_v43 }
  0x3e   : > { %669 = vmatpush1.bf16.msra.mxu0 %v1054_v37 }
  0x3f   : > { %670 = vmatprep.subr.bf16.mxu0 %v1058_v39 }
  0x42   : > { %671 = vmatpush1.bf16.msra.mxu0 %v1060_v41 }
  0x43   : > { %672 = vmatprep.subr.bf16.mxu0 %v1064_v42 }
  0x46   : > { %673 = vmatpush1.bf16.msra.mxu0 %v1066_v44 }
  0x47   : > { %674 = vmatprep.subr.bf16.mxu0 %v1070_v45 }
  0x4a   : > { %675 = vmatpush1.bf16.msra.mxu0 %v1072_v46 }
  0x4b   : > { %676 = vmatprep.subr.bf16.mxu0 %v1076_v47 }
  0x4e   : > { %677 = vmatpush1.bf16.msra.mxu0 %v1078_v48 }
  0x4f   : > { %678 = vmatprep.subr.bf16.mxu0 %v1082_v49 }
  0x52   : > { %679 = vmatpush1.bf16.msra.mxu0 %v1084_v50 }
  0x53   : > { %680 = vmatprep.subr.bf16.mxu0 %v1088_v51 }
  0x56   : > { %681 = vmatpush1.bf16.msra.mxu0 %v1090_v52 }
  0x59   : > { %683 = vmatmul.mubr.bf16.vlgmr.msra.gmra.mrb[0].mxu0 %v932_v53 }
 0x10f   : > { %v725_v54 = vpop.f32.mrb[0].mxu1 }
 0x110   : > { %v727_v55 = vpop.f32.mrb[1].mxu1 }
 0x111   : > { %v729_v56 = vpop.f32.mrb[2].mxu1 }
 0x112   : > { %v730_v57 = vpop.f32.mrb[3].mxu1 }
 0x12c   : > { %v684_v59 = vpop.f32.mrb[0].mxu0  ;;  %739 = sbr.rel (%p983_p7) target bundleno = 349 (0x15d), region = 44 }
 0x12d   : > { %v726_v60 = vadd.f32 %v725_v54, %v684_v59  ;;  %v686_v62 = vpop.f32.mrb[1].mxu0 }
 0x12e   : > { %v728_v63 = vadd.f32 %v727_v55, %v686_v62  ;;  %v688_v0 = vpop.f32.mrb[2].mxu0 }
 0x12f   : > { %v732_v1 = vadd.f32 %v726_v60, %v347_v58  ;;  %v689_v2 = vpop.f32.mrb[3].mxu0 }
 0x130   : > { %v733_v3 = vadd.f32 %v728_v63, %v348_v61 }
 0x131   : > { %734 = vst [vmem:[#allocation2] sm:$0xff] %v732_v1 }
 0x132   : > { %735 = vst [vmem:[#allocation2 + $0x8] sm:$0xff] %v733_v3 }
 0x138   : > { %v740_v10 = vld [vmem:[#allocation2] sm:$0xff] }
 0x139   : > { %v741_v11 = vld [vmem:[#allocation2 + $0x8] sm:$0xff]  ;;  %v754_v16 = vadd.f32 %v747_v12, %v740_v10 }
 0x13a   : > { %v755_v17 = vadd.f32 %v751_v13, %v741_v11 }
 0x13b   : > { %v759_v18 = vadd.f32 %v757_v14, %v754_v16 }
 0x13c   : > { %v760_v19 = vadd.f32 %v758_v15, %v755_v17 }
 0x13d   : > { %v984_v20 = vmul.f32 -1.442695, %v759_v18 }
 0x13e   : > { %v985_v21 = vmul.f32 -1.442695, %v760_v19 }
 0x13f   : > { %1094 = vpow2.f32 %v984_v20 }
 0x140   : > { %1096 = vpow2.f32 %v985_v21 }
 0x149   : > { %v1095_v22 = vpop.eup %1094 }
 0x14a   : > { %v1097_v23 = vpop.eup %1096  ;;  %v767_v24 = vadd.f32 1.0, %v1095_v22 }
 0x14b   : > { %v768_v25 = vadd.f32 1.0, %v1097_v23 }
 0x14c   : > { %1098 = vrcp.f32 %v767_v24 }
 0x14d   : > { %1100 = vrcp.f32 %v768_v25 }
 0x156   : > { %v1099_v26 = vpop.eup %1098 }
 0x157   : > { %v1101_v27 = vpop.eup %1100  ;;  %v773_v28 = vmul.f32 %v1099_v26, %v759_v18 }
 0x158   : > { %v774_v29 = vmul.f32 %v1101_v27, %v760_v19 }
 0x15a   : > { %v992_v30 = vpack.c.bf16 %v774_v29, %v773_v28 }
 0x15c   : > { %783 = vst [vmem:[%s1259_s4] sm:$0xff] %v992_v30 }
 0x15d PF: > { %s14_s17 = sadd.s32 1, %s1124_s17   ;;  %s1260_s15 = smov %s1120_s16 }
 0x15e   : > { %p11_p8 = scmp.ge.s32.totalorder %s14_s17, 8   ;;  %s1261_s16 = smov %s1263_s18 }
 0x160   :  { %13 = sbr.rel (!%p11_p8) target bundleno = 2 (0x2), region = 83 }

// kernel: resnet18_forward.31
= control target key start
LH: loop header
LB: loop body
LE: loop exit
PB: predicated region body
PF: predicated region fallthrough
CT: control target
= control target key end

     0   :  { %s1058_s12 = smov 0   ;;  %s1060_s13 = smov 0   ;;  %s1157_s0 = inlined_call_operand.vmem [shape: bf16[8,2304], index: 0, kind: input, shape index: {}]   ;;  %s1158_s1 = inlined_call_operand.vmem [shape: bf16[2304,256], index: 1, kind: input, shape index: {}]   ;;  %s1159_s2 = inlined_call_operand.vmem [shape: f32[1,256], index: 2, kind: input, shape index: {}]   ;;  %s1160_s3 = inlined_call_operand.vmem [shape: bf16[8,256], index: 3, kind: output, shape index: {}]  }
   0x1   :  { %s1062_s14 = smov 0  }
   0x2 LB: > { %s25_s15 = sadd.s32 1, %s1030_s13  ;;  %p837_p0 = scmp.ge.s32.totalorder %s1034_s14, 1  ;;  %s1034_s14 = sphi %s1062_s14, %s13_s14   ;;  %s1030_s13 = sphi %s1060_s13, %s1162_s13   ;;  %s1026_s12 = sphi %s1058_s12, %s1161_s12  }
   0x3   : > { %p26_p1 = scmp.ge.s32.totalorder %s25_s15, 6  ;;  %p194_p2 = scmp.lt.s32.totalorder %s1034_s14, 7 }
   0x5   : > { %s1164_s15 = smov (%p26_p1, %s25_s15), 0  ;;  %p195_p3 = pnand %p837_p0, %p194_p2 }
   0x6   : > { %s240_s16 = smul.u32 (!%p195_p3), 3, %s1026_s12  ;;  %p841_p6 = scmp.ne.s32.totalorder (!%p195_p3), %s1026_s12, 0 }
   0x7   : > { %198 = sbr.rel (%p195_p3) target bundleno = 347 (0x15b), region = 32 }
   0x8   : > { %s250_s17 = smul.u32 (!%p195_p3), 48, %s1026_s12  ;;  %p243_p4 = scmp.lt.s32.totalorder (!%p195_p3), %s240_s16, 17 }
   0xa   : > { %p252_p5 = scmp.lt.s32.totalorder (!%p195_p3), %s250_s17, 287 }
   0xe   : > { %s1166_s16 = smov (!%p243_p4, %s240_s16), 17  ;;  %s1168_s17 = smov (!%p252_p5, %s250_s17), 287 }
   0xf   : > { %s838_s18 = sshll.u32 %s1166_s16, 2  ;;  %s901_s22 = sshll.u32 %s1168_s17, 3  ;;  %v1036_v0 = vmov (!%p841_p6), 0.0  }
  0x10   : > { %s1083_s21 = scalar_lea.vmem %s1157_s0, %s838_s18  ;;  %s1088_s25 = scalar_lea.vmem %s1158_s1, %s901_s22  ;;  %282 = vst [vmem:[#allocation2] sm:$0xff] (!%p841_p6), %v1036_v0  ;;  %283 = vst [vmem:[#allocation2 + $0x8] sm:$0xff] (!%p841_p6), %v1036_v0 }
  0x11   : > { %281 = sbr.rel (%p841_p6) target bundleno = 24 (0x18), region = 36 }
  0x18 PF: > { %v929_v1 = vld [vmem:[%s1088_s25 + $0x4] ss:$8 sps:$4 sm:$0xff]   ;;  %v931_v2 = vld [vmem:[%s1088_s25] ss:$8 sps:$4 sm:$0xff]   ;;  %v1037_v3 = vmov 0   ;;  %p893_p7 = scmp.ne.s32.totalorder %s1026_s12, 5 }
  0x19   : > { %660 = vmatprep.mubr.bf16.mxu1 %v1037_v3  ;;  %587 = vmatprep.subr.bf16.mxu0 %v929_v1  ;;  %v932_v4 = vld [vmem:[%s1088_s25 + $0x14] ss:$8 sps:$4 sm:$0xff]   ;;  %v934_v5 = vld [vmem:[%s1088_s25 + $0x10] ss:$8 sps:$4 sm:$0xff]   ;;  %v935_v6 = vld [vmem:[%s1088_s25 + $0x24] ss:$8 sps:$4 sm:$0xff]  }
  0x1a   : > { %588 = vmatpush1.bf16.msra.mxu0 %v931_v2  ;;  %v937_v7 = vld [vmem:[%s1088_s25 + $0x20] ss:$8 sps:$4 sm:$0xff]   ;;  %v938_v8 = vld [vmem:[%s1088_s25 + $0x34] ss:$8 sps:$4 sm:$0xff]   ;;  %v940_v9 = vld [vmem:[%s1088_s25 + $0x30] ss:$8 sps:$4 sm:$0xff]  }
  0x1b   : > { %589 = vmatprep.subr.bf16.mxu0 %v932_v4  ;;  %v953_v10 = vld [vmem:[%s1088_s25 + $0x104] ss:$8 sps:$4 sm:$0xff]   ;;  %v955_v11 = vld [vmem:[%s1088_s25 + $0x100] ss:$8 sps:$4 sm:$0xff]   ;;  %v959_v13 = vld [vmem:[%s1088_s25 + $0x114] ss:$8 sps:$4 sm:$0xff]   ;;  %v681_v4 = vlaneseq (!%p893_p7) }
  0x1c   : > { %v941_v12 = vld [vmem:[%s1088_s25 + $0x44] ss:$8 sps:$4 sm:$0xff]   ;;  %628 = vmatprep.subr.bf16.mxu1 %v953_v10  ;;  %v961_v14 = vld [vmem:[%s1088_s25 + $0x110] ss:$8 sps:$4 sm:$0xff]   ;;  %v943_v15 = vld [vmem:[%s1088_s25 + $0x40] ss:$8 sps:$4 sm:$0xff]  }
  0x1d   : > { %629 = vmatpush1.bf16.msra.mxu1 %v955_v11  ;;  %v944_v16 = vld [vmem:[%s1088_s25 + $0x54] ss:$8 sps:$4 sm:$0xff]   ;;  %v965_v17 = vld [vmem:[%s1088_s25 + $0x124] ss:$8 sps:$4 sm:$0xff]   ;;  %v967_v18 = vld [vmem:[%s1088_s25 + $0x120] ss:$8 sps:$4 sm:$0xff]  }
  0x1e   : > { %590 = vmatpush1.bf16.msra.mxu0 %v934_v5  ;;  %630 = vmatprep.subr.bf16.mxu1 %v959_v13  ;;  %v946_v19 = vld [vmem:[%s1088_s25 + $0x50] ss:$8 sps:$4 sm:$0xff]   ;;  %v971_v20 = vld [vmem:[%s1088_s25 + $0x134] ss:$8 sps:$4 sm:$0xff]   ;;  %v947_v21 = vld [vmem:[%s1088_s25 + $0x64] ss:$8 sps:$4 sm:$0xff]  }
  0x1f   : > { %591 = vmatprep.subr.bf16.mxu0 %v935_v6  ;;  %v973_v22 = vld [vmem:[%s1088_s25 + $0x130] ss:$8 sps:$4 sm:$0xff]   ;;  %v949_v23 = vld [vmem:[%s1088_s25 + $0x60] ss:$8 sps:$4 sm:$0xff]   ;;  %v977_v24 = vld [vmem:[%s1088_s25 + $0x144] ss:$8 sps:$4 sm:$0xff]  }
  0x20   : > { %v950_v25 = vld [vmem:[%s1088_s25 + $0x74] ss:$8 sps:$4 sm:$0xff]   ;;  %v979_v26 = vld [vmem:[%s1088_s25 + $0x140] ss:$8 sps:$4 sm:$0xff]   ;;  %v952_v27 = vld [vmem:[%s1088_s25 + $0x70] ss:$8 sps:$4 sm:$0xff]  }
  0x21   : > { %631 = vmatpush1.bf16.msra.mxu1 %v961_v14  ;;  %v983_v28 = vld [vmem:[%s1088_s25 + $0x154] ss:$8 sps:$4 sm:$0xff]   ;;  %v956_v29 = vld [vmem:[%s1088_s25 + $0x84] ss:$8 sps:$4 sm:$0xff]   ;;  %v985_v30 = vld [vmem:[%s1088_s25 + $0x150] ss:$8 sps:$4 sm:$0xff]  }
  0x22   : > { %592 = vmatpush1.bf16.msra.mxu0 %v937_v7  ;;  %632 = vmatprep.subr.bf16.mxu1 %v965_v17  ;;  %v958_v31 = vld [vmem:[%s1088_s25 + $0x80] ss:$8 sps:$4 sm:$0xff]   ;;  %v989_v32 = vld [vmem:[%s1088_s25 + $0x164] ss:$8 sps:$4 sm:$0xff]   ;;  %v962_v33 = vld [vmem:[%s1088_s25 + $0x94] ss:$8 sps:$4 sm:$0xff]  }
  0x23   : > { %593 = vmatprep.subr.bf16.mxu0 %v938_v8  ;;  %v286_v34 = vld [vmem:[%s1083_s21] sm:$0xff]  ;;  %v964_v37 = vld [vmem:[%s1088_s25 + $0x90] ss:$8 sps:$4 sm:$0xff]   ;;  %v995_v38 = vld [vmem:[%s1088_s25 + $0x174] ss:$8 sps:$4 sm:$0xff]   ;;  %v682_v5 = vshrl.u32 (!%p893_p7), %v681_v4, 7 }
  0x24   : > { %v843_v35 = vcombine.high %v286_v34, %v286_v34  ;;  %v991_v36 = vld [vmem:[%s1088_s25 + $0x160] ss:$8 sps:$4 sm:$0xff]   ;;  %v968_v39 = vld [vmem:[%s1088_s25 + $0xa4] ss:$8 sps:$4 sm:$0xff]   ;;  %v997_v40 = vld [vmem:[%s1088_s25 + $0x170] ss:$8 sps:$4 sm:$0xff]   ;;  %v842_v53 = vcombine.low %v286_v34, %v286_v34 }
  0x25   : > { %633 = vmatpush1.bf16.msra.mxu1 %v967_v18  ;;  %v970_v41 = vld [vmem:[%s1088_s25 + $0xa0] ss:$8 sps:$4 sm:$0xff]   ;;  %v974_v42 = vld [vmem:[%s1088_s25 + $0xb4] ss:$8 sps:$4 sm:$0xff]   ;;  %v976_v44 = vld [vmem:[%s1088_s25 + $0xb0] ss:$8 sps:$4 sm:$0xff]  }
  0x26   : > { %594 = vmatpush1.bf16.msra.mxu0 %v940_v9  ;;  %634 = vmatprep.subr.bf16.mxu1 %v971_v20  ;;  %v1001_v43 = vld [vmem:[%s1083_s21 + $0x8] ss:$0 sps:$4 sm:$0xff]   ;;  %v980_v45 = vld [vmem:[%s1088_s25 + $0xc4] ss:$8 sps:$4 sm:$0xff]   ;;  %v986_v47 = vld [vmem:[%s1088_s25 + $0xd4] ss:$8 sps:$4 sm:$0xff]  }
  0x27   : > { %595 = vmatprep.subr.bf16.mxu0 %v941_v12  ;;  %619 = vmatprep.mubr.bf16.mxu0 %v843_v35  ;;  %v982_v46 = vld [vmem:[%s1088_s25 + $0xc0] ss:$8 sps:$4 sm:$0xff]   ;;  %v988_v48 = vld [vmem:[%s1088_s25 + $0xd0] ss:$8 sps:$4 sm:$0xff]   ;;  %v992_v49 = vld [vmem:[%s1088_s25 + $0xe4] ss:$8 sps:$4 sm:$0xff]  }
  0x28   : > { %v994_v50 = vld [vmem:[%s1088_s25 + $0xe0] ss:$8 sps:$4 sm:$0xff]   ;;  %v998_v51 = vld [vmem:[%s1088_s25 + $0xf4] ss:$8 sps:$4 sm:$0xff]   ;;  %v1000_v52 = vld [vmem:[%s1088_s25 + $0xf0] ss:$8 sps:$4 sm:$0xff]  }
  0x29   : > { %635 = vmatpush1.bf16.msra.mxu1 %v973_v22  ;;  %v284_v58 = vld [vmem:[#allocation2] sm:$0xff]  ;;  %v285_v61 = vld [vmem:[#allocation2 + $0x8] sm:$0xff]  ;;  %v683_v7 = vsub.s32 (!%p893_p7), 0, %v682_v5  ;;  %v687_v8 = vsub.s32 (!%p893_p7), 1, %v682_v5 }
  0x2a   : > { %596 = vmatpush1.bf16.msra.mxu0 %v943_v15  ;;  %636 = vmatprep.subr.bf16.mxu1 %v977_v24  ;;  %v679_v6 = vld [vmem:[%s1159_s2] sm:$0x3] (!%p893_p7) }
  0x2b   : > { %597 = vmatprep.subr.bf16.mxu0 %v944_v16  ;;  %v684_v11 = vrot.slane (!%p893_p7), %v679_v6, %v683_v7  ;;  %v688_v12 = vrot.slane (!%p893_p7), %v679_v6, %v687_v8 }
  0x2d   : > { %637 = vmatpush1.bf16.msra.mxu1 %v979_v26 }
  0x2e   : > { %598 = vmatpush1.bf16.msra.mxu0 %v946_v19  ;;  %638 = vmatprep.subr.bf16.mxu1 %v983_v28 }
  0x2f   : > { %599 = vmatprep.subr.bf16.mxu0 %v947_v21 }
  0x31   : > { %639 = vmatpush1.bf16.msra.mxu1 %v985_v30 }
  0x32   : > { %600 = vmatpush1.bf16.msra.mxu0 %v949_v23  ;;  %640 = vmatprep.subr.bf16.mxu1 %v989_v32 }
  0x33   : > { %601 = vmatprep.subr.bf16.mxu0 %v950_v25 }
  0x35   : > { %641 = vmatpush1.bf16.msra.mxu1 %v991_v36 }
  0x36   : > { %602 = vmatpush1.bf16.msra.mxu0 %v952_v27  ;;  %642 = vmatprep.subr.bf16.mxu1 %v995_v38 }
  0x37   : > { %603 = vmatprep.subr.bf16.mxu0 %v956_v29 }
  0x39   : > { %643 = vmatpush1.bf16.msra.mxu1 %v997_v40 }
  0x3a   : > { %604 = vmatpush1.bf16.msra.mxu0 %v958_v31 }
  0x3b   : > { %605 = vmatprep.subr.bf16.mxu0 %v962_v33 }
  0x3c   : > { %661 = vmatmul.mubr.bf16.vlgmr.msra.gmra.mrb[0].mxu1 %v1001_v43 }
  0x3e   : > { %606 = vmatpush1.bf16.msra.mxu0 %v964_v37 }
  0x3f   : > { %607 = vmatprep.subr.bf16.mxu0 %v968_v39 }
  0x42   : > { %608 = vmatpush1.bf16.msra.mxu0 %v970_v41 }
  0x43   : > { %609 = vmatprep.subr.bf16.mxu0 %v974_v42 }
  0x46   : > { %610 = vmatpush1.bf16.msra.mxu0 %v976_v44 }
  0x47   : > { %611 = vmatprep.subr.bf16.mxu0 %v980_v45 }
  0x4a   : > { %612 = vmatpush1.bf16.msra.mxu0 %v982_v46 }
  0x4b   : > { %613 = vmatprep.subr.bf16.mxu0 %v986_v47 }
  0x4e   : > { %614 = vmatpush1.bf16.msra.mxu0 %v988_v48 }
  0x4f   : > { %615 = vmatprep.subr.bf16.mxu0 %v992_v49 }
  0x52   : > { %616 = vmatpush1.bf16.msra.mxu0 %v994_v50 }
  0x53   : > { %617 = vmatprep.subr.bf16.mxu0 %v998_v51 }
  0x56   : > { %618 = vmatpush1.bf16.msra.mxu0 %v1000_v52 }
  0x59   : > { %620 = vmatmul.mubr.bf16.vlgmr.msra.gmra.mrb[0].mxu0 %v842_v53 }
 0x10f   : > { %v662_v54 = vpop.f32.mrb[0].mxu1 }
 0x110   : > { %v664_v55 = vpop.f32.mrb[1].mxu1 }
 0x111   : > { %v666_v56 = vpop.f32.mrb[2].mxu1 }
 0x112   : > { %v667_v57 = vpop.f32.mrb[3].mxu1 }
 0x12c   : > { %v621_v59 = vpop.f32.mrb[0].mxu0  ;;  %676 = sbr.rel (%p893_p7) target bundleno = 347 (0x15b), region = 40 }
 0x12d   : > { %v663_v60 = vadd.f32 %v662_v54, %v621_v59  ;;  %v623_v62 = vpop.f32.mrb[1].mxu0 }
 0x12e   : > { %v665_v63 = vadd.f32 %v664_v55, %v623_v62  ;;  %v625_v0 = vpop.f32.mrb[2].mxu0 }
 0x12f   : > { %v669_v1 = vadd.f32 %v663_v60, %v284_v58  ;;  %v626_v2 = vpop.f32.mrb[3].mxu0 }
 0x130   : > { %v670_v3 = vadd.f32 %v665_v63, %v285_v61 }
 0x131   : > { %671 = vst [vmem:[#allocation2] sm:$0xff] %v669_v1 }
 0x132   : > { %672 = vst [vmem:[#allocation2 + $0x8] sm:$0xff] %v670_v3 }
 0x138   : > { %v677_v9 = vld [vmem:[#allocation2] sm:$0xff] }
 0x139   : > { %v678_v10 = vld [vmem:[#allocation2 + $0x8] sm:$0xff]  ;;  %v691_v13 = vadd.f32 %v684_v11, %v677_v9 }
 0x13a   : > { %v692_v14 = vadd.f32 %v688_v12, %v678_v10 }
 0x13b   : > { %v894_v15 = vmul.f32 -1.442695, %v691_v13 }
 0x13c   : > { %v895_v16 = vmul.f32 -1.442695, %v692_v14 }
 0x13d   : > { %1004 = vpow2.f32 %v894_v15 }
 0x13e   : > { %1006 = vpow2.f32 %v895_v16 }
 0x147   : > { %v1005_v17 = vpop.eup %1004 }
 0x148   : > { %v1007_v18 = vpop.eup %1006  ;;  %v699_v19 = vadd.f32 1.0, %v1005_v17 }
 0x149   : > { %v700_v20 = vadd.f32 1.0, %v1007_v18 }
 0x14a   : > { %1008 = vrcp.f32 %v699_v19 }
 0x14b   : > { %1010 = vrcp.f32 %v700_v20 }
 0x154   : > { %v1009_v21 = vpop.eup %1008 }
 0x155   : > { %v1011_v22 = vpop.eup %1010  ;;  %v705_v23 = vmul.f32 %v1009_v21, %v691_v13 }
 0x156   : > { %v706_v24 = vmul.f32 %v1011_v22, %v692_v14 }
 0x158   : > { %v902_v25 = vpack.c.bf16 %v706_v24, %v705_v23 }
 0x15a   : > { %715 = vst [vmem:[%s1160_s3] sm:$0xff] %v902_v25 }
 0x15b PF: > { %s13_s14 = sadd.s32 1, %s1034_s14   ;;  %s1161_s12 = smov %s1030_s13 }
 0x15c   : > { %p10_p8 = scmp.ge.s32.totalorder %s13_s14, 8   ;;  %s1162_s13 = smov %s1164_s15 }
 0x15e   :  { %12 = sbr.rel (!%p10_p8) target bundleno = 2 (0x2), region = 76 }

// kernel: resnet18_forward.30
= control target key start
LH: loop header
LB: loop body
LE: loop exit
PB: predicated region body
PF: predicated region fallthrough
CT: control target
= control target key end

     0   :  { %s1371_s18 = smov 0   ;;  %s1373_s19 = smov 0   ;;  %s1521_s0 = inlined_call_operand.vmem [shape: bf16[8,2304], index: 0, kind: input, shape index: {}]   ;;  %s1522_s1 = inlined_call_operand.vmem [shape: bf16[2304,256], index: 1, kind: input, shape index: {}]   ;;  %s1523_s2 = inlined_call_operand.vmem [shape: f32[1,256], index: 2, kind: input, shape index: {}]   ;;  %s1524_s3 = inlined_call_operand.vmem [shape: bf16[8,128], index: 3, kind: input, shape index: {}]   ;;  %s1525_s4 = inlined_call_operand.vmem [shape: bf16[128,256], index: 4, kind: input, shape index: {}]   ;;  %s1526_s5 = inlined_call_operand.vmem [shape: bf16[8,256], index: 5, kind: output, shape index: {}]  }
   0x1   :  { %s1375_s20 = smov 0  }
   0x2 LB: > { %s27_s21 = sadd.s32 1, %s1333_s19  ;;  %p1100_p0 = scmp.ge.s32.totalorder %s1337_s20, 1  ;;  %s1337_s20 = sphi %s1375_s20, %s15_s20   ;;  %s1333_s19 = sphi %s1373_s19, %s1528_s19   ;;  %s1329_s18 = sphi %s1371_s18, %s1527_s18  }
   0x3   : > { %p28_p1 = scmp.ge.s32.totalorder %s27_s21, 6  ;;  %p264_p2 = scmp.lt.s32.totalorder %s1337_s20, 7 }
   0x5   : > { %s1530_s21 = smov (%p28_p1, %s27_s21), 0  ;;  %p265_p3 = pnand %p1100_p0, %p264_p2 }
   0x6   : > { %s323_s22 = smul.u32 (!%p265_p3), 3, %s1329_s18  ;;  %p1104_p6 = scmp.ne.s32.totalorder (!%p265_p3), %s1329_s18, 0 }
   0x7   : > { %268 = sbr.rel (%p265_p3) target bundleno = 586 (0x24a), region = 40 }
   0x8   : > { %s333_s23 = smul.u32 (!%p265_p3), 48, %s1329_s18  ;;  %p326_p4 = scmp.lt.s32.totalorder (!%p265_p3), %s323_s22, 17 }
   0xa   : > { %p335_p5 = scmp.lt.s32.totalorder (!%p265_p3), %s333_s23, 287 }
   0xe   : > { %s1532_s22 = smov (!%p326_p4, %s323_s22), 17  ;;  %s1534_s23 = smov (!%p335_p5, %s333_s23), 287 }
   0xf   : > { %s1101_s24 = sshll.u32 %s1532_s22, 2  ;;  %s1180_s28 = sshll.u32 %s1534_s23, 3  ;;  %v1208_v0 = vld [vmem:[%s1525_s4 + $0x4] ss:$8 sps:$4 sm:$0xff] (!%p1104_p6)   ;;  %v1210_v1 = vld [vmem:[%s1525_s4] ss:$8 sps:$4 sm:$0xff] (!%p1104_p6)  }
  0x10   : > { %s1396_s27 = scalar_lea.vmem %s1521_s0, %s1101_s24  ;;  %s1401_s6 = scalar_lea.vmem %s1522_s1, %s1180_s28  ;;  %v1339_v2 = vmov (!%p1104_p6), 0   ;;  %472 = vmatprep.subr.bf16.mxu0 (!%p1104_p6), %v1208_v0  ;;  %v1211_v3 = vld [vmem:[%s1525_s4 + $0x14] ss:$8 sps:$4 sm:$0xff] (!%p1104_p6)   ;;  %v1213_v4 = vld [vmem:[%s1525_s4 + $0x10] ss:$8 sps:$4 sm:$0xff] (!%p1104_p6)  }
  0x11   : > { %374 = sbr.rel (%p1104_p6) target bundleno = 263 (0x107), region = 44  ;;  %504 = vmatprep.mubr.bf16.mxu0 (!%p1104_p6), %v1339_v2  ;;  %473 = vmatpush1.bf16.msra.mxu0 (!%p1104_p6), %v1210_v1  ;;  %v1214_v5 = vld [vmem:[%s1525_s4 + $0x24] ss:$8 sps:$4 sm:$0xff] (!%p1104_p6)   ;;  %v1216_v6 = vld [vmem:[%s1525_s4 + $0x20] ss:$8 sps:$4 sm:$0xff] (!%p1104_p6)  }
  0x12   : > { %474 = vmatprep.subr.bf16.mxu0 (!%p1104_p6), %v1211_v3  ;;  %v1217_v7 = vld [vmem:[%s1525_s4 + $0x34] ss:$8 sps:$4 sm:$0xff] (!%p1104_p6)   ;;  %v1219_v8 = vld [vmem:[%s1525_s4 + $0x30] ss:$8 sps:$4 sm:$0xff] (!%p1104_p6)   ;;  %v1220_v9 = vld [vmem:[%s1525_s4 + $0x44] ss:$8 sps:$4 sm:$0xff] (!%p1104_p6)  }
  0x13   : > { %v1222_v10 = vld [vmem:[%s1525_s4 + $0x40] ss:$8 sps:$4 sm:$0xff] (!%p1104_p6)   ;;  %v1223_v11 = vld [vmem:[%s1525_s4 + $0x54] ss:$8 sps:$4 sm:$0xff] (!%p1104_p6)   ;;  %v1225_v12 = vld [vmem:[%s1525_s4 + $0x50] ss:$8 sps:$4 sm:$0xff] (!%p1104_p6)  }
  0x14   : > { %v1226_v13 = vld [vmem:[%s1525_s4 + $0x64] ss:$8 sps:$4 sm:$0xff] (!%p1104_p6)   ;;  %v1228_v14 = vld [vmem:[%s1525_s4 + $0x60] ss:$8 sps:$4 sm:$0xff] (!%p1104_p6)   ;;  %v1229_v15 = vld [vmem:[%s1525_s4 + $0x74] ss:$8 sps:$4 sm:$0xff] (!%p1104_p6)  }
  0x15   : > { %475 = vmatpush1.bf16.msra.mxu0 (!%p1104_p6), %v1213_v4  ;;  %v1231_v16 = vld [vmem:[%s1525_s4 + $0x70] ss:$8 sps:$4 sm:$0xff] (!%p1104_p6)   ;;  %v375_v17 = vld [vmem:[%s1524_s3] sm:$0xf] (!%p1104_p6) }
  0x16   : > { %476 = vmatprep.subr.bf16.mxu0 (!%p1104_p6), %v1214_v5 }
  0x19   : > { %477 = vmatpush1.bf16.msra.mxu0 %v1216_v6 }
  0x1a   : > { %478 = vmatprep.subr.bf16.mxu0 %v1217_v7 }
  0x1d   : > { %479 = vmatpush1.bf16.msra.mxu0 %v1219_v8 }
  0x1e   : > { %480 = vmatprep.subr.bf16.mxu0 %v1220_v9 }
  0x21   : > { %481 = vmatpush1.bf16.msra.mxu0 %v1222_v10 }
  0x22   : > { %482 = vmatprep.subr.bf16.mxu0 %v1223_v11 }
  0x25   : > { %483 = vmatpush1.bf16.msra.mxu0 %v1225_v12 }
  0x26   : > { %484 = vmatprep.subr.bf16.mxu0 %v1226_v13 }
  0x29   : > { %485 = vmatpush1.bf16.msra.mxu0 %v1228_v14 }
  0x2a   : > { %486 = vmatprep.subr.bf16.mxu0 %v1229_v15 }
  0x2d   : > { %487 = vmatpush1.bf16.msra.mxu0 %v1231_v16 }
  0x30   : > { %505 = vmatmul.mubr.bf16.vlgmr.msra.gmra.mrb[0].mxu0 %v375_v17 }
 0x103   : > { %v506_v18 = vpop.f32.mrb[0].mxu0 }
 0x104   : > { %513 = vst [vmem:[#allocation2] sm:$0xff] %v506_v18  ;;  %v508_v19 = vpop.f32.mrb[1].mxu0 }
 0x105   : > { %514 = vst [vmem:[#allocation2 + $0x8] sm:$0xff] %v508_v19  ;;  %v510_v20 = vpop.f32.mrb[2].mxu0 }
 0x106   : > { %v511_v21 = vpop.f32.mrb[3].mxu0 }
 0x107 PF: > { %v1232_v22 = vld [vmem:[%s1401_s6 + $0x4] ss:$8 sps:$4 sm:$0xff]   ;;  %v1234_v23 = vld [vmem:[%s1401_s6] ss:$8 sps:$4 sm:$0xff]   ;;  %v1340_v24 = vmov 0   ;;  %p1172_p7 = scmp.ne.s32.totalorder %s1329_s18, 5 }
 0x108   : > { %891 = vmatprep.mubr.bf16.mxu1 %v1340_v24  ;;  %818 = vmatprep.subr.bf16.mxu0 %v1232_v22  ;;  %v1235_v25 = vld [vmem:[%s1401_s6 + $0x14] ss:$8 sps:$4 sm:$0xff]   ;;  %v1237_v26 = vld [vmem:[%s1401_s6 + $0x10] ss:$8 sps:$4 sm:$0xff]   ;;  %v1238_v27 = vld [vmem:[%s1401_s6 + $0x24] ss:$8 sps:$4 sm:$0xff]  }
 0x109   : > { %819 = vmatpush1.bf16.msra.mxu0 %v1234_v23  ;;  %v1240_v28 = vld [vmem:[%s1401_s6 + $0x20] ss:$8 sps:$4 sm:$0xff]   ;;  %v1241_v29 = vld [vmem:[%s1401_s6 + $0x34] ss:$8 sps:$4 sm:$0xff]   ;;  %v1243_v30 = vld [vmem:[%s1401_s6 + $0x30] ss:$8 sps:$4 sm:$0xff]  }
 0x10a   : > { %820 = vmatprep.subr.bf16.mxu0 %v1235_v25  ;;  %v1256_v31 = vld [vmem:[%s1401_s6 + $0x104] ss:$8 sps:$4 sm:$0xff]   ;;  %v1258_v32 = vld [vmem:[%s1401_s6 + $0x100] ss:$8 sps:$4 sm:$0xff]   ;;  %v1262_v34 = vld [vmem:[%s1401_s6 + $0x114] ss:$8 sps:$4 sm:$0xff]   ;;  %v912_v25 = vlaneseq (!%p1172_p7) }
 0x10b   : > { %v1244_v33 = vld [vmem:[%s1401_s6 + $0x44] ss:$8 sps:$4 sm:$0xff]   ;;  %859 = vmatprep.subr.bf16.mxu1 %v1256_v31  ;;  %v1264_v35 = vld [vmem:[%s1401_s6 + $0x110] ss:$8 sps:$4 sm:$0xff]   ;;  %v1246_v36 = vld [vmem:[%s1401_s6 + $0x40] ss:$8 sps:$4 sm:$0xff]  }
 0x10c   : > { %860 = vmatpush1.bf16.msra.mxu1 %v1258_v32  ;;  %v1247_v37 = vld [vmem:[%s1401_s6 + $0x54] ss:$8 sps:$4 sm:$0xff]   ;;  %v1268_v38 = vld [vmem:[%s1401_s6 + $0x124] ss:$8 sps:$4 sm:$0xff]   ;;  %v1270_v39 = vld [vmem:[%s1401_s6 + $0x120] ss:$8 sps:$4 sm:$0xff]  }
 0x10d   : > { %821 = vmatpush1.bf16.msra.mxu0 %v1237_v26  ;;  %861 = vmatprep.subr.bf16.mxu1 %v1262_v34  ;;  %v1249_v40 = vld [vmem:[%s1401_s6 + $0x50] ss:$8 sps:$4 sm:$0xff]   ;;  %v1274_v41 = vld [vmem:[%s1401_s6 + $0x134] ss:$8 sps:$4 sm:$0xff]   ;;  %v1250_v42 = vld [vmem:[%s1401_s6 + $0x64] ss:$8 sps:$4 sm:$0xff]  }
 0x10e   : > { %822 = vmatprep.subr.bf16.mxu0 %v1238_v27  ;;  %v1276_v43 = vld [vmem:[%s1401_s6 + $0x130] ss:$8 sps:$4 sm:$0xff]   ;;  %v1252_v44 = vld [vmem:[%s1401_s6 + $0x60] ss:$8 sps:$4 sm:$0xff]   ;;  %v1280_v45 = vld [vmem:[%s1401_s6 + $0x144] ss:$8 sps:$4 sm:$0xff]  }
 0x10f   : > { %v1253_v46 = vld [vmem:[%s1401_s6 + $0x74] ss:$8 sps:$4 sm:$0xff]   ;;  %v1282_v47 = vld [vmem:[%s1401_s6 + $0x140] ss:$8 sps:$4 sm:$0xff]   ;;  %v1255_v48 = vld [vmem:[%s1401_s6 + $0x70] ss:$8 sps:$4 sm:$0xff]  }
 0x110   : > { %862 = vmatpush1.bf16.msra.mxu1 %v1264_v35  ;;  %v1286_v49 = vld [vmem:[%s1401_s6 + $0x154] ss:$8 sps:$4 sm:$0xff]   ;;  %v1259_v50 = vld [vmem:[%s1401_s6 + $0x84] ss:$8 sps:$4 sm:$0xff]   ;;  %v1288_v51 = vld [vmem:[%s1401_s6 + $0x150] ss:$8 sps:$4 sm:$0xff]  }
 0x111   : > { %823 = vmatpush1.bf16.msra.mxu0 %v1240_v28  ;;  %863 = vmatprep.subr.bf16.mxu1 %v1268_v38  ;;  %v1261_v52 = vld [vmem:[%s1401_s6 + $0x80] ss:$8 sps:$4 sm:$0xff]   ;;  %v1292_v53 = vld [vmem:[%s1401_s6 + $0x164] ss:$8 sps:$4 sm:$0xff]   ;;  %v1265_v54 = vld [vmem:[%s1401_s6 + $0x94] ss:$8 sps:$4 sm:$0xff]  }
 0x112   : > { %824 = vmatprep.subr.bf16.mxu0 %v1241_v29  ;;  %v517_v55 = vld [vmem:[%s1396_s27] sm:$0xff]  ;;  %v1267_v58 = vld [vmem:[%s1401_s6 + $0x90] ss:$8 sps:$4 sm:$0xff]   ;;  %v1298_v59 = vld [vmem:[%s1401_s6 + $0x174] ss:$8 sps:$4 sm:$0xff]   ;;  %v913_v26 = vshrl.u32 (!%p1172_p7), %v912_v25, 7 }
 0x113   : > { %v1122_v56 = vcombine.high %v517_v55, %v517_v55  ;;  %v1294_v57 = vld [vmem:[%s1401_s6 + $0x160] ss:$8 sps:$4 sm:$0xff]   ;;  %v1271_v60 = vld [vmem:[%s1401_s6 + $0xa4] ss:$8 sps:$4 sm:$0xff]   ;;  %v1300_v61 = vld [vmem:[%s1401_s6 + $0x170] ss:$8 sps:$4 sm:$0xff]   ;;  %v1121_v10 = vcombine.low %v517_v55, %v517_v55 }
 0x114   : > { %864 = vmatpush1.bf16.msra.mxu1 %v1270_v39  ;;  %v1273_v62 = vld [vmem:[%s1401_s6 + $0xa0] ss:$8 sps:$4 sm:$0xff]   ;;  %v1277_v63 = vld [vmem:[%s1401_s6 + $0xb4] ss:$8 sps:$4 sm:$0xff]   ;;  %v1279_v1 = vld [vmem:[%s1401_s6 + $0xb0] ss:$8 sps:$4 sm:$0xff]  }
 0x115   : > { %825 = vmatpush1.bf16.msra.mxu0 %v1243_v30  ;;  %865 = vmatprep.subr.bf16.mxu1 %v1274_v41  ;;  %v1304_v0 = vld [vmem:[%s1396_s27 + $0x8] ss:$0 sps:$4 sm:$0xff]   ;;  %v1283_v2 = vld [vmem:[%s1401_s6 + $0xc4] ss:$8 sps:$4 sm:$0xff]   ;;  %v1289_v4 = vld [vmem:[%s1401_s6 + $0xd4] ss:$8 sps:$4 sm:$0xff]  }
 0x116   : > { %826 = vmatprep.subr.bf16.mxu0 %v1244_v33  ;;  %850 = vmatprep.mubr.bf16.mxu0 %v1122_v56  ;;  %v1285_v3 = vld [vmem:[%s1401_s6 + $0xc0] ss:$8 sps:$4 sm:$0xff]   ;;  %v1291_v5 = vld [vmem:[%s1401_s6 + $0xd0] ss:$8 sps:$4 sm:$0xff]   ;;  %v1295_v6 = vld [vmem:[%s1401_s6 + $0xe4] ss:$8 sps:$4 sm:$0xff]  }
 0x117   : > { %v1297_v7 = vld [vmem:[%s1401_s6 + $0xe0] ss:$8 sps:$4 sm:$0xff]   ;;  %v1301_v8 = vld [vmem:[%s1401_s6 + $0xf4] ss:$8 sps:$4 sm:$0xff]   ;;  %v1303_v9 = vld [vmem:[%s1401_s6 + $0xf0] ss:$8 sps:$4 sm:$0xff]  }
 0x118   : > { %866 = vmatpush1.bf16.msra.mxu1 %v1276_v43  ;;  %v515_v15 = vld [vmem:[#allocation2] sm:$0xff]  ;;  %v516_v18 = vld [vmem:[#allocation2 + $0x8] sm:$0xff]  ;;  %v914_v28 = vsub.s32 (!%p1172_p7), 0, %v913_v26  ;;  %v918_v29 = vsub.s32 (!%p1172_p7), 1, %v913_v26 }
 0x119   : > { %827 = vmatpush1.bf16.msra.mxu0 %v1246_v36  ;;  %867 = vmatprep.subr.bf16.mxu1 %v1280_v45  ;;  %v910_v27 = vld [vmem:[%s1523_s2] sm:$0x3] (!%p1172_p7) }
 0x11a   : > { %828 = vmatprep.subr.bf16.mxu0 %v1247_v37  ;;  %v915_v32 = vrot.slane (!%p1172_p7), %v910_v27, %v914_v28  ;;  %v919_v33 = vrot.slane (!%p1172_p7), %v910_v27, %v918_v29 }
 0x11c   : > { %868 = vmatpush1.bf16.msra.mxu1 %v1282_v47 }
 0x11d   : > { %829 = vmatpush1.bf16.msra.mxu0 %v1249_v40  ;;  %869 = vmatprep.subr.bf16.mxu1 %v1286_v49 }
 0x11e   : > { %830 = vmatprep.subr.bf16.mxu0 %v1250_v42 }
 0x120   : > { %870 = vmatpush1.bf16.msra.mxu1 %v1288_v51 }
 0x121   : > { %831 = vmatpush1.bf16.msra.mxu0 %v1252_v44  ;;  %871 = vmatprep.subr.bf16.mxu1 %v1292_v53 }
 0x122   : > { %832 = vmatprep.subr.bf16.mxu0 %v1253_v46 }
 0x124   : > { %872 = vmatpush1.bf16.msra.mxu1 %v1294_v57 }
 0x125   : > { %833 = vmatpush1.bf16.msra.mxu0 %v1255_v48  ;;  %873 = vmatprep.subr.bf16.mxu1 %v1298_v59 }
 0x126   : > { %834 = vmatprep.subr.bf16.mxu0 %v1259_v50 }
 0x128   : > { %874 = vmatpush1.bf16.msra.mxu1 %v1300_v61 }
 0x129   : > { %835 = vmatpush1.bf16.msra.mxu0 %v1261_v52 }
 0x12a   : > { %836 = vmatprep.subr.bf16.mxu0 %v1265_v54 }
 0x12b   : > { %892 = vmatmul.mubr.bf16.vlgmr.msra.gmra.mrb[0].mxu1 %v1304_v0 }
 0x12d   : > { %837 = vmatpush1.bf16.msra.mxu0 %v1267_v58 }
 0x12e   : > { %838 = vmatprep.subr.bf16.mxu0 %v1271_v60 }
 0x131   : > { %839 = vmatpush1.bf16.msra.mxu0 %v1273_v62 }
 0x132   : > { %840 = vmatprep.subr.bf16.mxu0 %v1277_v63 }
 0x135   : > { %841 = vmatpush1.bf16.msra.mxu0 %v1279_v1 }
 0x136   : > { %842 = vmatprep.subr.bf16.mxu0 %v1283_v2 }
 0x139   : > { %843 = vmatpush1.bf16.msra.mxu0 %v1285_v3 }
 0x13a   : > { %844 = vmatprep.subr.bf16.mxu0 %v1289_v4 }
 0x13d   : > { %845 = vmatpush1.bf16.msra.mxu0 %v1291_v5 }
 0x13e   : > { %846 = vmatprep.subr.bf16.mxu0 %v1295_v6 }
 0x141   : > { %847 = vmatpush1.bf16.msra.mxu0 %v1297_v7 }
 0x142   : > { %848 = vmatprep.subr.bf16.mxu0 %v1301_v8 }
 0x145   : > { %849 = vmatpush1.bf16.msra.mxu0 %v1303_v9 }
 0x148   : > { %851 = vmatmul.mubr.bf16.vlgmr.msra.gmra.mrb[0].mxu0 %v1121_v10 }
 0x1fe   : > { %v893_v11 = vpop.f32.mrb[0].mxu1 }
 0x1ff   : > { %v895_v12 = vpop.f32.mrb[1].mxu1 }
 0x200   : > { %v897_v13 = vpop.f32.mrb[2].mxu1 }
 0x201   : > { %v898_v14 = vpop.f32.mrb[3].mxu1 }
 0x21b   : > { %v852_v16 = vpop.f32.mrb[0].mxu0  ;;  %907 = sbr.rel (%p1172_p7) target bundleno = 586 (0x24a), region = 48 }
 0x21c   : > { %v894_v17 = vadd.f32 %v893_v11, %v852_v16  ;;  %v854_v19 = vpop.f32.mrb[1].mxu0 }
 0x21d   : > { %v896_v20 = vadd.f32 %v895_v12, %v854_v19  ;;  %v856_v21 = vpop.f32.mrb[2].mxu0 }
 0x21e   : > { %v900_v22 = vadd.f32 %v894_v17, %v515_v15  ;;  %v857_v23 = vpop.f32.mrb[3].mxu0 }
 0x21f   : > { %v901_v24 = vadd.f32 %v896_v20, %v516_v18 }
 0x220   : > { %902 = vst [vmem:[#allocation2] sm:$0xff] %v900_v22 }
 0x221   : > { %903 = vst [vmem:[#allocation2 + $0x8] sm:$0xff] %v901_v24 }
 0x227   : > { %v908_v30 = vld [vmem:[#allocation2] sm:$0xff] }
 0x228   : > { %v909_v31 = vld [vmem:[#allocation2 + $0x8] sm:$0xff]  ;;  %v922_v34 = vadd.f32 %v915_v32, %v908_v30 }
 0x229   : > { %v923_v35 = vadd.f32 %v919_v33, %v909_v31 }
 0x22a   : > { %v1173_v36 = vmul.f32 -1.442695, %v922_v34 }
 0x22b   : > { %v1174_v37 = vmul.f32 -1.442695, %v923_v35 }
 0x22c   : > { %1307 = vpow2.f32 %v1173_v36 }
 0x22d   : > { %1309 = vpow2.f32 %v1174_v37 }
 0x236   : > { %v1308_v38 = vpop.eup %1307 }
 0x237   : > { %v1310_v39 = vpop.eup %1309  ;;  %v930_v40 = vadd.f32 1.0, %v1308_v38 }
 0x238   : > { %v931_v41 = vadd.f32 1.0, %v1310_v39 }
 0x239   : > { %1311 = vrcp.f32 %v930_v40 }
 0x23a   : > { %1313 = vrcp.f32 %v931_v41 }
 0x243   : > { %v1312_v42 = vpop.eup %1311 }
 0x244   : > { %v1314_v43 = vpop.eup %1313  ;;  %v936_v44 = vmul.f32 %v1312_v42, %v922_v34 }
 0x245   : > { %v937_v45 = vmul.f32 %v1314_v43, %v923_v35 }
 0x247   : > { %v1181_v46 = vpack.c.bf16 %v937_v45, %v936_v44 }
 0x249   : > { %946 = vst [vmem:[%s1526_s5] sm:$0xff] %v1181_v46 }
 0x24a PF: > { %s15_s20 = sadd.s32 1, %s1337_s20   ;;  %s1527_s18 = smov %s1333_s19 }
 0x24b   : > { %p12_p8 = scmp.ge.s32.totalorder %s15_s20, 8   ;;  %s1528_s19 = smov %s1530_s21 }
 0x24d   :  { %14 = sbr.rel (!%p12_p8) target bundleno = 2 (0x2), region = 90 }

// kernel: resnet18_forward.33
= control target key start
LH: loop header
LB: loop body
LE: loop exit
PB: predicated region body
PF: predicated region fallthrough
CT: control target
= control target key end

     0   :  { %s1341_s12 = smov 0   ;;  %s1343_s13 = smov 0   ;;  %s1604_s0 = inlined_call_operand.vmem [shape: bf16[8,2304], index: 0, kind: input, shape index: {}]   ;;  %s1605_s1 = inlined_call_operand.vmem [shape: bf16[2304,512], index: 1, kind: input, shape index: {}]   ;;  %s1606_s2 = inlined_call_operand.vmem [shape: f32[1,512], index: 2, kind: input, shape index: {}]   ;;  %s1607_s3 = inlined_call_operand.vmem [shape: bf16[8,512], index: 3, kind: output, shape index: {}]  }
   0x1   :  { %s1345_s14 = smov 0   ;;  %s1347_s15 = smov 0  }
   0x2   :  { %s1349_s16 = smov 0   ;;  %s1351_s17 = smov 0  }
   0x3   :  { %s1353_s18 = smov 0  }
   0x4 LB: > { %s25_s19 = sadd.s32 1, %s1309_s16  ;;  %s28_s20 = sadd.s32 1, %s1313_s17  ;;  %s1317_s18 = sphi %s1353_s18, %s13_s18   ;;  %s1313_s17 = sphi %s1351_s17, %s1613_s17   ;;  %s1309_s16 = sphi %s1349_s16, %s1612_s16   ;;  %s1305_s15 = sphi %s1347_s15, %s1611_s15   ;;  %s1301_s14 = sphi %s1345_s14, %s1610_s14   ;;  %s1297_s13 = sphi %s1343_s13, %s1609_s13   ;;  %s1293_s12 = sphi %s1341_s12, %s1608_s12  }
   0x5   : > { %p26_p0 = scmp.ge.s32.totalorder %s25_s19, 6  ;;  %p76_p1 = scmp.ne.s32.totalorder %s1297_s13, %s1293_s12 }
   0x6   : > { %p77_p2 = scmp.eq.s32.totalorder %s1317_s18, 0  ;;  %s69_s24 = sadd.s32 1, %s1297_s13 }
   0x7   : > { %s1615_s19 = smov (%p26_p0, %s25_s19), 0  ;;  %s1617_s20 = smov (!%p26_p0, %s28_s20), %s1313_s17 }
   0x8   : > { %p78_p3 = por %p77_p2, %p76_p1  ;;  %p30_p4 = scmp.ge.s32.totalorder %s1617_s20, 2 }
   0x9   : > { %s64_s21 = ssub.s32 %s1309_s16, %s1615_s19  ;;  %p1051_p6 = scmp.ge.s32.totalorder %s1317_s18, 12 }
   0xa   : > { %s1619_s20 = smov (%p30_p4, %s1617_s20), 0 }
   0xb   : > { %s65_s22 = ssub.s32 %s1313_s17, %s1619_s20  ;;  %156 = sbr.rel (%p1051_p6) target bundleno = 50 (0x32), region = 16 }
   0xc   : > { %s66_s23 = sor.u32 %s65_s22, %s64_s21 }
   0xd   : > { %p67_p5 = scmp.eq.s32.totalorder %s66_s23, 0 }
   0xf   : > { %s1392_s25 = scalar_select %p67_p5, %s1297_s13, %s69_s24  }
  0x12   : > { %172 = sbr.rel (!%p78_p3) target bundleno = 50 (0x32), region = 24  ;;  %s174_s26 = sand.u32 (%p78_p3), 1, %s1297_s13  }
  0x13   : > { %s1120_s27 = smul.u32 (%p78_p3), 384, %s174_s26  ;;  %s1052_s28 = sshll.u32 (%p78_p3), %s1313_s17, 1 }
  0x14   : > { %s1118_s29 = smul.u32 (%p78_p3), 192, %s1309_s16 }
  0x15   : > { %s1406_s8 = scalar_lea.vmem (%p78_p3), [#allocation3], %s1120_s27 }
  0x16   : > { %s180_s30 = sadd.s32 (%p78_p3), %s1118_s29, %s1052_s28 }
  0x17   : > { %s1054_s4 = sshll.u32 (%p78_p3), %s180_s30, 2 }
  0x18   : > { %s1401_s7 = scalar_lea.vmem (%p78_p3), %s1605_s1, %s1054_s4 }
  0x19   : > { %v304_v0 = vld [vmem:[%s1401_s7] sm:$0xff]  ;;  %v306_v1 = vld [vmem:[%s1401_s7 + $0x10] sm:$0xff] }
  0x1a   : > { %v308_v2 = vld [vmem:[%s1401_s7 + $0x20] sm:$0xff]  ;;  %305 = vst [vmem:[%s1406_s8] sm:$0xff] %v304_v0  ;;  %307 = vst [vmem:[%s1406_s8 + $0x8] sm:$0xff] %v306_v1  ;;  %v310_v3 = vld [vmem:[%s1401_s7 + $0x30] sm:$0xff] }
  0x1b   : > { %309 = vst [vmem:[%s1406_s8 + $0x10] sm:$0xff] %v308_v2  ;;  %v312_v4 = vld [vmem:[%s1401_s7 + $0x40] sm:$0xff]  ;;  %v314_v5 = vld [vmem:[%s1401_s7 + $0x50] sm:$0xff]  ;;  %311 = vst [vmem:[%s1406_s8 + $0x18] sm:$0xff] %v310_v3 }
  0x1c   : > { %313 = vst [vmem:[%s1406_s8 + $0x20] sm:$0xff] %v312_v4  ;;  %315 = vst [vmem:[%s1406_s8 + $0x28] sm:$0xff] %v314_v5  ;;  %v316_v6 = vld [vmem:[%s1401_s7 + $0x60] sm:$0xff]  ;;  %v318_v7 = vld [vmem:[%s1401_s7 + $0x70] sm:$0xff] }
  0x1d   : > { %v320_v8 = vld [vmem:[%s1401_s7 + $0x80] sm:$0xff]  ;;  %317 = vst [vmem:[%s1406_s8 + $0x30] sm:$0xff] %v316_v6  ;;  %319 = vst [vmem:[%s1406_s8 + $0x38] sm:$0xff] %v318_v7  ;;  %v322_v9 = vld [vmem:[%s1401_s7 + $0x90] sm:$0xff] }
  0x1e   : > { %321 = vst [vmem:[%s1406_s8 + $0x40] sm:$0xff] %v320_v8  ;;  %v324_v10 = vld [vmem:[%s1401_s7 + $0xa0] sm:$0xff]  ;;  %v326_v11 = vld [vmem:[%s1401_s7 + $0xb0] sm:$0xff]  ;;  %323 = vst [vmem:[%s1406_s8 + $0x48] sm:$0xff] %v322_v9 }
  0x1f   : > { %325 = vst [vmem:[%s1406_s8 + $0x50] sm:$0xff] %v324_v10  ;;  %327 = vst [vmem:[%s1406_s8 + $0x58] sm:$0xff] %v326_v11  ;;  %v328_v12 = vld [vmem:[%s1401_s7 + $0xc0] sm:$0xff]  ;;  %v330_v13 = vld [vmem:[%s1401_s7 + $0xd0] sm:$0xff] }
  0x20   : > { %v332_v14 = vld [vmem:[%s1401_s7 + $0xe0] sm:$0xff]  ;;  %329 = vst [vmem:[%s1406_s8 + $0x60] sm:$0xff] %v328_v12  ;;  %331 = vst [vmem:[%s1406_s8 + $0x68] sm:$0xff] %v330_v13  ;;  %v334_v15 = vld [vmem:[%s1401_s7 + $0xf0] sm:$0xff] }
  0x21   : > { %333 = vst [vmem:[%s1406_s8 + $0x70] sm:$0xff] %v332_v14  ;;  %v336_v16 = vld [vmem:[%s1401_s7 + $0x100] sm:$0xff]  ;;  %v338_v17 = vld [vmem:[%s1401_s7 + $0x110] sm:$0xff]  ;;  %335 = vst [vmem:[%s1406_s8 + $0x78] sm:$0xff] %v334_v15 }
  0x22   : > { %337 = vst [vmem:[%s1406_s8 + $0x80] sm:$0xff] %v336_v16  ;;  %339 = vst [vmem:[%s1406_s8 + $0x88] sm:$0xff] %v338_v17  ;;  %v340_v18 = vld [vmem:[%s1401_s7 + $0x120] sm:$0xff]  ;;  %v342_v19 = vld [vmem:[%s1401_s7 + $0x130] sm:$0xff] }
  0x23   : > { %v344_v20 = vld [vmem:[%s1401_s7 + $0x140] sm:$0xff]  ;;  %341 = vst [vmem:[%s1406_s8 + $0x90] sm:$0xff] %v340_v18  ;;  %343 = vst [vmem:[%s1406_s8 + $0x98] sm:$0xff] %v342_v19  ;;  %v346_v21 = vld [vmem:[%s1401_s7 + $0x150] sm:$0xff] }
  0x24   : > { %345 = vst [vmem:[%s1406_s8 + $0xa0] sm:$0xff] %v344_v20  ;;  %v348_v22 = vld [vmem:[%s1401_s7 + $0x160] sm:$0xff]  ;;  %v350_v23 = vld [vmem:[%s1401_s7 + $0x170] sm:$0xff]  ;;  %347 = vst [vmem:[%s1406_s8 + $0xa8] sm:$0xff] %v346_v21 }
  0x25   : > { %349 = vst [vmem:[%s1406_s8 + $0xb0] sm:$0xff] %v348_v22  ;;  %351 = vst [vmem:[%s1406_s8 + $0xb8] sm:$0xff] %v350_v23  ;;  %v352_v24 = vld [vmem:[%s1401_s7 + $0x180] sm:$0xff]  ;;  %v354_v25 = vld [vmem:[%s1401_s7 + $0x190] sm:$0xff] }
  0x26   : > { %v356_v26 = vld [vmem:[%s1401_s7 + $0x1a0] sm:$0xff]  ;;  %353 = vst [vmem:[%s1406_s8 + $0xc0] sm:$0xff] %v352_v24  ;;  %355 = vst [vmem:[%s1406_s8 + $0xc8] sm:$0xff] %v354_v25  ;;  %v358_v27 = vld [vmem:[%s1401_s7 + $0x1b0] sm:$0xff] }
  0x27   : > { %357 = vst [vmem:[%s1406_s8 + $0xd0] sm:$0xff] %v356_v26  ;;  %v360_v28 = vld [vmem:[%s1401_s7 + $0x1c0] sm:$0xff]  ;;  %v362_v29 = vld [vmem:[%s1401_s7 + $0x1d0] sm:$0xff]  ;;  %359 = vst [vmem:[%s1406_s8 + $0xd8] sm:$0xff] %v358_v27 }
  0x28   : > { %361 = vst [vmem:[%s1406_s8 + $0xe0] sm:$0xff] %v360_v28  ;;  %363 = vst [vmem:[%s1406_s8 + $0xe8] sm:$0xff] %v362_v29  ;;  %v364_v30 = vld [vmem:[%s1401_s7 + $0x1e0] sm:$0xff]  ;;  %v366_v31 = vld [vmem:[%s1401_s7 + $0x1f0] sm:$0xff] }
  0x29   : > { %v368_v32 = vld [vmem:[%s1401_s7 + $0x200] sm:$0xff]  ;;  %365 = vst [vmem:[%s1406_s8 + $0xf0] sm:$0xff] %v364_v30  ;;  %367 = vst [vmem:[%s1406_s8 + $0xf8] sm:$0xff] %v366_v31  ;;  %v370_v33 = vld [vmem:[%s1401_s7 + $0x210] sm:$0xff] }
  0x2a   : > { %369 = vst [vmem:[%s1406_s8 + $0x100] sm:$0xff] %v368_v32  ;;  %v372_v34 = vld [vmem:[%s1401_s7 + $0x220] sm:$0xff]  ;;  %v374_v35 = vld [vmem:[%s1401_s7 + $0x230] sm:$0xff]  ;;  %371 = vst [vmem:[%s1406_s8 + $0x108] sm:$0xff] %v370_v33 }
  0x2b   : > { %373 = vst [vmem:[%s1406_s8 + $0x110] sm:$0xff] %v372_v34  ;;  %375 = vst [vmem:[%s1406_s8 + $0x118] sm:$0xff] %v374_v35  ;;  %v376_v36 = vld [vmem:[%s1401_s7 + $0x240] sm:$0xff]  ;;  %v378_v37 = vld [vmem:[%s1401_s7 + $0x250] sm:$0xff] }
  0x2c   : > { %v380_v38 = vld [vmem:[%s1401_s7 + $0x260] sm:$0xff]  ;;  %377 = vst [vmem:[%s1406_s8 + $0x120] sm:$0xff] %v376_v36  ;;  %379 = vst [vmem:[%s1406_s8 + $0x128] sm:$0xff] %v378_v37  ;;  %v382_v39 = vld [vmem:[%s1401_s7 + $0x270] sm:$0xff] }
  0x2d   : > { %381 = vst [vmem:[%s1406_s8 + $0x130] sm:$0xff] %v380_v38  ;;  %v384_v40 = vld [vmem:[%s1401_s7 + $0x280] sm:$0xff]  ;;  %v386_v41 = vld [vmem:[%s1401_s7 + $0x290] sm:$0xff]  ;;  %383 = vst [vmem:[%s1406_s8 + $0x138] sm:$0xff] %v382_v39 }
  0x2e   : > { %385 = vst [vmem:[%s1406_s8 + $0x140] sm:$0xff] %v384_v40  ;;  %387 = vst [vmem:[%s1406_s8 + $0x148] sm:$0xff] %v386_v41  ;;  %v388_v42 = vld [vmem:[%s1401_s7 + $0x2a0] sm:$0xff]  ;;  %v390_v43 = vld [vmem:[%s1401_s7 + $0x2b0] sm:$0xff] }
  0x2f   : > { %v392_v44 = vld [vmem:[%s1401_s7 + $0x2c0] sm:$0xff]  ;;  %389 = vst [vmem:[%s1406_s8 + $0x150] sm:$0xff] %v388_v42  ;;  %391 = vst [vmem:[%s1406_s8 + $0x158] sm:$0xff] %v390_v43  ;;  %v394_v45 = vld [vmem:[%s1401_s7 + $0x2d0] sm:$0xff] }
  0x30   : > { %393 = vst [vmem:[%s1406_s8 + $0x160] sm:$0xff] %v392_v44  ;;  %v396_v46 = vld [vmem:[%s1401_s7 + $0x2e0] sm:$0xff]  ;;  %v398_v47 = vld [vmem:[%s1401_s7 + $0x2f0] sm:$0xff]  ;;  %395 = vst [vmem:[%s1406_s8 + $0x168] sm:$0xff] %v394_v45 }
  0x31   : > { %397 = vst [vmem:[%s1406_s8 + $0x170] sm:$0xff] %v396_v46  ;;  %399 = vst [vmem:[%s1406_s8 + $0x178] sm:$0xff] %v398_v47 }
  0x32 PF: > { %p1055_p7 = scmp.ge.s32.totalorder %s1317_s18, 1  ;;  %p412_p8 = scmp.lt.s32.totalorder %s1317_s18, 13 }
  0x34   : > { %p413_p9 = pnand %p1055_p7, %p412_p8 }
  0x35   : > { %s419_s9 = sand.u32 (!%p413_p9), 1, %s1293_s12   ;;  %s459_s10 = smul.u32 (!%p413_p9), 3, %s1301_s14 }
  0x36   : > { %416 = sbr.rel (%p413_p9) target bundleno = 394 (0x18a), region = 66  ;;  %s1057_s21 = sshll.u32 (!%p413_p9), %s1305_s15, 1 }
  0x37   : > { %s1121_s11 = smul.u32 (!%p413_p9), 384, %s419_s9  ;;  %p462_p10 = scmp.lt.s32.totalorder (!%p413_p9), %s459_s10, 17 }
  0x38   : > { %p472_p11 = scmp.lt.s32.totalorder (!%p413_p9), %s1057_s21, 3  ;;  %p1060_p12 = scmp.ne.s32.totalorder (!%p413_p9), %s1301_s14, 0 }
  0x39   : > { %s1523_s5 = scalar_lea.vmem (!%p413_p9), [#allocation3], %s1121_s11 }
  0x3d   : > { %s1621_s10 = smov (!%p462_p10, %s459_s10), 17  ;;  %s1623_s21 = smov (!%p472_p11, %s1057_s21), 3 }
  0x3e   : > { %s1056_s22 = sshll.u32 %s1621_s10, 2  ;;  %s474_s12 = scalar_lea.vmem %s1606_s2, %s1623_s21  ;;  %v1319_v48 = vmov (!%p1060_p12), 0.0  }
  0x3f   : > { %s1511_s26 = scalar_lea.vmem %s1604_s0, %s1056_s22  ;;  %s1059_s29 = sshll.u32 %s1623_s21, 2  ;;  %491 = vst [vmem:[#allocation2] sm:$0xff] (!%p1060_p12), %v1319_v48  ;;  %492 = vst [vmem:[#allocation2 + $0x8] sm:$0xff] (!%p1060_p12), %v1319_v48 }
  0x40   : > { %s1521_s4 = scalar_lea.vmem %s1607_s3, %s1059_s29  ;;  %490 = sbr.rel (%p1060_p12) target bundleno = 71 (0x47), region = 74 }
  0x47 PF: > { %v1180_v49 = vld [vmem:[%s1523_s5 + $0x4] ss:$8 sps:$4 sm:$0xff]   ;;  %v1182_v50 = vld [vmem:[%s1523_s5] ss:$8 sps:$4 sm:$0xff]   ;;  %v1320_v51 = vmov 0   ;;  %v495_v18 = vld [vmem:[%s1511_s26] sm:$0xff] }
  0x48   : > { %869 = vmatprep.mubr.bf16.mxu1 %v1320_v51  ;;  %796 = vmatprep.subr.bf16.mxu0 %v1180_v49  ;;  %v1183_v52 = vld [vmem:[%s1523_s5 + $0x14] ss:$8 sps:$4 sm:$0xff]   ;;  %v1185_v53 = vld [vmem:[%s1523_s5 + $0x10] ss:$8 sps:$4 sm:$0xff]   ;;  %v1186_v54 = vld [vmem:[%s1523_s5 + $0x24] ss:$8 sps:$4 sm:$0xff]   ;;  %v1062_v19 = vcombine.high %v495_v18, %v495_v18  ;;  %v1061_v37 = vcombine.low %v495_v18, %v495_v18 }
  0x49   : > { %797 = vmatpush1.bf16.msra.mxu0 %v1182_v50  ;;  %v1188_v55 = vld [vmem:[%s1523_s5 + $0x20] ss:$8 sps:$4 sm:$0xff]   ;;  %v1189_v56 = vld [vmem:[%s1523_s5 + $0x34] ss:$8 sps:$4 sm:$0xff]   ;;  %v1191_v57 = vld [vmem:[%s1523_s5 + $0x30] ss:$8 sps:$4 sm:$0xff]  }
  0x4a   : > { %798 = vmatprep.subr.bf16.mxu0 %v1183_v52  ;;  %v1204_v58 = vld [vmem:[%s1523_s5 + $0x104] ss:$8 sps:$4 sm:$0xff]   ;;  %v1206_v59 = vld [vmem:[%s1523_s5 + $0x100] ss:$8 sps:$4 sm:$0xff]   ;;  %v1210_v61 = vld [vmem:[%s1523_s5 + $0x114] ss:$8 sps:$4 sm:$0xff]   ;;  %828 = vmatprep.mubr.bf16.mxu0 %v1062_v19 }
  0x4b   : > { %v1192_v60 = vld [vmem:[%s1523_s5 + $0x44] ss:$8 sps:$4 sm:$0xff]   ;;  %837 = vmatprep.subr.bf16.mxu1 %v1204_v58  ;;  %v1212_v62 = vld [vmem:[%s1523_s5 + $0x110] ss:$8 sps:$4 sm:$0xff]   ;;  %v1194_v63 = vld [vmem:[%s1523_s5 + $0x40] ss:$8 sps:$4 sm:$0xff]  }
  0x4c   : > { %838 = vmatpush1.bf16.msra.mxu1 %v1206_v59  ;;  %v1195_v0 = vld [vmem:[%s1523_s5 + $0x54] ss:$8 sps:$4 sm:$0xff]   ;;  %v1216_v1 = vld [vmem:[%s1523_s5 + $0x124] ss:$8 sps:$4 sm:$0xff]   ;;  %v1218_v2 = vld [vmem:[%s1523_s5 + $0x120] ss:$8 sps:$4 sm:$0xff]  }
  0x4d   : > { %799 = vmatpush1.bf16.msra.mxu0 %v1185_v53  ;;  %839 = vmatprep.subr.bf16.mxu1 %v1210_v61  ;;  %v1197_v3 = vld [vmem:[%s1523_s5 + $0x50] ss:$8 sps:$4 sm:$0xff]   ;;  %v1222_v4 = vld [vmem:[%s1523_s5 + $0x134] ss:$8 sps:$4 sm:$0xff]   ;;  %v1198_v5 = vld [vmem:[%s1523_s5 + $0x64] ss:$8 sps:$4 sm:$0xff]  }
  0x4e   : > { %800 = vmatprep.subr.bf16.mxu0 %v1186_v54  ;;  %v1224_v6 = vld [vmem:[%s1523_s5 + $0x130] ss:$8 sps:$4 sm:$0xff]   ;;  %v1200_v7 = vld [vmem:[%s1523_s5 + $0x60] ss:$8 sps:$4 sm:$0xff]   ;;  %v1228_v8 = vld [vmem:[%s1523_s5 + $0x144] ss:$8 sps:$4 sm:$0xff]  }
  0x4f   : > { %v1201_v9 = vld [vmem:[%s1523_s5 + $0x74] ss:$8 sps:$4 sm:$0xff]   ;;  %v1230_v10 = vld [vmem:[%s1523_s5 + $0x140] ss:$8 sps:$4 sm:$0xff]   ;;  %v1203_v11 = vld [vmem:[%s1523_s5 + $0x70] ss:$8 sps:$4 sm:$0xff]  }
  0x50   : > { %840 = vmatpush1.bf16.msra.mxu1 %v1212_v62  ;;  %v1234_v12 = vld [vmem:[%s1523_s5 + $0x154] ss:$8 sps:$4 sm:$0xff]   ;;  %v1207_v13 = vld [vmem:[%s1523_s5 + $0x84] ss:$8 sps:$4 sm:$0xff]   ;;  %v1236_v14 = vld [vmem:[%s1523_s5 + $0x150] ss:$8 sps:$4 sm:$0xff]  }
  0x51   : > { %801 = vmatpush1.bf16.msra.mxu0 %v1188_v55  ;;  %841 = vmatprep.subr.bf16.mxu1 %v1216_v1  ;;  %v1209_v15 = vld [vmem:[%s1523_s5 + $0x80] ss:$8 sps:$4 sm:$0xff]   ;;  %v1240_v16 = vld [vmem:[%s1523_s5 + $0x164] ss:$8 sps:$4 sm:$0xff]   ;;  %v1213_v17 = vld [vmem:[%s1523_s5 + $0x94] ss:$8 sps:$4 sm:$0xff]  }
  0x52   : > { %802 = vmatprep.subr.bf16.mxu0 %v1189_v56  ;;  %v1242_v20 = vld [vmem:[%s1523_s5 + $0x160] ss:$8 sps:$4 sm:$0xff]   ;;  %v1215_v21 = vld [vmem:[%s1523_s5 + $0x90] ss:$8 sps:$4 sm:$0xff]   ;;  %v1246_v22 = vld [vmem:[%s1523_s5 + $0x174] ss:$8 sps:$4 sm:$0xff]  }
  0x53   : > { %v1219_v23 = vld [vmem:[%s1523_s5 + $0xa4] ss:$8 sps:$4 sm:$0xff]   ;;  %v1248_v24 = vld [vmem:[%s1523_s5 + $0x170] ss:$8 sps:$4 sm:$0xff]   ;;  %v1221_v25 = vld [vmem:[%s1523_s5 + $0xa0] ss:$8 sps:$4 sm:$0xff]  }
  0x54   : > { %842 = vmatpush1.bf16.msra.mxu1 %v1218_v2  ;;  %v1225_v26 = vld [vmem:[%s1523_s5 + $0xb4] ss:$8 sps:$4 sm:$0xff]   ;;  %v1252_v27 = vld [vmem:[%s1511_s26 + $0x8] ss:$0 sps:$4 sm:$0xff]   ;;  %v1231_v29 = vld [vmem:[%s1523_s5 + $0xc4] ss:$8 sps:$4 sm:$0xff]  }
  0x55   : > { %803 = vmatpush1.bf16.msra.mxu0 %v1191_v57  ;;  %843 = vmatprep.subr.bf16.mxu1 %v1222_v4  ;;  %v1227_v28 = vld [vmem:[%s1523_s5 + $0xb0] ss:$8 sps:$4 sm:$0xff]   ;;  %v1233_v30 = vld [vmem:[%s1523_s5 + $0xc0] ss:$8 sps:$4 sm:$0xff]   ;;  %v1237_v31 = vld [vmem:[%s1523_s5 + $0xd4] ss:$8 sps:$4 sm:$0xff]  }
  0x56   : > { %804 = vmatprep.subr.bf16.mxu0 %v1192_v60  ;;  %v1239_v32 = vld [vmem:[%s1523_s5 + $0xd0] ss:$8 sps:$4 sm:$0xff]   ;;  %v1243_v33 = vld [vmem:[%s1523_s5 + $0xe4] ss:$8 sps:$4 sm:$0xff]   ;;  %v1245_v34 = vld [vmem:[%s1523_s5 + $0xe0] ss:$8 sps:$4 sm:$0xff]  }
  0x57   : > { %v1249_v35 = vld [vmem:[%s1523_s5 + $0xf4] ss:$8 sps:$4 sm:$0xff]   ;;  %v1251_v36 = vld [vmem:[%s1523_s5 + $0xf0] ss:$8 sps:$4 sm:$0xff]   ;;  %p1112_p13 = scmp.ne.s32.totalorder %s1301_s14, 5 }
  0x58   : > { %844 = vmatpush1.bf16.msra.mxu1 %v1224_v6  ;;  %v493_v42 = vld [vmem:[#allocation2] sm:$0xff]  ;;  %v494_v45 = vld [vmem:[#allocation2 + $0x8] sm:$0xff]  ;;  %v890_v52 = vlaneseq (!%p1112_p13) }
  0x59   : > { %805 = vmatpush1.bf16.msra.mxu0 %v1194_v63  ;;  %845 = vmatprep.subr.bf16.mxu1 %v1228_v8  ;;  %v888_v54 = vld [vmem:[%s474_s12] sm:$0x3] (!%p1112_p13) }
  0x5a   : > { %806 = vmatprep.subr.bf16.mxu0 %v1195_v0  ;;  %v891_v53 = vshrl.u32 (!%p1112_p13), %v890_v52, 7 }
  0x5c   : > { %846 = vmatpush1.bf16.msra.mxu1 %v1230_v10  ;;  %v892_v55 = vsub.s32 (!%p1112_p13), 0, %v891_v53  ;;  %v896_v56 = vsub.s32 (!%p1112_p13), 1, %v891_v53 }
  0x5d   : > { %807 = vmatpush1.bf16.msra.mxu0 %v1197_v3  ;;  %847 = vmatprep.subr.bf16.mxu1 %v1234_v12 }
  0x5e   : > { %808 = vmatprep.subr.bf16.mxu0 %v1198_v5  ;;  %v893_v59 = vrot.slane (!%p1112_p13), %v888_v54, %v892_v55  ;;  %v897_v60 = vrot.slane (!%p1112_p13), %v888_v54, %v896_v56 }
  0x60   : > { %848 = vmatpush1.bf16.msra.mxu1 %v1236_v14 }
  0x61   : > { %809 = vmatpush1.bf16.msra.mxu0 %v1200_v7  ;;  %849 = vmatprep.subr.bf16.mxu1 %v1240_v16 }
  0x62   : > { %810 = vmatprep.subr.bf16.mxu0 %v1201_v9 }
  0x64   : > { %850 = vmatpush1.bf16.msra.mxu1 %v1242_v20 }
  0x65   : > { %811 = vmatpush1.bf16.msra.mxu0 %v1203_v11  ;;  %851 = vmatprep.subr.bf16.mxu1 %v1246_v22 }
  0x66   : > { %812 = vmatprep.subr.bf16.mxu0 %v1207_v13 }
  0x68   : > { %852 = vmatpush1.bf16.msra.mxu1 %v1248_v24 }
  0x69   : > { %813 = vmatpush1.bf16.msra.mxu0 %v1209_v15 }
  0x6a   : > { %814 = vmatprep.subr.bf16.mxu0 %v1213_v17 }
  0x6b   : > { %870 = vmatmul.mubr.bf16.vlgmr.msra.gmra.mrb[0].mxu1 %v1252_v27 }
  0x6d   : > { %815 = vmatpush1.bf16.msra.mxu0 %v1215_v21 }
  0x6e   : > { %816 = vmatprep.subr.bf16.mxu0 %v1219_v23 }
  0x71   : > { %817 = vmatpush1.bf16.msra.mxu0 %v1221_v25 }
  0x72   : > { %818 = vmatprep.subr.bf16.mxu0 %v1225_v26 }
  0x75   : > { %819 = vmatpush1.bf16.msra.mxu0 %v1227_v28 }
  0x76   : > { %820 = vmatprep.subr.bf16.mxu0 %v1231_v29 }
  0x79   : > { %821 = vmatpush1.bf16.msra.mxu0 %v1233_v30 }
  0x7a   : > { %822 = vmatprep.subr.bf16.mxu0 %v1237_v31 }
  0x7d   : > { %823 = vmatpush1.bf16.msra.mxu0 %v1239_v32 }
  0x7e   : > { %824 = vmatprep.subr.bf16.mxu0 %v1243_v33 }
  0x81   : > { %825 = vmatpush1.bf16.msra.mxu0 %v1245_v34 }
  0x82   : > { %826 = vmatprep.subr.bf16.mxu0 %v1249_v35 }
  0x85   : > { %827 = vmatpush1.bf16.msra.mxu0 %v1251_v36 }
  0x88   : > { %829 = vmatmul.mubr.bf16.vlgmr.msra.gmra.mrb[0].mxu0 %v1061_v37 }
 0x13e   : > { %v871_v38 = vpop.f32.mrb[0].mxu1 }
 0x13f   : > { %v873_v39 = vpop.f32.mrb[1].mxu1 }
 0x140   : > { %v875_v40 = vpop.f32.mrb[2].mxu1 }
 0x141   : > { %v876_v41 = vpop.f32.mrb[3].mxu1 }
 0x15b   : > { %v830_v43 = vpop.f32.mrb[0].mxu0  ;;  %885 = sbr.rel (%p1112_p13) target bundleno = 394 (0x18a), region = 78 }
 0x15c   : > { %v872_v44 = vadd.f32 %v871_v38, %v830_v43  ;;  %v832_v46 = vpop.f32.mrb[1].mxu0 }
 0x15d   : > { %v874_v47 = vadd.f32 %v873_v39, %v832_v46  ;;  %v834_v48 = vpop.f32.mrb[2].mxu0 }
 0x15e   : > { %v878_v49 = vadd.f32 %v872_v44, %v493_v42  ;;  %v835_v50 = vpop.f32.mrb[3].mxu0 }
 0x15f   : > { %v879_v51 = vadd.f32 %v874_v47, %v494_v45 }
 0x160   : > { %880 = vst [vmem:[#allocation2] sm:$0xff] %v878_v49 }
 0x161   : > { %881 = vst [vmem:[#allocation2 + $0x8] sm:$0xff] %v879_v51 }
 0x167   : > { %v886_v57 = vld [vmem:[#allocation2] sm:$0xff] }
 0x168   : > { %v887_v58 = vld [vmem:[#allocation2 + $0x8] sm:$0xff]  ;;  %v900_v61 = vadd.f32 %v893_v59, %v886_v57 }
 0x169   : > { %v901_v62 = vadd.f32 %v897_v60, %v887_v58 }
 0x16a   : > { %v1113_v63 = vmul.f32 -1.442695, %v900_v61 }
 0x16b   : > { %v1114_v0 = vmul.f32 -1.442695, %v901_v62 }
 0x16c   : > { %1255 = vpow2.f32 %v1113_v63 }
 0x16d   : > { %1257 = vpow2.f32 %v1114_v0 }
 0x176   : > { %v1256_v1 = vpop.eup %1255 }
 0x177   : > { %v1258_v2 = vpop.eup %1257  ;;  %v908_v3 = vadd.f32 1.0, %v1256_v1 }
 0x178   : > { %v909_v4 = vadd.f32 1.0, %v1258_v2 }
 0x179   : > { %1259 = vrcp.f32 %v908_v3 }
 0x17a   : > { %1261 = vrcp.f32 %v909_v4 }
 0x183   : > { %v1260_v5 = vpop.eup %1259 }
 0x184   : > { %v1262_v6 = vpop.eup %1261  ;;  %v914_v7 = vmul.f32 %v1260_v5, %v900_v61 }
 0x185   : > { %v915_v8 = vmul.f32 %v1262_v6, %v901_v62 }
 0x187   : > { %v1119_v9 = vpack.c.bf16 %v915_v8, %v914_v7 }
 0x189   : > { %924 = vst [vmem:[%s1521_s4] sm:$0xff] %v1119_v9 }
 0x18a PF: > { %s13_s18 = sadd.s32 1, %s1317_s18   ;;  %s1608_s12 = smov %s1297_s13 }
 0x18b   : > { %p10_p0 = scmp.ge.s32.totalorder %s13_s18, 14   ;;  %s1609_s13 = smov %s1392_s25 }
 0x18c   : > { %s1610_s14 = smov %s1309_s16  ;;  %s1611_s15 = smov %s1313_s17 }
 0x18d   : > { %s1612_s16 = smov %s1615_s19  ;;  %s1613_s17 = smov %s1619_s20 }
 0x18e   :  { %12 = sbr.rel (!%p10_p0) target bundleno = 4 (0x4), region = 119 }

// kernel: resnet18_forward.35
= control target key start
LH: loop header
LB: loop body
LE: loop exit
PB: predicated region body
PF: predicated region fallthrough
CT: control target
= control target key end

     0   :  { %s1545_s12 = smov 0   ;;  %s1547_s13 = smov 0   ;;  %s1856_s0 = inlined_call_operand.vmem [shape: bf16[8,4608], index: 0, kind: input, shape index: {}]   ;;  %s1857_s1 = inlined_call_operand.vmem [shape: bf16[4608,512], index: 1, kind: input, shape index: {}]   ;;  %s1858_s2 = inlined_call_operand.vmem [shape: f32[1,512], index: 2, kind: input, shape index: {}]   ;;  %s1859_s3 = inlined_call_operand.vmem [shape: bf16[8,512], index: 3, kind: output, shape index: {}]  }
   0x1   :  { %s1549_s14 = smov 0   ;;  %s1551_s15 = smov 0  }
   0x2   :  { %s1553_s16 = smov 0   ;;  %s1555_s17 = smov 0  }
   0x3   :  { %s1557_s18 = smov 0  }
   0x4 LB: > { %s25_s19 = sadd.s32 1, %s1514_s16  ;;  %s28_s20 = sadd.s32 1, %s1518_s17  ;;  %s1522_s18 = sphi %s1557_s18, %s13_s18   ;;  %s1518_s17 = sphi %s1555_s17, %s1865_s17   ;;  %s1514_s16 = sphi %s1553_s16, %s1864_s16   ;;  %s1510_s15 = sphi %s1551_s15, %s1863_s15   ;;  %s1506_s14 = sphi %s1549_s14, %s1862_s14   ;;  %s1502_s13 = sphi %s1547_s13, %s1861_s13   ;;  %s1498_s12 = sphi %s1545_s12, %s1860_s12  }
   0x5   : > { %p26_p0 = scmp.ge.s32.totalorder %s25_s19, 9  ;;  %p76_p1 = scmp.ne.s32.totalorder %s1502_s13, %s1498_s12 }
   0x6   : > { %p77_p2 = scmp.eq.s32.totalorder %s1522_s18, 0  ;;  %s69_s24 = sadd.s32 1, %s1502_s13 }
   0x7   : > { %s1867_s19 = smov (%p26_p0, %s25_s19), 0  ;;  %s1869_s20 = smov (!%p26_p0, %s28_s20), %s1518_s17 }
   0x8   : > { %p78_p3 = por %p77_p2, %p76_p1  ;;  %p30_p4 = scmp.ge.s32.totalorder %s1869_s20, 2 }
   0x9   : > { %s64_s21 = ssub.s32 %s1514_s16, %s1867_s19  ;;  %p1213_p6 = scmp.ge.s32.totalorder %s1522_s18, 18 }
   0xa   : > { %s1871_s20 = smov (%p30_p4, %s1869_s20), 0 }
   0xb   : > { %s65_s22 = ssub.s32 %s1518_s17, %s1871_s20  ;;  %156 = sbr.rel (%p1213_p6) target bundleno = 57 (0x39), region = 16 }
   0xc   : > { %s66_s23 = sor.u32 %s65_s22, %s64_s21 }
   0xd   : > { %p67_p5 = scmp.eq.s32.totalorder %s66_s23, 0 }
   0xf   : > { %s1596_s25 = scalar_select %p67_p5, %s1502_s13, %s69_s24  }
  0x12   : > { %172 = sbr.rel (!%p78_p3) target bundleno = 57 (0x39), region = 24  ;;  %s174_s26 = sand.u32 (%p78_p3), 1, %s1502_s13  }
  0x13   : > { %s1216_s27 = sshll.u32 (%p78_p3), %s1518_s17, 1  ;;  %s1214_s28 = sshll.u32 (%p78_p3), %s174_s26, 9 }
  0x14   : > { %s1301_s29 = sshll.u32 (%p78_p3), %s1514_s16, 8  ;;  %s1610_s8 = scalar_lea.vmem (%p78_p3), [#allocation3], %s1214_s28 }
  0x15   : > { %s180_s30 = sadd.s32 (%p78_p3), %s1301_s29, %s1216_s27 }
  0x16   : > { %s1218_s4 = sshll.u32 (%p78_p3), %s180_s30, 2 }
  0x17   : > { %s1605_s7 = scalar_lea.vmem (%p78_p3), %s1857_s1, %s1218_s4 }
  0x18   : > { %v336_v0 = vld [vmem:[%s1605_s7] sm:$0xff] (%p78_p3)  ;;  %v338_v1 = vld [vmem:[%s1605_s7 + $0x10] sm:$0xff] (%p78_p3) }
  0x19   : > { %v340_v2 = vld [vmem:[%s1605_s7 + $0x20] sm:$0xff]  ;;  %337 = vst [vmem:[%s1610_s8] sm:$0xff] %v336_v0  ;;  %339 = vst [vmem:[%s1610_s8 + $0x8] sm:$0xff] %v338_v1  ;;  %v342_v3 = vld [vmem:[%s1605_s7 + $0x30] sm:$0xff] }
  0x1a   : > { %341 = vst [vmem:[%s1610_s8 + $0x10] sm:$0xff] %v340_v2  ;;  %v344_v4 = vld [vmem:[%s1605_s7 + $0x40] sm:$0xff]  ;;  %v346_v5 = vld [vmem:[%s1605_s7 + $0x50] sm:$0xff]  ;;  %343 = vst [vmem:[%s1610_s8 + $0x18] sm:$0xff] %v342_v3 }
  0x1b   : > { %345 = vst [vmem:[%s1610_s8 + $0x20] sm:$0xff] %v344_v4  ;;  %347 = vst [vmem:[%s1610_s8 + $0x28] sm:$0xff] %v346_v5  ;;  %v348_v6 = vld [vmem:[%s1605_s7 + $0x60] sm:$0xff]  ;;  %v350_v7 = vld [vmem:[%s1605_s7 + $0x70] sm:$0xff] }
  0x1c   : > { %v352_v8 = vld [vmem:[%s1605_s7 + $0x80] sm:$0xff]  ;;  %349 = vst [vmem:[%s1610_s8 + $0x30] sm:$0xff] %v348_v6  ;;  %351 = vst [vmem:[%s1610_s8 + $0x38] sm:$0xff] %v350_v7  ;;  %v354_v9 = vld [vmem:[%s1605_s7 + $0x90] sm:$0xff] }
  0x1d   : > { %353 = vst [vmem:[%s1610_s8 + $0x40] sm:$0xff] %v352_v8  ;;  %v356_v10 = vld [vmem:[%s1605_s7 + $0xa0] sm:$0xff]  ;;  %v358_v11 = vld [vmem:[%s1605_s7 + $0xb0] sm:$0xff]  ;;  %355 = vst [vmem:[%s1610_s8 + $0x48] sm:$0xff] %v354_v9 }
  0x1e   : > { %357 = vst [vmem:[%s1610_s8 + $0x50] sm:$0xff] %v356_v10  ;;  %359 = vst [vmem:[%s1610_s8 + $0x58] sm:$0xff] %v358_v11  ;;  %v360_v12 = vld [vmem:[%s1605_s7 + $0xc0] sm:$0xff]  ;;  %v362_v13 = vld [vmem:[%s1605_s7 + $0xd0] sm:$0xff] }
  0x1f   : > { %v364_v14 = vld [vmem:[%s1605_s7 + $0xe0] sm:$0xff]  ;;  %361 = vst [vmem:[%s1610_s8 + $0x60] sm:$0xff] %v360_v12  ;;  %363 = vst [vmem:[%s1610_s8 + $0x68] sm:$0xff] %v362_v13  ;;  %v366_v15 = vld [vmem:[%s1605_s7 + $0xf0] sm:$0xff] }
  0x20   : > { %365 = vst [vmem:[%s1610_s8 + $0x70] sm:$0xff] %v364_v14  ;;  %v368_v16 = vld [vmem:[%s1605_s7 + $0x100] sm:$0xff]  ;;  %v370_v17 = vld [vmem:[%s1605_s7 + $0x110] sm:$0xff]  ;;  %367 = vst [vmem:[%s1610_s8 + $0x78] sm:$0xff] %v366_v15 }
  0x21   : > { %369 = vst [vmem:[%s1610_s8 + $0x80] sm:$0xff] %v368_v16  ;;  %371 = vst [vmem:[%s1610_s8 + $0x88] sm:$0xff] %v370_v17  ;;  %v372_v18 = vld [vmem:[%s1605_s7 + $0x120] sm:$0xff]  ;;  %v374_v19 = vld [vmem:[%s1605_s7 + $0x130] sm:$0xff] }
  0x22   : > { %v376_v20 = vld [vmem:[%s1605_s7 + $0x140] sm:$0xff]  ;;  %373 = vst [vmem:[%s1610_s8 + $0x90] sm:$0xff] %v372_v18  ;;  %375 = vst [vmem:[%s1610_s8 + $0x98] sm:$0xff] %v374_v19  ;;  %v378_v21 = vld [vmem:[%s1605_s7 + $0x150] sm:$0xff] }
  0x23   : > { %377 = vst [vmem:[%s1610_s8 + $0xa0] sm:$0xff] %v376_v20  ;;  %v380_v22 = vld [vmem:[%s1605_s7 + $0x160] sm:$0xff]  ;;  %v382_v23 = vld [vmem:[%s1605_s7 + $0x170] sm:$0xff]  ;;  %379 = vst [vmem:[%s1610_s8 + $0xa8] sm:$0xff] %v378_v21 }
  0x24   : > { %381 = vst [vmem:[%s1610_s8 + $0xb0] sm:$0xff] %v380_v22  ;;  %383 = vst [vmem:[%s1610_s8 + $0xb8] sm:$0xff] %v382_v23  ;;  %v384_v24 = vld [vmem:[%s1605_s7 + $0x180] sm:$0xff]  ;;  %v386_v25 = vld [vmem:[%s1605_s7 + $0x190] sm:$0xff] }
  0x25   : > { %v388_v26 = vld [vmem:[%s1605_s7 + $0x1a0] sm:$0xff]  ;;  %385 = vst [vmem:[%s1610_s8 + $0xc0] sm:$0xff] %v384_v24  ;;  %387 = vst [vmem:[%s1610_s8 + $0xc8] sm:$0xff] %v386_v25  ;;  %v390_v27 = vld [vmem:[%s1605_s7 + $0x1b0] sm:$0xff] }
  0x26   : > { %389 = vst [vmem:[%s1610_s8 + $0xd0] sm:$0xff] %v388_v26  ;;  %v392_v28 = vld [vmem:[%s1605_s7 + $0x1c0] sm:$0xff]  ;;  %v394_v29 = vld [vmem:[%s1605_s7 + $0x1d0] sm:$0xff]  ;;  %391 = vst [vmem:[%s1610_s8 + $0xd8] sm:$0xff] %v390_v27 }
  0x27   : > { %393 = vst [vmem:[%s1610_s8 + $0xe0] sm:$0xff] %v392_v28  ;;  %395 = vst [vmem:[%s1610_s8 + $0xe8] sm:$0xff] %v394_v29  ;;  %v396_v30 = vld [vmem:[%s1605_s7 + $0x1e0] sm:$0xff]  ;;  %v398_v31 = vld [vmem:[%s1605_s7 + $0x1f0] sm:$0xff] }
  0x28   : > { %v400_v32 = vld [vmem:[%s1605_s7 + $0x200] sm:$0xff]  ;;  %397 = vst [vmem:[%s1610_s8 + $0xf0] sm:$0xff] %v396_v30  ;;  %399 = vst [vmem:[%s1610_s8 + $0xf8] sm:$0xff] %v398_v31  ;;  %v402_v33 = vld [vmem:[%s1605_s7 + $0x210] sm:$0xff] }
  0x29   : > { %401 = vst [vmem:[%s1610_s8 + $0x100] sm:$0xff] %v400_v32  ;;  %v404_v34 = vld [vmem:[%s1605_s7 + $0x220] sm:$0xff]  ;;  %v406_v35 = vld [vmem:[%s1605_s7 + $0x230] sm:$0xff]  ;;  %403 = vst [vmem:[%s1610_s8 + $0x108] sm:$0xff] %v402_v33 }
  0x2a   : > { %405 = vst [vmem:[%s1610_s8 + $0x110] sm:$0xff] %v404_v34  ;;  %407 = vst [vmem:[%s1610_s8 + $0x118] sm:$0xff] %v406_v35  ;;  %v408_v36 = vld [vmem:[%s1605_s7 + $0x240] sm:$0xff]  ;;  %v410_v37 = vld [vmem:[%s1605_s7 + $0x250] sm:$0xff] }
  0x2b   : > { %v412_v38 = vld [vmem:[%s1605_s7 + $0x260] sm:$0xff]  ;;  %409 = vst [vmem:[%s1610_s8 + $0x120] sm:$0xff] %v408_v36  ;;  %411 = vst [vmem:[%s1610_s8 + $0x128] sm:$0xff] %v410_v37  ;;  %v414_v39 = vld [vmem:[%s1605_s7 + $0x270] sm:$0xff] }
  0x2c   : > { %413 = vst [vmem:[%s1610_s8 + $0x130] sm:$0xff] %v412_v38  ;;  %v416_v40 = vld [vmem:[%s1605_s7 + $0x280] sm:$0xff]  ;;  %v418_v41 = vld [vmem:[%s1605_s7 + $0x290] sm:$0xff]  ;;  %415 = vst [vmem:[%s1610_s8 + $0x138] sm:$0xff] %v414_v39 }
  0x2d   : > { %417 = vst [vmem:[%s1610_s8 + $0x140] sm:$0xff] %v416_v40  ;;  %419 = vst [vmem:[%s1610_s8 + $0x148] sm:$0xff] %v418_v41  ;;  %v420_v42 = vld [vmem:[%s1605_s7 + $0x2a0] sm:$0xff]  ;;  %v422_v43 = vld [vmem:[%s1605_s7 + $0x2b0] sm:$0xff] }
  0x2e   : > { %v424_v44 = vld [vmem:[%s1605_s7 + $0x2c0] sm:$0xff]  ;;  %421 = vst [vmem:[%s1610_s8 + $0x150] sm:$0xff] %v420_v42  ;;  %423 = vst [vmem:[%s1610_s8 + $0x158] sm:$0xff] %v422_v43  ;;  %v426_v45 = vld [vmem:[%s1605_s7 + $0x2d0] sm:$0xff] }
  0x2f   : > { %425 = vst [vmem:[%s1610_s8 + $0x160] sm:$0xff] %v424_v44  ;;  %v428_v46 = vld [vmem:[%s1605_s7 + $0x2e0] sm:$0xff]  ;;  %v430_v47 = vld [vmem:[%s1605_s7 + $0x2f0] sm:$0xff]  ;;  %427 = vst [vmem:[%s1610_s8 + $0x168] sm:$0xff] %v426_v45 }
  0x30   : > { %429 = vst [vmem:[%s1610_s8 + $0x170] sm:$0xff] %v428_v46  ;;  %431 = vst [vmem:[%s1610_s8 + $0x178] sm:$0xff] %v430_v47  ;;  %v432_v48 = vld [vmem:[%s1605_s7 + $0x300] sm:$0xff]  ;;  %v434_v49 = vld [vmem:[%s1605_s7 + $0x310] sm:$0xff] }
  0x31   : > { %v436_v50 = vld [vmem:[%s1605_s7 + $0x320] sm:$0xff]  ;;  %433 = vst [vmem:[%s1610_s8 + $0x180] sm:$0xff] %v432_v48  ;;  %435 = vst [vmem:[%s1610_s8 + $0x188] sm:$0xff] %v434_v49  ;;  %v438_v51 = vld [vmem:[%s1605_s7 + $0x330] sm:$0xff] }
  0x32   : > { %437 = vst [vmem:[%s1610_s8 + $0x190] sm:$0xff] %v436_v50  ;;  %v440_v52 = vld [vmem:[%s1605_s7 + $0x340] sm:$0xff]  ;;  %v442_v53 = vld [vmem:[%s1605_s7 + $0x350] sm:$0xff]  ;;  %439 = vst [vmem:[%s1610_s8 + $0x198] sm:$0xff] %v438_v51 }
  0x33   : > { %441 = vst [vmem:[%s1610_s8 + $0x1a0] sm:$0xff] %v440_v52  ;;  %443 = vst [vmem:[%s1610_s8 + $0x1a8] sm:$0xff] %v442_v53  ;;  %v444_v54 = vld [vmem:[%s1605_s7 + $0x360] sm:$0xff]  ;;  %v446_v55 = vld [vmem:[%s1605_s7 + $0x370] sm:$0xff] }
  0x34   : > { %v448_v56 = vld [vmem:[%s1605_s7 + $0x380] sm:$0xff]  ;;  %445 = vst [vmem:[%s1610_s8 + $0x1b0] sm:$0xff] %v444_v54  ;;  %447 = vst [vmem:[%s1610_s8 + $0x1b8] sm:$0xff] %v446_v55  ;;  %v450_v57 = vld [vmem:[%s1605_s7 + $0x390] sm:$0xff] }
  0x35   : > { %449 = vst [vmem:[%s1610_s8 + $0x1c0] sm:$0xff] %v448_v56  ;;  %v452_v58 = vld [vmem:[%s1605_s7 + $0x3a0] sm:$0xff]  ;;  %v454_v59 = vld [vmem:[%s1605_s7 + $0x3b0] sm:$0xff]  ;;  %451 = vst [vmem:[%s1610_s8 + $0x1c8] sm:$0xff] %v450_v57 }
  0x36   : > { %453 = vst [vmem:[%s1610_s8 + $0x1d0] sm:$0xff] %v452_v58  ;;  %455 = vst [vmem:[%s1610_s8 + $0x1d8] sm:$0xff] %v454_v59  ;;  %v456_v60 = vld [vmem:[%s1605_s7 + $0x3c0] sm:$0xff]  ;;  %v458_v61 = vld [vmem:[%s1605_s7 + $0x3d0] sm:$0xff] }
  0x37   : > { %v460_v62 = vld [vmem:[%s1605_s7 + $0x3e0] sm:$0xff]  ;;  %457 = vst [vmem:[%s1610_s8 + $0x1e0] sm:$0xff] %v456_v60  ;;  %459 = vst [vmem:[%s1610_s8 + $0x1e8] sm:$0xff] %v458_v61  ;;  %v462_v63 = vld [vmem:[%s1605_s7 + $0x3f0] sm:$0xff] }
  0x38   : > { %461 = vst [vmem:[%s1610_s8 + $0x1f0] sm:$0xff] %v460_v62  ;;  %463 = vst [vmem:[%s1610_s8 + $0x1f8] sm:$0xff] %v462_v63 }
  0x39 PF: > { %p1219_p7 = scmp.ge.s32.totalorder %s1522_s18, 1  ;;  %p476_p8 = scmp.lt.s32.totalorder %s1522_s18, 19 }
  0x3b   : > { %p477_p9 = pnand %p1219_p7, %p476_p8 }
  0x3c   : > { %s483_s9 = sand.u32 (!%p477_p9), 1, %s1498_s12   ;;  %s1221_s10 = sshll.u32 (!%p477_p9), %s1506_s14, 2 }
  0x3d   : > { %480 = sbr.rel (%p477_p9) target bundleno = 402 (0x192), region = 66  ;;  %s1220_s11 = sshll.u32 (!%p477_p9), %s483_s9, 9 }
  0x3e   : > { %p526_p10 = scmp.lt.s32.totalorder (!%p477_p9), %s1221_s10, 35  ;;  %s1223_s21 = sshll.u32 (!%p477_p9), %s1510_s15, 1 }
  0x3f   : > { %p536_p11 = scmp.lt.s32.totalorder (!%p477_p9), %s1223_s21, 3  ;;  %s1759_s5 = scalar_lea.vmem (!%p477_p9), [#allocation3], %s1220_s11 }
  0x40   : > { %p1226_p12 = scmp.ne.s32.totalorder (!%p477_p9), %s1506_s14, 0 }
  0x44   : > { %s1873_s10 = smov (!%p526_p10, %s1221_s10), 35  ;;  %s1875_s21 = smov (!%p536_p11, %s1223_s21), 3 }
  0x45   : > { %s1222_s22 = sshll.u32 %s1873_s10, 2  ;;  %s538_s12 = scalar_lea.vmem %s1858_s2, %s1875_s21  ;;  %v1524_v0 = vmov (!%p1226_p12), 0.0  }
  0x46   : > { %s1745_s26 = scalar_lea.vmem %s1856_s0, %s1222_s22  ;;  %s1225_s29 = sshll.u32 %s1875_s21, 2  ;;  %554 = vst [vmem:[#allocation2] sm:$0xff] (!%p1226_p12), %v1524_v0  ;;  %555 = vst [vmem:[#allocation2 + $0x8] sm:$0xff] (!%p1226_p12), %v1524_v0 }
  0x47   : > { %s1757_s15 = scalar_lea.vmem %s1859_s3, %s1225_s29  ;;  %553 = sbr.rel (%p1226_p12) target bundleno = 78 (0x4e), region = 74 }
  0x4e PF: > { %v1360_v1 = vld [vmem:[%s1759_s5 + $0x4] ss:$8 sps:$4 sm:$0xff]   ;;  %v1364_v3 = vld [vmem:[%s1759_s5] ss:$8 sps:$4 sm:$0xff]   ;;  %v1366_v5 = vld [vmem:[%s1759_s5 + $0x14] ss:$8 sps:$4 sm:$0xff]  }
  0x4f   : > { %v1362_v2 = vld [vmem:[%s1759_s5 + $0x104] ss:$8 sps:$4 sm:$0xff]   ;;  %958 = vmatprep.subr.bf16.mxu0 %v1360_v1  ;;  %v1365_v4 = vld [vmem:[%s1759_s5 + $0x100] ss:$8 sps:$4 sm:$0xff]   ;;  %v1368_v6 = vld [vmem:[%s1759_s5 + $0x114] ss:$8 sps:$4 sm:$0xff]  }
  0x50   : > { %999 = vmatprep.subr.bf16.mxu1 %v1362_v2  ;;  %959 = vmatpush1.bf16.msra.mxu0 %v1364_v3  ;;  %v1370_v7 = vld [vmem:[%s1759_s5 + $0x10] ss:$8 sps:$4 sm:$0xff]   ;;  %v1372_v9 = vld [vmem:[%s1759_s5 + $0x24] ss:$8 sps:$4 sm:$0xff]   ;;  %v1376_v11 = vld [vmem:[%s1759_s5 + $0x20] ss:$8 sps:$4 sm:$0xff]  }
  0x51   : > { %1000 = vmatpush1.bf16.msra.mxu1 %v1365_v4  ;;  %960 = vmatprep.subr.bf16.mxu0 %v1366_v5  ;;  %v1371_v8 = vld [vmem:[%s1759_s5 + $0x110] ss:$8 sps:$4 sm:$0xff]   ;;  %v1374_v10 = vld [vmem:[%s1759_s5 + $0x124] ss:$8 sps:$4 sm:$0xff]   ;;  %v1377_v12 = vld [vmem:[%s1759_s5 + $0x120] ss:$8 sps:$4 sm:$0xff]  }
  0x52   : > { %1001 = vmatprep.subr.bf16.mxu1 %v1368_v6  ;;  %v1378_v13 = vld [vmem:[%s1759_s5 + $0x34] ss:$8 sps:$4 sm:$0xff]   ;;  %v1382_v15 = vld [vmem:[%s1759_s5 + $0x30] ss:$8 sps:$4 sm:$0xff]   ;;  %v1384_v17 = vld [vmem:[%s1759_s5 + $0x44] ss:$8 sps:$4 sm:$0xff]  }
  0x53   : > { %v1380_v14 = vld [vmem:[%s1759_s5 + $0x134] ss:$8 sps:$4 sm:$0xff]   ;;  %v1383_v16 = vld [vmem:[%s1759_s5 + $0x130] ss:$8 sps:$4 sm:$0xff]   ;;  %v1386_v18 = vld [vmem:[%s1759_s5 + $0x144] ss:$8 sps:$4 sm:$0xff]  }
  0x54   : > { %961 = vmatpush1.bf16.msra.mxu0 %v1370_v7  ;;  %v1388_v19 = vld [vmem:[%s1759_s5 + $0x40] ss:$8 sps:$4 sm:$0xff]   ;;  %v1390_v21 = vld [vmem:[%s1759_s5 + $0x54] ss:$8 sps:$4 sm:$0xff]   ;;  %v1394_v23 = vld [vmem:[%s1759_s5 + $0x50] ss:$8 sps:$4 sm:$0xff]  }
  0x55   : > { %1002 = vmatpush1.bf16.msra.mxu1 %v1371_v8  ;;  %962 = vmatprep.subr.bf16.mxu0 %v1372_v9  ;;  %v1389_v20 = vld [vmem:[%s1759_s5 + $0x140] ss:$8 sps:$4 sm:$0xff]   ;;  %v1392_v22 = vld [vmem:[%s1759_s5 + $0x154] ss:$8 sps:$4 sm:$0xff]   ;;  %v1395_v24 = vld [vmem:[%s1759_s5 + $0x150] ss:$8 sps:$4 sm:$0xff]  }
  0x56   : > { %1003 = vmatprep.subr.bf16.mxu1 %v1374_v10  ;;  %v1396_v25 = vld [vmem:[%s1759_s5 + $0x64] ss:$8 sps:$4 sm:$0xff]   ;;  %v1400_v27 = vld [vmem:[%s1759_s5 + $0x60] ss:$8 sps:$4 sm:$0xff]   ;;  %v1402_v29 = vld [vmem:[%s1759_s5 + $0x74] ss:$8 sps:$4 sm:$0xff]  }
  0x57   : > { %v1398_v26 = vld [vmem:[%s1759_s5 + $0x164] ss:$8 sps:$4 sm:$0xff]   ;;  %v1401_v28 = vld [vmem:[%s1759_s5 + $0x160] ss:$8 sps:$4 sm:$0xff]   ;;  %v1404_v30 = vld [vmem:[%s1759_s5 + $0x174] ss:$8 sps:$4 sm:$0xff]  }
  0x58   : > { %963 = vmatpush1.bf16.msra.mxu0 %v1376_v11  ;;  %v1406_v31 = vld [vmem:[%s1759_s5 + $0x70] ss:$8 sps:$4 sm:$0xff]   ;;  %v1408_v33 = vld [vmem:[%s1759_s5 + $0x84] ss:$8 sps:$4 sm:$0xff]   ;;  %v1412_v35 = vld [vmem:[%s1759_s5 + $0x80] ss:$8 sps:$4 sm:$0xff]  }
  0x59   : > { %1004 = vmatpush1.bf16.msra.mxu1 %v1377_v12  ;;  %964 = vmatprep.subr.bf16.mxu0 %v1378_v13  ;;  %v1407_v32 = vld [vmem:[%s1759_s5 + $0x170] ss:$8 sps:$4 sm:$0xff]   ;;  %v1410_v34 = vld [vmem:[%s1759_s5 + $0x184] ss:$8 sps:$4 sm:$0xff]   ;;  %v1413_v36 = vld [vmem:[%s1759_s5 + $0x180] ss:$8 sps:$4 sm:$0xff]  }
  0x5a   : > { %1005 = vmatprep.subr.bf16.mxu1 %v1380_v14  ;;  %v1414_v37 = vld [vmem:[%s1759_s5 + $0x94] ss:$8 sps:$4 sm:$0xff]   ;;  %v1418_v39 = vld [vmem:[%s1759_s5 + $0x90] ss:$8 sps:$4 sm:$0xff]   ;;  %v1420_v41 = vld [vmem:[%s1759_s5 + $0xa4] ss:$8 sps:$4 sm:$0xff]  }
  0x5b   : > { %v1416_v38 = vld [vmem:[%s1759_s5 + $0x194] ss:$8 sps:$4 sm:$0xff]   ;;  %v1419_v40 = vld [vmem:[%s1759_s5 + $0x190] ss:$8 sps:$4 sm:$0xff]   ;;  %v1422_v42 = vld [vmem:[%s1759_s5 + $0x1a4] ss:$8 sps:$4 sm:$0xff]  }
  0x5c   : > { %965 = vmatpush1.bf16.msra.mxu0 %v1382_v15  ;;  %v1424_v43 = vld [vmem:[%s1759_s5 + $0xa0] ss:$8 sps:$4 sm:$0xff]   ;;  %v1426_v45 = vld [vmem:[%s1759_s5 + $0xb4] ss:$8 sps:$4 sm:$0xff]   ;;  %v1430_v50 = vld [vmem:[%s1759_s5 + $0xb0] ss:$8 sps:$4 sm:$0xff]  }
  0x5d   : > { %1006 = vmatpush1.bf16.msra.mxu1 %v1383_v16  ;;  %966 = vmatprep.subr.bf16.mxu0 %v1384_v17  ;;  %v1425_v44 = vld [vmem:[%s1759_s5 + $0x1a0] ss:$8 sps:$4 sm:$0xff]   ;;  %v1428_v46 = vld [vmem:[%s1759_s5 + $0x1b4] ss:$8 sps:$4 sm:$0xff]   ;;  %v1431_v51 = vld [vmem:[%s1759_s5 + $0x1b0] ss:$8 sps:$4 sm:$0xff]  }
  0x5e   : > { %1007 = vmatprep.subr.bf16.mxu1 %v1386_v18  ;;  %v558_v47 = vld [vmem:[%s1745_s26] sm:$0xff]  ;;  %v559_v49 = vld [vmem:[%s1745_s26 + $0x8] sm:$0xff]  ;;  %v1432_v53 = vld [vmem:[%s1759_s5 + $0xc4] ss:$8 sps:$4 sm:$0xff]   ;;  %p1295_p13 = scmp.ne.s32.totalorder %s1506_s14, 8 }
  0x5f   : > { %v1228_v48 = vcombine.high %v558_v47, %v558_v47  ;;  %v1230_v52 = vcombine.high %v559_v49, %v559_v49  ;;  %v1434_v54 = vld [vmem:[%s1759_s5 + $0x1c4] ss:$8 sps:$4 sm:$0xff]   ;;  %v1436_v55 = vld [vmem:[%s1759_s5 + $0xc0] ss:$8 sps:$4 sm:$0xff]   ;;  %v1438_v57 = vld [vmem:[%s1759_s5 + $0xd4] ss:$8 sps:$4 sm:$0xff]   ;;  %v1227_v5 = vcombine.low %v558_v47, %v558_v47  ;;  %v1229_v6 = vcombine.low %v559_v49, %v559_v49 }
  0x60   : > { %967 = vmatpush1.bf16.msra.mxu0 %v1388_v19  ;;  %v1437_v56 = vld [vmem:[%s1759_s5 + $0x1c0] ss:$8 sps:$4 sm:$0xff]   ;;  %v1440_v58 = vld [vmem:[%s1759_s5 + $0x1d4] ss:$8 sps:$4 sm:$0xff]   ;;  %v1442_v59 = vld [vmem:[%s1759_s5 + $0xd0] ss:$8 sps:$4 sm:$0xff]  }
  0x61   : > { %1008 = vmatpush1.bf16.msra.mxu1 %v1389_v20  ;;  %968 = vmatprep.subr.bf16.mxu0 %v1390_v21  ;;  %v1443_v60 = vld [vmem:[%s1759_s5 + $0x1d0] ss:$8 sps:$4 sm:$0xff]   ;;  %v1444_v61 = vld [vmem:[%s1759_s5 + $0xe4] ss:$8 sps:$4 sm:$0xff]   ;;  %v1448_v63 = vld [vmem:[%s1759_s5 + $0xe0] ss:$8 sps:$4 sm:$0xff]   ;;  %v1052_v21 = vlaneseq (!%p1295_p13) }
  0x62   : > { %1009 = vmatprep.subr.bf16.mxu1 %v1392_v22  ;;  %990 = vmatprep.mubr.bf16.mxu0 %v1228_v48  ;;  %v1446_v62 = vld [vmem:[%s1759_s5 + $0x1e4] ss:$8 sps:$4 sm:$0xff]   ;;  %v1449_v0 = vld [vmem:[%s1759_s5 + $0x1e0] ss:$8 sps:$4 sm:$0xff]   ;;  %v1450_v1 = vld [vmem:[%s1759_s5 + $0xf4] ss:$8 sps:$4 sm:$0xff]  }
  0x63   : > { %1031 = vmatprep.mubr.bf16.mxu1 %v1230_v52  ;;  %v1452_v2 = vld [vmem:[%s1759_s5 + $0x1f4] ss:$8 sps:$4 sm:$0xff]   ;;  %v1454_v3 = vld [vmem:[%s1759_s5 + $0xf0] ss:$8 sps:$4 sm:$0xff]   ;;  %v1053_v22 = vshrl.u32 (!%p1295_p13), %v1052_v21, 7 }
  0x64   : > { %969 = vmatpush1.bf16.msra.mxu0 %v1394_v23  ;;  %v1455_v4 = vld [vmem:[%s1759_s5 + $0x1f0] ss:$8 sps:$4 sm:$0xff]  }
  0x65   : > { %1010 = vmatpush1.bf16.msra.mxu1 %v1395_v24  ;;  %970 = vmatprep.subr.bf16.mxu0 %v1396_v25  ;;  %v556_v8 = vld [vmem:[#allocation2] sm:$0xff]  ;;  %v557_v12 = vld [vmem:[#allocation2 + $0x8] sm:$0xff]  ;;  %v1054_v24 = vsub.s32 (!%p1295_p13), 0, %v1053_v22  ;;  %v1058_v25 = vsub.s32 (!%p1295_p13), 1, %v1053_v22 }
  0x66   : > { %1011 = vmatprep.subr.bf16.mxu1 %v1398_v26  ;;  %v1050_v23 = vld [vmem:[%s538_s12] sm:$0x3] (!%p1295_p13) }
  0x68   : > { %971 = vmatpush1.bf16.msra.mxu0 %v1400_v27 }
  0x69   : > { %1012 = vmatpush1.bf16.msra.mxu1 %v1401_v28  ;;  %972 = vmatprep.subr.bf16.mxu0 %v1402_v29  ;;  %v1055_v28 = vrot.slane (!%p1295_p13), %v1050_v23, %v1054_v24  ;;  %v1059_v29 = vrot.slane (!%p1295_p13), %v1050_v23, %v1058_v25 }
  0x6a   : > { %1013 = vmatprep.subr.bf16.mxu1 %v1404_v30 }
  0x6c   : > { %973 = vmatpush1.bf16.msra.mxu0 %v1406_v31 }
  0x6d   : > { %1014 = vmatpush1.bf16.msra.mxu1 %v1407_v32  ;;  %974 = vmatprep.subr.bf16.mxu0 %v1408_v33 }
  0x6e   : > { %1015 = vmatprep.subr.bf16.mxu1 %v1410_v34 }
  0x70   : > { %975 = vmatpush1.bf16.msra.mxu0 %v1412_v35 }
  0x71   : > { %1016 = vmatpush1.bf16.msra.mxu1 %v1413_v36  ;;  %976 = vmatprep.subr.bf16.mxu0 %v1414_v37 }
  0x72   : > { %1017 = vmatprep.subr.bf16.mxu1 %v1416_v38 }
  0x74   : > { %977 = vmatpush1.bf16.msra.mxu0 %v1418_v39 }
  0x75   : > { %1018 = vmatpush1.bf16.msra.mxu1 %v1419_v40  ;;  %978 = vmatprep.subr.bf16.mxu0 %v1420_v41 }
  0x76   : > { %1019 = vmatprep.subr.bf16.mxu1 %v1422_v42 }
  0x78   : > { %979 = vmatpush1.bf16.msra.mxu0 %v1424_v43 }
  0x79   : > { %1020 = vmatpush1.bf16.msra.mxu1 %v1425_v44  ;;  %980 = vmatprep.subr.bf16.mxu0 %v1426_v45 }
  0x7a   : > { %1021 = vmatprep.subr.bf16.mxu1 %v1428_v46 }
  0x7c   : > { %981 = vmatpush1.bf16.msra.mxu0 %v1430_v50 }
  0x7d   : > { %1022 = vmatpush1.bf16.msra.mxu1 %v1431_v51  ;;  %982 = vmatprep.subr.bf16.mxu0 %v1432_v53 }
  0x7e   : > { %1023 = vmatprep.subr.bf16.mxu1 %v1434_v54 }
  0x80   : > { %983 = vmatpush1.bf16.msra.mxu0 %v1436_v55 }
  0x81   : > { %1024 = vmatpush1.bf16.msra.mxu1 %v1437_v56  ;;  %984 = vmatprep.subr.bf16.mxu0 %v1438_v57 }
  0x82   : > { %1025 = vmatprep.subr.bf16.mxu1 %v1440_v58 }
  0x84   : > { %985 = vmatpush1.bf16.msra.mxu0 %v1442_v59 }
  0x85   : > { %1026 = vmatpush1.bf16.msra.mxu1 %v1443_v60  ;;  %986 = vmatprep.subr.bf16.mxu0 %v1444_v61 }
  0x86   : > { %1027 = vmatprep.subr.bf16.mxu1 %v1446_v62 }
  0x88   : > { %987 = vmatpush1.bf16.msra.mxu0 %v1448_v63 }
  0x89   : > { %1028 = vmatpush1.bf16.msra.mxu1 %v1449_v0  ;;  %988 = vmatprep.subr.bf16.mxu0 %v1450_v1 }
  0x8a   : > { %1029 = vmatprep.subr.bf16.mxu1 %v1452_v2 }
  0x8c   : > { %989 = vmatpush1.bf16.msra.mxu0 %v1454_v3 }
  0x8d   : > { %1030 = vmatpush1.bf16.msra.mxu1 %v1455_v4 }
  0x8f   : > { %991 = vmatmul.mubr.bf16.vlgmr.msra.gmra.mrb[0].mxu0 %v1227_v5 }
  0x90   : > { %1032 = vmatmul.mubr.bf16.vlgmr.msra.gmra.mrb[0].mxu1 %v1229_v6 }
 0x162   : > { %v992_v7 = vpop.f32.mrb[0].mxu0 }
 0x163   : > { %v1033_v9 = vpop.f32.mrb[0].mxu1  ;;  %v994_v11 = vpop.f32.mrb[1].mxu0  ;;  %1047 = sbr.rel (%p1295_p13) target bundleno = 402 (0x192), region = 78 }
 0x164   : > { %v1034_v10 = vadd.f32 %v1033_v9, %v992_v7  ;;  %v1035_v13 = vpop.f32.mrb[1].mxu1  ;;  %v996_v15 = vpop.f32.mrb[2].mxu0 }
 0x165   : > { %v1036_v14 = vadd.f32 %v1035_v13, %v994_v11  ;;  %v1037_v16 = vpop.f32.mrb[2].mxu1  ;;  %v997_v18 = vpop.f32.mrb[3].mxu0 }
 0x166   : > { %v1040_v17 = vadd.f32 %v1034_v10, %v556_v8  ;;  %v1038_v19 = vpop.f32.mrb[3].mxu1 }
 0x167   : > { %v1041_v20 = vadd.f32 %v1036_v14, %v557_v12 }
 0x168   : > { %1042 = vst [vmem:[#allocation2] sm:$0xff] %v1040_v17 }
 0x169   : > { %1043 = vst [vmem:[#allocation2 + $0x8] sm:$0xff] %v1041_v20 }
 0x16f   : > { %v1048_v26 = vld [vmem:[#allocation2] sm:$0xff] }
 0x170   : > { %v1049_v27 = vld [vmem:[#allocation2 + $0x8] sm:$0xff]  ;;  %v1062_v30 = vadd.f32 %v1055_v28, %v1048_v26 }
 0x171   : > { %v1063_v31 = vadd.f32 %v1059_v29, %v1049_v27 }
 0x172   : > { %v1296_v32 = vmul.f32 -1.442695, %v1062_v30 }
 0x173   : > { %v1297_v33 = vmul.f32 -1.442695, %v1063_v31 }
 0x174   : > { %1460 = vpow2.f32 %v1296_v32 }
 0x175   : > { %1462 = vpow2.f32 %v1297_v33 }
 0x17e   : > { %v1461_v34 = vpop.eup %1460 }
 0x17f   : > { %v1463_v35 = vpop.eup %1462  ;;  %v1070_v36 = vadd.f32 1.0, %v1461_v34 }
 0x180   : > { %v1071_v37 = vadd.f32 1.0, %v1463_v35 }
 0x181   : > { %1464 = vrcp.f32 %v1070_v36 }
 0x182   : > { %1466 = vrcp.f32 %v1071_v37 }
 0x18b   : > { %v1465_v38 = vpop.eup %1464 }
 0x18c   : > { %v1467_v39 = vpop.eup %1466  ;;  %v1076_v40 = vmul.f32 %v1465_v38, %v1062_v30 }
 0x18d   : > { %v1077_v41 = vmul.f32 %v1467_v39, %v1063_v31 }
 0x18f   : > { %v1302_v42 = vpack.c.bf16 %v1077_v41, %v1076_v40 }
 0x191   : > { %1086 = vst [vmem:[%s1757_s15] sm:$0xff] %v1302_v42 }
 0x192 PF: > { %s13_s18 = sadd.s32 1, %s1522_s18   ;;  %s1860_s12 = smov %s1502_s13 }
 0x193   : > { %p10_p0 = scmp.ge.s32.totalorder %s13_s18, 20   ;;  %s1861_s13 = smov %s1596_s25 }
 0x194   : > { %s1862_s14 = smov %s1514_s16  ;;  %s1863_s15 = smov %s1518_s17 }
 0x195   : > { %s1864_s16 = smov %s1867_s19  ;;  %s1865_s17 = smov %s1871_s20 }
 0x196   :  { %12 = sbr.rel (!%p10_p0) target bundleno = 4 (0x4), region = 119 }

// kernel: resnet18_forward.36
= control target key start
LH: loop header
LB: loop body
LE: loop exit
PB: predicated region body
PF: predicated region fallthrough
CT: control target
= control target key end

     0   :  { %s1638_s15 = smov 0   ;;  %s1640_s16 = smov 0   ;;  %s1955_s0 = inlined_call_operand.vmem [shape: bf16[8,4608], index: 0, kind: input, shape index: {}]   ;;  %s1956_s1 = inlined_call_operand.vmem [shape: bf16[4608,512], index: 1, kind: input, shape index: {}]   ;;  %s1957_s2 = inlined_call_operand.vmem [shape: f32[1,512], index: 2, kind: input, shape index: {}]   ;;  %s1958_s3 = inlined_call_operand.vmem [shape: bf16[8,512], index: 3, kind: input, shape index: {}]   ;;  %s1959_s4 = inlined_call_operand.vmem [shape: bf16[8,512], index: 4, kind: output, shape index: {}]  }
   0x1   :  { %s1642_s17 = smov 0   ;;  %s1644_s18 = smov 0  }
   0x2   :  { %s1646_s19 = smov 0   ;;  %s1648_s20 = smov 0  }
   0x3   :  { %s1650_s21 = smov 0  }
   0x4 LB: > { %s26_s22 = sadd.s32 1, %s1602_s19  ;;  %s29_s23 = sadd.s32 1, %s1606_s20  ;;  %s1610_s21 = sphi %s1650_s21, %s14_s21   ;;  %s1606_s20 = sphi %s1648_s20, %s1965_s20   ;;  %s1602_s19 = sphi %s1646_s19, %s1964_s19   ;;  %s1598_s18 = sphi %s1644_s18, %s1963_s18   ;;  %s1594_s17 = sphi %s1642_s17, %s1962_s17   ;;  %s1590_s16 = sphi %s1640_s16, %s1961_s16   ;;  %s1586_s15 = sphi %s1638_s15, %s1960_s15  }
   0x5   : > { %p27_p0 = scmp.ge.s32.totalorder %s26_s22, 9  ;;  %p77_p1 = scmp.ne.s32.totalorder %s1590_s16, %s1586_s15 }
   0x6   : > { %p78_p2 = scmp.eq.s32.totalorder %s1610_s21, 0  ;;  %s70_s27 = sadd.s32 1, %s1590_s16 }
   0x7   : > { %s1967_s22 = smov (%p27_p0, %s26_s22), 0  ;;  %s1969_s23 = smov (!%p27_p0, %s29_s23), %s1606_s20 }
   0x8   : > { %p79_p3 = por %p78_p2, %p77_p1  ;;  %p31_p4 = scmp.ge.s32.totalorder %s1969_s23, 2 }
   0x9   : > { %s65_s24 = ssub.s32 %s1602_s19, %s1967_s22  ;;  %p1299_p6 = scmp.ge.s32.totalorder %s1610_s21, 18 }
   0xa   : > { %s1971_s23 = smov (%p31_p4, %s1969_s23), 0 }
   0xb   : > { %s66_s25 = ssub.s32 %s1606_s20, %s1971_s23  ;;  %185 = sbr.rel (%p1299_p6) target bundleno = 57 (0x39), region = 16 }
   0xc   : > { %s67_s26 = sor.u32 %s66_s25, %s65_s24 }
   0xd   : > { %p68_p5 = scmp.eq.s32.totalorder %s67_s26, 0 }
   0xf   : > { %s1689_s28 = scalar_select %p68_p5, %s1590_s16, %s70_s27  }
  0x12   : > { %201 = sbr.rel (!%p79_p3) target bundleno = 57 (0x39), region = 24  ;;  %s203_s29 = sand.u32 (%p79_p3), 1, %s1590_s16  }
  0x13   : > { %s1302_s30 = sshll.u32 (%p79_p3), %s1606_s20, 1  ;;  %s1300_s5 = sshll.u32 (%p79_p3), %s203_s29, 9 }
  0x14   : > { %s1389_s6 = sshll.u32 (%p79_p3), %s1602_s19, 8  ;;  %s1703_s12 = scalar_lea.vmem (%p79_p3), [#allocation3], %s1300_s5 }
  0x15   : > { %s209_s7 = sadd.s32 (%p79_p3), %s1389_s6, %s1302_s30 }
  0x16   : > { %s1304_s8 = sshll.u32 (%p79_p3), %s209_s7, 2 }
  0x17   : > { %s1698_s11 = scalar_lea.vmem (%p79_p3), %s1956_s1, %s1304_s8 }
  0x18   : > { %v365_v0 = vld [vmem:[%s1698_s11] sm:$0xff] (%p79_p3)  ;;  %v367_v1 = vld [vmem:[%s1698_s11 + $0x10] sm:$0xff] (%p79_p3) }
  0x19   : > { %v369_v2 = vld [vmem:[%s1698_s11 + $0x20] sm:$0xff]  ;;  %366 = vst [vmem:[%s1703_s12] sm:$0xff] %v365_v0  ;;  %368 = vst [vmem:[%s1703_s12 + $0x8] sm:$0xff] %v367_v1  ;;  %v371_v3 = vld [vmem:[%s1698_s11 + $0x30] sm:$0xff] }
  0x1a   : > { %370 = vst [vmem:[%s1703_s12 + $0x10] sm:$0xff] %v369_v2  ;;  %v373_v4 = vld [vmem:[%s1698_s11 + $0x40] sm:$0xff]  ;;  %v375_v5 = vld [vmem:[%s1698_s11 + $0x50] sm:$0xff]  ;;  %372 = vst [vmem:[%s1703_s12 + $0x18] sm:$0xff] %v371_v3 }
  0x1b   : > { %374 = vst [vmem:[%s1703_s12 + $0x20] sm:$0xff] %v373_v4  ;;  %376 = vst [vmem:[%s1703_s12 + $0x28] sm:$0xff] %v375_v5  ;;  %v377_v6 = vld [vmem:[%s1698_s11 + $0x60] sm:$0xff]  ;;  %v379_v7 = vld [vmem:[%s1698_s11 + $0x70] sm:$0xff] }
  0x1c   : > { %v381_v8 = vld [vmem:[%s1698_s11 + $0x80] sm:$0xff]  ;;  %378 = vst [vmem:[%s1703_s12 + $0x30] sm:$0xff] %v377_v6  ;;  %380 = vst [vmem:[%s1703_s12 + $0x38] sm:$0xff] %v379_v7  ;;  %v383_v9 = vld [vmem:[%s1698_s11 + $0x90] sm:$0xff] }
  0x1d   : > { %382 = vst [vmem:[%s1703_s12 + $0x40] sm:$0xff] %v381_v8  ;;  %v385_v10 = vld [vmem:[%s1698_s11 + $0xa0] sm:$0xff]  ;;  %v387_v11 = vld [vmem:[%s1698_s11 + $0xb0] sm:$0xff]  ;;  %384 = vst [vmem:[%s1703_s12 + $0x48] sm:$0xff] %v383_v9 }
  0x1e   : > { %386 = vst [vmem:[%s1703_s12 + $0x50] sm:$0xff] %v385_v10  ;;  %388 = vst [vmem:[%s1703_s12 + $0x58] sm:$0xff] %v387_v11  ;;  %v389_v12 = vld [vmem:[%s1698_s11 + $0xc0] sm:$0xff]  ;;  %v391_v13 = vld [vmem:[%s1698_s11 + $0xd0] sm:$0xff] }
  0x1f   : > { %v393_v14 = vld [vmem:[%s1698_s11 + $0xe0] sm:$0xff]  ;;  %390 = vst [vmem:[%s1703_s12 + $0x60] sm:$0xff] %v389_v12  ;;  %392 = vst [vmem:[%s1703_s12 + $0x68] sm:$0xff] %v391_v13  ;;  %v395_v15 = vld [vmem:[%s1698_s11 + $0xf0] sm:$0xff] }
  0x20   : > { %394 = vst [vmem:[%s1703_s12 + $0x70] sm:$0xff] %v393_v14  ;;  %v397_v16 = vld [vmem:[%s1698_s11 + $0x100] sm:$0xff]  ;;  %v399_v17 = vld [vmem:[%s1698_s11 + $0x110] sm:$0xff]  ;;  %396 = vst [vmem:[%s1703_s12 + $0x78] sm:$0xff] %v395_v15 }
  0x21   : > { %398 = vst [vmem:[%s1703_s12 + $0x80] sm:$0xff] %v397_v16  ;;  %400 = vst [vmem:[%s1703_s12 + $0x88] sm:$0xff] %v399_v17  ;;  %v401_v18 = vld [vmem:[%s1698_s11 + $0x120] sm:$0xff]  ;;  %v403_v19 = vld [vmem:[%s1698_s11 + $0x130] sm:$0xff] }
  0x22   : > { %v405_v20 = vld [vmem:[%s1698_s11 + $0x140] sm:$0xff]  ;;  %402 = vst [vmem:[%s1703_s12 + $0x90] sm:$0xff] %v401_v18  ;;  %404 = vst [vmem:[%s1703_s12 + $0x98] sm:$0xff] %v403_v19  ;;  %v407_v21 = vld [vmem:[%s1698_s11 + $0x150] sm:$0xff] }
  0x23   : > { %406 = vst [vmem:[%s1703_s12 + $0xa0] sm:$0xff] %v405_v20  ;;  %v409_v22 = vld [vmem:[%s1698_s11 + $0x160] sm:$0xff]  ;;  %v411_v23 = vld [vmem:[%s1698_s11 + $0x170] sm:$0xff]  ;;  %408 = vst [vmem:[%s1703_s12 + $0xa8] sm:$0xff] %v407_v21 }
  0x24   : > { %410 = vst [vmem:[%s1703_s12 + $0xb0] sm:$0xff] %v409_v22  ;;  %412 = vst [vmem:[%s1703_s12 + $0xb8] sm:$0xff] %v411_v23  ;;  %v413_v24 = vld [vmem:[%s1698_s11 + $0x180] sm:$0xff]  ;;  %v415_v25 = vld [vmem:[%s1698_s11 + $0x190] sm:$0xff] }
  0x25   : > { %v417_v26 = vld [vmem:[%s1698_s11 + $0x1a0] sm:$0xff]  ;;  %414 = vst [vmem:[%s1703_s12 + $0xc0] sm:$0xff] %v413_v24  ;;  %416 = vst [vmem:[%s1703_s12 + $0xc8] sm:$0xff] %v415_v25  ;;  %v419_v27 = vld [vmem:[%s1698_s11 + $0x1b0] sm:$0xff] }
  0x26   : > { %418 = vst [vmem:[%s1703_s12 + $0xd0] sm:$0xff] %v417_v26  ;;  %v421_v28 = vld [vmem:[%s1698_s11 + $0x1c0] sm:$0xff]  ;;  %v423_v29 = vld [vmem:[%s1698_s11 + $0x1d0] sm:$0xff]  ;;  %420 = vst [vmem:[%s1703_s12 + $0xd8] sm:$0xff] %v419_v27 }
  0x27   : > { %422 = vst [vmem:[%s1703_s12 + $0xe0] sm:$0xff] %v421_v28  ;;  %424 = vst [vmem:[%s1703_s12 + $0xe8] sm:$0xff] %v423_v29  ;;  %v425_v30 = vld [vmem:[%s1698_s11 + $0x1e0] sm:$0xff]  ;;  %v427_v31 = vld [vmem:[%s1698_s11 + $0x1f0] sm:$0xff] }
  0x28   : > { %v429_v32 = vld [vmem:[%s1698_s11 + $0x200] sm:$0xff]  ;;  %426 = vst [vmem:[%s1703_s12 + $0xf0] sm:$0xff] %v425_v30  ;;  %428 = vst [vmem:[%s1703_s12 + $0xf8] sm:$0xff] %v427_v31  ;;  %v431_v33 = vld [vmem:[%s1698_s11 + $0x210] sm:$0xff] }
  0x29   : > { %430 = vst [vmem:[%s1703_s12 + $0x100] sm:$0xff] %v429_v32  ;;  %v433_v34 = vld [vmem:[%s1698_s11 + $0x220] sm:$0xff]  ;;  %v435_v35 = vld [vmem:[%s1698_s11 + $0x230] sm:$0xff]  ;;  %432 = vst [vmem:[%s1703_s12 + $0x108] sm:$0xff] %v431_v33 }
  0x2a   : > { %434 = vst [vmem:[%s1703_s12 + $0x110] sm:$0xff] %v433_v34  ;;  %436 = vst [vmem:[%s1703_s12 + $0x118] sm:$0xff] %v435_v35  ;;  %v437_v36 = vld [vmem:[%s1698_s11 + $0x240] sm:$0xff]  ;;  %v439_v37 = vld [vmem:[%s1698_s11 + $0x250] sm:$0xff] }
  0x2b   : > { %v441_v38 = vld [vmem:[%s1698_s11 + $0x260] sm:$0xff]  ;;  %438 = vst [vmem:[%s1703_s12 + $0x120] sm:$0xff] %v437_v36  ;;  %440 = vst [vmem:[%s1703_s12 + $0x128] sm:$0xff] %v439_v37  ;;  %v443_v39 = vld [vmem:[%s1698_s11 + $0x270] sm:$0xff] }
  0x2c   : > { %442 = vst [vmem:[%s1703_s12 + $0x130] sm:$0xff] %v441_v38  ;;  %v445_v40 = vld [vmem:[%s1698_s11 + $0x280] sm:$0xff]  ;;  %v447_v41 = vld [vmem:[%s1698_s11 + $0x290] sm:$0xff]  ;;  %444 = vst [vmem:[%s1703_s12 + $0x138] sm:$0xff] %v443_v39 }
  0x2d   : > { %446 = vst [vmem:[%s1703_s12 + $0x140] sm:$0xff] %v445_v40  ;;  %448 = vst [vmem:[%s1703_s12 + $0x148] sm:$0xff] %v447_v41  ;;  %v449_v42 = vld [vmem:[%s1698_s11 + $0x2a0] sm:$0xff]  ;;  %v451_v43 = vld [vmem:[%s1698_s11 + $0x2b0] sm:$0xff] }
  0x2e   : > { %v453_v44 = vld [vmem:[%s1698_s11 + $0x2c0] sm:$0xff]  ;;  %450 = vst [vmem:[%s1703_s12 + $0x150] sm:$0xff] %v449_v42  ;;  %452 = vst [vmem:[%s1703_s12 + $0x158] sm:$0xff] %v451_v43  ;;  %v455_v45 = vld [vmem:[%s1698_s11 + $0x2d0] sm:$0xff] }
  0x2f   : > { %454 = vst [vmem:[%s1703_s12 + $0x160] sm:$0xff] %v453_v44  ;;  %v457_v46 = vld [vmem:[%s1698_s11 + $0x2e0] sm:$0xff]  ;;  %v459_v47 = vld [vmem:[%s1698_s11 + $0x2f0] sm:$0xff]  ;;  %456 = vst [vmem:[%s1703_s12 + $0x168] sm:$0xff] %v455_v45 }
  0x30   : > { %458 = vst [vmem:[%s1703_s12 + $0x170] sm:$0xff] %v457_v46  ;;  %460 = vst [vmem:[%s1703_s12 + $0x178] sm:$0xff] %v459_v47  ;;  %v461_v48 = vld [vmem:[%s1698_s11 + $0x300] sm:$0xff]  ;;  %v463_v49 = vld [vmem:[%s1698_s11 + $0x310] sm:$0xff] }
  0x31   : > { %v465_v50 = vld [vmem:[%s1698_s11 + $0x320] sm:$0xff]  ;;  %462 = vst [vmem:[%s1703_s12 + $0x180] sm:$0xff] %v461_v48  ;;  %464 = vst [vmem:[%s1703_s12 + $0x188] sm:$0xff] %v463_v49  ;;  %v467_v51 = vld [vmem:[%s1698_s11 + $0x330] sm:$0xff] }
  0x32   : > { %466 = vst [vmem:[%s1703_s12 + $0x190] sm:$0xff] %v465_v50  ;;  %v469_v52 = vld [vmem:[%s1698_s11 + $0x340] sm:$0xff]  ;;  %v471_v53 = vld [vmem:[%s1698_s11 + $0x350] sm:$0xff]  ;;  %468 = vst [vmem:[%s1703_s12 + $0x198] sm:$0xff] %v467_v51 }
  0x33   : > { %470 = vst [vmem:[%s1703_s12 + $0x1a0] sm:$0xff] %v469_v52  ;;  %472 = vst [vmem:[%s1703_s12 + $0x1a8] sm:$0xff] %v471_v53  ;;  %v473_v54 = vld [vmem:[%s1698_s11 + $0x360] sm:$0xff]  ;;  %v475_v55 = vld [vmem:[%s1698_s11 + $0x370] sm:$0xff] }
  0x34   : > { %v477_v56 = vld [vmem:[%s1698_s11 + $0x380] sm:$0xff]  ;;  %474 = vst [vmem:[%s1703_s12 + $0x1b0] sm:$0xff] %v473_v54  ;;  %476 = vst [vmem:[%s1703_s12 + $0x1b8] sm:$0xff] %v475_v55  ;;  %v479_v57 = vld [vmem:[%s1698_s11 + $0x390] sm:$0xff] }
  0x35   : > { %478 = vst [vmem:[%s1703_s12 + $0x1c0] sm:$0xff] %v477_v56  ;;  %v481_v58 = vld [vmem:[%s1698_s11 + $0x3a0] sm:$0xff]  ;;  %v483_v59 = vld [vmem:[%s1698_s11 + $0x3b0] sm:$0xff]  ;;  %480 = vst [vmem:[%s1703_s12 + $0x1c8] sm:$0xff] %v479_v57 }
  0x36   : > { %482 = vst [vmem:[%s1703_s12 + $0x1d0] sm:$0xff] %v481_v58  ;;  %484 = vst [vmem:[%s1703_s12 + $0x1d8] sm:$0xff] %v483_v59  ;;  %v485_v60 = vld [vmem:[%s1698_s11 + $0x3c0] sm:$0xff]  ;;  %v487_v61 = vld [vmem:[%s1698_s11 + $0x3d0] sm:$0xff] }
  0x37   : > { %v489_v62 = vld [vmem:[%s1698_s11 + $0x3e0] sm:$0xff]  ;;  %486 = vst [vmem:[%s1703_s12 + $0x1e0] sm:$0xff] %v485_v60  ;;  %488 = vst [vmem:[%s1703_s12 + $0x1e8] sm:$0xff] %v487_v61  ;;  %v491_v63 = vld [vmem:[%s1698_s11 + $0x3f0] sm:$0xff] }
  0x38   : > { %490 = vst [vmem:[%s1703_s12 + $0x1f0] sm:$0xff] %v489_v62  ;;  %492 = vst [vmem:[%s1703_s12 + $0x1f8] sm:$0xff] %v491_v63 }
  0x39 PF: > { %p1305_p7 = scmp.ge.s32.totalorder %s1610_s21, 1  ;;  %p518_p8 = scmp.lt.s32.totalorder %s1610_s21, 19 }
  0x3b   : > { %p519_p9 = pnand %p1305_p7, %p518_p8 }
  0x3c   : > { %s525_s13 = sand.u32 (!%p519_p9), 1, %s1586_s15   ;;  %s1307_s14 = sshll.u32 (!%p519_p9), %s1594_s17, 2 }
  0x3d   : > { %522 = sbr.rel (%p519_p9) target bundleno = 405 (0x195), region = 70  ;;  %s1306_s24 = sshll.u32 (!%p519_p9), %s525_s13, 9 }
  0x3e   : > { %p579_p10 = scmp.lt.s32.totalorder (!%p519_p9), %s1307_s14, 35  ;;  %s1309_s25 = sshll.u32 (!%p519_p9), %s1598_s18, 1 }
  0x3f   : > { %p589_p11 = scmp.lt.s32.totalorder (!%p519_p9), %s1309_s25, 3  ;;  %s1857_s13 = scalar_lea.vmem (!%p519_p9), [#allocation3], %s1306_s24 }
  0x40   : > { %p1314_p12 = scmp.ne.s32.totalorder (!%p519_p9), %s1594_s17, 0 }
  0x44   : > { %s1973_s14 = smov (!%p579_p10, %s1307_s14), 35  ;;  %s1975_s25 = smov (!%p589_p11, %s1309_s25), 3 }
  0x45   : > { %s1308_s26 = sshll.u32 %s1973_s14, 2  ;;  %s591_s15 = scalar_lea.vmem %s1957_s2, %s1975_s25  ;;  %v1612_v0 = vmov (!%p1314_p12), 0.0  }
  0x46   : > { %s1838_s30 = scalar_lea.vmem %s1955_s0, %s1308_s26  ;;  %s1311_s7 = sshll.u32 %s1975_s25, 2  ;;  %617 = vst [vmem:[#allocation2] sm:$0xff] (!%p1314_p12), %v1612_v0  ;;  %618 = vst [vmem:[#allocation2 + $0x8] sm:$0xff] (!%p1314_p12), %v1612_v0 }
  0x47   : > { %s1850_s18 = scalar_lea.vmem %s1958_s3, %s1311_s7  ;;  %s1855_s12 = scalar_lea.vmem %s1959_s4, %s1311_s7 }
  0x48   : > { %616 = sbr.rel (%p1314_p12) target bundleno = 79 (0x4f), region = 78 }
  0x4f PF: > { %v1448_v1 = vld [vmem:[%s1857_s13 + $0x4] ss:$8 sps:$4 sm:$0xff]   ;;  %v1452_v3 = vld [vmem:[%s1857_s13] ss:$8 sps:$4 sm:$0xff]   ;;  %v1454_v5 = vld [vmem:[%s1857_s13 + $0x14] ss:$8 sps:$4 sm:$0xff]  }
  0x50   : > { %v1450_v2 = vld [vmem:[%s1857_s13 + $0x104] ss:$8 sps:$4 sm:$0xff]   ;;  %1021 = vmatprep.subr.bf16.mxu0 %v1448_v1  ;;  %v1453_v4 = vld [vmem:[%s1857_s13 + $0x100] ss:$8 sps:$4 sm:$0xff]   ;;  %v1456_v6 = vld [vmem:[%s1857_s13 + $0x114] ss:$8 sps:$4 sm:$0xff]  }
  0x51   : > { %1062 = vmatprep.subr.bf16.mxu1 %v1450_v2  ;;  %1022 = vmatpush1.bf16.msra.mxu0 %v1452_v3  ;;  %v1458_v7 = vld [vmem:[%s1857_s13 + $0x10] ss:$8 sps:$4 sm:$0xff]   ;;  %v1460_v9 = vld [vmem:[%s1857_s13 + $0x24] ss:$8 sps:$4 sm:$0xff]   ;;  %v1464_v11 = vld [vmem:[%s1857_s13 + $0x20] ss:$8 sps:$4 sm:$0xff]  }
  0x52   : > { %1063 = vmatpush1.bf16.msra.mxu1 %v1453_v4  ;;  %1023 = vmatprep.subr.bf16.mxu0 %v1454_v5  ;;  %v1459_v8 = vld [vmem:[%s1857_s13 + $0x110] ss:$8 sps:$4 sm:$0xff]   ;;  %v1462_v10 = vld [vmem:[%s1857_s13 + $0x124] ss:$8 sps:$4 sm:$0xff]   ;;  %v1465_v12 = vld [vmem:[%s1857_s13 + $0x120] ss:$8 sps:$4 sm:$0xff]  }
  0x53   : > { %1064 = vmatprep.subr.bf16.mxu1 %v1456_v6  ;;  %v1466_v13 = vld [vmem:[%s1857_s13 + $0x34] ss:$8 sps:$4 sm:$0xff]   ;;  %v1470_v15 = vld [vmem:[%s1857_s13 + $0x30] ss:$8 sps:$4 sm:$0xff]   ;;  %v1472_v17 = vld [vmem:[%s1857_s13 + $0x44] ss:$8 sps:$4 sm:$0xff]  }
  0x54   : > { %v1468_v14 = vld [vmem:[%s1857_s13 + $0x134] ss:$8 sps:$4 sm:$0xff]   ;;  %v1471_v16 = vld [vmem:[%s1857_s13 + $0x130] ss:$8 sps:$4 sm:$0xff]   ;;  %v1474_v18 = vld [vmem:[%s1857_s13 + $0x144] ss:$8 sps:$4 sm:$0xff]  }
  0x55   : > { %1024 = vmatpush1.bf16.msra.mxu0 %v1458_v7  ;;  %v1476_v19 = vld [vmem:[%s1857_s13 + $0x40] ss:$8 sps:$4 sm:$0xff]   ;;  %v1478_v21 = vld [vmem:[%s1857_s13 + $0x54] ss:$8 sps:$4 sm:$0xff]   ;;  %v1482_v23 = vld [vmem:[%s1857_s13 + $0x50] ss:$8 sps:$4 sm:$0xff]  }
  0x56   : > { %1065 = vmatpush1.bf16.msra.mxu1 %v1459_v8  ;;  %1025 = vmatprep.subr.bf16.mxu0 %v1460_v9  ;;  %v1477_v20 = vld [vmem:[%s1857_s13 + $0x140] ss:$8 sps:$4 sm:$0xff]   ;;  %v1480_v22 = vld [vmem:[%s1857_s13 + $0x154] ss:$8 sps:$4 sm:$0xff]   ;;  %v1483_v24 = vld [vmem:[%s1857_s13 + $0x150] ss:$8 sps:$4 sm:$0xff]  }
  0x57   : > { %1066 = vmatprep.subr.bf16.mxu1 %v1462_v10  ;;  %v1484_v25 = vld [vmem:[%s1857_s13 + $0x64] ss:$8 sps:$4 sm:$0xff]   ;;  %v1488_v27 = vld [vmem:[%s1857_s13 + $0x60] ss:$8 sps:$4 sm:$0xff]   ;;  %v1490_v29 = vld [vmem:[%s1857_s13 + $0x74] ss:$8 sps:$4 sm:$0xff]  }
  0x58   : > { %v1486_v26 = vld [vmem:[%s1857_s13 + $0x164] ss:$8 sps:$4 sm:$0xff]   ;;  %v1489_v28 = vld [vmem:[%s1857_s13 + $0x160] ss:$8 sps:$4 sm:$0xff]   ;;  %v1492_v30 = vld [vmem:[%s1857_s13 + $0x174] ss:$8 sps:$4 sm:$0xff]  }
  0x59   : > { %1026 = vmatpush1.bf16.msra.mxu0 %v1464_v11  ;;  %v1494_v31 = vld [vmem:[%s1857_s13 + $0x70] ss:$8 sps:$4 sm:$0xff]   ;;  %v1496_v33 = vld [vmem:[%s1857_s13 + $0x84] ss:$8 sps:$4 sm:$0xff]   ;;  %v1500_v35 = vld [vmem:[%s1857_s13 + $0x80] ss:$8 sps:$4 sm:$0xff]  }
  0x5a   : > { %1067 = vmatpush1.bf16.msra.mxu1 %v1465_v12  ;;  %1027 = vmatprep.subr.bf16.mxu0 %v1466_v13  ;;  %v1495_v32 = vld [vmem:[%s1857_s13 + $0x170] ss:$8 sps:$4 sm:$0xff]   ;;  %v1498_v34 = vld [vmem:[%s1857_s13 + $0x184] ss:$8 sps:$4 sm:$0xff]   ;;  %v1501_v36 = vld [vmem:[%s1857_s13 + $0x180] ss:$8 sps:$4 sm:$0xff]  }
  0x5b   : > { %1068 = vmatprep.subr.bf16.mxu1 %v1468_v14  ;;  %v1502_v37 = vld [vmem:[%s1857_s13 + $0x94] ss:$8 sps:$4 sm:$0xff]   ;;  %v1506_v39 = vld [vmem:[%s1857_s13 + $0x90] ss:$8 sps:$4 sm:$0xff]   ;;  %v1508_v41 = vld [vmem:[%s1857_s13 + $0xa4] ss:$8 sps:$4 sm:$0xff]  }
  0x5c   : > { %v1504_v38 = vld [vmem:[%s1857_s13 + $0x194] ss:$8 sps:$4 sm:$0xff]   ;;  %v1507_v40 = vld [vmem:[%s1857_s13 + $0x190] ss:$8 sps:$4 sm:$0xff]   ;;  %v1510_v42 = vld [vmem:[%s1857_s13 + $0x1a4] ss:$8 sps:$4 sm:$0xff]  }
  0x5d   : > { %1028 = vmatpush1.bf16.msra.mxu0 %v1470_v15  ;;  %v1512_v43 = vld [vmem:[%s1857_s13 + $0xa0] ss:$8 sps:$4 sm:$0xff]   ;;  %v1514_v45 = vld [vmem:[%s1857_s13 + $0xb4] ss:$8 sps:$4 sm:$0xff]   ;;  %v1518_v50 = vld [vmem:[%s1857_s13 + $0xb0] ss:$8 sps:$4 sm:$0xff]  }
  0x5e   : > { %1069 = vmatpush1.bf16.msra.mxu1 %v1471_v16  ;;  %1029 = vmatprep.subr.bf16.mxu0 %v1472_v17  ;;  %v1513_v44 = vld [vmem:[%s1857_s13 + $0x1a0] ss:$8 sps:$4 sm:$0xff]   ;;  %v1516_v46 = vld [vmem:[%s1857_s13 + $0x1b4] ss:$8 sps:$4 sm:$0xff]   ;;  %v1519_v51 = vld [vmem:[%s1857_s13 + $0x1b0] ss:$8 sps:$4 sm:$0xff]  }
  0x5f   : > { %1070 = vmatprep.subr.bf16.mxu1 %v1474_v18  ;;  %v621_v47 = vld [vmem:[%s1838_s30] sm:$0xff]  ;;  %v622_v49 = vld [vmem:[%s1838_s30 + $0x8] sm:$0xff]  ;;  %v1520_v53 = vld [vmem:[%s1857_s13 + $0xc4] ss:$8 sps:$4 sm:$0xff]   ;;  %p1383_p13 = scmp.ne.s32.totalorder %s1594_s17, 8 }
  0x60   : > { %v1316_v48 = vcombine.high %v621_v47, %v621_v47  ;;  %v1318_v52 = vcombine.high %v622_v49, %v622_v49  ;;  %v1522_v54 = vld [vmem:[%s1857_s13 + $0x1c4] ss:$8 sps:$4 sm:$0xff]   ;;  %v1524_v55 = vld [vmem:[%s1857_s13 + $0xc0] ss:$8 sps:$4 sm:$0xff]   ;;  %v1526_v57 = vld [vmem:[%s1857_s13 + $0xd4] ss:$8 sps:$4 sm:$0xff]   ;;  %v1315_v5 = vcombine.low %v621_v47, %v621_v47  ;;  %v1317_v6 = vcombine.low %v622_v49, %v622_v49 }
  0x61   : > { %1030 = vmatpush1.bf16.msra.mxu0 %v1476_v19  ;;  %v1525_v56 = vld [vmem:[%s1857_s13 + $0x1c0] ss:$8 sps:$4 sm:$0xff]   ;;  %v1528_v58 = vld [vmem:[%s1857_s13 + $0x1d4] ss:$8 sps:$4 sm:$0xff]   ;;  %v1530_v59 = vld [vmem:[%s1857_s13 + $0xd0] ss:$8 sps:$4 sm:$0xff]  }
  0x62   : > { %1071 = vmatpush1.bf16.msra.mxu1 %v1477_v20  ;;  %1031 = vmatprep.subr.bf16.mxu0 %v1478_v21  ;;  %v1531_v60 = vld [vmem:[%s1857_s13 + $0x1d0] ss:$8 sps:$4 sm:$0xff]   ;;  %v1532_v61 = vld [vmem:[%s1857_s13 + $0xe4] ss:$8 sps:$4 sm:$0xff]   ;;  %v1536_v63 = vld [vmem:[%s1857_s13 + $0xe0] ss:$8 sps:$4 sm:$0xff]   ;;  %v1115_v21 = vlaneseq (!%p1383_p13) }
  0x63   : > { %1072 = vmatprep.subr.bf16.mxu1 %v1480_v22  ;;  %1053 = vmatprep.mubr.bf16.mxu0 %v1316_v48  ;;  %v1534_v62 = vld [vmem:[%s1857_s13 + $0x1e4] ss:$8 sps:$4 sm:$0xff]   ;;  %v1537_v0 = vld [vmem:[%s1857_s13 + $0x1e0] ss:$8 sps:$4 sm:$0xff]   ;;  %v1538_v1 = vld [vmem:[%s1857_s13 + $0xf4] ss:$8 sps:$4 sm:$0xff]  }
  0x64   : > { %1094 = vmatprep.mubr.bf16.mxu1 %v1318_v52  ;;  %v1540_v2 = vld [vmem:[%s1857_s13 + $0x1f4] ss:$8 sps:$4 sm:$0xff]   ;;  %v1542_v3 = vld [vmem:[%s1857_s13 + $0xf0] ss:$8 sps:$4 sm:$0xff]   ;;  %v1116_v22 = vshrl.u32 (!%p1383_p13), %v1115_v21, 7 }
  0x65   : > { %1032 = vmatpush1.bf16.msra.mxu0 %v1482_v23  ;;  %v1543_v4 = vld [vmem:[%s1857_s13 + $0x1f0] ss:$8 sps:$4 sm:$0xff]  }
  0x66   : > { %1073 = vmatpush1.bf16.msra.mxu1 %v1483_v24  ;;  %1033 = vmatprep.subr.bf16.mxu0 %v1484_v25  ;;  %v619_v8 = vld [vmem:[#allocation2] sm:$0xff]  ;;  %v620_v12 = vld [vmem:[#allocation2 + $0x8] sm:$0xff]  ;;  %v1117_v25 = vsub.s32 (!%p1383_p13), 0, %v1116_v22 }
  0x67   : > { %1074 = vmatprep.subr.bf16.mxu1 %v1486_v26  ;;  %v1113_v23 = vld [vmem:[%s591_s15] sm:$0x3] (!%p1383_p13)  ;;  %v1121_v26 = vsub.s32 (!%p1383_p13), 1, %v1116_v22 }
  0x68   : > { %v1127_v24 = vld [vmem:[%s1850_s18] sm:$0xff] (!%p1383_p13) }
  0x69   : > { %1034 = vmatpush1.bf16.msra.mxu0 %v1488_v27 }
  0x6a   : > { %1075 = vmatpush1.bf16.msra.mxu1 %v1489_v28  ;;  %1035 = vmatprep.subr.bf16.mxu0 %v1490_v29  ;;  %v1118_v29 = vrot.slane (!%p1383_p13), %v1113_v23, %v1117_v25 }
  0x6b   : > { %1076 = vmatprep.subr.bf16.mxu1 %v1492_v30  ;;  %v1122_v30 = vrot.slane (!%p1383_p13), %v1113_v23, %v1121_v26 }
  0x6d   : > { %1036 = vmatpush1.bf16.msra.mxu0 %v1494_v31  ;;  %v1128_v31 = vunpack.c.l.bf16 (!%p1383_p13), %v1127_v24 }
  0x6e   : > { %1077 = vmatpush1.bf16.msra.mxu1 %v1495_v32  ;;  %1037 = vmatprep.subr.bf16.mxu0 %v1496_v33  ;;  %v1129_v32 = vunpack.c.h.bf16 (!%p1383_p13), %v1127_v24 }
  0x6f   : > { %1078 = vmatprep.subr.bf16.mxu1 %v1498_v34 }
  0x71   : > { %1038 = vmatpush1.bf16.msra.mxu0 %v1500_v35 }
  0x72   : > { %1079 = vmatpush1.bf16.msra.mxu1 %v1501_v36  ;;  %1039 = vmatprep.subr.bf16.mxu0 %v1502_v37 }
  0x73   : > { %1080 = vmatprep.subr.bf16.mxu1 %v1504_v38 }
  0x75   : > { %1040 = vmatpush1.bf16.msra.mxu0 %v1506_v39 }
  0x76   : > { %1081 = vmatpush1.bf16.msra.mxu1 %v1507_v40  ;;  %1041 = vmatprep.subr.bf16.mxu0 %v1508_v41 }
  0x77   : > { %1082 = vmatprep.subr.bf16.mxu1 %v1510_v42 }
  0x79   : > { %1042 = vmatpush1.bf16.msra.mxu0 %v1512_v43 }
  0x7a   : > { %1083 = vmatpush1.bf16.msra.mxu1 %v1513_v44  ;;  %1043 = vmatprep.subr.bf16.mxu0 %v1514_v45 }
  0x7b   : > { %1084 = vmatprep.subr.bf16.mxu1 %v1516_v46 }
  0x7d   : > { %1044 = vmatpush1.bf16.msra.mxu0 %v1518_v50 }
  0x7e   : > { %1085 = vmatpush1.bf16.msra.mxu1 %v1519_v51  ;;  %1045 = vmatprep.subr.bf16.mxu0 %v1520_v53 }
  0x7f   : > { %1086 = vmatprep.subr.bf16.mxu1 %v1522_v54 }
  0x81   : > { %1046 = vmatpush1.bf16.msra.mxu0 %v1524_v55 }
  0x82   : > { %1087 = vmatpush1.bf16.msra.mxu1 %v1525_v56  ;;  %1047 = vmatprep.subr.bf16.mxu0 %v1526_v57 }
  0x83   : > { %1088 = vmatprep.subr.bf16.mxu1 %v1528_v58 }
  0x85   : > { %1048 = vmatpush1.bf16.msra.mxu0 %v1530_v59 }
  0x86   : > { %1089 = vmatpush1.bf16.msra.mxu1 %v1531_v60  ;;  %1049 = vmatprep.subr.bf16.mxu0 %v1532_v61 }
  0x87   : > { %1090 = vmatprep.subr.bf16.mxu1 %v1534_v62 }
  0x89   : > { %1050 = vmatpush1.bf16.msra.mxu0 %v1536_v63 }
  0x8a   : > { %1091 = vmatpush1.bf16.msra.mxu1 %v1537_v0  ;;  %1051 = vmatprep.subr.bf16.mxu0 %v1538_v1 }
  0x8b   : > { %1092 = vmatprep.subr.bf16.mxu1 %v1540_v2 }
  0x8d   : > { %1052 = vmatpush1.bf16.msra.mxu0 %v1542_v3 }
  0x8e   : > { %1093 = vmatpush1.bf16.msra.mxu1 %v1543_v4 }
  0x90   : > { %1054 = vmatmul.mubr.bf16.vlgmr.msra.gmra.mrb[0].mxu0 %v1315_v5 }
  0x91   : > { %1095 = vmatmul.mubr.bf16.vlgmr.msra.gmra.mrb[0].mxu1 %v1317_v6 }
 0x163   : > { %v1055_v7 = vpop.f32.mrb[0].mxu0 }
 0x164   : > { %v1096_v9 = vpop.f32.mrb[0].mxu1  ;;  %v1057_v11 = vpop.f32.mrb[1].mxu0  ;;  %1110 = sbr.rel (%p1383_p13) target bundleno = 405 (0x195), region = 82 }
 0x165   : > { %v1097_v10 = vadd.f32 %v1096_v9, %v1055_v7  ;;  %v1098_v13 = vpop.f32.mrb[1].mxu1  ;;  %v1059_v15 = vpop.f32.mrb[2].mxu0 }
 0x166   : > { %v1099_v14 = vadd.f32 %v1098_v13, %v1057_v11  ;;  %v1100_v16 = vpop.f32.mrb[2].mxu1  ;;  %v1060_v18 = vpop.f32.mrb[3].mxu0 }
 0x167   : > { %v1103_v17 = vadd.f32 %v1097_v10, %v619_v8  ;;  %v1101_v19 = vpop.f32.mrb[3].mxu1 }
 0x168   : > { %v1104_v20 = vadd.f32 %v1099_v14, %v620_v12 }
 0x169   : > { %1105 = vst [vmem:[#allocation2] sm:$0xff] %v1103_v17 }
 0x16a   : > { %1106 = vst [vmem:[#allocation2 + $0x8] sm:$0xff] %v1104_v20 }
 0x170   : > { %v1111_v27 = vld [vmem:[#allocation2] sm:$0xff] }
 0x171   : > { %v1112_v28 = vld [vmem:[#allocation2 + $0x8] sm:$0xff]  ;;  %v1125_v33 = vadd.f32 %v1118_v29, %v1111_v27 }
 0x172   : > { %v1126_v34 = vadd.f32 %v1122_v30, %v1112_v28 }
 0x173   : > { %v1130_v35 = vadd.f32 %v1128_v31, %v1125_v33 }
 0x174   : > { %v1131_v36 = vadd.f32 %v1129_v32, %v1126_v34 }
 0x175   : > { %v1384_v37 = vmul.f32 -1.442695, %v1130_v35 }
 0x176   : > { %v1385_v38 = vmul.f32 -1.442695, %v1131_v36 }
 0x177   : > { %1548 = vpow2.f32 %v1384_v37 }
 0x178   : > { %1550 = vpow2.f32 %v1385_v38 }
 0x181   : > { %v1549_v39 = vpop.eup %1548 }
 0x182   : > { %v1551_v40 = vpop.eup %1550  ;;  %v1138_v41 = vadd.f32 1.0, %v1549_v39 }
 0x183   : > { %v1139_v42 = vadd.f32 1.0, %v1551_v40 }
 0x184   : > { %1552 = vrcp.f32 %v1138_v41 }
 0x185   : > { %1554 = vrcp.f32 %v1139_v42 }
 0x18e   : > { %v1553_v43 = vpop.eup %1552 }
 0x18f   : > { %v1555_v44 = vpop.eup %1554  ;;  %v1144_v45 = vmul.f32 %v1553_v43, %v1130_v35 }
 0x190   : > { %v1145_v46 = vmul.f32 %v1555_v44, %v1131_v36 }
 0x192   : > { %v1390_v47 = vpack.c.bf16 %v1145_v46, %v1144_v45 }
 0x194   : > { %1154 = vst [vmem:[%s1855_s12] sm:$0xff] %v1390_v47 }
 0x195 PF: > { %s14_s21 = sadd.s32 1, %s1610_s21   ;;  %s1960_s15 = smov %s1590_s16 }
 0x196   : > { %p11_p0 = scmp.ge.s32.totalorder %s14_s21, 20   ;;  %s1961_s16 = smov %s1689_s28 }
 0x197   : > { %s1962_s17 = smov %s1602_s19  ;;  %s1963_s18 = smov %s1606_s20 }
 0x198   : > { %s1964_s19 = smov %s1967_s22  ;;  %s1965_s20 = smov %s1971_s23 }
 0x199   :  { %13 = sbr.rel (!%p11_p0) target bundleno = 4 (0x4), region = 126 }

// kernel: resnet18_forward.34
= control target key start
LH: loop header
LB: loop body
LE: loop exit
PB: predicated region body
PF: predicated region fallthrough
CT: control target
= control target key end

     0   :  { %s2659_s0 = inlined_call_operand.vmem [shape: bf16[8,4608], index: 0, kind: input, shape index: {}]   ;;  %s2660_s1 = inlined_call_operand.vmem [shape: bf16[4608,512], index: 1, kind: input, shape index: {}]   ;;  %s2661_s2 = inlined_call_operand.vmem [shape: f32[1,512], index: 2, kind: input, shape index: {}]   ;;  %s2662_s3 = inlined_call_operand.vmem [shape: bf16[8,256], index: 3, kind: input, shape index: {}]   ;;  %s2663_s4 = inlined_call_operand.vmem [shape: bf16[256,512], index: 4, kind: input, shape index: {}]   ;;  %s2664_s5 = inlined_call_operand.vmem [shape: bf16[8,512], index: 5, kind: output, shape index: {}]  }
   0x1   :  { %2665 = sst [smem:[#allocation5_spill]] %s2660_s1 }
   0x2   :  { %2666 = sst [smem:[#allocation6_spill]] %s2663_s4 }
   0x3   :  { %s2203_s18 = smov 0   ;;  %s2205_s19 = smov 0  }
   0x4   :  { %s2207_s20 = smov 0   ;;  %s2209_s21 = smov 0  }
   0x5   :  { %s2211_s22 = smov 0   ;;  %s2213_s23 = smov 0  }
   0x6   :  { %s2215_s24 = smov 0   ;;  %s2217_s25 = smov 0  }
   0x7   :  { %s2219_s26 = smov 0  }
   0x8 LB: > { %s27_s27 = sadd.s32 1, %s2163_s24  ;;  %s30_s28 = sadd.s32 1, %s2167_s25  ;;  %s2171_s26 = sphi %s2219_s26, %s15_s26   ;;  %s2167_s25 = sphi %s2217_s25, %s2678_s25   ;;  %s2163_s24 = sphi %s2215_s24, %s2677_s24   ;;  %s2159_s23 = sphi %s2213_s23, %s2676_s23   ;;  %s2155_s22 = sphi %s2211_s22, %s2675_s22   ;;  %s2151_s21 = sphi %s2209_s21, %s2674_s21   ;;  %s2147_s20 = sphi %s2207_s20, %s2673_s20   ;;  %s2143_s19 = sphi %s2205_s19, %s2672_s19   ;;  %s2139_s18 = sphi %s2203_s18, %s2671_s18  }
   0x9   : > { %p28_p0 = scmp.ge.s32.totalorder %s27_s27, 9  ;;  %p78_p1 = scmp.ne.s32.totalorder %s2151_s21, %s2147_s20 }
   0xa   : > { %p79_p2 = scmp.eq.s32.totalorder %s2171_s26, 0  ;;  %p156_p5 = scmp.ne.s32.totalorder %s2143_s19, %s2139_s18 }
   0xb   : > { %s2680_s27 = smov (%p28_p0, %s27_s27), 0  ;;  %s2682_s28 = smov (!%p28_p0, %s30_s28), %s2167_s25 }
   0xc   : > { %p2256_p3 = por %p79_p2, %p78_p1  ;;  %p32_p4 = scmp.ge.s32.totalorder %s2682_s28, 2 }
   0xd   : > { %s66_s30 = ssub.s32 %s2163_s24, %s2680_s27  ;;  %s71_s6 = sadd.s32 1, %s2151_s21 }
   0xe   : > { %s2684_s28 = smov (%p32_p4, %s2682_s28), 0  ;;  %p2267_p6 = por %p156_p5, %p79_p2 }
   0xf   : > { %s67_s8 = ssub.s32 %s2167_s25, %s2684_s28  ;;  %s149_s9 = sadd.s32 1, %s2143_s19 }
  0x10   : > { %s68_s10 = sor.u32 %s67_s8, %s66_s30  ;;  %p147_p7 = scmp.eq.s32.totalorder %s67_s8, 0 }
  0x11   : > { %p69_p8 = scmp.eq.s32.totalorder %s68_s10, 0  ;;  %p1742_p9 = scmp.ge.s32.totalorder %s2171_s26, 18 }
  0x12   : > { %s2275_s11 = scalar_select %p147_p7, %s2143_s19, %s149_s9  }
  0x13   : > { %s2278_s12 = scalar_select %p69_p8, %s2151_s21, %s71_s6  }
  0x14   : > { %218 = sbr.rel (%p1742_p9) target bundleno = 95 (0x5f), region = 20 }
  0x1b   : > { %234 = sbr.rel (!%p2256_p3) target bundleno = 69 (0x45), region = 28  ;;  %s236_s13 = sand.u32 (%p2256_p3), 1, %s2151_s21  }
  0x1c   : > { %s1745_s14 = sshll.u32 (%p2256_p3), %s2167_s25, 1  ;;  %s1743_s15 = sshll.u32 (%p2256_p3), %s236_s13, 9 }
  0x1d   : > { %s1868_s16 = sshll.u32 (%p2256_p3), %s2163_s24, 8  ;;  %s2669_s1 = sld [smem:[#allocation5_spill]] (%p2256_p3) }
  0x1e   : > { %s242_s17 = sadd.s32 (%p2256_p3), %s1868_s16, %s1745_s14  ;;  %s2294_s29 = scalar_lea.vmem (%p2256_p3), [#allocation3], %s1743_s15 }
  0x1f   : > { %s1747_s30 = sshll.u32 (%p2256_p3), %s242_s17, 2 }
  0x23   : > { %s2289_s6 = scalar_lea.vmem %s2669_s1, %s1747_s30 }
  0x24   : > { %v398_v0 = vld [vmem:[%s2289_s6] sm:$0xff]  ;;  %v400_v1 = vld [vmem:[%s2289_s6 + $0x10] sm:$0xff] }
  0x25   : > { %v402_v2 = vld [vmem:[%s2289_s6 + $0x20] sm:$0xff]  ;;  %399 = vst [vmem:[%s2294_s29] sm:$0xff] %v398_v0  ;;  %401 = vst [vmem:[%s2294_s29 + $0x8] sm:$0xff] %v400_v1  ;;  %v404_v3 = vld [vmem:[%s2289_s6 + $0x30] sm:$0xff] }
  0x26   : > { %403 = vst [vmem:[%s2294_s29 + $0x10] sm:$0xff] %v402_v2  ;;  %v406_v4 = vld [vmem:[%s2289_s6 + $0x40] sm:$0xff]  ;;  %v408_v5 = vld [vmem:[%s2289_s6 + $0x50] sm:$0xff]  ;;  %405 = vst [vmem:[%s2294_s29 + $0x18] sm:$0xff] %v404_v3 }
  0x27   : > { %407 = vst [vmem:[%s2294_s29 + $0x20] sm:$0xff] %v406_v4  ;;  %409 = vst [vmem:[%s2294_s29 + $0x28] sm:$0xff] %v408_v5  ;;  %v410_v6 = vld [vmem:[%s2289_s6 + $0x60] sm:$0xff]  ;;  %v412_v7 = vld [vmem:[%s2289_s6 + $0x70] sm:$0xff] }
  0x28   : > { %v414_v8 = vld [vmem:[%s2289_s6 + $0x80] sm:$0xff]  ;;  %411 = vst [vmem:[%s2294_s29 + $0x30] sm:$0xff] %v410_v6  ;;  %413 = vst [vmem:[%s2294_s29 + $0x38] sm:$0xff] %v412_v7  ;;  %v416_v9 = vld [vmem:[%s2289_s6 + $0x90] sm:$0xff] }
  0x29   : > { %415 = vst [vmem:[%s2294_s29 + $0x40] sm:$0xff] %v414_v8  ;;  %v418_v10 = vld [vmem:[%s2289_s6 + $0xa0] sm:$0xff]  ;;  %v420_v11 = vld [vmem:[%s2289_s6 + $0xb0] sm:$0xff]  ;;  %417 = vst [vmem:[%s2294_s29 + $0x48] sm:$0xff] %v416_v9 }
  0x2a   : > { %419 = vst [vmem:[%s2294_s29 + $0x50] sm:$0xff] %v418_v10  ;;  %421 = vst [vmem:[%s2294_s29 + $0x58] sm:$0xff] %v420_v11  ;;  %v422_v12 = vld [vmem:[%s2289_s6 + $0xc0] sm:$0xff]  ;;  %v424_v13 = vld [vmem:[%s2289_s6 + $0xd0] sm:$0xff] }
  0x2b   : > { %v426_v14 = vld [vmem:[%s2289_s6 + $0xe0] sm:$0xff]  ;;  %423 = vst [vmem:[%s2294_s29 + $0x60] sm:$0xff] %v422_v12  ;;  %425 = vst [vmem:[%s2294_s29 + $0x68] sm:$0xff] %v424_v13  ;;  %v428_v15 = vld [vmem:[%s2289_s6 + $0xf0] sm:$0xff] }
  0x2c   : > { %427 = vst [vmem:[%s2294_s29 + $0x70] sm:$0xff] %v426_v14  ;;  %v430_v16 = vld [vmem:[%s2289_s6 + $0x100] sm:$0xff]  ;;  %v432_v17 = vld [vmem:[%s2289_s6 + $0x110] sm:$0xff]  ;;  %429 = vst [vmem:[%s2294_s29 + $0x78] sm:$0xff] %v428_v15 }
  0x2d   : > { %431 = vst [vmem:[%s2294_s29 + $0x80] sm:$0xff] %v430_v16  ;;  %433 = vst [vmem:[%s2294_s29 + $0x88] sm:$0xff] %v432_v17  ;;  %v434_v18 = vld [vmem:[%s2289_s6 + $0x120] sm:$0xff]  ;;  %v436_v19 = vld [vmem:[%s2289_s6 + $0x130] sm:$0xff] }
  0x2e   : > { %v438_v20 = vld [vmem:[%s2289_s6 + $0x140] sm:$0xff]  ;;  %435 = vst [vmem:[%s2294_s29 + $0x90] sm:$0xff] %v434_v18  ;;  %437 = vst [vmem:[%s2294_s29 + $0x98] sm:$0xff] %v436_v19  ;;  %v440_v21 = vld [vmem:[%s2289_s6 + $0x150] sm:$0xff] }
  0x2f   : > { %439 = vst [vmem:[%s2294_s29 + $0xa0] sm:$0xff] %v438_v20  ;;  %v442_v22 = vld [vmem:[%s2289_s6 + $0x160] sm:$0xff]  ;;  %v444_v23 = vld [vmem:[%s2289_s6 + $0x170] sm:$0xff]  ;;  %441 = vst [vmem:[%s2294_s29 + $0xa8] sm:$0xff] %v440_v21 }
  0x30   : > { %443 = vst [vmem:[%s2294_s29 + $0xb0] sm:$0xff] %v442_v22  ;;  %445 = vst [vmem:[%s2294_s29 + $0xb8] sm:$0xff] %v444_v23  ;;  %v446_v24 = vld [vmem:[%s2289_s6 + $0x180] sm:$0xff]  ;;  %v448_v25 = vld [vmem:[%s2289_s6 + $0x190] sm:$0xff] }
  0x31   : > { %v450_v26 = vld [vmem:[%s2289_s6 + $0x1a0] sm:$0xff]  ;;  %447 = vst [vmem:[%s2294_s29 + $0xc0] sm:$0xff] %v446_v24  ;;  %449 = vst [vmem:[%s2294_s29 + $0xc8] sm:$0xff] %v448_v25  ;;  %v452_v27 = vld [vmem:[%s2289_s6 + $0x1b0] sm:$0xff] }
  0x32   : > { %451 = vst [vmem:[%s2294_s29 + $0xd0] sm:$0xff] %v450_v26  ;;  %v454_v28 = vld [vmem:[%s2289_s6 + $0x1c0] sm:$0xff]  ;;  %v456_v29 = vld [vmem:[%s2289_s6 + $0x1d0] sm:$0xff]  ;;  %453 = vst [vmem:[%s2294_s29 + $0xd8] sm:$0xff] %v452_v27 }
  0x33   : > { %455 = vst [vmem:[%s2294_s29 + $0xe0] sm:$0xff] %v454_v28  ;;  %457 = vst [vmem:[%s2294_s29 + $0xe8] sm:$0xff] %v456_v29  ;;  %v458_v30 = vld [vmem:[%s2289_s6 + $0x1e0] sm:$0xff]  ;;  %v460_v31 = vld [vmem:[%s2289_s6 + $0x1f0] sm:$0xff] }
  0x34   : > { %v462_v32 = vld [vmem:[%s2289_s6 + $0x200] sm:$0xff]  ;;  %459 = vst [vmem:[%s2294_s29 + $0xf0] sm:$0xff] %v458_v30  ;;  %461 = vst [vmem:[%s2294_s29 + $0xf8] sm:$0xff] %v460_v31  ;;  %v464_v33 = vld [vmem:[%s2289_s6 + $0x210] sm:$0xff] }
  0x35   : > { %463 = vst [vmem:[%s2294_s29 + $0x100] sm:$0xff] %v462_v32  ;;  %v466_v34 = vld [vmem:[%s2289_s6 + $0x220] sm:$0xff]  ;;  %v468_v35 = vld [vmem:[%s2289_s6 + $0x230] sm:$0xff]  ;;  %465 = vst [vmem:[%s2294_s29 + $0x108] sm:$0xff] %v464_v33 }
  0x36   : > { %467 = vst [vmem:[%s2294_s29 + $0x110] sm:$0xff] %v466_v34  ;;  %469 = vst [vmem:[%s2294_s29 + $0x118] sm:$0xff] %v468_v35  ;;  %v470_v36 = vld [vmem:[%s2289_s6 + $0x240] sm:$0xff]  ;;  %v472_v37 = vld [vmem:[%s2289_s6 + $0x250] sm:$0xff] }
  0x37   : > { %v474_v38 = vld [vmem:[%s2289_s6 + $0x260] sm:$0xff]  ;;  %471 = vst [vmem:[%s2294_s29 + $0x120] sm:$0xff] %v470_v36  ;;  %473 = vst [vmem:[%s2294_s29 + $0x128] sm:$0xff] %v472_v37  ;;  %v476_v39 = vld [vmem:[%s2289_s6 + $0x270] sm:$0xff] }
  0x38   : > { %475 = vst [vmem:[%s2294_s29 + $0x130] sm:$0xff] %v474_v38  ;;  %v478_v40 = vld [vmem:[%s2289_s6 + $0x280] sm:$0xff]  ;;  %v480_v41 = vld [vmem:[%s2289_s6 + $0x290] sm:$0xff]  ;;  %477 = vst [vmem:[%s2294_s29 + $0x138] sm:$0xff] %v476_v39 }
  0x39   : > { %479 = vst [vmem:[%s2294_s29 + $0x140] sm:$0xff] %v478_v40  ;;  %481 = vst [vmem:[%s2294_s29 + $0x148] sm:$0xff] %v480_v41  ;;  %v482_v42 = vld [vmem:[%s2289_s6 + $0x2a0] sm:$0xff]  ;;  %v484_v43 = vld [vmem:[%s2289_s6 + $0x2b0] sm:$0xff] }
  0x3a   : > { %v486_v44 = vld [vmem:[%s2289_s6 + $0x2c0] sm:$0xff]  ;;  %483 = vst [vmem:[%s2294_s29 + $0x150] sm:$0xff] %v482_v42  ;;  %485 = vst [vmem:[%s2294_s29 + $0x158] sm:$0xff] %v484_v43  ;;  %v488_v45 = vld [vmem:[%s2289_s6 + $0x2d0] sm:$0xff] }
  0x3b   : > { %487 = vst [vmem:[%s2294_s29 + $0x160] sm:$0xff] %v486_v44  ;;  %v490_v46 = vld [vmem:[%s2289_s6 + $0x2e0] sm:$0xff]  ;;  %v492_v47 = vld [vmem:[%s2289_s6 + $0x2f0] sm:$0xff]  ;;  %489 = vst [vmem:[%s2294_s29 + $0x168] sm:$0xff] %v488_v45 }
  0x3c   : > { %491 = vst [vmem:[%s2294_s29 + $0x170] sm:$0xff] %v490_v46  ;;  %493 = vst [vmem:[%s2294_s29 + $0x178] sm:$0xff] %v492_v47  ;;  %v494_v48 = vld [vmem:[%s2289_s6 + $0x300] sm:$0xff]  ;;  %v496_v49 = vld [vmem:[%s2289_s6 + $0x310] sm:$0xff] }
  0x3d   : > { %v498_v50 = vld [vmem:[%s2289_s6 + $0x320] sm:$0xff]  ;;  %495 = vst [vmem:[%s2294_s29 + $0x180] sm:$0xff] %v494_v48  ;;  %497 = vst [vmem:[%s2294_s29 + $0x188] sm:$0xff] %v496_v49  ;;  %v500_v51 = vld [vmem:[%s2289_s6 + $0x330] sm:$0xff] }
  0x3e   : > { %499 = vst [vmem:[%s2294_s29 + $0x190] sm:$0xff] %v498_v50  ;;  %v502_v52 = vld [vmem:[%s2289_s6 + $0x340] sm:$0xff]  ;;  %v504_v53 = vld [vmem:[%s2289_s6 + $0x350] sm:$0xff]  ;;  %501 = vst [vmem:[%s2294_s29 + $0x198] sm:$0xff] %v500_v51 }
  0x3f   : > { %503 = vst [vmem:[%s2294_s29 + $0x1a0] sm:$0xff] %v502_v52  ;;  %505 = vst [vmem:[%s2294_s29 + $0x1a8] sm:$0xff] %v504_v53  ;;  %v506_v54 = vld [vmem:[%s2289_s6 + $0x360] sm:$0xff]  ;;  %v508_v55 = vld [vmem:[%s2289_s6 + $0x370] sm:$0xff] }
  0x40   : > { %v510_v56 = vld [vmem:[%s2289_s6 + $0x380] sm:$0xff]  ;;  %507 = vst [vmem:[%s2294_s29 + $0x1b0] sm:$0xff] %v506_v54  ;;  %509 = vst [vmem:[%s2294_s29 + $0x1b8] sm:$0xff] %v508_v55  ;;  %v512_v57 = vld [vmem:[%s2289_s6 + $0x390] sm:$0xff] }
  0x41   : > { %511 = vst [vmem:[%s2294_s29 + $0x1c0] sm:$0xff] %v510_v56  ;;  %v514_v58 = vld [vmem:[%s2289_s6 + $0x3a0] sm:$0xff]  ;;  %v516_v59 = vld [vmem:[%s2289_s6 + $0x3b0] sm:$0xff]  ;;  %513 = vst [vmem:[%s2294_s29 + $0x1c8] sm:$0xff] %v512_v57 }
  0x42   : > { %515 = vst [vmem:[%s2294_s29 + $0x1d0] sm:$0xff] %v514_v58  ;;  %517 = vst [vmem:[%s2294_s29 + $0x1d8] sm:$0xff] %v516_v59  ;;  %v518_v60 = vld [vmem:[%s2289_s6 + $0x3c0] sm:$0xff]  ;;  %v520_v61 = vld [vmem:[%s2289_s6 + $0x3d0] sm:$0xff] }
  0x43   : > { %v522_v62 = vld [vmem:[%s2289_s6 + $0x3e0] sm:$0xff]  ;;  %519 = vst [vmem:[%s2294_s29 + $0x1e0] sm:$0xff] %v518_v60  ;;  %521 = vst [vmem:[%s2294_s29 + $0x1e8] sm:$0xff] %v520_v61  ;;  %v524_v63 = vld [vmem:[%s2289_s6 + $0x3f0] sm:$0xff] }
  0x44   : > { %523 = vst [vmem:[%s2294_s29 + $0x1f0] sm:$0xff] %v522_v62  ;;  %525 = vst [vmem:[%s2294_s29 + $0x1f8] sm:$0xff] %v524_v63 }
  0x45 PF: > { %539 = sbr.rel (!%p2267_p6) target bundleno = 95 (0x5f), region = 70  ;;  %s541_s10 = sand.u32 (%p2267_p6), 1, %s2143_s19  }
  0x46   : > { %s1869_s13 = sshll.u32 (%p2267_p6), %s2167_s25, 3  ;;  %s1748_s14 = sshll.u32 (%p2267_p6), %s541_s10, 8 }
  0x47   : > { %s2670_s4 = sld [smem:[#allocation6_spill]] (%p2267_p6)  ;;  %s2433_s7 = scalar_lea.vmem (%p2267_p6), [#allocation4], %s1748_s14 }
  0x4d   : > { %s2428_s17 = scalar_lea.vmem %s2670_s4, %s1869_s13 }
  0x4e   : > { %v636_v0 = vld [vmem:[%s2428_s17] sm:$0xff]  ;;  %v638_v1 = vld [vmem:[%s2428_s17 + $0x10] sm:$0xff] }
  0x4f   : > { %v640_v2 = vld [vmem:[%s2428_s17 + $0x20] sm:$0xff]  ;;  %637 = vst [vmem:[%s2433_s7] sm:$0xff] %v636_v0  ;;  %639 = vst [vmem:[%s2433_s7 + $0x8] sm:$0xff] %v638_v1  ;;  %v642_v3 = vld [vmem:[%s2428_s17 + $0x30] sm:$0xff] }
  0x50   : > { %641 = vst [vmem:[%s2433_s7 + $0x10] sm:$0xff] %v640_v2  ;;  %v644_v4 = vld [vmem:[%s2428_s17 + $0x40] sm:$0xff]  ;;  %v646_v5 = vld [vmem:[%s2428_s17 + $0x50] sm:$0xff]  ;;  %643 = vst [vmem:[%s2433_s7 + $0x18] sm:$0xff] %v642_v3 }
  0x51   : > { %645 = vst [vmem:[%s2433_s7 + $0x20] sm:$0xff] %v644_v4  ;;  %647 = vst [vmem:[%s2433_s7 + $0x28] sm:$0xff] %v646_v5  ;;  %v648_v6 = vld [vmem:[%s2428_s17 + $0x60] sm:$0xff]  ;;  %v650_v7 = vld [vmem:[%s2428_s17 + $0x70] sm:$0xff] }
  0x52   : > { %v652_v8 = vld [vmem:[%s2428_s17 + $0x80] sm:$0xff]  ;;  %649 = vst [vmem:[%s2433_s7 + $0x30] sm:$0xff] %v648_v6  ;;  %651 = vst [vmem:[%s2433_s7 + $0x38] sm:$0xff] %v650_v7  ;;  %v654_v9 = vld [vmem:[%s2428_s17 + $0x90] sm:$0xff] }
  0x53   : > { %653 = vst [vmem:[%s2433_s7 + $0x40] sm:$0xff] %v652_v8  ;;  %v656_v10 = vld [vmem:[%s2428_s17 + $0xa0] sm:$0xff]  ;;  %v658_v11 = vld [vmem:[%s2428_s17 + $0xb0] sm:$0xff]  ;;  %655 = vst [vmem:[%s2433_s7 + $0x48] sm:$0xff] %v654_v9 }
  0x54   : > { %657 = vst [vmem:[%s2433_s7 + $0x50] sm:$0xff] %v656_v10  ;;  %659 = vst [vmem:[%s2433_s7 + $0x58] sm:$0xff] %v658_v11  ;;  %v660_v12 = vld [vmem:[%s2428_s17 + $0xc0] sm:$0xff]  ;;  %v662_v13 = vld [vmem:[%s2428_s17 + $0xd0] sm:$0xff] }
  0x55   : > { %v664_v14 = vld [vmem:[%s2428_s17 + $0xe0] sm:$0xff]  ;;  %661 = vst [vmem:[%s2433_s7 + $0x60] sm:$0xff] %v660_v12  ;;  %663 = vst [vmem:[%s2433_s7 + $0x68] sm:$0xff] %v662_v13  ;;  %v666_v15 = vld [vmem:[%s2428_s17 + $0xf0] sm:$0xff] }
  0x56   : > { %665 = vst [vmem:[%s2433_s7 + $0x70] sm:$0xff] %v664_v14  ;;  %v668_v16 = vld [vmem:[%s2428_s17 + $0x100] sm:$0xff]  ;;  %v670_v17 = vld [vmem:[%s2428_s17 + $0x110] sm:$0xff]  ;;  %667 = vst [vmem:[%s2433_s7 + $0x78] sm:$0xff] %v666_v15 }
  0x57   : > { %669 = vst [vmem:[%s2433_s7 + $0x80] sm:$0xff] %v668_v16  ;;  %671 = vst [vmem:[%s2433_s7 + $0x88] sm:$0xff] %v670_v17  ;;  %v672_v18 = vld [vmem:[%s2428_s17 + $0x120] sm:$0xff]  ;;  %v674_v19 = vld [vmem:[%s2428_s17 + $0x130] sm:$0xff] }
  0x58   : > { %v676_v20 = vld [vmem:[%s2428_s17 + $0x140] sm:$0xff]  ;;  %673 = vst [vmem:[%s2433_s7 + $0x90] sm:$0xff] %v672_v18  ;;  %675 = vst [vmem:[%s2433_s7 + $0x98] sm:$0xff] %v674_v19  ;;  %v678_v21 = vld [vmem:[%s2428_s17 + $0x150] sm:$0xff] }
  0x59   : > { %677 = vst [vmem:[%s2433_s7 + $0xa0] sm:$0xff] %v676_v20  ;;  %v680_v22 = vld [vmem:[%s2428_s17 + $0x160] sm:$0xff]  ;;  %v682_v23 = vld [vmem:[%s2428_s17 + $0x170] sm:$0xff]  ;;  %679 = vst [vmem:[%s2433_s7 + $0xa8] sm:$0xff] %v678_v21 }
  0x5a   : > { %681 = vst [vmem:[%s2433_s7 + $0xb0] sm:$0xff] %v680_v22  ;;  %683 = vst [vmem:[%s2433_s7 + $0xb8] sm:$0xff] %v682_v23  ;;  %v684_v24 = vld [vmem:[%s2428_s17 + $0x180] sm:$0xff]  ;;  %v686_v25 = vld [vmem:[%s2428_s17 + $0x190] sm:$0xff] }
  0x5b   : > { %v688_v26 = vld [vmem:[%s2428_s17 + $0x1a0] sm:$0xff]  ;;  %685 = vst [vmem:[%s2433_s7 + $0xc0] sm:$0xff] %v684_v24  ;;  %687 = vst [vmem:[%s2433_s7 + $0xc8] sm:$0xff] %v686_v25  ;;  %v690_v27 = vld [vmem:[%s2428_s17 + $0x1b0] sm:$0xff] }
  0x5c   : > { %689 = vst [vmem:[%s2433_s7 + $0xd0] sm:$0xff] %v688_v26  ;;  %v692_v28 = vld [vmem:[%s2428_s17 + $0x1c0] sm:$0xff]  ;;  %v694_v29 = vld [vmem:[%s2428_s17 + $0x1d0] sm:$0xff]  ;;  %691 = vst [vmem:[%s2433_s7 + $0xd8] sm:$0xff] %v690_v27 }
  0x5d   : > { %693 = vst [vmem:[%s2433_s7 + $0xe0] sm:$0xff] %v692_v28  ;;  %695 = vst [vmem:[%s2433_s7 + $0xe8] sm:$0xff] %v694_v29  ;;  %v696_v30 = vld [vmem:[%s2428_s17 + $0x1e0] sm:$0xff]  ;;  %v698_v31 = vld [vmem:[%s2428_s17 + $0x1f0] sm:$0xff] }
  0x5e   : > { %697 = vst [vmem:[%s2433_s7 + $0xf0] sm:$0xff] %v696_v30  ;;  %699 = vst [vmem:[%s2433_s7 + $0xf8] sm:$0xff] %v698_v31 }
  0x5f PF: > { %p1751_p10 = scmp.ge.s32.totalorder %s2171_s26, 1  ;;  %p704_p11 = scmp.lt.s32.totalorder %s2171_s26, 19 }
  0x61   : > { %p705_p12 = pnand %p1751_p10, %p704_p11 }
  0x62   : > { %s711_s30 = sand.u32 (!%p705_p12), 1, %s2147_s20   ;;  %s718_s8 = sand.u32 (!%p705_p12), 1, %s2139_s18  }
  0x63   : > { %708 = sbr.rel (%p705_p12) target bundleno = 711 (0x2c7), region = 108  ;;  %s1752_s9 = sshll.u32 (!%p705_p12), %s711_s30, 9 }
  0x64   : > { %s1753_s6 = sshll.u32 (!%p705_p12), %s718_s8, 8  ;;  %s1754_s29 = sshll.u32 (!%p705_p12), %s2155_s22, 2 }
  0x65   : > { %s1756_s10 = sshll.u32 (!%p705_p12), %s2159_s23, 1  ;;  %p774_p13 = scmp.lt.s32.totalorder (!%p705_p12), %s1754_s29, 35 }
  0x66   : > { %p784_p0 = scmp.lt.s32.totalorder (!%p705_p12), %s1756_s10, 3  ;;  %s2519_s1 = scalar_lea.vmem (!%p705_p12), [#allocation3], %s1752_s9 }
  0x67   : > { %s2521_s4 = scalar_lea.vmem (!%p705_p12), [#allocation4], %s1753_s6  ;;  %p1759_p1 = scmp.ne.s32.totalorder (!%p705_p12), %s2155_s22, 0 }
  0x6a   : > { %s2686_s29 = smov (!%p774_p13, %s1754_s29), 35  ;;  %s2688_s10 = smov (!%p784_p0, %s1756_s10), 3 }
  0x6b   : > { %s1755_s13 = sshll.u32 %s2686_s29, 2  ;;  %s786_s18 = scalar_lea.vmem %s2661_s2, %s2688_s10  ;;  %v1943_v32 = vld [vmem:[%s2521_s4 + $0x4] ss:$8 sps:$4 sm:$0xff] (!%p1759_p1)   ;;  %v1945_v33 = vld [vmem:[%s2521_s4] ss:$8 sps:$4 sm:$0xff] (!%p1759_p1)   ;;  %v808_v45 = vld [vmem:[%s2662_s3] sm:$0xff] (!%p1759_p1) }
  0x6c   : > { %s2507_s16 = scalar_lea.vmem %s2659_s0, %s1755_s13  ;;  %s1758_s7 = sshll.u32 %s2688_s10, 2  ;;  %1008 = vmatprep.subr.bf16.mxu0 (!%p1759_p1), %v1943_v32  ;;  %v1946_v34 = vld [vmem:[%s2521_s4 + $0x14] ss:$8 sps:$4 sm:$0xff] (!%p1759_p1)   ;;  %v1948_v35 = vld [vmem:[%s2521_s4 + $0x10] ss:$8 sps:$4 sm:$0xff] (!%p1759_p1)   ;;  %v1761_v46 = vcombine.high (!%p1759_p1), %v808_v45, %v808_v45  ;;  %v1760_v2 = vcombine.low (!%p1759_p1), %v808_v45, %v808_v45 }
  0x6d   : > { %s2517_s8 = scalar_lea.vmem %s2664_s5, %s1758_s7  ;;  %807 = sbr.rel (%p1759_p1) target bundleno = 387 (0x183), region = 120  ;;  %1009 = vmatpush1.bf16.msra.mxu0 (!%p1759_p1), %v1945_v33  ;;  %v1949_v36 = vld [vmem:[%s2521_s4 + $0x24] ss:$8 sps:$4 sm:$0xff] (!%p1759_p1)   ;;  %v1951_v37 = vld [vmem:[%s2521_s4 + $0x20] ss:$8 sps:$4 sm:$0xff] (!%p1759_p1)  }
  0x6e   : > { %1010 = vmatprep.subr.bf16.mxu0 (!%p1759_p1), %v1946_v34  ;;  %v1952_v38 = vld [vmem:[%s2521_s4 + $0x34] ss:$8 sps:$4 sm:$0xff] (!%p1759_p1)   ;;  %v1954_v39 = vld [vmem:[%s2521_s4 + $0x30] ss:$8 sps:$4 sm:$0xff] (!%p1759_p1)   ;;  %v1955_v40 = vld [vmem:[%s2521_s4 + $0x44] ss:$8 sps:$4 sm:$0xff] (!%p1759_p1)   ;;  %1040 = vmatprep.mubr.bf16.mxu0 (!%p1759_p1), %v1761_v46 }
  0x6f   : > { %v1957_v41 = vld [vmem:[%s2521_s4 + $0x40] ss:$8 sps:$4 sm:$0xff] (!%p1759_p1)   ;;  %v1958_v42 = vld [vmem:[%s2521_s4 + $0x54] ss:$8 sps:$4 sm:$0xff] (!%p1759_p1)   ;;  %v1960_v43 = vld [vmem:[%s2521_s4 + $0x50] ss:$8 sps:$4 sm:$0xff] (!%p1759_p1)  }
  0x70   : > { %v1961_v44 = vld [vmem:[%s2521_s4 + $0x64] ss:$8 sps:$4 sm:$0xff] (!%p1759_p1)   ;;  %v1963_v47 = vld [vmem:[%s2521_s4 + $0x60] ss:$8 sps:$4 sm:$0xff] (!%p1759_p1)   ;;  %v1964_v48 = vld [vmem:[%s2521_s4 + $0x74] ss:$8 sps:$4 sm:$0xff] (!%p1759_p1)  }
  0x71   : > { %1011 = vmatpush1.bf16.msra.mxu0 (!%p1759_p1), %v1948_v35  ;;  %v1966_v49 = vld [vmem:[%s2521_s4 + $0x70] ss:$8 sps:$4 sm:$0xff] (!%p1759_p1)   ;;  %v1967_v50 = vld [vmem:[%s2521_s4 + $0x84] ss:$8 sps:$4 sm:$0xff] (!%p1759_p1)   ;;  %v1969_v51 = vld [vmem:[%s2521_s4 + $0x80] ss:$8 sps:$4 sm:$0xff] (!%p1759_p1)  }
  0x72   : > { %1012 = vmatprep.subr.bf16.mxu0 (!%p1759_p1), %v1949_v36  ;;  %v1970_v52 = vld [vmem:[%s2521_s4 + $0x94] ss:$8 sps:$4 sm:$0xff] (!%p1759_p1)   ;;  %v1972_v53 = vld [vmem:[%s2521_s4 + $0x90] ss:$8 sps:$4 sm:$0xff] (!%p1759_p1)   ;;  %v1973_v54 = vld [vmem:[%s2521_s4 + $0xa4] ss:$8 sps:$4 sm:$0xff] (!%p1759_p1)  }
  0x73   : > { %v1975_v55 = vld [vmem:[%s2521_s4 + $0xa0] ss:$8 sps:$4 sm:$0xff] (!%p1759_p1)   ;;  %v1976_v56 = vld [vmem:[%s2521_s4 + $0xb4] ss:$8 sps:$4 sm:$0xff] (!%p1759_p1)   ;;  %v1978_v57 = vld [vmem:[%s2521_s4 + $0xb0] ss:$8 sps:$4 sm:$0xff] (!%p1759_p1)  }
  0x74   : > { %v1979_v58 = vld [vmem:[%s2521_s4 + $0xc4] ss:$8 sps:$4 sm:$0xff]   ;;  %v1981_v59 = vld [vmem:[%s2521_s4 + $0xc0] ss:$8 sps:$4 sm:$0xff]   ;;  %v1982_v60 = vld [vmem:[%s2521_s4 + $0xd4] ss:$8 sps:$4 sm:$0xff]  }
  0x75   : > { %1013 = vmatpush1.bf16.msra.mxu0 %v1951_v37  ;;  %v1984_v61 = vld [vmem:[%s2521_s4 + $0xd0] ss:$8 sps:$4 sm:$0xff]   ;;  %v1985_v62 = vld [vmem:[%s2521_s4 + $0xe4] ss:$8 sps:$4 sm:$0xff]   ;;  %v1987_v63 = vld [vmem:[%s2521_s4 + $0xe0] ss:$8 sps:$4 sm:$0xff]  }
  0x76   : > { %1014 = vmatprep.subr.bf16.mxu0 %v1952_v38  ;;  %v1988_v0 = vld [vmem:[%s2521_s4 + $0xf4] ss:$8 sps:$4 sm:$0xff]   ;;  %v1990_v1 = vld [vmem:[%s2521_s4 + $0xf0] ss:$8 sps:$4 sm:$0xff]  }
  0x79   : > { %1015 = vmatpush1.bf16.msra.mxu0 %v1954_v39 }
  0x7a   : > { %1016 = vmatprep.subr.bf16.mxu0 %v1955_v40 }
  0x7d   : > { %1017 = vmatpush1.bf16.msra.mxu0 %v1957_v41 }
  0x7e   : > { %1018 = vmatprep.subr.bf16.mxu0 %v1958_v42 }
  0x81   : > { %1019 = vmatpush1.bf16.msra.mxu0 %v1960_v43 }
  0x82   : > { %1020 = vmatprep.subr.bf16.mxu0 %v1961_v44 }
  0x85   : > { %1021 = vmatpush1.bf16.msra.mxu0 %v1963_v47 }
  0x86   : > { %1022 = vmatprep.subr.bf16.mxu0 %v1964_v48 }
  0x89   : > { %1023 = vmatpush1.bf16.msra.mxu0 %v1966_v49 }
  0x8a   : > { %1024 = vmatprep.subr.bf16.mxu0 %v1967_v50 }
  0x8d   : > { %1025 = vmatpush1.bf16.msra.mxu0 %v1969_v51 }
  0x8e   : > { %1026 = vmatprep.subr.bf16.mxu0 %v1970_v52 }
  0x91   : > { %1027 = vmatpush1.bf16.msra.mxu0 %v1972_v53 }
  0x92   : > { %1028 = vmatprep.subr.bf16.mxu0 %v1973_v54 }
  0x95   : > { %1029 = vmatpush1.bf16.msra.mxu0 %v1975_v55 }
  0x96   : > { %1030 = vmatprep.subr.bf16.mxu0 %v1976_v56 }
  0x99   : > { %1031 = vmatpush1.bf16.msra.mxu0 %v1978_v57 }
  0x9a   : > { %1032 = vmatprep.subr.bf16.mxu0 %v1979_v58 }
  0x9d   : > { %1033 = vmatpush1.bf16.msra.mxu0 %v1981_v59 }
  0x9e   : > { %1034 = vmatprep.subr.bf16.mxu0 %v1982_v60 }
  0xa1   : > { %1035 = vmatpush1.bf16.msra.mxu0 %v1984_v61 }
  0xa2   : > { %1036 = vmatprep.subr.bf16.mxu0 %v1985_v62 }
  0xa5   : > { %1037 = vmatpush1.bf16.msra.mxu0 %v1987_v63 }
  0xa6   : > { %1038 = vmatprep.subr.bf16.mxu0 %v1988_v0 }
  0xa9   : > { %1039 = vmatpush1.bf16.msra.mxu0 %v1990_v1 }
  0xac   : > { %1041 = vmatmul.mubr.bf16.vlgmr.msra.gmra.mrb[0].mxu0 %v1760_v2 }
 0x17f   : > { %v1042_v3 = vpop.f32.mrb[0].mxu0 }
 0x180   : > { %1049 = vst [vmem:[#allocation2] sm:$0xff] %v1042_v3  ;;  %v1044_v4 = vpop.f32.mrb[1].mxu0 }
 0x181   : > { %1050 = vst [vmem:[#allocation2 + $0x8] sm:$0xff] %v1044_v4  ;;  %v1046_v5 = vpop.f32.mrb[2].mxu0 }
 0x182   : > { %v1047_v6 = vpop.f32.mrb[3].mxu0 }
 0x183 PF: > { %v1993_v7 = vld [vmem:[%s2519_s1 + $0x4] ss:$8 sps:$4 sm:$0xff]   ;;  %v1997_v9 = vld [vmem:[%s2519_s1] ss:$8 sps:$4 sm:$0xff]   ;;  %v1999_v11 = vld [vmem:[%s2519_s1 + $0x14] ss:$8 sps:$4 sm:$0xff]  }
 0x184   : > { %v1995_v8 = vld [vmem:[%s2519_s1 + $0x104] ss:$8 sps:$4 sm:$0xff]   ;;  %1453 = vmatprep.subr.bf16.mxu0 %v1993_v7  ;;  %v1998_v10 = vld [vmem:[%s2519_s1 + $0x100] ss:$8 sps:$4 sm:$0xff]   ;;  %v2001_v12 = vld [vmem:[%s2519_s1 + $0x114] ss:$8 sps:$4 sm:$0xff]  }
 0x185   : > { %1494 = vmatprep.subr.bf16.mxu1 %v1995_v8  ;;  %1454 = vmatpush1.bf16.msra.mxu0 %v1997_v9  ;;  %v2003_v13 = vld [vmem:[%s2519_s1 + $0x10] ss:$8 sps:$4 sm:$0xff]   ;;  %v2005_v15 = vld [vmem:[%s2519_s1 + $0x24] ss:$8 sps:$4 sm:$0xff]   ;;  %v2009_v17 = vld [vmem:[%s2519_s1 + $0x20] ss:$8 sps:$4 sm:$0xff]  }
 0x186   : > { %1495 = vmatpush1.bf16.msra.mxu1 %v1998_v10  ;;  %1455 = vmatprep.subr.bf16.mxu0 %v1999_v11  ;;  %v2004_v14 = vld [vmem:[%s2519_s1 + $0x110] ss:$8 sps:$4 sm:$0xff]   ;;  %v2007_v16 = vld [vmem:[%s2519_s1 + $0x124] ss:$8 sps:$4 sm:$0xff]   ;;  %v2010_v18 = vld [vmem:[%s2519_s1 + $0x120] ss:$8 sps:$4 sm:$0xff]  }
 0x187   : > { %1496 = vmatprep.subr.bf16.mxu1 %v2001_v12  ;;  %v2011_v19 = vld [vmem:[%s2519_s1 + $0x34] ss:$8 sps:$4 sm:$0xff]   ;;  %v2015_v21 = vld [vmem:[%s2519_s1 + $0x30] ss:$8 sps:$4 sm:$0xff]   ;;  %v2017_v23 = vld [vmem:[%s2519_s1 + $0x44] ss:$8 sps:$4 sm:$0xff]  }
 0x188   : > { %v2013_v20 = vld [vmem:[%s2519_s1 + $0x134] ss:$8 sps:$4 sm:$0xff]   ;;  %v2016_v22 = vld [vmem:[%s2519_s1 + $0x130] ss:$8 sps:$4 sm:$0xff]   ;;  %v2019_v24 = vld [vmem:[%s2519_s1 + $0x144] ss:$8 sps:$4 sm:$0xff]  }
 0x189   : > { %1456 = vmatpush1.bf16.msra.mxu0 %v2003_v13  ;;  %v2021_v25 = vld [vmem:[%s2519_s1 + $0x40] ss:$8 sps:$4 sm:$0xff]   ;;  %v2023_v27 = vld [vmem:[%s2519_s1 + $0x54] ss:$8 sps:$4 sm:$0xff]   ;;  %v2027_v29 = vld [vmem:[%s2519_s1 + $0x50] ss:$8 sps:$4 sm:$0xff]  }
 0x18a   : > { %1497 = vmatpush1.bf16.msra.mxu1 %v2004_v14  ;;  %1457 = vmatprep.subr.bf16.mxu0 %v2005_v15  ;;  %v2022_v26 = vld [vmem:[%s2519_s1 + $0x140] ss:$8 sps:$4 sm:$0xff]   ;;  %v2025_v28 = vld [vmem:[%s2519_s1 + $0x154] ss:$8 sps:$4 sm:$0xff]   ;;  %v2028_v30 = vld [vmem:[%s2519_s1 + $0x150] ss:$8 sps:$4 sm:$0xff]  }
 0x18b   : > { %1498 = vmatprep.subr.bf16.mxu1 %v2007_v16  ;;  %v2029_v31 = vld [vmem:[%s2519_s1 + $0x64] ss:$8 sps:$4 sm:$0xff]   ;;  %v2033_v33 = vld [vmem:[%s2519_s1 + $0x60] ss:$8 sps:$4 sm:$0xff]   ;;  %v2035_v35 = vld [vmem:[%s2519_s1 + $0x74] ss:$8 sps:$4 sm:$0xff]  }
 0x18c   : > { %v2031_v32 = vld [vmem:[%s2519_s1 + $0x164] ss:$8 sps:$4 sm:$0xff]   ;;  %v2034_v34 = vld [vmem:[%s2519_s1 + $0x160] ss:$8 sps:$4 sm:$0xff]   ;;  %v2037_v36 = vld [vmem:[%s2519_s1 + $0x174] ss:$8 sps:$4 sm:$0xff]  }
 0x18d   : > { %1458 = vmatpush1.bf16.msra.mxu0 %v2009_v17  ;;  %v2039_v37 = vld [vmem:[%s2519_s1 + $0x70] ss:$8 sps:$4 sm:$0xff]   ;;  %v2041_v39 = vld [vmem:[%s2519_s1 + $0x84] ss:$8 sps:$4 sm:$0xff]   ;;  %v2045_v41 = vld [vmem:[%s2519_s1 + $0x80] ss:$8 sps:$4 sm:$0xff]  }
 0x18e   : > { %1499 = vmatpush1.bf16.msra.mxu1 %v2010_v18  ;;  %1459 = vmatprep.subr.bf16.mxu0 %v2011_v19  ;;  %v2040_v38 = vld [vmem:[%s2519_s1 + $0x170] ss:$8 sps:$4 sm:$0xff]   ;;  %v2043_v40 = vld [vmem:[%s2519_s1 + $0x184] ss:$8 sps:$4 sm:$0xff]   ;;  %v2046_v42 = vld [vmem:[%s2519_s1 + $0x180] ss:$8 sps:$4 sm:$0xff]  }
 0x18f   : > { %1500 = vmatprep.subr.bf16.mxu1 %v2013_v20  ;;  %v2047_v43 = vld [vmem:[%s2519_s1 + $0x94] ss:$8 sps:$4 sm:$0xff]   ;;  %v2051_v45 = vld [vmem:[%s2519_s1 + $0x90] ss:$8 sps:$4 sm:$0xff]   ;;  %v2053_v47 = vld [vmem:[%s2519_s1 + $0xa4] ss:$8 sps:$4 sm:$0xff]  }
 0x190   : > { %v2049_v44 = vld [vmem:[%s2519_s1 + $0x194] ss:$8 sps:$4 sm:$0xff]   ;;  %v2052_v46 = vld [vmem:[%s2519_s1 + $0x190] ss:$8 sps:$4 sm:$0xff]   ;;  %v2055_v48 = vld [vmem:[%s2519_s1 + $0x1a4] ss:$8 sps:$4 sm:$0xff]  }
 0x191   : > { %1460 = vmatpush1.bf16.msra.mxu0 %v2015_v21  ;;  %v2057_v49 = vld [vmem:[%s2519_s1 + $0xa0] ss:$8 sps:$4 sm:$0xff]   ;;  %v2059_v51 = vld [vmem:[%s2519_s1 + $0xb4] ss:$8 sps:$4 sm:$0xff]   ;;  %v2063_v56 = vld [vmem:[%s2519_s1 + $0xb0] ss:$8 sps:$4 sm:$0xff]  }
 0x192   : > { %1501 = vmatpush1.bf16.msra.mxu1 %v2016_v22  ;;  %1461 = vmatprep.subr.bf16.mxu0 %v2017_v23  ;;  %v2058_v50 = vld [vmem:[%s2519_s1 + $0x1a0] ss:$8 sps:$4 sm:$0xff]   ;;  %v2061_v52 = vld [vmem:[%s2519_s1 + $0x1b4] ss:$8 sps:$4 sm:$0xff]   ;;  %v2064_v57 = vld [vmem:[%s2519_s1 + $0x1b0] ss:$8 sps:$4 sm:$0xff]  }
 0x193   : > { %1502 = vmatprep.subr.bf16.mxu1 %v2019_v24  ;;  %v1053_v53 = vld [vmem:[%s2507_s16] sm:$0xff]  ;;  %v1054_v55 = vld [vmem:[%s2507_s16 + $0x8] sm:$0xff]  ;;  %v2065_v59 = vld [vmem:[%s2519_s1 + $0xc4] ss:$8 sps:$4 sm:$0xff]   ;;  %p1862_p2 = scmp.ne.s32.totalorder %s2155_s22, 8 }
 0x194   : > { %v1795_v54 = vcombine.high %v1053_v53, %v1053_v53  ;;  %v1797_v58 = vcombine.high %v1054_v55, %v1054_v55  ;;  %v2067_v60 = vld [vmem:[%s2519_s1 + $0x1c4] ss:$8 sps:$4 sm:$0xff]   ;;  %v2069_v61 = vld [vmem:[%s2519_s1 + $0xc0] ss:$8 sps:$4 sm:$0xff]   ;;  %v2071_v63 = vld [vmem:[%s2519_s1 + $0xd4] ss:$8 sps:$4 sm:$0xff]   ;;  %v1794_v11 = vcombine.low %v1053_v53, %v1053_v53  ;;  %v1796_v12 = vcombine.low %v1054_v55, %v1054_v55 }
 0x195   : > { %1462 = vmatpush1.bf16.msra.mxu0 %v2021_v25  ;;  %v2070_v62 = vld [vmem:[%s2519_s1 + $0x1c0] ss:$8 sps:$4 sm:$0xff]   ;;  %v2073_v0 = vld [vmem:[%s2519_s1 + $0x1d4] ss:$8 sps:$4 sm:$0xff]   ;;  %v2075_v1 = vld [vmem:[%s2519_s1 + $0xd0] ss:$8 sps:$4 sm:$0xff]  }
 0x196   : > { %1503 = vmatpush1.bf16.msra.mxu1 %v2022_v26  ;;  %1463 = vmatprep.subr.bf16.mxu0 %v2023_v27  ;;  %v2076_v2 = vld [vmem:[%s2519_s1 + $0x1d0] ss:$8 sps:$4 sm:$0xff]   ;;  %v2077_v3 = vld [vmem:[%s2519_s1 + $0xe4] ss:$8 sps:$4 sm:$0xff]   ;;  %v2081_v5 = vld [vmem:[%s2519_s1 + $0xe0] ss:$8 sps:$4 sm:$0xff]   ;;  %v1547_v27 = vlaneseq (!%p1862_p2) }
 0x197   : > { %1504 = vmatprep.subr.bf16.mxu1 %v2025_v28  ;;  %1485 = vmatprep.mubr.bf16.mxu0 %v1795_v54  ;;  %v2079_v4 = vld [vmem:[%s2519_s1 + $0x1e4] ss:$8 sps:$4 sm:$0xff]   ;;  %v2082_v6 = vld [vmem:[%s2519_s1 + $0x1e0] ss:$8 sps:$4 sm:$0xff]   ;;  %v2083_v7 = vld [vmem:[%s2519_s1 + $0xf4] ss:$8 sps:$4 sm:$0xff]  }
 0x198   : > { %1526 = vmatprep.mubr.bf16.mxu1 %v1797_v58  ;;  %v2085_v8 = vld [vmem:[%s2519_s1 + $0x1f4] ss:$8 sps:$4 sm:$0xff]   ;;  %v2087_v9 = vld [vmem:[%s2519_s1 + $0xf0] ss:$8 sps:$4 sm:$0xff]   ;;  %v1548_v28 = vshrl.u32 (!%p1862_p2), %v1547_v27, 7 }
 0x199   : > { %1464 = vmatpush1.bf16.msra.mxu0 %v2027_v29  ;;  %v2088_v10 = vld [vmem:[%s2519_s1 + $0x1f0] ss:$8 sps:$4 sm:$0xff]  }
 0x19a   : > { %1505 = vmatpush1.bf16.msra.mxu1 %v2028_v30  ;;  %1465 = vmatprep.subr.bf16.mxu0 %v2029_v31  ;;  %v1051_v14 = vld [vmem:[#allocation2] sm:$0xff]  ;;  %v1052_v18 = vld [vmem:[#allocation2 + $0x8] sm:$0xff]  ;;  %v1549_v30 = vsub.s32 (!%p1862_p2), 0, %v1548_v28  ;;  %v1553_v31 = vsub.s32 (!%p1862_p2), 1, %v1548_v28 }
 0x19b   : > { %1506 = vmatprep.subr.bf16.mxu1 %v2031_v32  ;;  %v1545_v29 = vld [vmem:[%s786_s18] sm:$0x3] (!%p1862_p2) }
 0x19d   : > { %1466 = vmatpush1.bf16.msra.mxu0 %v2033_v33 }
 0x19e   : > { %1507 = vmatpush1.bf16.msra.mxu1 %v2034_v34  ;;  %1467 = vmatprep.subr.bf16.mxu0 %v2035_v35  ;;  %v1550_v34 = vrot.slane (!%p1862_p2), %v1545_v29, %v1549_v30  ;;  %v1554_v35 = vrot.slane (!%p1862_p2), %v1545_v29, %v1553_v31 }
 0x19f   : > { %1508 = vmatprep.subr.bf16.mxu1 %v2037_v36 }
 0x1a1   : > { %1468 = vmatpush1.bf16.msra.mxu0 %v2039_v37 }
 0x1a2   : > { %1509 = vmatpush1.bf16.msra.mxu1 %v2040_v38  ;;  %1469 = vmatprep.subr.bf16.mxu0 %v2041_v39 }
 0x1a3   : > { %1510 = vmatprep.subr.bf16.mxu1 %v2043_v40 }
 0x1a5   : > { %1470 = vmatpush1.bf16.msra.mxu0 %v2045_v41 }
 0x1a6   : > { %1511 = vmatpush1.bf16.msra.mxu1 %v2046_v42  ;;  %1471 = vmatprep.subr.bf16.mxu0 %v2047_v43 }
 0x1a7   : > { %1512 = vmatprep.subr.bf16.mxu1 %v2049_v44 }
 0x1a9   : > { %1472 = vmatpush1.bf16.msra.mxu0 %v2051_v45 }
 0x1aa   : > { %1513 = vmatpush1.bf16.msra.mxu1 %v2052_v46  ;;  %1473 = vmatprep.subr.bf16.mxu0 %v2053_v47 }
 0x1ab   : > { %1514 = vmatprep.subr.bf16.mxu1 %v2055_v48 }
 0x1ad   : > { %1474 = vmatpush1.bf16.msra.mxu0 %v2057_v49 }
 0x1ae   : > { %1515 = vmatpush1.bf16.msra.mxu1 %v2058_v50  ;;  %1475 = vmatprep.subr.bf16.mxu0 %v2059_v51 }
 0x1af   : > { %1516 = vmatprep.subr.bf16.mxu1 %v2061_v52 }
 0x1b1   : > { %1476 = vmatpush1.bf16.msra.mxu0 %v2063_v56 }
 0x1b2   : > { %1517 = vmatpush1.bf16.msra.mxu1 %v2064_v57  ;;  %1477 = vmatprep.subr.bf16.mxu0 %v2065_v59 }
 0x1b3   : > { %1518 = vmatprep.subr.bf16.mxu1 %v2067_v60 }
 0x1b5   : > { %1478 = vmatpush1.bf16.msra.mxu0 %v2069_v61 }
 0x1b6   : > { %1519 = vmatpush1.bf16.msra.mxu1 %v2070_v62  ;;  %1479 = vmatprep.subr.bf16.mxu0 %v2071_v63 }
 0x1b7   : > { %1520 = vmatprep.subr.bf16.mxu1 %v2073_v0 }
 0x1b9   : > { %1480 = vmatpush1.bf16.msra.mxu0 %v2075_v1 }
 0x1ba   : > { %1521 = vmatpush1.bf16.msra.mxu1 %v2076_v2  ;;  %1481 = vmatprep.subr.bf16.mxu0 %v2077_v3 }
 0x1bb   : > { %1522 = vmatprep.subr.bf16.mxu1 %v2079_v4 }
 0x1bd   : > { %1482 = vmatpush1.bf16.msra.mxu0 %v2081_v5 }
 0x1be   : > { %1523 = vmatpush1.bf16.msra.mxu1 %v2082_v6  ;;  %1483 = vmatprep.subr.bf16.mxu0 %v2083_v7 }
 0x1bf   : > { %1524 = vmatprep.subr.bf16.mxu1 %v2085_v8 }
 0x1c1   : > { %1484 = vmatpush1.bf16.msra.mxu0 %v2087_v9 }
 0x1c2   : > { %1525 = vmatpush1.bf16.msra.mxu1 %v2088_v10 }
 0x1c4   : > { %1486 = vmatmul.mubr.bf16.vlgmr.msra.gmra.mrb[0].mxu0 %v1794_v11 }
 0x1c5   : > { %1527 = vmatmul.mubr.bf16.vlgmr.msra.gmra.mrb[0].mxu1 %v1796_v12 }
 0x297   : > { %v1487_v13 = vpop.f32.mrb[0].mxu0 }
 0x298   : > { %v1528_v15 = vpop.f32.mrb[0].mxu1  ;;  %v1489_v17 = vpop.f32.mrb[1].mxu0  ;;  %1542 = sbr.rel (%p1862_p2) target bundleno = 711 (0x2c7), region = 124 }
 0x299   : > { %v1529_v16 = vadd.f32 %v1528_v15, %v1487_v13  ;;  %v1530_v19 = vpop.f32.mrb[1].mxu1  ;;  %v1491_v21 = vpop.f32.mrb[2].mxu0 }
 0x29a   : > { %v1531_v20 = vadd.f32 %v1530_v19, %v1489_v17  ;;  %v1532_v22 = vpop.f32.mrb[2].mxu1  ;;  %v1492_v24 = vpop.f32.mrb[3].mxu0 }
 0x29b   : > { %v1535_v23 = vadd.f32 %v1529_v16, %v1051_v14  ;;  %v1533_v25 = vpop.f32.mrb[3].mxu1 }
 0x29c   : > { %v1536_v26 = vadd.f32 %v1531_v20, %v1052_v18 }
 0x29d   : > { %1537 = vst [vmem:[#allocation2] sm:$0xff] %v1535_v23 }
 0x29e   : > { %1538 = vst [vmem:[#allocation2 + $0x8] sm:$0xff] %v1536_v26 }
 0x2a4   : > { %v1543_v32 = vld [vmem:[#allocation2] sm:$0xff] }
 0x2a5   : > { %v1544_v33 = vld [vmem:[#allocation2 + $0x8] sm:$0xff]  ;;  %v1557_v36 = vadd.f32 %v1550_v34, %v1543_v32 }
 0x2a6   : > { %v1558_v37 = vadd.f32 %v1554_v35, %v1544_v33 }
 0x2a7   : > { %v1863_v38 = vmul.f32 -1.442695, %v1557_v36 }
 0x2a8   : > { %v1864_v39 = vmul.f32 -1.442695, %v1558_v37 }
 0x2a9   : > { %2093 = vpow2.f32 %v1863_v38 }
 0x2aa   : > { %2095 = vpow2.f32 %v1864_v39 }
 0x2b3   : > { %v2094_v40 = vpop.eup %2093 }
 0x2b4   : > { %v2096_v41 = vpop.eup %2095  ;;  %v1565_v42 = vadd.f32 1.0, %v2094_v40 }
 0x2b5   : > { %v1566_v43 = vadd.f32 1.0, %v2096_v41 }
 0x2b6   : > { %2097 = vrcp.f32 %v1565_v42 }
 0x2b7   : > { %2099 = vrcp.f32 %v1566_v43 }
 0x2c0   : > { %v2098_v44 = vpop.eup %2097 }
 0x2c1   : > { %v2100_v45 = vpop.eup %2099  ;;  %v1571_v46 = vmul.f32 %v2098_v44, %v1557_v36 }
 0x2c2   : > { %v1572_v47 = vmul.f32 %v2100_v45, %v1558_v37 }
 0x2c4   : > { %v1870_v48 = vpack.c.bf16 %v1572_v47, %v1571_v46 }
 0x2c6   : > { %1581 = vst [vmem:[%s2517_s8] sm:$0xff] %v1870_v48 }
 0x2c7 PF: > { %s15_s26 = sadd.s32 1, %s2171_s26   ;;  %s2671_s18 = smov %s2143_s19 }
 0x2c8   : > { %p12_p3 = scmp.ge.s32.totalorder %s15_s26, 20   ;;  %s2672_s19 = smov %s2275_s11 }
 0x2c9   : > { %s2673_s20 = smov %s2151_s21  ;;  %s2674_s21 = smov %s2278_s12 }
 0x2ca   : > { %s2675_s22 = smov %s2163_s24  ;;  %s2676_s23 = smov %s2167_s25 }
 0x2cb   : > { %s2677_s24 = smov %s2680_s27  ;;  %s2678_s25 = smov %s2684_s28 }
 0x2cc   :  { %14 = sbr.rel (!%p12_p3) target bundleno = 8 (0x8), region = 176 }

// kernel: resnet18_forward.37
= control target key start
LH: loop header
LB: loop body
LE: loop exit
PB: predicated region body
PF: predicated region fallthrough
CT: control target
= control target key end

     0   :  { %v47_v24 = vlaneseq  ;;  %vm375_vm0 = vcmask 1041409   ;;  %vm378_vm1 = vcmask 1042434   ;;  %vm381_vm2 = vcmask 1043459   ;;  %s1080_s1 = inlined_call_operand.vmem [shape: bf16[512,128], index: 1, kind: input, shape index: {}]   ;;  %s1081_s0 = inlined_call_operand.vmem [shape: bf16[8,1,512], index: 0, kind: input, shape index: {}]   ;;  %s1082_s2 = inlined_call_operand.vmem [shape: f32[1,128], index: 2, kind: input, shape index: {}]   ;;  %s1083_s3 = inlined_call_operand.vmem [shape: f32[8,128], index: 3, kind: output, shape index: {}]  }
   0x1   :  { %v818_v0 = vld [vmem:[%s1080_s1 + $0x40] sm:$0xff]   ;;  %v822_v4 = vld [vmem:[%s1080_s1 + $0x48] sm:$0xff]   ;;  %v826_v8 = vld [vmem:[%s1080_s1 + $0x50] sm:$0xff]   ;;  %vm384_vm3 = vcmask 1044484   ;;  %vm387_vm4 = vcmask 1045509   ;;  %vm390_vm5 = vcmask 1046534  }
   0x2   :  { %v819_v1 = vld [vmem:[%s1080_s1 + $0xc0] sm:$0xff]   ;;  %774 = vmatprep.subr.bf16.mxu0 %v818_v0  ;;  %v823_v5 = vld [vmem:[%s1080_s1 + $0xc8] sm:$0xff]   ;;  %v827_v9 = vld [vmem:[%s1080_s1 + $0xd0] sm:$0xff]   ;;  %v48_v29 = vshrl.u32 %v47_v24, 7  ;;  %vm393_vm6 = vcmask 1047559  }
   0x3   :  { %v820_v2 = vld [vmem:[%s1080_s1] sm:$0xff]   ;;  %796 = vmatprep.subr.bf16.mxu1 %v819_v1  ;;  %v824_v6 = vld [vmem:[%s1080_s1 + $0x8] sm:$0xff]   ;;  %v828_v10 = vld [vmem:[%s1080_s1 + $0x10] sm:$0xff]  }
   0x4   :  { %v821_v3 = vld [vmem:[%s1080_s1 + $0x80] sm:$0xff]   ;;  %775 = vmatpush3.bf16.msra.mxu0 %v820_v2  ;;  %v825_v7 = vld [vmem:[%s1080_s1 + $0x88] sm:$0xff]   ;;  %v829_v11 = vld [vmem:[%s1080_s1 + $0x90] sm:$0xff]   ;;  %v53_v34 = vsub.s32 2, %v48_v29  ;;  %v61_v38 = vsub.s32 6, %v48_v29  ;;  %v975_v39 = vsub.s32 0, %v48_v29 }
   0x5   :  { %797 = vmatpush3.bf16.msra.mxu1 %v821_v3  ;;  %776 = vmatprep.subr.bf16.mxu0 %v822_v4  ;;  %v830_v12 = vld [vmem:[%s1080_s1 + $0x58] sm:$0xff]   ;;  %v834_v16 = vld [vmem:[%s1080_s1 + $0x60] sm:$0xff]   ;;  %v838_v20 = vld [vmem:[%s1080_s1 + $0x68] sm:$0xff]   ;;  %v977_v40 = vsub.s32 4, %v48_v29 }
   0x6   :  { %798 = vmatprep.subr.bf16.mxu1 %v823_v5  ;;  %v831_v13 = vld [vmem:[%s1080_s1 + $0xd8] sm:$0xff]   ;;  %v835_v17 = vld [vmem:[%s1080_s1 + $0xe0] sm:$0xff]   ;;  %v839_v21 = vld [vmem:[%s1080_s1 + $0xe8] sm:$0xff]  }
   0x7   :  { %v832_v14 = vld [vmem:[%s1080_s1 + $0x18] sm:$0xff]   ;;  %v836_v18 = vld [vmem:[%s1080_s1 + $0x20] sm:$0xff]   ;;  %v840_v22 = vld [vmem:[%s1080_s1 + $0x28] sm:$0xff]  }
   0x8   :  { %777 = vmatpush3.bf16.msra.mxu0 %v824_v6  ;;  %v833_v15 = vld [vmem:[%s1080_s1 + $0x98] sm:$0xff]   ;;  %v837_v19 = vld [vmem:[%s1080_s1 + $0xa0] sm:$0xff]   ;;  %v841_v23 = vld [vmem:[%s1080_s1 + $0xa8] sm:$0xff]  }
   0x9   :  { %799 = vmatpush3.bf16.msra.mxu1 %v825_v7  ;;  %778 = vmatprep.subr.bf16.mxu0 %v826_v8  ;;  %v842_v25 = vld [vmem:[%s1080_s1 + $0x70] sm:$0xff]   ;;  %v846_v30 = vld [vmem:[%s1080_s1 + $0x78] sm:$0xff]   ;;  %v756_v35 = vld [vmem:[%s1081_s0] sm:$0xff]  }
   0xa   :  { %800 = vmatprep.subr.bf16.mxu1 %v827_v9  ;;  %v843_v26 = vld [vmem:[%s1080_s1 + $0xf0] sm:$0xff]   ;;  %v847_v31 = vld [vmem:[%s1080_s1 + $0xf8] sm:$0xff]   ;;  %v771_v36 = vld [vmem:[%s1081_s0 + $0x8] sm:$0xff]   ;;  %v979_v41 = vunpack.c.l.bf16 %v756_v35  ;;  %v981_v42 = vunpack.c.h.bf16 %v756_v35 }
   0xb   :  { %v844_v27 = vld [vmem:[%s1080_s1 + $0x30] sm:$0xff]   ;;  %v848_v32 = vld [vmem:[%s1080_s1 + $0x38] sm:$0xff]   ;;  %v983_v43 = vunpack.c.l.bf16 %v771_v36  ;;  %v985_v44 = vunpack.c.h.bf16 %v771_v36 }
   0xc   :  { %779 = vmatpush3.bf16.msra.mxu0 %v828_v10  ;;  %v845_v28 = vld [vmem:[%s1080_s1 + $0xb0] sm:$0xff]   ;;  %v849_v33 = vld [vmem:[%s1080_s1 + $0xb8] sm:$0xff]   ;;  %v54_v50 = vrot.slane %v979_v41, %v53_v34  ;;  %v70_v51 = vrot.slane %v981_v42, %v53_v34 }
   0xd   :  { %801 = vmatpush3.bf16.msra.mxu1 %v829_v11  ;;  %780 = vmatprep.subr.bf16.mxu0 %v830_v12  ;;  %v772_v37 = vld [vmem:[%s1081_s0 + $0x10] sm:$0xff]   ;;  %v773_v45 = vld [vmem:[%s1081_s0 + $0x18] sm:$0xff]   ;;  %v86_v52 = vrot.slane %v983_v43, %v53_v34  ;;  %v102_v53 = vrot.slane %v985_v44, %v53_v34 }
   0xe   :  { %802 = vmatprep.subr.bf16.mxu1 %v831_v13  ;;  %v990_v46 = vunpack.c.l.bf16 %v772_v37  ;;  %v992_v47 = vunpack.c.h.bf16 %v772_v37  ;;  %v994_v48 = vunpack.c.l.bf16 %v773_v45  ;;  %v996_v49 = vunpack.c.h.bf16 %v773_v45 }
   0xf   :  { %v208_v58 = vpack.c.bf16 %v54_v50, %v54_v50  ;;  %v212_v59 = vpack.c.bf16 %v70_v51, %v70_v51  ;;  %v216_v60 = vpack.c.bf16 %v86_v52, %v86_v52  ;;  %v220_v61 = vpack.c.bf16 %v102_v53, %v102_v53 }
  0x10   :  { %781 = vmatpush3.bf16.msra.mxu0 %v832_v14  ;;  %v118_v54 = vrot.slane %v990_v46, %v53_v34  ;;  %v134_v55 = vrot.slane %v992_v47, %v53_v34  ;;  %v150_v56 = vrot.slane %v994_v48, %v53_v34  ;;  %v166_v57 = vrot.slane %v996_v49, %v53_v34 }
  0x11   :  { %803 = vmatpush3.bf16.msra.mxu1 %v833_v15  ;;  %782 = vmatprep.subr.bf16.mxu0 %v834_v16  ;;  %v343_v2 = vunpack.c.l.b16 %v208_v58  ;;  %v347_v3 = vunpack.c.l.b16 %v212_v59  ;;  %v351_v4 = vunpack.c.l.b16 %v216_v60  ;;  %v355_v5 = vunpack.c.l.b16 %v220_v61 }
  0x12   :  { %804 = vmatprep.subr.bf16.mxu1 %v835_v17  ;;  %v224_v62 = vpack.c.bf16 %v118_v54, %v118_v54  ;;  %v228_v63 = vpack.c.bf16 %v134_v55, %v134_v55  ;;  %v232_v0 = vpack.c.bf16 %v150_v56, %v150_v56  ;;  %v236_v1 = vpack.c.bf16 %v166_v57, %v166_v57 }
  0x13   :  { %v395_v10 = vrot.slane %v347_v3, 7  ;;  %v397_v11 = vrot.slane %v351_v4, 6  ;;  %v399_v12 = vrot.slane %v355_v5, 5  ;;  %v62_v13 = vrot.slane %v979_v41, %v61_v38 }
  0x14   :  { %783 = vmatpush3.bf16.msra.mxu0 %v836_v18  ;;  %v359_v6 = vunpack.c.l.b16 %v224_v62  ;;  %v363_v7 = vunpack.c.l.b16 %v228_v63  ;;  %v367_v8 = vunpack.c.l.b16 %v232_v0  ;;  %v371_v9 = vunpack.c.l.b16 %v236_v1 }
  0x15   :  { %805 = vmatpush3.bf16.msra.mxu1 %v837_v19  ;;  %784 = vmatprep.subr.bf16.mxu0 %v838_v20  ;;  %v396_v18 = vsel %vm375_vm0, %v395_v10, %v343_v2  ;;  %v78_v19 = vrot.slane %v981_v42, %v61_v38  ;;  %v94_v20 = vrot.slane %v983_v43, %v61_v38 }
  0x16   :  { %806 = vmatprep.subr.bf16.mxu1 %v839_v21  ;;  %v401_v14 = vrot.slane %v359_v6, 4  ;;  %v403_v15 = vrot.slane %v363_v7, 3  ;;  %v405_v16 = vrot.slane %v367_v8, 2  ;;  %v407_v17 = vrot.slane %v371_v9, 1 }
  0x17   :  { %v110_v21 = vrot.slane %v985_v44, %v61_v38  ;;  %v142_v24 = vrot.slane %v992_v47, %v61_v38  ;;  %v214_v29 = vpack.c.bf16 %v78_v19, %v78_v19  ;;  %v50_v3 = vrot.slane %v979_v41, %v975_v39 }
  0x18   :  { %785 = vmatpush3.bf16.msra.mxu0 %v840_v22  ;;  %v398_v22 = vsel %vm378_vm1, %v397_v11, %v396_v18  ;;  %v66_v5 = vrot.slane %v981_v42, %v975_v39  ;;  %v82_v6 = vrot.slane %v983_v43, %v975_v39  ;;  %v98_v7 = vrot.slane %v985_v44, %v975_v39 }
  0x19   :  { %807 = vmatpush3.bf16.msra.mxu1 %v841_v23  ;;  %786 = vmatprep.subr.bf16.mxu0 %v842_v25  ;;  %v126_v23 = vrot.slane %v990_v46, %v61_v38  ;;  %v158_v25 = vrot.slane %v994_v48, %v61_v38  ;;  %v230_v35 = vpack.c.bf16 %v142_v24, %v142_v24  ;;  %v349_v51 = vunpack.c.l.b16 %v214_v29 }
  0x1a   :  { %808 = vmatprep.subr.bf16.mxu1 %v843_v26  ;;  %v400_v26 = vsel %vm381_vm2, %v399_v12, %v398_v22  ;;  %v114_v9 = vrot.slane %v990_v46, %v975_v39  ;;  %v130_v10 = vrot.slane %v992_v47, %v975_v39  ;;  %v146_v11 = vrot.slane %v994_v48, %v975_v39 }
  0x1b   :  { %v234_v36 = vpack.c.bf16 %v158_v25, %v158_v25  ;;  %v365_v55 = vunpack.c.l.b16 %v230_v35  ;;  %v423_v59 = vrot.slane %v349_v51, 7  ;;  %v219_v18 = vpack.c.bf16 %v98_v7, %v98_v7 }
  0x1c   :  { %787 = vmatpush3.bf16.msra.mxu0 %v844_v27  ;;  %v174_v27 = vrot.slane %v996_v49, %v61_v38  ;;  %v223_v19 = vpack.c.bf16 %v114_v9, %v114_v9  ;;  %v231_v22 = vpack.c.bf16 %v146_v11, %v146_v11 }
  0x1d   :  { %809 = vmatpush3.bf16.msra.mxu1 %v845_v28  ;;  %788 = vmatprep.subr.bf16.mxu0 %v846_v30  ;;  %v210_v28 = vpack.c.bf16 %v62_v13, %v62_v13  ;;  %v402_v30 = vsel %vm384_vm3, %v401_v14, %v400_v26  ;;  %v369_v57 = vunpack.c.l.b16 %v234_v36  ;;  %v431_v63 = vrot.slane %v365_v55, 3 }
  0x1e   :  { %810 = vmatprep.subr.bf16.mxu1 %v847_v31  ;;  %v218_v31 = vpack.c.bf16 %v94_v20, %v94_v20  ;;  %v404_v34 = vsel %vm387_vm4, %v403_v15, %v402_v30  ;;  %v238_v37 = vpack.c.bf16 %v174_v27, %v174_v27  ;;  %v162_v13 = vrot.slane %v996_v49, %v975_v39 }
  0x1f   :  { %v406_v45 = vsel %vm390_vm5, %v405_v16, %v404_v34  ;;  %v345_v50 = vunpack.c.l.b16 %v210_v28  ;;  %v433_v1 = vrot.slane %v369_v57, 2  ;;  %v207_v14 = vpack.c.bf16 %v50_v3, %v50_v3 }
  0x20   :  { %789 = vmatpush3.bf16.msra.mxu0 %v848_v32  ;;  %v222_v32 = vpack.c.bf16 %v110_v21, %v110_v21  ;;  %v353_v52 = vunpack.c.l.b16 %v218_v31  ;;  %v408_v53 = vsel %vm393_vm6, %v407_v17, %v406_v45  ;;  %v373_v58 = vunpack.c.l.b16 %v238_v37 }
  0x21   :  { %811 = vmatpush3.bf16.msra.mxu1 %v849_v33  ;;  %v226_v33 = vpack.c.bf16 %v126_v23, %v126_v23  ;;  %v438_v56 = vpack.c.b16 %v408_v53, %v408_v53  ;;  %v424_v0 = vsel %vm375_vm0, %v423_v59, %v345_v50  ;;  %v211_v15 = vpack.c.bf16 %v66_v5, %v66_v5 }
  0x22   :  { %v357_v38 = vunpack.c.l.b16 %v222_v32  ;;  %v425_v60 = vrot.slane %v353_v52, 6  ;;  %v435_v2 = vrot.slane %v373_v58, 1  ;;  %v215_v17 = vpack.c.bf16 %v82_v6, %v82_v6 }
  0x23   :  { %v361_v54 = vunpack.c.l.b16 %v226_v33  ;;  %669 = vmatprep.mubr.bf16.mxu0 %v438_v56  ;;  %v227_v21 = vpack.c.bf16 %v130_v10, %v130_v10  ;;  %v235_v23 = vpack.c.bf16 %v162_v13, %v162_v13  ;;  %v342_v25 = vunpack.c.l.b16 %v207_v14 }
  0x24   :  { %v427_v61 = vrot.slane %v357_v38, 5  ;;  %v426_v4 = vsel %vm378_vm1, %v425_v60, %v424_v0  ;;  %v346_v26 = vunpack.c.l.b16 %v211_v15  ;;  %v350_v27 = vunpack.c.l.b16 %v215_v17 }
  0x25   :  { %v429_v62 = vrot.slane %v361_v54, 4  ;;  %v354_v29 = vunpack.c.l.b16 %v219_v18  ;;  %v358_v39 = vunpack.c.l.b16 %v223_v19  ;;  %v362_v30 = vunpack.c.l.b16 %v227_v21 }
  0x26   :  { %v428_v8 = vsel %vm381_vm2, %v427_v61, %v426_v4  ;;  %v366_v31 = vunpack.c.l.b16 %v231_v22  ;;  %v370_v32 = vunpack.c.l.b16 %v235_v23  ;;  %v374_v33 = vrot.slane %v346_v26, 7 }
  0x27   :  { %v430_v12 = vsel %vm384_vm3, %v429_v62, %v428_v8  ;;  %v377_v34 = vrot.slane %v350_v27, 6  ;;  %v380_v35 = vrot.slane %v354_v29, 5  ;;  %v383_v36 = vrot.slane %v358_v39, 4  ;;  %v722_v29 = vld [vmem:[%s1082_s2] ss:$0 sm:$0xff] }
  0x28   :  { %v432_v16 = vsel %vm387_vm4, %v431_v63, %v430_v12  ;;  %v386_v37 = vrot.slane %v362_v30, 3  ;;  %v58_v45 = vrot.slane %v979_v41, %v977_v40  ;;  %v376_v50 = vsel %vm375_vm0, %v374_v33, %v342_v25 }
  0x29   :  { %v434_v20 = vsel %vm390_vm5, %v433_v1, %v432_v16  ;;  %v389_v51 = vrot.slane %v366_v31, 2  ;;  %v392_v52 = vrot.slane %v370_v32, 1  ;;  %v74_v53 = vrot.slane %v981_v42, %v977_v40 }
  0x2a   :  { %v436_v24 = vsel %vm393_vm6, %v435_v2, %v434_v20  ;;  %v379_v38 = vsel %vm378_vm1, %v377_v34, %v376_v50  ;;  %v90_v54 = vrot.slane %v983_v43, %v977_v40  ;;  %v106_v55 = vrot.slane %v985_v44, %v977_v40 }
  0x2b   :  { %v440_v28 = vpack.c.b16 %v436_v24, %v436_v24  ;;  %v122_v56 = vrot.slane %v990_v46, %v977_v40  ;;  %v382_v41 = vsel %vm381_vm2, %v380_v35, %v379_v38  ;;  %v138_v57 = vrot.slane %v992_v47, %v977_v40 }
  0x2c   :  { %v154_v58 = vrot.slane %v994_v48, %v977_v40  ;;  %v170_v42 = vrot.slane %v996_v49, %v977_v40  ;;  %v385_v59 = vsel %vm384_vm3, %v383_v36, %v382_v41  ;;  %v209_v43 = vpack.c.bf16 %v58_v45, %v58_v45 }
  0x2d   :  { %709 = vmatprep.mubr.bf16.mxu1 %v440_v28  ;;  %v213_v60 = vpack.c.bf16 %v74_v53, %v74_v53  ;;  %v217_v61 = vpack.c.bf16 %v90_v54, %v90_v54  ;;  %v388_v44 = vsel %vm387_vm4, %v386_v37, %v385_v59  ;;  %v221_v62 = vpack.c.bf16 %v106_v55, %v106_v55 }
  0x2e   :  { %v225_v46 = vpack.c.bf16 %v122_v56, %v122_v56  ;;  %v229_v63 = vpack.c.bf16 %v138_v57, %v138_v57  ;;  %v391_v0 = vsel %vm390_vm5, %v389_v51, %v388_v44  ;;  %v233_v1 = vpack.c.bf16 %v154_v58, %v154_v58 }
  0x2f   :  { %v237_v47 = vpack.c.bf16 %v170_v42, %v170_v42  ;;  %v344_v2 = vunpack.c.l.b16 %v209_v43  ;;  %v394_v48 = vsel %vm393_vm6, %v392_v52, %v391_v0  ;;  %v348_v3 = vunpack.c.l.b16 %v213_v60 }
  0x30   :  { %v352_v4 = vunpack.c.l.b16 %v217_v61  ;;  %v356_v40 = vunpack.c.l.b16 %v221_v62  ;;  %v437_v49 = vpack.c.b16 %v394_v48, %v394_v48  ;;  %v360_v5 = vunpack.c.l.b16 %v225_v46 }
  0x31   :  { %v364_v6 = vunpack.c.l.b16 %v229_v63  ;;  %v368_v7 = vunpack.c.l.b16 %v233_v1  ;;  %v372_v8 = vunpack.c.l.b16 %v237_v47  ;;  %v409_v9 = vrot.slane %v348_v3, 7 }
  0x32   :  { %v411_v10 = vrot.slane %v352_v4, 6  ;;  %v413_v11 = vrot.slane %v356_v40, 5  ;;  %670 = vmatmul.mubr.bf16.vlgmr.msra.gmra.mrb[0].mxu0 %v437_v49  ;;  %v415_v12 = vrot.slane %v360_v5, 4 }
  0x33   :  { %v410_v13 = vsel %vm375_vm0, %v409_v9, %v344_v2  ;;  %v417_v14 = vrot.slane %v364_v6, 3  ;;  %v419_v16 = vrot.slane %v368_v7, 2  ;;  %v421_v18 = vrot.slane %v372_v8, 1 }
  0x34   :  { %v412_v15 = vsel %vm378_vm1, %v411_v10, %v410_v13 }
  0x35   :  { %v414_v17 = vsel %vm381_vm2, %v413_v11, %v412_v15 }
  0x36   :  { %v416_v19 = vsel %vm384_vm3, %v415_v12, %v414_v17 }
  0x37   :  { %v418_v20 = vsel %vm387_vm4, %v417_v14, %v416_v19 }
  0x38   :  { %v420_v21 = vsel %vm390_vm5, %v419_v16, %v418_v20 }
  0x39   :  { %v422_v22 = vsel %vm393_vm6, %v421_v18, %v420_v21 }
  0x3a   :  { %v439_v23 = vpack.c.b16 %v422_v22, %v422_v22 }
  0x3c   :  { %710 = vmatmul.mubr.bf16.vlgmr.msra.gmra.mrb[0].mxu1 %v439_v23 }
 0x105   :  { %v790_v24 = vpop.f32.mrb[0].mxu0 }
 0x106   :  { %v791_v25 = vpop.f32.mrb[1].mxu0 }
 0x107   :  { %v792_v26 = vadd.f32 %v791_v25, %v790_v24  ;;  %v793_v27 = vpop.f32.mrb[2].mxu0 }
 0x108   :  { %v794_v28 = vpop.f32.mrb[3].mxu0 }
 0x109   :  { %v672_v30 = vadd.f32 %v792_v26, %v722_v29 }
 0x10f   :  { %v812_v39 = vpop.f32.mrb[0].mxu1 }
 0x110   :  { %v813_v31 = vpop.f32.mrb[1].mxu1 }
 0x111   :  { %v814_v32 = vadd.f32 %v813_v31, %v812_v39  ;;  %v815_v33 = vpop.f32.mrb[2].mxu1 }
 0x112   :  { %v816_v34 = vpop.f32.mrb[3].mxu1 }
 0x113   :  { %v712_v35 = vadd.f32 %v814_v32, %v672_v30 }
 0x115   :  { %717 = vst [vmem:[%s1083_s3] sm:$0xff] %v712_v35 }

</bundles_post_ra>
